<compile_context>
chip_gen: v5e
topology: v5e:2x2
jax: 0.10.0
libtpu: 0.0.40
codegen_flags: <defaults>
</compile_context>

<pallas_src>
import functools

import jax
import jax.numpy as jnp
from jax.experimental import pallas as pl
from jax.experimental.pallas import tpu as pltpu

VMEM_LIMIT_BYTES = 48 * 1024 * 1024            # explicit budget; fits v7x's 64 MiB VMEM
VMEM_SPEC = pl.BlockSpec(memory_space=pltpu.MemorySpace.VMEM)


# ---------------------------------------------------------------------------
# Stage slab geometry
# ---------------------------------------------------------------------------
def _ceil_to(x, m):
    return ((x + m - 1) // m) * m


def stage_geom(H, W):
    """Geometry of the flattened, zero-padded per-image activation slab."""
    Hp, Wp = H + 2, W + 2                      # spatial dims incl. the 3x3 zero-pad ring
    Hv = _ceil_to(Hp * Wp, 8)                  # flattened padded image, sublane-rounded
    G = _ceil_to(Wp + 1, 8)                    # guard rows: 3x3 tap windows stay in bounds
    R = Hv + 2 * G                             # total slab rows per image
    return Hp, Wp, Hv, G, R


# ---------------------------------------------------------------------------
# Pallas kernels
# ---------------------------------------------------------------------------
def _transition_kernel(p_ref, w_ref, s_ref, b_ref, rsel_ref, o_ref):
    """(im2col patches) @ [conv_a | resconv] weights, folded BN, ReLU on the main half."""
    acc = jnp.dot(p_ref[...], w_ref[...], preferred_element_type=jnp.float32)
    y = acc * s_ref[...] + b_ref[...]
    y = jnp.where(rsel_ref[...] != 0.0, jnp.maximum(y, 0.0), y)
    o_ref[...] = y.astype(o_ref.dtype)


def _stage_tail_kernel(x_ref, r_ref, m_ref,
                       w1_ref, s1_ref, b1_ref,
                       w2_ref, s2_ref, b2_ref,
                       w3_ref, s3_ref, b3_ref,
                       o_ref, scr1, scr2, *, G, Hv, Wp, C):
    """Three stride-1 3x3 convs of one stage, fully fused per image.

    conv_b + BN + residual(resconv) + ReLU
    conv_c + BN + ReLU
    conv_d + BN + residual(post-relu_b) + ReLU
    """
    offs = [(dy - 1) * Wp + (dx - 1) for dy in range(3) for dx in range(3)]
    mask = m_ref[...]                                   # (Hv, 1): 1.0 on real pixels
    zeros_g = jnp.zeros((G, C), jnp.float32)

    def conv3x3(src_ref, w_ref):
        acc = jnp.zeros((Hv, C), jnp.float32)
        for t, off in enumerate(offs):
            win = src_ref[pl.ds(G + off, Hv), :].astype(jnp.bfloat16)
            acc = acc + jnp.dot(win, w_ref[pl.ds(t * C, C), :],
                                preferred_element_type=jnp.float32)
        return acc

    # Keep scratch guard rows defined (they only ever feed masked border rows).
    scr1[pl.ds(0, G), :] = zeros_g
    scr1[pl.ds(G + Hv, G), :] = zeros_g
    scr2[pl.ds(0, G), :] = zeros_g
    scr2[pl.ds(G + Hv, G), :] = zeros_g

    # conv_b + BN + residual (resconv output) + ReLU
    y = conv3x3(x_ref, w1_ref) * s1_ref[...] + b1_ref[...] + r_ref[pl.ds(G, Hv), :]
    h1 = jnp.maximum(y, 0.0) * mask
    scr1[pl.ds(G, Hv), :] = h1

    # conv_c + BN + ReLU
    y = conv3x3(scr1, w2_ref) * s2_ref[...] + b2_ref[...]
    h2 = jnp.maximum(y, 0.0) * mask
    scr2[pl.ds(G, Hv), :] = h2

    # conv_d + BN + residual (h1) + ReLU
    y = conv3x3(scr2, w3_ref) * s3_ref[...] + b3_ref[...] + h1
    h3 = jnp.maximum(y, 0.0) * mask

    o_ref[pl.ds(0, G), :] = zeros_g
    o_ref[pl.ds(G, Hv), :] = h3
    o_ref[pl.ds(G + Hv, G), :] = zeros_g


def _head_kernel(x_ref, s18_ref, b18_ref, wfc_ref, bfc_ref, s19_ref, b19_ref, o_ref,
                 *, inv_hw):
    """avgpool -> bn18 -> fc -> bn19 -> logsoftmax, fully fused."""
    x = x_ref[...]                                      # (B, Hv, C); non-pixel rows are 0
    pooled = jnp.sum(x, axis=1) * inv_hw                # adaptive avgpool to 1x1 -> (B, C)
    h = pooled * s18_ref[...] + b18_ref[...]            # bn18 (eval, folded)
    logits = jnp.dot(h, wfc_ref[...], preferred_element_type=jnp.float32) + bfc_ref[...]
    y = logits * s19_ref[...] + b19_ref[...]            # bn19 (eval, folded)
    m = jnp.max(y, axis=-1, keepdims=True)              # logsoftmax (dim=1)
    lse = m + jnp.log(jnp.sum(jnp.exp(y - m), axis=-1, keepdims=True))
    o_ref[...] = (y - lse).astype(o_ref.dtype)


# ---------------------------------------------------------------------------
# Pallas wrappers
# ---------------------------------------------------------------------------
def pick_m_tile(M, target=512):
    if M <= target:
        return M
    for t in range(target, 7, -8):
        if M % t == 0:
            return t
    return M  # TODO(synk): ragged-M grids (pl.cdiv + in-kernel masking) for awkward M


def transition_gemm(patches, w_comb, s_comb, b_comb, rsel):
    M, K = patches.shape
    N = w_comb.shape[1]
    tm = pick_m_tile(M)
    return pl.pallas_call(
        _transition_kernel,
        out_shape=jax.ShapeDtypeStruct((M, N), jnp.float32),
        grid=(M // tm,),
        in_specs=[
            pl.BlockSpec((tm, K), lambda i: (i, 0)),
            pl.BlockSpec((K, N), lambda i: (0, 0)),
            pl.BlockSpec((1, N), lambda i: (0, 0)),
            pl.BlockSpec((1, N), lambda i: (0, 0)),
            pl.BlockSpec((1, N), lambda i: (0, 0)),
        ],
        out_specs=pl.BlockSpec((tm, N), lambda i: (i, 0)),
        compiler_params=pltpu.CompilerParams(
            dimension_semantics=("parallel",),
            vmem_limit_bytes=VMEM_LIMIT_BYTES),
    )(patches, w_comb, s_comb, b_comb, rsel)


def stage_tail(x_slab, r_slab, mask, wsb, H, W):
    """wsb = [(w, scale, bias)] for the three stride-1 convs of the stage."""
    B, R, C = x_slab.shape
    _, Wp, Hv, G, _ = stage_geom(H, W)
    kernel = functools.partial(_stage_tail_kernel, G=G, Hv=Hv, Wp=Wp, C=C)

    slab_spec = pl.BlockSpec((None, R, C), lambda b: (b, 0, 0))

    def full2d(shape):
        return pl.BlockSpec(shape, lambda b: (0, 0))

    in_specs = [slab_spec, slab_spec, full2d((Hv, 1))]
    args = [x_slab, r_slab, mask]
    for (w, s, b) in wsb:
        in_specs += [full2d((9 * C, C)), full2d((1, C)), full2d((1, C))]
        args += [w, s, b]

    return pl.pallas_call(
        kernel,
        out_shape=jax.ShapeDtypeStruct((B, R, C), jnp.float32),
        grid=(B,),
        in_specs=in_specs,
        out_specs=slab_spec,
        scratch_shapes=[pltpu.VMEM((R, C), jnp.float32),
                        pltpu.VMEM((R, C), jnp.float32)],
        compiler_params=pltpu.CompilerParams(
            dimension_semantics=("parallel",),
            vmem_limit_bytes=VMEM_LIMIT_BYTES),
    )(*args)


# ---------------------------------------------------------------------------
# Plain-JAX glue (cheap 1x-traffic reshapes/pads; only the 3 stride-2 convs use im2col)
# ---------------------------------------------------------------------------
def im2col_s2(xp):
    """xp: (B, H+2, W+2, C) zero-padded NHWC -> 3x3/stride-2 patches.
    Rows ordered (b, ho, wo); columns ordered (dy, dx, cin)."""
    B, Hp, Wp, C = xp.shape
    Ho, Wo = (Hp - 2) // 2, (Wp - 2) // 2
    cols = []
    for dy in range(3):
        for dx in range(3):
            cols.append(xp[:, dy:dy + 2 * Ho:2, dx:dx + 2 * Wo:2, :])
    patches = jnp.concatenate(cols, axis=-1)
    return patches.reshape(B * Ho * Wo, 9 * C), Ho, Wo


def to_slab(x, H, W):
    """(B, H, W, C) -> (B, R, C) flattened zero-padded stage slab."""
    Hp, Wp, _, G, R = stage_geom(H, W)
    B = x.shape[0]
    C = x.shape[-1]
    xp = jnp.pad(x, ((0, 0), (1, 1), (1, 1), (0, 0)))
    flat = xp.reshape(B, Hp * Wp, C)
    return jnp.pad(flat, ((0, 0), (G, R - G - Hp * Wp), (0, 0)))


def slab_to_padded(slab, H, W):
    """(B, R, C) slab -> (B, H+2, W+2, C) zero-padded NHWC (its valid block)."""
    Hp, Wp, _, G, _ = stage_geom(H, W)
    B, _, C = slab.shape
    return slab[:, G:G + Hp * Wp, :].reshape(B, Hp, Wp, C)


def make_mask(H, W):
    Hp, Wp, Hv, _, _ = stage_geom(H, W)
    p = jnp.arange(Hv)
    row, col = p // Wp, p % Wp
    valid = (p < Hp * Wp) & (row >= 1) & (row <= H) & (col >= 1) & (col <= W)
    return valid.astype(jnp.float32).reshape(Hv, 1)


def _row(v):
    return v.reshape(1, -1).astype(jnp.float32)


def combine_transition_weights(w_main, w_res, bn_main, cin, cout):
    """Fuse [3x3 conv_a + BN + ReLU | 1x1 resconv] into one (9*cin, 2*cout) GEMM:
    the 1x1 stride-2 weight is embedded at the center-tap rows (same input window)."""
    s_main, b_main = bn_main
    w_res9 = jnp.zeros((9 * cin, cout), jnp.float32).at[4 * cin:5 * cin, :].set(w_res)
    w_comb = jnp.concatenate([w_main, w_res9], axis=1).astype(jnp.bfloat16)
    s_comb = jnp.concatenate([s_main, jnp.ones((cout,), jnp.float32)]).reshape(1, -1)
    b_comb = jnp.concatenate([b_main, jnp.zeros((cout,), jnp.float32)]).reshape(1, -1)
    rsel = jnp.concatenate([jnp.ones((cout,), jnp.float32),
                            jnp.zeros((cout,), jnp.float32)]).reshape(1, -1)
    return w_comb, s_comb, b_comb, rsel


# ---------------------------------------------------------------------------
# Parameters (deterministic synthetic init; BN in eval mode, folded)
# ---------------------------------------------------------------------------
def fold_bn(gamma, beta, mean, var, eps=1e-5):
    scale = gamma * jax.lax.rsqrt(var + eps)
    bias = beta - mean * scale
    return scale, bias


def init_params(key, c_in=16, widths=(32, 64, 128), num_classes=10):
    keys = iter(jax.random.split(key, 128))
    p = {}

    def conv_w(kh, kw, cin, cout):
        std = (2.0 / (kh * kw * cin)) ** 0.5
        return jax.random.normal(next(keys), (kh * kw * cin, cout), jnp.float32) * std

    def bn(c):
        g = 1.0 + 0.1 * jax.random.normal(next(keys), (c,), jnp.float32)
        b = 0.1 * jax.random.normal(next(keys), (c,), jnp.float32)
        m = 0.1 * jax.random.normal(next(keys), (c,), jnp.float32)
        v = 1.0 + 0.1 * jnp.abs(jax.random.normal(next(keys), (c,), jnp.float32))
        return fold_bn(g, b, m, v)

    w0, w1, w2 = widths
    p["conv6"] = conv_w(3, 3, c_in, w0); p["bn6"] = bn(w0)
    p["resconv1"] = conv_w(1, 1, c_in, w0)  # TODO(synk): resconv assumed plain 1x1 conv (no BN), matching the reference forward.
    p["conv7"] = conv_w(3, 3, w0, w0); p["bn7"] = bn(w0)
    p["conv8"] = conv_w(3, 3, w0, w0); p["bn8"] = bn(w0)
    p["conv9"] = conv_w(3, 3, w0, w0); p["bn9"] = bn(w0)
    p["conv10"] = conv_w(3, 3, w0, w1); p["bn10"] = bn(w1)
    p["resconv2"] = conv_w(1, 1, w0, w1)
    p["conv11"] = conv_w(3, 3, w1, w1); p["bn11"] = bn(w1)
    p["conv12"] = conv_w(3, 3, w1, w1); p["bn12"] = bn(w1)
    p["conv13"] = conv_w(3, 3, w1, w1); p["bn13"] = bn(w1)
    p["conv14"] = conv_w(3, 3, w1, w2); p["bn14"] = bn(w2)
    p["resconv3"] = conv_w(1, 1, w1, w2)
    p["conv15"] = conv_w(3, 3, w2, w2); p["bn15"] = bn(w2)
    p["conv16"] = conv_w(3, 3, w2, w2); p["bn16"] = bn(w2)
    p["conv17"] = conv_w(3, 3, w2, w2); p["bn17"] = bn(w2)
    p["bn18"] = bn(w2)
    p["fc_w"] = jax.random.normal(next(keys), (w2, num_classes), jnp.float32) * (1.0 / w2) ** 0.5
    p["fc_b"] = 0.1 * jax.random.normal(next(keys), (num_classes,), jnp.float32)
    p["bn19"] = bn(num_classes)
    return p


# ---------------------------------------------------------------------------
# Forward pass (mirrors the PyTorch module's forward exactly, eval mode)
# ---------------------------------------------------------------------------
def run_stage(xp, p, names):
    """One ResNet stage.  xp: (B, Hin+2, Win+2, Cin) zero-padded stage input.
    names = (conv_a, bn_a, resconv, conv_b, bn_b, conv_c, bn_c, conv_d, bn_d)."""
    cv_a, bn_a, rescv, cv_b, bn_b, cv_c, bn_c, cv_d, bn_d = names
    B = xp.shape[0]
    cin = xp.shape[-1]
    cout = p[cv_a].shape[1]

    # transition: conv_a (3x3/s2) + BN + ReLU fused with resconv (1x1/s2)
    patches, Ho, Wo = im2col_s2(xp)
    w_comb, s_comb, b_comb, rsel = combine_transition_weights(
        p[cv_a], p[rescv], p[bn_a], cin, cout)
    to = transition_gemm(patches.astype(jnp.bfloat16), w_comb, s_comb, b_comb, rsel)
    to = to.reshape(B, Ho, Wo, 2 * cout)
    main_slab = to_slab(to[..., :cout], Ho, Wo)      # post-ReLU conv_a output
    res_slab = to_slab(to[..., cout:], Ho, Wo)       # resconv output (no BN / ReLU)

    # tail: the three stride-1 convs, fused in one kernel
    wsb = [(p[cv_b].astype(jnp.bfloat16), _row(p[bn_b][0]), _row(p[bn_b][1])),
           (p[cv_c].astype(jnp.bfloat16), _row(p[bn_c][0]), _row(p[bn_c][1])),
           (p[cv_d].astype(jnp.bfloat16), _row(p[bn_d][0]), _row(p[bn_d][1]))]
    out_slab = stage_tail(main_slab, res_slab, make_mask(Ho, Wo), wsb, Ho, Wo)
    return out_slab, Ho, Wo, cout


def resnet_forward(x_nchw, p):
    x = jnp.transpose(x_nchw, (0, 2, 3, 1)).astype(jnp.float32)     # NCHW -> NHWC
    xp = jnp.pad(x, ((0, 0), (1, 1), (1, 1), (0, 0)))

    slab, H, W, C = run_stage(xp, p, ("conv6", "bn6", "resconv1",
                                      "conv7", "bn7", "conv8", "bn8", "conv9", "bn9"))
    slab, H, W, C = run_stage(slab_to_padded(slab, H, W), p,
                              ("conv10", "bn10", "resconv2",
                               "conv11", "bn11", "conv12", "bn12", "conv13", "bn13"))
    slab, H, W, C = run_stage(slab_to_padded(slab, H, W), p,
                              ("conv14", "bn14", "resconv3",
                               "conv15", "bn15", "conv16", "bn16", "conv17", "bn17"))

    # head: avgpool -> bn18 -> fc -> bn19 -> logsoftmax (one fused kernel)
    _, _, Hv, G, _ = stage_geom(H, W)
    x_head = slab[:, G:G + Hv, :]                 # (B, Hv, C); non-pixel rows are zero
    B = x_head.shape[0]
    ncls = p["fc_w"].shape[1]
    s18, b18 = p["bn18"]
    s19, b19 = p["bn19"]
    head = functools.partial(_head_kernel, inv_hw=1.0 / float(H * W))
    return pl.pallas_call(
        head,
        out_shape=jax.ShapeDtypeStruct((B, ncls), jnp.float32),
        in_specs=[VMEM_SPEC] * 7,
        out_specs=VMEM_SPEC,
        compiler_params=pltpu.CompilerParams(vmem_limit_bytes=VMEM_LIMIT_BYTES),
    )(x_head, _row(s18), _row(b18), p["fc_w"], _row(p["fc_b"]), _row(s19), _row(b19))


# ---------------------------------------------------------------------------
if __name__ == "__main__":
    key = jax.random.PRNGKey(0)
    kx, kp = jax.random.split(key)

    # Small-shape stand-in for the frozen-layer1 output: (batch=2, C=16, H=W=16), NCHW.
    x = jax.random.normal(kx, (2, 16, 16, 16), jnp.float32)
    params = init_params(kp, c_in=16, widths=(32, 64, 128), num_classes=10)

    fwd = jax.jit(resnet_forward)
    logp = jax.block_until_ready(fwd(x, params))

    assert logp.shape == (2, 10), logp.shape
    # log-softmax rows must exponentiate-and-sum to ~1
    assert bool(jnp.all(jnp.abs(jnp.sum(jnp.exp(logp), axis=-1) - 1.0) < 1e-3))
    print("KERNEL_OK")
</pallas_src>

<mosaic_0001>
module attributes {stable_mosaic.version = 11 : i64} {
  func.func @_transition_kernel(%arg0: i32, %arg1: memref<128x144xbf16, #tpu.memory_space<vmem>>, %arg2: memref<144x64xbf16, #tpu.memory_space<vmem>>, %arg3: memref<1x64xf32, #tpu.memory_space<vmem>>, %arg4: memref<1x64xf32, #tpu.memory_space<vmem>>, %arg5: memref<1x64xf32, #tpu.memory_space<vmem>>, %arg6: memref<128x64xf32, #tpu.memory_space<vmem>>) attributes {dimension_semantics = [#tpu.dimension_semantics<parallel>], iteration_bounds = array<i64: 1>, scalar_prefetch = 0 : i64, scratch_operands = 0 : i64, tpu.core_type = #tpu.core_type<tc>, window_params = [{transform_indices = @transform_0, window_bounds = array<i64: 128, 144>}, {pipeline_mode = #tpu.pipeline_mode<synchronous>, transform_indices = @transform_1, window_bounds = array<i64: 144, 64>}, {pipeline_mode = #tpu.pipeline_mode<synchronous>, transform_indices = @transform_2, window_bounds = array<i64: 1, 64>}, {pipeline_mode = #tpu.pipeline_mode<synchronous>, transform_indices = @transform_3, window_bounds = array<i64: 1, 64>}, {pipeline_mode = #tpu.pipeline_mode<synchronous>, transform_indices = @transform_4, window_bounds = array<i64: 1, 64>}, {transform_indices = @transform_5, window_bounds = array<i64: 128, 64>}]} {
    %c0 = arith.constant 0 : index
    %c0_0 = arith.constant 0 : index
    %0 = vector.load %arg1[%c0, %c0_0] : memref<128x144xbf16, #tpu.memory_space<vmem>>, vector<128x144xbf16>
    %c0_1 = arith.constant 0 : index
    %c0_2 = arith.constant 0 : index
    %1 = vector.load %arg2[%c0_1, %c0_2] : memref<144x64xbf16, #tpu.memory_space<vmem>>, vector<144x64xbf16>
    %cst = arith.constant dense<0.000000e+00> : vector<128x64xf32>
    %2 = tpu.matmul %0, %1, %cst {dimension_numbers = #tpu.dot_dimension_numbers<[1], [0], [0], [1], [0, 0, 1, 1], [], []>} : vector<128x144xbf16>, vector<144x64xbf16>, vector<128x64xf32> -> vector<128x64xf32>
    %c0_3 = arith.constant 0 : index
    %c0_4 = arith.constant 0 : index
    %3 = vector.load %arg3[%c0_3, %c0_4] : memref<1x64xf32, #tpu.memory_space<vmem>>, vector<1x64xf32>
    %4 = vector.broadcast %3 : vector<1x64xf32> to vector<128x64xf32>
    %5 = arith.mulf %2, %4 : vector<128x64xf32>
    %c0_5 = arith.constant 0 : index
    %c0_6 = arith.constant 0 : index
    %6 = vector.load %arg4[%c0_5, %c0_6] : memref<1x64xf32, #tpu.memory_space<vmem>>, vector<1x64xf32>
    %7 = vector.broadcast %6 : vector<1x64xf32> to vector<128x64xf32>
    %8 = arith.addf %5, %7 : vector<128x64xf32>
    %c0_7 = arith.constant 0 : index
    %c0_8 = arith.constant 0 : index
    %9 = vector.load %arg5[%c0_7, %c0_8] : memref<1x64xf32, #tpu.memory_space<vmem>>, vector<1x64xf32>
    %cst_9 = arith.constant 0.000000e+00 : f32
    %10 = vector.broadcast %cst_9 : f32 to vector<1x64xf32>
    %11 = arith.cmpf one, %9, %10 : vector<1x64xf32>
    %cst_10 = arith.constant 0.000000e+00 : f32
    %12 = vector.broadcast %cst_10 : f32 to vector<128x64xf32>
    %13 = arith.maximumf %8, %12 : vector<128x64xf32>
    %14 = vector.shape_cast %11 : vector<1x64xi1> to vector<1x64xi1>
    %15 = vector.broadcast %14 : vector<1x64xi1> to vector<128x64xi1>
    %16 = arith.select %15, %13, %8 : vector<128x64xi1>, vector<128x64xf32>
    %c0_11 = arith.constant 0 : index
    %c0_12 = arith.constant 0 : index
    %17 = vector.load %arg6[%c0_11, %c0_12] : memref<128x64xf32, #tpu.memory_space<vmem>>, vector<128x64xf32>
    tpu.vector_store %arg6[%c0_11, %c0_12], %16 {strides = array<i32>} : memref<128x64xf32, #tpu.memory_space<vmem>>, vector<128x64xf32>,
    return
  }
  func.func @transform_0(%arg0: i32) -> (i32, i32) {
    %c0_i32 = arith.constant 0 : i32
    %c0_i32_0 = arith.constant 0 : i32
    return %arg0, %c0_i32 : i32, i32
  }
  func.func @transform_1(%arg0: i32) -> (i32, i32) {
    %c0_i32 = arith.constant 0 : i32
    %c0_i32_0 = arith.constant 0 : i32
    %c0_i32_1 = arith.constant 0 : i32
    return %c0_i32, %c0_i32_0 : i32, i32
  }
  func.func @transform_2(%arg0: i32) -> (i32, i32) {
    %c0_i32 = arith.constant 0 : i32
    %c0_i32_0 = arith.constant 0 : i32
    %c0_i32_1 = arith.constant 0 : i32
    return %c0_i32, %c0_i32_0 : i32, i32
  }
  func.func @transform_3(%arg0: i32) -> (i32, i32) {
    %c0_i32 = arith.constant 0 : i32
    %c0_i32_0 = arith.constant 0 : i32
    %c0_i32_1 = arith.constant 0 : i32
    return %c0_i32, %c0_i32_0 : i32, i32
  }
  func.func @transform_4(%arg0: i32) -> (i32, i32) {
    %c0_i32 = arith.constant 0 : i32
    %c0_i32_0 = arith.constant 0 : i32
    %c0_i32_1 = arith.constant 0 : i32
    return %c0_i32, %c0_i32_0 : i32, i32
  }
  func.func @transform_5(%arg0: i32) -> (i32, i32) {
    %c0_i32 = arith.constant 0 : i32
    %c0_i32_0 = arith.constant 0 : i32
    return %arg0, %c0_i32 : i32, i32
  }
}

module attributes {stable_mosaic.version = 11 : i64} {
  func.func @_stage_tail_kernel(%arg0: i32, %arg1: memref<1x136x32xf32, #tpu.memory_space<vmem>>, %arg2: memref<1x136x32xf32, #tpu.memory_space<vmem>>, %arg3: memref<104x1xf32, #tpu.memory_space<vmem>>, %arg4: memref<288x32xbf16, #tpu.memory_space<vmem>>, %arg5: memref<1x32xf32, #tpu.memory_space<vmem>>, %arg6: memref<1x32xf32, #tpu.memory_space<vmem>>, %arg7: memref<288x32xbf16, #tpu.memory_space<vmem>>, %arg8: memref<1x32xf32, #tpu.memory_space<vmem>>, %arg9: memref<1x32xf32, #tpu.memory_space<vmem>>, %arg10: memref<288x32xbf16, #tpu.memory_space<vmem>>, %arg11: memref<1x32xf32, #tpu.memory_space<vmem>>, %arg12: memref<1x32xf32, #tpu.memory_space<vmem>>, %arg13: memref<1x136x32xf32, #tpu.memory_space<vmem>>, %arg14: memref<136x32xf32, #tpu.memory_space<vmem>>, %arg15: memref<136x32xf32, #tpu.memory_space<vmem>>) attributes {dimension_semantics = [#tpu.dimension_semantics<parallel>], iteration_bounds = array<i64: 2>, scalar_prefetch = 0 : i64, scratch_operands = 2 : i64, tpu.core_type = #tpu.core_type<tc>, window_params = [{transform_indices = @transform_0, window_bounds = array<i64: 1, 136, 32>}, {transform_indices = @transform_1, window_bounds = array<i64: 1, 136, 32>}, {pipeline_mode = #tpu.pipeline_mode<synchronous>, transform_indices = @transform_2, window_bounds = array<i64: 104, 1>}, {pipeline_mode = #tpu.pipeline_mode<synchronous>, transform_indices = @transform_3, window_bounds = array<i64: 288, 32>}, {pipeline_mode = #tpu.pipeline_mode<synchronous>, transform_indices = @transform_4, window_bounds = array<i64: 1, 32>}, {pipeline_mode = #tpu.pipeline_mode<synchronous>, transform_indices = @transform_5, window_bounds = array<i64: 1, 32>}, {pipeline_mode = #tpu.pipeline_mode<synchronous>, transform_indices = @transform_6, window_bounds = array<i64: 288, 32>}, {pipeline_mode = #tpu.pipeline_mode<synchronous>, transform_indices = @transform_7, window_bounds = array<i64: 1, 32>}, {pipeline_mode = #tpu.pipeline_mode<synchronous>, transform_indices = @transform_8, window_bounds = array<i64: 1, 32>}, {pipeline_mode = #tpu.pipeline_mode<synchronous>, transform_indices = @transform_9, window_bounds = array<i64: 288, 32>}, {pipeline_mode = #tpu.pipeline_mode<synchronous>, transform_indices = @transform_10, window_bounds = array<i64: 1, 32>}, {pipeline_mode = #tpu.pipeline_mode<synchronous>, transform_indices = @transform_11, window_bounds = array<i64: 1, 32>}, {transform_indices = @transform_12, window_bounds = array<i64: 1, 136, 32>}]} {
    %c0 = arith.constant 0 : index
    %c0_0 = arith.constant 0 : index
    %0 = vector.load %arg3[%c0, %c0_0] : memref<104x1xf32, #tpu.memory_space<vmem>>, vector<104x1xf32>
    %cst = arith.constant 0.000000e+00 : f32
    %1 = vector.broadcast %cst : f32 to vector<16x32xf32>
    %c0_1 = arith.constant 0 : index
    %c0_2 = arith.constant 0 : index
    %2 = vector.load %arg14[%c0_1, %c0_2] : memref<136x32xf32, #tpu.memory_space<vmem>>, vector<16x32xf32>
    tpu.vector_store %arg14[%c0_1, %c0_2], %1 {strides = array<i32>} : memref<136x32xf32, #tpu.memory_space<vmem>>, vector<16x32xf32>,
    %c120 = arith.constant 120 : index
    %c0_3 = arith.constant 0 : index
    %3 = vector.load %arg14[%c120, %c0_3] : memref<136x32xf32, #tpu.memory_space<vmem>>, vector<16x32xf32>
    tpu.vector_store %arg14[%c120, %c0_3], %1 {strides = array<i32>} : memref<136x32xf32, #tpu.memory_space<vmem>>, vector<16x32xf32>,
    %c0_4 = arith.constant 0 : index
    %c0_5 = arith.constant 0 : index
    %4 = vector.load %arg15[%c0_4, %c0_5] : memref<136x32xf32, #tpu.memory_space<vmem>>, vector<16x32xf32>
    tpu.vector_store %arg15[%c0_4, %c0_5], %1 {strides = array<i32>} : memref<136x32xf32, #tpu.memory_space<vmem>>, vector<16x32xf32>,
    %c120_6 = arith.constant 120 : index
    %c0_7 = arith.constant 0 : index
    %5 = vector.load %arg15[%c120_6, %c0_7] : memref<136x32xf32, #tpu.memory_space<vmem>>, vector<16x32xf32>
    tpu.vector_store %arg15[%c120_6, %c0_7], %1 {strides = array<i32>} : memref<136x32xf32, #tpu.memory_space<vmem>>, vector<16x32xf32>,
    %cst_8 = arith.constant 0.000000e+00 : f32
    %6 = vector.broadcast %cst_8 : f32 to vector<104x32xf32>
    %c0_9 = arith.constant 0 : index
    %c5 = arith.constant 5 : index
    %c0_10 = arith.constant 0 : index
    %7 = vector.load %arg1[%c0_9, %c5, %c0_10] : memref<1x136x32xf32, #tpu.memory_space<vmem>>, vector<1x104x32xf32>
    %8 = vector.shape_cast %7 : vector<1x104x32xf32> to vector<104x32xf32>
    %9 = arith.truncf %8 : vector<104x32xf32> to vector<104x32xbf16>
    %c0_11 = arith.constant 0 : index
    %c0_12 = arith.constant 0 : index
    %10 = vector.load %arg4[%c0_11, %c0_12] : memref<288x32xbf16, #tpu.memory_space<vmem>>, vector<32x32xbf16>
    %cst_13 = arith.constant dense<0.000000e+00> : vector<104x32xf32>
    %11 = tpu.matmul %9, %10, %cst_13 {dimension_numbers = #tpu.dot_dimension_numbers<[1], [0], [0], [1], [0, 0, 1, 1], [], []>} : vector<104x32xbf16>, vector<32x32xbf16>, vector<104x32xf32> -> vector<104x32xf32>
    %12 = arith.addf %6, %11 : vector<104x32xf32>
    %c0_14 = arith.constant 0 : index
    %c6 = arith.constant 6 : index
    %c0_15 = arith.constant 0 : index
    %13 = vector.load %arg1[%c0_14, %c6, %c0_15] : memref<1x136x32xf32, #tpu.memory_space<vmem>>, vector<1x104x32xf32>
    %14 = vector.shape_cast %13 : vector<1x104x32xf32> to vector<104x32xf32>
    %15 = arith.truncf %14 : vector<104x32xf32> to vector<104x32xbf16>
    %c32 = arith.constant 32 : index
    %c0_16 = arith.constant 0 : index
    %16 = vector.load %arg4[%c32, %c0_16] : memref<288x32xbf16, #tpu.memory_space<vmem>>, vector<32x32xbf16>
    %cst_17 = arith.constant dense<0.000000e+00> : vector<104x32xf32>
    %17 = tpu.matmul %15, %16, %cst_17 {dimension_numbers = #tpu.dot_dimension_numbers<[1], [0], [0], [1], [0, 0, 1, 1], [], []>} : vector<104x32xbf16>, vector<32x32xbf16>, vector<104x32xf32> -> vector<104x32xf32>
    %18 = arith.addf %12, %17 : vector<104x32xf32>
    %c0_18 = arith.constant 0 : index
    %c7 = arith.constant 7 : index
    %c0_19 = arith.constant 0 : index
    %19 = vector.load %arg1[%c0_18, %c7, %c0_19] : memref<1x136x32xf32, #tpu.memory_space<vmem>>, vector<1x104x32xf32>
    %20 = vector.shape_cast %19 : vector<1x104x32xf32> to vector<104x32xf32>
    %21 = arith.truncf %20 : vector<104x32xf32> to vector<104x32xbf16>
    %c64 = arith.constant 64 : index
    %c0_20 = arith.constant 0 : index
    %22 = vector.load %arg4[%c64, %c0_20] : memref<288x32xbf16, #tpu.memory_space<vmem>>, vector<32x32xbf16>
    %cst_21 = arith.constant dense<0.000000e+00> : vector<104x32xf32>
    %23 = tpu.matmul %21, %22, %cst_21 {dimension_numbers = #tpu.dot_dimension_numbers<[1], [0], [0], [1], [0, 0, 1, 1], [], []>} : vector<104x32xbf16>, vector<32x32xbf16>, vector<104x32xf32> -> vector<104x32xf32>
    %24 = arith.addf %18, %23 : vector<104x32xf32>
    %c0_22 = arith.constant 0 : index
    %c15 = arith.constant 15 : index
    %c0_23 = arith.constant 0 : index
    %25 = vector.load %arg1[%c0_22, %c15, %c0_23] : memref<1x136x32xf32, #tpu.memory_space<vmem>>, vector<1x104x32xf32>
    %26 = vector.shape_cast %25 : vector<1x104x32xf32> to vector<104x32xf32>
    %27 = arith.truncf %26 : vector<104x32xf32> to vector<104x32xbf16>
    %c96 = arith.constant 96 : index
    %c0_24 = arith.constant 0 : index
    %28 = vector.load %arg4[%c96, %c0_24] : memref<288x32xbf16, #tpu.memory_space<vmem>>, vector<32x32xbf16>
    %cst_25 = arith.constant dense<0.000000e+00> : vector<104x32xf32>
    %29 = tpu.matmul %27, %28, %cst_25 {dimension_numbers = #tpu.dot_dimension_numbers<[1], [0], [0], [1], [0, 0, 1, 1], [], []>} : vector<104x32xbf16>, vector<32x32xbf16>, vector<104x32xf32> -> vector<104x32xf32>
    %30 = arith.addf %24, %29 : vector<104x32xf32>
    %c0_26 = arith.constant 0 : index
    %c16 = arith.constant 16 : index
    %c0_27 = arith.constant 0 : index
    %31 = vector.load %arg1[%c0_26, %c16, %c0_27] : memref<1x136x32xf32, #tpu.memory_space<vmem>>, vector<1x104x32xf32>
    %32 = vector.shape_cast %31 : vector<1x104x32xf32> to vector<104x32xf32>
    %33 = arith.truncf %32 : vector<104x32xf32> to vector<104x32xbf16>
    %c128 = arith.constant 128 : index
    %c0_28 = arith.constant 0 : index
    %34 = vector.load %arg4[%c128, %c0_28] : memref<288x32xbf16, #tpu.memory_space<vmem>>, vector<32x32xbf16>
    %cst_29 = arith.constant dense<0.000000e+00> : vector<104x32xf32>
    %35 = tpu.matmul %33, %34, %cst_29 {dimension_numbers = #tpu.dot_dimension_numbers<[1], [0], [0], [1], [0, 0, 1, 1], [], []>} : vector<104x32xbf16>, vector<32x32xbf16>, vector<104x32xf32> -> vector<104x32xf32>
    %36 = arith.addf %30, %35 : vector<104x32xf32>
    %c0_30 = arith.constant 0 : index
    %c17 = arith.constant 17 : index
    %c0_31 = arith.constant 0 : index
    %37 = vector.load %arg1[%c0_30, %c17, %c0_31] : memref<1x136x32xf32, #tpu.memory_space<vmem>>, vector<1x104x32xf32>
    %38 = vector.shape_cast %37 : vector<1x104x32xf32> to vector<104x32xf32>
    %39 = arith.truncf %38 : vector<104x32xf32> to vector<104x32xbf16>
    %c160 = arith.constant 160 : index
    %c0_32 = arith.constant 0 : index
    %40 = vector.load %arg4[%c160, %c0_32] : memref<288x32xbf16, #tpu.memory_space<vmem>>, vector<32x32xbf16>
    %cst_33 = arith.constant dense<0.000000e+00> : vector<104x32xf32>
    %41 = tpu.matmul %39, %40, %cst_33 {dimension_numbers = #tpu.dot_dimension_numbers<[1], [0], [0], [1], [0, 0, 1, 1], [], []>} : vector<104x32xbf16>, vector<32x32xbf16>, vector<104x32xf32> -> vector<104x32xf32>
    %42 = arith.addf %36, %41 : vector<104x32xf32>
    %c0_34 = arith.constant 0 : index
    %c25 = arith.constant 25 : index
    %c0_35 = arith.constant 0 : index
    %43 = vector.load %arg1[%c0_34, %c25, %c0_35] : memref<1x136x32xf32, #tpu.memory_space<vmem>>, vector<1x104x32xf32>
    %44 = vector.shape_cast %43 : vector<1x104x32xf32> to vector<104x32xf32>
    %45 = arith.truncf %44 : vector<104x32xf32> to vector<104x32xbf16>
    %c192 = arith.constant 192 : index
    %c0_36 = arith.constant 0 : index
    %46 = vector.load %arg4[%c192, %c0_36] : memref<288x32xbf16, #tpu.memory_space<vmem>>, vector<32x32xbf16>
    %cst_37 = arith.constant dense<0.000000e+00> : vector<104x32xf32>
    %47 = tpu.matmul %45, %46, %cst_37 {dimension_numbers = #tpu.dot_dimension_numbers<[1], [0], [0], [1], [0, 0, 1, 1], [], []>} : vector<104x32xbf16>, vector<32x32xbf16>, vector<104x32xf32> -> vector<104x32xf32>
    %48 = arith.addf %42, %47 : vector<104x32xf32>
    %c0_38 = arith.constant 0 : index
    %c26 = arith.constant 26 : index
    %c0_39 = arith.constant 0 : index
    %49 = vector.load %arg1[%c0_38, %c26, %c0_39] : memref<1x136x32xf32, #tpu.memory_space<vmem>>, vector<1x104x32xf32>
    %50 = vector.shape_cast %49 : vector<1x104x32xf32> to vector<104x32xf32>
    %51 = arith.truncf %50 : vector<104x32xf32> to vector<104x32xbf16>
    %c224 = arith.constant 224 : index
    %c0_40 = arith.constant 0 : index
    %52 = vector.load %arg4[%c224, %c0_40] : memref<288x32xbf16, #tpu.memory_space<vmem>>, vector<32x32xbf16>
    %cst_41 = arith.constant dense<0.000000e+00> : vector<104x32xf32>
    %53 = tpu.matmul %51, %52, %cst_41 {dimension_numbers = #tpu.dot_dimension_numbers<[1], [0], [0], [1], [0, 0, 1, 1], [], []>} : vector<104x32xbf16>, vector<32x32xbf16>, vector<104x32xf32> -> vector<104x32xf32>
    %54 = arith.addf %48, %53 : vector<104x32xf32>
    %c0_42 = arith.constant 0 : index
    %c27 = arith.constant 27 : index
    %c0_43 = arith.constant 0 : index
    %55 = vector.load %arg1[%c0_42, %c27, %c0_43] : memref<1x136x32xf32, #tpu.memory_space<vmem>>, vector<1x104x32xf32>
    %56 = vector.shape_cast %55 : vector<1x104x32xf32> to vector<104x32xf32>
    %57 = arith.truncf %56 : vector<104x32xf32> to vector<104x32xbf16>
    %c256 = arith.constant 256 : index
    %c0_44 = arith.constant 0 : index
    %58 = vector.load %arg4[%c256, %c0_44] : memref<288x32xbf16, #tpu.memory_space<vmem>>, vector<32x32xbf16>
    %cst_45 = arith.constant dense<0.000000e+00> : vector<104x32xf32>
    %59 = tpu.matmul %57, %58, %cst_45 {dimension_numbers = #tpu.dot_dimension_numbers<[1], [0], [0], [1], [0, 0, 1, 1], [], []>} : vector<104x32xbf16>, vector<32x32xbf16>, vector<104x32xf32> -> vector<104x32xf32>
    %60 = arith.addf %54, %59 : vector<104x32xf32>
    %c0_46 = arith.constant 0 : index
    %c0_47 = arith.constant 0 : index
    %61 = vector.load %arg5[%c0_46, %c0_47] : memref<1x32xf32, #tpu.memory_space<vmem>>, vector<1x32xf32>
    %62 = vector.broadcast %61 : vector<1x32xf32> to vector<104x32xf32>
    %63 = arith.mulf %60, %62 : vector<104x32xf32>
    %c0_48 = arith.constant 0 : index
    %c0_49 = arith.constant 0 : index
    %64 = vector.load %arg6[%c0_48, %c0_49] : memref<1x32xf32, #tpu.memory_space<vmem>>, vector<1x32xf32>
    %65 = vector.broadcast %64 : vector<1x32xf32> to vector<104x32xf32>
    %66 = arith.addf %63, %65 : vector<104x32xf32>
    %c0_50 = arith.constant 0 : index
    %c16_51 = arith.constant 16 : index
    %c0_52 = arith.constant 0 : index
    %67 = vector.load %arg2[%c0_50, %c16_51, %c0_52] : memref<1x136x32xf32, #tpu.memory_space<vmem>>, vector<1x104x32xf32>
    %68 = vector.shape_cast %67 : vector<1x104x32xf32> to vector<104x32xf32>
    %69 = arith.addf %66, %68 : vector<104x32xf32>
    %cst_53 = arith.constant 0.000000e+00 : f32
    %70 = vector.broadcast %cst_53 : f32 to vector<104x32xf32>
    %71 = arith.maximumf %69, %70 : vector<104x32xf32>
    %72 = vector.broadcast %0 : vector<104x1xf32> to vector<104x32xf32>
    %73 = arith.mulf %71, %72 : vector<104x32xf32>
    %c16_54 = arith.constant 16 : index
    %c0_55 = arith.constant 0 : index
    %74 = vector.load %arg14[%c16_54, %c0_55] : memref<136x32xf32, #tpu.memory_space<vmem>>, vector<104x32xf32>
    tpu.vector_store %arg14[%c16_54, %c0_55], %73 {strides = array<i32>} : memref<136x32xf32, #tpu.memory_space<vmem>>, vector<104x32xf32>,
    %cst_56 = arith.constant 0.000000e+00 : f32
    %75 = vector.broadcast %cst_56 : f32 to vector<104x32xf32>
    %c5_57 = arith.constant 5 : index
    %c0_58 = arith.constant 0 : index
    %76 = vector.load %arg14[%c5_57, %c0_58] : memref<136x32xf32, #tpu.memory_space<vmem>>, vector<104x32xf32>
    %77 = arith.truncf %76 : vector<104x32xf32> to vector<104x32xbf16>
    %c0_59 = arith.constant 0 : index
    %c0_60 = arith.constant 0 : index
    %78 = vector.load %arg7[%c0_59, %c0_60] : memref<288x32xbf16, #tpu.memory_space<vmem>>, vector<32x32xbf16>
    %cst_61 = arith.constant dense<0.000000e+00> : vector<104x32xf32>
    %79 = tpu.matmul %77, %78, %cst_61 {dimension_numbers = #tpu.dot_dimension_numbers<[1], [0], [0], [1], [0, 0, 1, 1], [], []>} : vector<104x32xbf16>, vector<32x32xbf16>, vector<104x32xf32> -> vector<104x32xf32>
    %80 = arith.addf %75, %79 : vector<104x32xf32>
    %c6_62 = arith.constant 6 : index
    %c0_63 = arith.constant 0 : index
    %81 = vector.load %arg14[%c6_62, %c0_63] : memref<136x32xf32, #tpu.memory_space<vmem>>, vector<104x32xf32>
    %82 = arith.truncf %81 : vector<104x32xf32> to vector<104x32xbf16>
    %c32_64 = arith.constant 32 : index
    %c0_65 = arith.constant 0 : index
    %83 = vector.load %arg7[%c32_64, %c0_65] : memref<288x32xbf16, #tpu.memory_space<vmem>>, vector<32x32xbf16>
    %cst_66 = arith.constant dense<0.000000e+00> : vector<104x32xf32>
    %84 = tpu.matmul %82, %83, %cst_66 {dimension_numbers = #tpu.dot_dimension_numbers<[1], [0], [0], [1], [0, 0, 1, 1], [], []>} : vector<104x32xbf16>, vector<32x32xbf16>, vector<104x32xf32> -> vector<104x32xf32>
    %85 = arith.addf %80, %84 : vector<104x32xf32>
    %c7_67 = arith.constant 7 : index
    %c0_68 = arith.constant 0 : index
    %86 = vector.load %arg14[%c7_67, %c0_68] : memref<136x32xf32, #tpu.memory_space<vmem>>, vector<104x32xf32>
    %87 = arith.truncf %86 : vector<104x32xf32> to vector<104x32xbf16>
    %c64_69 = arith.constant 64 : index
    %c0_70 = arith.constant 0 : index
    %88 = vector.load %arg7[%c64_69, %c0_70] : memref<288x32xbf16, #tpu.memory_space<vmem>>, vector<32x32xbf16>
    %cst_71 = arith.constant dense<0.000000e+00> : vector<104x32xf32>
    %89 = tpu.matmul %87, %88, %cst_71 {dimension_numbers = #tpu.dot_dimension_numbers<[1], [0], [0], [1], [0, 0, 1, 1], [], []>} : vector<104x32xbf16>, vector<32x32xbf16>, vector<104x32xf32> -> vector<104x32xf32>
    %90 = arith.addf %85, %89 : vector<104x32xf32>
    %c15_72 = arith.constant 15 : index
    %c0_73 = arith.constant 0 : index
    %91 = vector.load %arg14[%c15_72, %c0_73] : memref<136x32xf32, #tpu.memory_space<vmem>>, vector<104x32xf32>
    %92 = arith.truncf %91 : vector<104x32xf32> to vector<104x32xbf16>
    %c96_74 = arith.constant 96 : index
    %c0_75 = arith.constant 0 : index
    %93 = vector.load %arg7[%c96_74, %c0_75] : memref<288x32xbf16, #tpu.memory_space<vmem>>, vector<32x32xbf16>
    %cst_76 = arith.constant dense<0.000000e+00> : vector<104x32xf32>
    %94 = tpu.matmul %92, %93, %cst_76 {dimension_numbers = #tpu.dot_dimension_numbers<[1], [0], [0], [1], [0, 0, 1, 1], [], []>} : vector<104x32xbf16>, vector<32x32xbf16>, vector<104x32xf32> -> vector<104x32xf32>
    %95 = arith.addf %90, %94 : vector<104x32xf32>
    %c16_77 = arith.constant 16 : index
    %c0_78 = arith.constant 0 : index
    %96 = vector.load %arg14[%c16_77, %c0_78] : memref<136x32xf32, #tpu.memory_space<vmem>>, vector<104x32xf32>
    %97 = arith.truncf %96 : vector<104x32xf32> to vector<104x32xbf16>
    %c128_79 = arith.constant 128 : index
    %c0_80 = arith.constant 0 : index
    %98 = vector.load %arg7[%c128_79, %c0_80] : memref<288x32xbf16, #tpu.memory_space<vmem>>, vector<32x32xbf16>
    %cst_81 = arith.constant dense<0.000000e+00> : vector<104x32xf32>
    %99 = tpu.matmul %97, %98, %cst_81 {dimension_numbers = #tpu.dot_dimension_numbers<[1], [0], [0], [1], [0, 0, 1, 1], [], []>} : vector<104x32xbf16>, vector<32x32xbf16>, vector<104x32xf32> -> vector<104x32xf32>
    %100 = arith.addf %95, %99 : vector<104x32xf32>
    %c17_82 = arith.constant 17 : index
    %c0_83 = arith.constant 0 : index
    %101 = vector.load %arg14[%c17_82, %c0_83] : memref<136x32xf32, #tpu.memory_space<vmem>>, vector<104x32xf32>
    %102 = arith.truncf %101 : vector<104x32xf32> to vector<104x32xbf16>
    %c160_84 = arith.constant 160 : index
    %c0_85 = arith.constant 0 : index
    %103 = vector.load %arg7[%c160_84, %c0_85] : memref<288x32xbf16, #tpu.memory_space<vmem>>, vector<32x32xbf16>
    %cst_86 = arith.constant dense<0.000000e+00> : vector<104x32xf32>
    %104 = tpu.matmul %102, %103, %cst_86 {dimension_numbers = #tpu.dot_dimension_numbers<[1], [0], [0], [1], [0, 0, 1, 1], [], []>} : vector<104x32xbf16>, vector<32x32xbf16>, vector<104x32xf32> -> vector<104x32xf32>
    %105 = arith.addf %100, %104 : vector<104x32xf32>
    %c25_87 = arith.constant 25 : index
    %c0_88 = arith.constant 0 : index
    %106 = vector.load %arg14[%c25_87, %c0_88] : memref<136x32xf32, #tpu.memory_space<vmem>>, vector<104x32xf32>
    %107 = arith.truncf %106 : vector<104x32xf32> to vector<104x32xbf16>
    %c192_89 = arith.constant 192 : index
    %c0_90 = arith.constant 0 : index
    %108 = vector.load %arg7[%c192_89, %c0_90] : memref<288x32xbf16, #tpu.memory_space<vmem>>, vector<32x32xbf16>
    %cst_91 = arith.constant dense<0.000000e+00> : vector<104x32xf32>
    %109 = tpu.matmul %107, %108, %cst_91 {dimension_numbers = #tpu.dot_dimension_numbers<[1], [0], [0], [1], [0, 0, 1, 1], [], []>} : vector<104x32xbf16>, vector<32x32xbf16>, vector<104x32xf32> -> vector<104x32xf32>
    %110 = arith.addf %105, %109 : vector<104x32xf32>
    %c26_92 = arith.constant 26 : index
    %c0_93 = arith.constant 0 : index
    %111 = vector.load %arg14[%c26_92, %c0_93] : memref<136x32xf32, #tpu.memory_space<vmem>>, vector<104x32xf32>
    %112 = arith.truncf %111 : vector<104x32xf32> to vector<104x32xbf16>
    %c224_94 = arith.constant 224 : index
    %c0_95 = arith.constant 0 : index
    %113 = vector.load %arg7[%c224_94, %c0_95] : memref<288x32xbf16, #tpu.memory_space<vmem>>, vector<32x32xbf16>
    %cst_96 = arith.constant dense<0.000000e+00> : vector<104x32xf32>
    %114 = tpu.matmul %112, %113, %cst_96 {dimension_numbers = #tpu.dot_dimension_numbers<[1], [0], [0], [1], [0, 0, 1, 1], [], []>} : vector<104x32xbf16>, vector<32x32xbf16>, vector<104x32xf32> -> vector<104x32xf32>
    %115 = arith.addf %110, %114 : vector<104x32xf32>
    %c27_97 = arith.constant 27 : index
    %c0_98 = arith.constant 0 : index
    %116 = vector.load %arg14[%c27_97, %c0_98] : memref<136x32xf32, #tpu.memory_space<vmem>>, vector<104x32xf32>
    %117 = arith.truncf %116 : vector<104x32xf32> to vector<104x32xbf16>
    %c256_99 = arith.constant 256 : index
    %c0_100 = arith.constant 0 : index
    %118 = vector.load %arg7[%c256_99, %c0_100] : memref<288x32xbf16, #tpu.memory_space<vmem>>, vector<32x32xbf16>
    %cst_101 = arith.constant dense<0.000000e+00> : vector<104x32xf32>
    %119 = tpu.matmul %117, %118, %cst_101 {dimension_numbers = #tpu.dot_dimension_numbers<[1], [0], [0], [1], [0, 0, 1, 1], [], []>} : vector<104x32xbf16>, vector<32x32xbf16>, vector<104x32xf32> -> vector<104x32xf32>
    %120 = arith.addf %115, %119 : vector<104x32xf32>
    %c0_102 = arith.constant 0 : index
    %c0_103 = arith.constant 0 : index
    %121 = vector.load %arg8[%c0_102, %c0_103] : memref<1x32xf32, #tpu.memory_space<vmem>>, vector<1x32xf32>
    %122 = vector.broadcast %121 : vector<1x32xf32> to vector<104x32xf32>
    %123 = arith.mulf %120, %122 : vector<104x32xf32>
    %c0_104 = arith.constant 0 : index
    %c0_105 = arith.constant 0 : index
    %124 = vector.load %arg9[%c0_104, %c0_105] : memref<1x32xf32, #tpu.memory_space<vmem>>, vector<1x32xf32>
    %125 = vector.broadcast %124 : vector<1x32xf32> to vector<104x32xf32>
    %126 = arith.addf %123, %125 : vector<104x32xf32>
    %cst_106 = arith.constant 0.000000e+00 : f32
    %127 = vector.broadcast %cst_106 : f32 to vector<104x32xf32>
    %128 = arith.maximumf %126, %127 : vector<104x32xf32>
    %129 = vector.broadcast %0 : vector<104x1xf32> to vector<104x32xf32>
    %130 = arith.mulf %128, %129 : vector<104x32xf32>
    %c16_107 = arith.constant 16 : index
    %c0_108 = arith.constant 0 : index
    %131 = vector.load %arg15[%c16_107, %c0_108] : memref<136x32xf32, #tpu.memory_space<vmem>>, vector<104x32xf32>
    tpu.vector_store %arg15[%c16_107, %c0_108], %130 {strides = array<i32>} : memref<136x32xf32, #tpu.memory_space<vmem>>, vector<104x32xf32>,
    %cst_109 = arith.constant 0.000000e+00 : f32
    %132 = vector.broadcast %cst_109 : f32 to vector<104x32xf32>
    %c5_110 = arith.constant 5 : index
    %c0_111 = arith.constant 0 : index
    %133 = vector.load %arg15[%c5_110, %c0_111] : memref<136x32xf32, #tpu.memory_space<vmem>>, vector<104x32xf32>
    %134 = arith.truncf %133 : vector<104x32xf32> to vector<104x32xbf16>
    %c0_112 = arith.constant 0 : index
    %c0_113 = arith.constant 0 : index
    %135 = vector.load %arg10[%c0_112, %c0_113] : memref<288x32xbf16, #tpu.memory_space<vmem>>, vector<32x32xbf16>
    %cst_114 = arith.constant dense<0.000000e+00> : vector<104x32xf32>
    %136 = tpu.matmul %134, %135, %cst_114 {dimension_numbers = #tpu.dot_dimension_numbers<[1], [0], [0], [1], [0, 0, 1, 1], [], []>} : vector<104x32xbf16>, vector<32x32xbf16>, vector<104x32xf32> -> vector<104x32xf32>
    %137 = arith.addf %132, %136 : vector<104x32xf32>
    %c6_115 = arith.constant 6 : index
    %c0_116 = arith.constant 0 : index
    %138 = vector.load %arg15[%c6_115, %c0_116] : memref<136x32xf32, #tpu.memory_space<vmem>>, vector<104x32xf32>
    %139 = arith.truncf %138 : vector<104x32xf32> to vector<104x32xbf16>
    %c32_117 = arith.constant 32 : index
    %c0_118 = arith.constant 0 : index
    %140 = vector.load %arg10[%c32_117, %c0_118] : memref<288x32xbf16, #tpu.memory_space<vmem>>, vector<32x32xbf16>
    %cst_119 = arith.constant dense<0.000000e+00> : vector<104x32xf32>
    %141 = tpu.matmul %139, %140, %cst_119 {dimension_numbers = #tpu.dot_dimension_numbers<[1], [0], [0], [1], [0, 0, 1, 1], [], []>} : vector<104x32xbf16>, vector<32x32xbf16>, vector<104x32xf32> -> vector<104x32xf32>
    %142 = arith.addf %137, %141 : vector<104x32xf32>
    %c7_120 = arith.constant 7 : index
    %c0_121 = arith.constant 0 : index
    %143 = vector.load %arg15[%c7_120, %c0_121] : memref<136x32xf32, #tpu.memory_space<vmem>>, vector<104x32xf32>
    %144 = arith.truncf %143 : vector<104x32xf32> to vector<104x32xbf16>
    %c64_122 = arith.constant 64 : index
    %c0_123 = arith.constant 0 : index
    %145 = vector.load %arg10[%c64_122, %c0_123] : memref<288x32xbf16, #tpu.memory_space<vmem>>, vector<32x32xbf16>
    %cst_124 = arith.constant dense<0.000000e+00> : vector<104x32xf32>
    %146 = tpu.matmul %144, %145, %cst_124 {dimension_numbers = #tpu.dot_dimension_numbers<[1], [0], [0], [1], [0, 0, 1, 1], [], []>} : vector<104x32xbf16>, vector<32x32xbf16>, vector<104x32xf32> -> vector<104x32xf32>
    %147 = arith.addf %142, %146 : vector<104x32xf32>
    %c15_125 = arith.constant 15 : index
    %c0_126 = arith.constant 0 : index
    %148 = vector.load %arg15[%c15_125, %c0_126] : memref<136x32xf32, #tpu.memory_space<vmem>>, vector<104x32xf32>
    %149 = arith.truncf %148 : vector<104x32xf32> to vector<104x32xbf16>
    %c96_127 = arith.constant 96 : index
    %c0_128 = arith.constant 0 : index
    %150 = vector.load %arg10[%c96_127, %c0_128] : memref<288x32xbf16, #tpu.memory_space<vmem>>, vector<32x32xbf16>
    %cst_129 = arith.constant dense<0.000000e+00> : vector<104x32xf32>
    %151 = tpu.matmul %149, %150, %cst_129 {dimension_numbers = #tpu.dot_dimension_numbers<[1], [0], [0], [1], [0, 0, 1, 1], [], []>} : vector<104x32xbf16>, vector<32x32xbf16>, vector<104x32xf32> -> vector<104x32xf32>
    %152 = arith.addf %147, %151 : vector<104x32xf32>
    %c16_130 = arith.constant 16 : index
    %c0_131 = arith.constant 0 : index
    %153 = vector.load %arg15[%c16_130, %c0_131] : memref<136x32xf32, #tpu.memory_space<vmem>>, vector<104x32xf32>
    %154 = arith.truncf %153 : vector<104x32xf32> to vector<104x32xbf16>
    %c128_132 = arith.constant 128 : index
    %c0_133 = arith.constant 0 : index
    %155 = vector.load %arg10[%c128_132, %c0_133] : memref<288x32xbf16, #tpu.memory_space<vmem>>, vector<32x32xbf16>
    %cst_134 = arith.constant dense<0.000000e+00> : vector<104x32xf32>
    %156 = tpu.matmul %154, %155, %cst_134 {dimension_numbers = #tpu.dot_dimension_numbers<[1], [0], [0], [1], [0, 0, 1, 1], [], []>} : vector<104x32xbf16>, vector<32x32xbf16>, vector<104x32xf32> -> vector<104x32xf32>
    %157 = arith.addf %152, %156 : vector<104x32xf32>
    %c17_135 = arith.constant 17 : index
    %c0_136 = arith.constant 0 : index
    %158 = vector.load %arg15[%c17_135, %c0_136] : memref<136x32xf32, #tpu.memory_space<vmem>>, vector<104x32xf32>
    %159 = arith.truncf %158 : vector<104x32xf32> to vector<104x32xbf16>
    %c160_137 = arith.constant 160 : index
    %c0_138 = arith.constant 0 : index
    %160 = vector.load %arg10[%c160_137, %c0_138] : memref<288x32xbf16, #tpu.memory_space<vmem>>, vector<32x32xbf16>
    %cst_139 = arith.constant dense<0.000000e+00> : vector<104x32xf32>
    %161 = tpu.matmul %159, %160, %cst_139 {dimension_numbers = #tpu.dot_dimension_numbers<[1], [0], [0], [1], [0, 0, 1, 1], [], []>} : vector<104x32xbf16>, vector<32x32xbf16>, vector<104x32xf32> -> vector<104x32xf32>
    %162 = arith.addf %157, %161 : vector<104x32xf32>
    %c25_140 = arith.constant 25 : index
    %c0_141 = arith.constant 0 : index
    %163 = vector.load %arg15[%c25_140, %c0_141] : memref<136x32xf32, #tpu.memory_space<vmem>>, vector<104x32xf32>
    %164 = arith.truncf %163 : vector<104x32xf32> to vector<104x32xbf16>
    %c192_142 = arith.constant 192 : index
    %c0_143 = arith.constant 0 : index
    %165 = vector.load %arg10[%c192_142, %c0_143] : memref<288x32xbf16, #tpu.memory_space<vmem>>, vector<32x32xbf16>
    %cst_144 = arith.constant dense<0.000000e+00> : vector<104x32xf32>
    %166 = tpu.matmul %164, %165, %cst_144 {dimension_numbers = #tpu.dot_dimension_numbers<[1], [0], [0], [1], [0, 0, 1, 1], [], []>} : vector<104x32xbf16>, vector<32x32xbf16>, vector<104x32xf32> -> vector<104x32xf32>
    %167 = arith.addf %162, %166 : vector<104x32xf32>
    %c26_145 = arith.constant 26 : index
    %c0_146 = arith.constant 0 : index
    %168 = vector.load %arg15[%c26_145, %c0_146] : memref<136x32xf32, #tpu.memory_space<vmem>>, vector<104x32xf32>
    %169 = arith.truncf %168 : vector<104x32xf32> to vector<104x32xbf16>
    %c224_147 = arith.constant 224 : index
    %c0_148 = arith.constant 0 : index
    %170 = vector.load %arg10[%c224_147, %c0_148] : memref<288x32xbf16, #tpu.memory_space<vmem>>, vector<32x32xbf16>
    %cst_149 = arith.constant dense<0.000000e+00> : vector<104x32xf32>
    %171 = tpu.matmul %169, %170, %cst_149 {dimension_numbers = #tpu.dot_dimension_numbers<[1], [0], [0], [1], [0, 0, 1, 1], [], []>} : vector<104x32xbf16>, vector<32x32xbf16>, vector<104x32xf32> -> vector<104x32xf32>
    %172 = arith.addf %167, %171 : vector<104x32xf32>
    %c27_150 = arith.constant 27 : index
    %c0_151 = arith.constant 0 : index
    %173 = vector.load %arg15[%c27_150, %c0_151] : memref<136x32xf32, #tpu.memory_space<vmem>>, vector<104x32xf32>
    %174 = arith.truncf %173 : vector<104x32xf32> to vector<104x32xbf16>
    %c256_152 = arith.constant 256 : index
    %c0_153 = arith.constant 0 : index
    %175 = vector.load %arg10[%c256_152, %c0_153] : memref<288x32xbf16, #tpu.memory_space<vmem>>, vector<32x32xbf16>
    %cst_154 = arith.constant dense<0.000000e+00> : vector<104x32xf32>
    %176 = tpu.matmul %174, %175, %cst_154 {dimension_numbers = #tpu.dot_dimension_numbers<[1], [0], [0], [1], [0, 0, 1, 1], [], []>} : vector<104x32xbf16>, vector<32x32xbf16>, vector<104x32xf32> -> vector<104x32xf32>
    %177 = arith.addf %172, %176 : vector<104x32xf32>
    %c0_155 = arith.constant 0 : index
    %c0_156 = arith.constant 0 : index
    %178 = vector.load %arg11[%c0_155, %c0_156] : memref<1x32xf32, #tpu.memory_space<vmem>>, vector<1x32xf32>
    %179 = vector.broadcast %178 : vector<1x32xf32> to vector<104x32xf32>
    %180 = arith.mulf %177, %179 : vector<104x32xf32>
    %c0_157 = arith.constant 0 : index
    %c0_158 = arith.constant 0 : index
    %181 = vector.load %arg12[%c0_157, %c0_158] : memref<1x32xf32, #tpu.memory_space<vmem>>, vector<1x32xf32>
    %182 = vector.broadcast %181 : vector<1x32xf32> to vector<104x32xf32>
    %183 = arith.addf %180, %182 : vector<104x32xf32>
    %184 = arith.addf %183, %73 : vector<104x32xf32>
    %cst_159 = arith.constant 0.000000e+00 : f32
    %185 = vector.broadcast %cst_159 : f32 to vector<104x32xf32>
    %186 = arith.maximumf %184, %185 : vector<104x32xf32>
    %187 = vector.broadcast %0 : vector<104x1xf32> to vector<104x32xf32>
    %188 = arith.mulf %186, %187 : vector<104x32xf32>
    %c0_160 = arith.constant 0 : index
    %c0_161 = arith.constant 0 : index
    %c0_162 = arith.constant 0 : index
    %189 = vector.load %arg13[%c0_160, %c0_161, %c0_162] : memref<1x136x32xf32, #tpu.memory_space<vmem>>, vector<1x16x32xf32>
    %190 = vector.shape_cast %189 : vector<1x16x32xf32> to vector<16x32xf32>
    %191 = vector.shape_cast %1 : vector<16x32xf32> to vector<1x16x32xf32>
    tpu.vector_store %arg13[%c0_160, %c0_161, %c0_162], %191 {strides = array<i32>} : memref<1x136x32xf32, #tpu.memory_space<vmem>>, vector<1x16x32xf32>,
    %c0_163 = arith.constant 0 : index
    %c16_164 = arith.constant 16 : index
    %c0_165 = arith.constant 0 : index
    %192 = vector.load %arg13[%c0_163, %c16_164, %c0_165] : memref<1x136x32xf32, #tpu.memory_space<vmem>>, vector<1x104x32xf32>
    %193 = vector.shape_cast %192 : vector<1x104x32xf32> to vector<104x32xf32>
    %194 = vector.shape_cast %188 : vector<104x32xf32> to vector<1x104x32xf32>
    tpu.vector_store %arg13[%c0_163, %c16_164, %c0_165], %194 {strides = array<i32>} : memref<1x136x32xf32, #tpu.memory_space<vmem>>, vector<1x104x32xf32>,
    %c0_166 = arith.constant 0 : index
    %c120_167 = arith.constant 120 : index
    %c0_168 = arith.constant 0 : index
    %195 = vector.load %arg13[%c0_166, %c120_167, %c0_168] : memref<1x136x32xf32, #tpu.memory_space<vmem>>, vector<1x16x32xf32>
    %196 = vector.shape_cast %195 : vector<1x16x32xf32> to vector<16x32xf32>
    %197 = vector.shape_cast %1 : vector<16x32xf32> to vector<1x16x32xf32>
    tpu.vector_store %arg13[%c0_166, %c120_167, %c0_168], %197 {strides = array<i32>} : memref<1x136x32xf32, #tpu.memory_space<vmem>>, vector<1x16x32xf32>,
    return
  }
  func.func @transform_0(%arg0: i32) -> (i32, i32, i32) {
    %c0_i32 = arith.constant 0 : i32
    %c0_i32_0 = arith.constant 0 : i32
    %c0_i32_1 = arith.constant 0 : i32
    return %arg0, %c0_i32, %c0_i32_0 : i32, i32, i32
  }
  func.func @transform_1(%arg0: i32) -> (i32, i32, i32) {
    %c0_i32 = arith.constant 0 : i32
    %c0_i32_0 = arith.constant 0 : i32
    %c0_i32_1 = arith.constant 0 : i32
    return %arg0, %c0_i32, %c0_i32_0 : i32, i32, i32
  }
  func.func @transform_2(%arg0: i32) -> (i32, i32) {
    %c0_i32 = arith.constant 0 : i32
    %c0_i32_0 = arith.constant 0 : i32
    %c0_i32_1 = arith.constant 0 : i32
    return %c0_i32, %c0_i32_0 : i32, i32
  }
  func.func @transform_3(%arg0: i32) -> (i32, i32) {
    %c0_i32 = arith.constant 0 : i32
    %c0_i32_0 = arith.constant 0 : i32
    %c0_i32_1 = arith.constant 0 : i32
    return %c0_i32, %c0_i32_0 : i32, i32
  }
  func.func @transform_4(%arg0: i32) -> (i32, i32) {
    %c0_i32 = arith.constant 0 : i32
    %c0_i32_0 = arith.constant 0 : i32
    %c0_i32_1 = arith.constant 0 : i32
    return %c0_i32, %c0_i32_0 : i32, i32
  }
  func.func @transform_5(%arg0: i32) -> (i32, i32) {
    %c0_i32 = arith.constant 0 : i32
    %c0_i32_0 = arith.constant 0 : i32
    %c0_i32_1 = arith.constant 0 : i32
    return %c0_i32, %c0_i32_0 : i32, i32
  }
  func.func @transform_6(%arg0: i32) -> (i32, i32) {
    %c0_i32 = arith.constant 0 : i32
    %c0_i32_0 = arith.constant 0 : i32
    %c0_i32_1 = arith.constant 0 : i32
    return %c0_i32, %c0_i32_0 : i32, i32
  }
  func.func @transform_7(%arg0: i32) -> (i32, i32) {
    %c0_i32 = arith.constant 0 : i32
    %c0_i32_0 = arith.constant 0 : i32
    %c0_i32_1 = arith.constant 0 : i32
    return %c0_i32, %c0_i32_0 : i32, i32
  }
  func.func @transform_8(%arg0: i32) -> (i32, i32) {
    %c0_i32 = arith.constant 0 : i32
    %c0_i32_0 = arith.constant 0 : i32
    %c0_i32_1 = arith.constant 0 : i32
    return %c0_i32, %c0_i32_0 : i32, i32
  }
  func.func @transform_9(%arg0: i32) -> (i32, i32) {
    %c0_i32 = arith.constant 0 : i32
    %c0_i32_0 = arith.constant 0 : i32
    %c0_i32_1 = arith.constant 0 : i32
    return %c0_i32, %c0_i32_0 : i32, i32
  }
  func.func @transform_10(%arg0: i32) -> (i32, i32) {
    %c0_i32 = arith.constant 0 : i32
    %c0_i32_0 = arith.constant 0 : i32
    %c0_i32_1 = arith.constant 0 : i32
    return %c0_i32, %c0_i32_0 : i32, i32
  }
  func.func @transform_11(%arg0: i32) -> (i32, i32) {
    %c0_i32 = arith.constant 0 : i32
    %c0_i32_0 = arith.constant 0 : i32
    %c0_i32_1 = arith.constant 0 : i32
    return %c0_i32, %c0_i32_0 : i32, i32
  }
  func.func @transform_12(%arg0: i32) -> (i32, i32, i32) {
    %c0_i32 = arith.constant 0 : i32
    %c0_i32_0 = arith.constant 0 : i32
    %c0_i32_1 = arith.constant 0 : i32
    return %arg0, %c0_i32, %c0_i32_0 : i32, i32, i32
  }
}

module attributes {stable_mosaic.version = 11 : i64} {
  func.func @_transition_kernel(%arg0: i32, %arg1: memref<32x288xbf16, #tpu.memory_space<vmem>>, %arg2: memref<288x128xbf16, #tpu.memory_space<vmem>>, %arg3: memref<1x128xf32, #tpu.memory_space<vmem>>, %arg4: memref<1x128xf32, #tpu.memory_space<vmem>>, %arg5: memref<1x128xf32, #tpu.memory_space<vmem>>, %arg6: memref<32x128xf32, #tpu.memory_space<vmem>>) attributes {dimension_semantics = [#tpu.dimension_semantics<parallel>], iteration_bounds = array<i64: 1>, scalar_prefetch = 0 : i64, scratch_operands = 0 : i64, tpu.core_type = #tpu.core_type<tc>, window_params = [{transform_indices = @transform_0, window_bounds = array<i64: 32, 288>}, {pipeline_mode = #tpu.pipeline_mode<synchronous>, transform_indices = @transform_1, window_bounds = array<i64: 288, 128>}, {pipeline_mode = #tpu.pipeline_mode<synchronous>, transform_indices = @transform_2, window_bounds = array<i64: 1, 128>}, {pipeline_mode = #tpu.pipeline_mode<synchronous>, transform_indices = @transform_3, window_bounds = array<i64: 1, 128>}, {pipeline_mode = #tpu.pipeline_mode<synchronous>, transform_indices = @transform_4, window_bounds = array<i64: 1, 128>}, {transform_indices = @transform_5, window_bounds = array<i64: 32, 128>}]} {
    %c0 = arith.constant 0 : index
    %c0_0 = arith.constant 0 : index
    %0 = vector.load %arg1[%c0, %c0_0] : memref<32x288xbf16, #tpu.memory_space<vmem>>, vector<32x288xbf16>
    %c0_1 = arith.constant 0 : index
    %c0_2 = arith.constant 0 : index
    %1 = vector.load %arg2[%c0_1, %c0_2] : memref<288x128xbf16, #tpu.memory_space<vmem>>, vector<288x128xbf16>
    %cst = arith.constant dense<0.000000e+00> : vector<32x128xf32>
    %2 = tpu.matmul %0, %1, %cst {dimension_numbers = #tpu.dot_dimension_numbers<[1], [0], [0], [1], [0, 0, 1, 1], [], []>} : vector<32x288xbf16>, vector<288x128xbf16>, vector<32x128xf32> -> vector<32x128xf32>
    %c0_3 = arith.constant 0 : index
    %c0_4 = arith.constant 0 : index
    %3 = vector.load %arg3[%c0_3, %c0_4] : memref<1x128xf32, #tpu.memory_space<vmem>>, vector<1x128xf32>
    %4 = vector.broadcast %3 : vector<1x128xf32> to vector<32x128xf32>
    %5 = arith.mulf %2, %4 : vector<32x128xf32>
    %c0_5 = arith.constant 0 : index
    %c0_6 = arith.constant 0 : index
    %6 = vector.load %arg4[%c0_5, %c0_6] : memref<1x128xf32, #tpu.memory_space<vmem>>, vector<1x128xf32>
    %7 = vector.broadcast %6 : vector<1x128xf32> to vector<32x128xf32>
    %8 = arith.addf %5, %7 : vector<32x128xf32>
    %c0_7 = arith.constant 0 : index
    %c0_8 = arith.constant 0 : index
    %9 = vector.load %arg5[%c0_7, %c0_8] : memref<1x128xf32, #tpu.memory_space<vmem>>, vector<1x128xf32>
    %cst_9 = arith.constant 0.000000e+00 : f32
    %10 = vector.broadcast %cst_9 : f32 to vector<1x128xf32>
    %11 = arith.cmpf one, %9, %10 : vector<1x128xf32>
    %cst_10 = arith.constant 0.000000e+00 : f32
    %12 = vector.broadcast %cst_10 : f32 to vector<32x128xf32>
    %13 = arith.maximumf %8, %12 : vector<32x128xf32>
    %14 = vector.shape_cast %11 : vector<1x128xi1> to vector<1x128xi1>
    %15 = vector.broadcast %14 : vector<1x128xi1> to vector<32x128xi1>
    %16 = arith.select %15, %13, %8 : vector<32x128xi1>, vector<32x128xf32>
    %c0_11 = arith.constant 0 : index
    %c0_12 = arith.constant 0 : index
    %17 = vector.load %arg6[%c0_11, %c0_12] : memref<32x128xf32, #tpu.memory_space<vmem>>, vector<32x128xf32>
    tpu.vector_store %arg6[%c0_11, %c0_12], %16 {strides = array<i32>} : memref<32x128xf32, #tpu.memory_space<vmem>>, vector<32x128xf32>,
    return
  }
  func.func @transform_0(%arg0: i32) -> (i32, i32) {
    %c0_i32 = arith.constant 0 : i32
    %c0_i32_0 = arith.constant 0 : i32
    return %arg0, %c0_i32 : i32, i32
  }
  func.func @transform_1(%arg0: i32) -> (i32, i32) {
    %c0_i32 = arith.constant 0 : i32
    %c0_i32_0 = arith.constant 0 : i32
    %c0_i32_1 = arith.constant 0 : i32
    return %c0_i32, %c0_i32_0 : i32, i32
  }
  func.func @transform_2(%arg0: i32) -> (i32, i32) {
    %c0_i32 = arith.constant 0 : i32
    %c0_i32_0 = arith.constant 0 : i32
    %c0_i32_1 = arith.constant 0 : i32
    return %c0_i32, %c0_i32_0 : i32, i32
  }
  func.func @transform_3(%arg0: i32) -> (i32, i32) {
    %c0_i32 = arith.constant 0 : i32
    %c0_i32_0 = arith.constant 0 : i32
    %c0_i32_1 = arith.constant 0 : i32
    return %c0_i32, %c0_i32_0 : i32, i32
  }
  func.func @transform_4(%arg0: i32) -> (i32, i32) {
    %c0_i32 = arith.constant 0 : i32
    %c0_i32_0 = arith.constant 0 : i32
    %c0_i32_1 = arith.constant 0 : i32
    return %c0_i32, %c0_i32_0 : i32, i32
  }
  func.func @transform_5(%arg0: i32) -> (i32, i32) {
    %c0_i32 = arith.constant 0 : i32
    %c0_i32_0 = arith.constant 0 : i32
    return %arg0, %c0_i32 : i32, i32
  }
}

module attributes {stable_mosaic.version = 11 : i64} {
  func.func @_stage_tail_kernel(%arg0: i32, %arg1: memref<1x56x64xf32, #tpu.memory_space<vmem>>, %arg2: memref<1x56x64xf32, #tpu.memory_space<vmem>>, %arg3: memref<40x1xf32, #tpu.memory_space<vmem>>, %arg4: memref<576x64xbf16, #tpu.memory_space<vmem>>, %arg5: memref<1x64xf32, #tpu.memory_space<vmem>>, %arg6: memref<1x64xf32, #tpu.memory_space<vmem>>, %arg7: memref<576x64xbf16, #tpu.memory_space<vmem>>, %arg8: memref<1x64xf32, #tpu.memory_space<vmem>>, %arg9: memref<1x64xf32, #tpu.memory_space<vmem>>, %arg10: memref<576x64xbf16, #tpu.memory_space<vmem>>, %arg11: memref<1x64xf32, #tpu.memory_space<vmem>>, %arg12: memref<1x64xf32, #tpu.memory_space<vmem>>, %arg13: memref<1x56x64xf32, #tpu.memory_space<vmem>>, %arg14: memref<56x64xf32, #tpu.memory_space<vmem>>, %arg15: memref<56x64xf32, #tpu.memory_space<vmem>>) attributes {dimension_semantics = [#tpu.dimension_semantics<parallel>], iteration_bounds = array<i64: 2>, scalar_prefetch = 0 : i64, scratch_operands = 2 : i64, tpu.core_type = #tpu.core_type<tc>, window_params = [{transform_indices = @transform_0, window_bounds = array<i64: 1, 56, 64>}, {transform_indices = @transform_1, window_bounds = array<i64: 1, 56, 64>}, {pipeline_mode = #tpu.pipeline_mode<synchronous>, transform_indices = @transform_2, window_bounds = array<i64: 40, 1>}, {pipeline_mode = #tpu.pipeline_mode<synchronous>, transform_indices = @transform_3, window_bounds = array<i64: 576, 64>}, {pipeline_mode = #tpu.pipeline_mode<synchronous>, transform_indices = @transform_4, window_bounds = array<i64: 1, 64>}, {pipeline_mode = #tpu.pipeline_mode<synchronous>, transform_indices = @transform_5, window_bounds = array<i64: 1, 64>}, {pipeline_mode = #tpu.pipeline_mode<synchronous>, transform_indices = @transform_6, window_bounds = array<i64: 576, 64>}, {pipeline_mode = #tpu.pipeline_mode<synchronous>, transform_indices = @transform_7, window_bounds = array<i64: 1, 64>}, {pipeline_mode = #tpu.pipeline_mode<synchronous>, transform_indices = @transform_8, window_bounds = array<i64: 1, 64>}, {pipeline_mode = #tpu.pipeline_mode<synchronous>, transform_indices = @transform_9, window_bounds = array<i64: 576, 64>}, {pipeline_mode = #tpu.pipeline_mode<synchronous>, transform_indices = @transform_10, window_bounds = array<i64: 1, 64>}, {pipeline_mode = #tpu.pipeline_mode<synchronous>, transform_indices = @transform_11, window_bounds = array<i64: 1, 64>}, {transform_indices = @transform_12, window_bounds = array<i64: 1, 56, 64>}]} {
    %c0 = arith.constant 0 : index
    %c0_0 = arith.constant 0 : index
    %0 = vector.load %arg3[%c0, %c0_0] : memref<40x1xf32, #tpu.memory_space<vmem>>, vector<40x1xf32>
    %cst = arith.constant 0.000000e+00 : f32
    %1 = vector.broadcast %cst : f32 to vector<8x64xf32>
    %c0_1 = arith.constant 0 : index
    %c0_2 = arith.constant 0 : index
    %2 = vector.load %arg14[%c0_1, %c0_2] : memref<56x64xf32, #tpu.memory_space<vmem>>, vector<8x64xf32>
    tpu.vector_store %arg14[%c0_1, %c0_2], %1 {strides = array<i32>} : memref<56x64xf32, #tpu.memory_space<vmem>>, vector<8x64xf32>,
    %c48 = arith.constant 48 : index
    %c0_3 = arith.constant 0 : index
    %3 = vector.load %arg14[%c48, %c0_3] : memref<56x64xf32, #tpu.memory_space<vmem>>, vector<8x64xf32>
    tpu.vector_store %arg14[%c48, %c0_3], %1 {strides = array<i32>} : memref<56x64xf32, #tpu.memory_space<vmem>>, vector<8x64xf32>,
    %c0_4 = arith.constant 0 : index
    %c0_5 = arith.constant 0 : index
    %4 = vector.load %arg15[%c0_4, %c0_5] : memref<56x64xf32, #tpu.memory_space<vmem>>, vector<8x64xf32>
    tpu.vector_store %arg15[%c0_4, %c0_5], %1 {strides = array<i32>} : memref<56x64xf32, #tpu.memory_space<vmem>>, vector<8x64xf32>,
    %c48_6 = arith.constant 48 : index
    %c0_7 = arith.constant 0 : index
    %5 = vector.load %arg15[%c48_6, %c0_7] : memref<56x64xf32, #tpu.memory_space<vmem>>, vector<8x64xf32>
    tpu.vector_store %arg15[%c48_6, %c0_7], %1 {strides = array<i32>} : memref<56x64xf32, #tpu.memory_space<vmem>>, vector<8x64xf32>,
    %cst_8 = arith.constant 0.000000e+00 : f32
    %6 = vector.broadcast %cst_8 : f32 to vector<40x64xf32>
    %c0_9 = arith.constant 0 : index
    %c1 = arith.constant 1 : index
    %c0_10 = arith.constant 0 : index
    %7 = vector.load %arg1[%c0_9, %c1, %c0_10] : memref<1x56x64xf32, #tpu.memory_space<vmem>>, vector<1x40x64xf32>
    %8 = vector.shape_cast %7 : vector<1x40x64xf32> to vector<40x64xf32>
    %9 = arith.truncf %8 : vector<40x64xf32> to vector<40x64xbf16>
    %c0_11 = arith.constant 0 : index
    %c0_12 = arith.constant 0 : index
    %10 = vector.load %arg4[%c0_11, %c0_12] : memref<576x64xbf16, #tpu.memory_space<vmem>>, vector<64x64xbf16>
    %cst_13 = arith.constant dense<0.000000e+00> : vector<40x64xf32>
    %11 = tpu.matmul %9, %10, %cst_13 {dimension_numbers = #tpu.dot_dimension_numbers<[1], [0], [0], [1], [0, 0, 1, 1], [], []>} : vector<40x64xbf16>, vector<64x64xbf16>, vector<40x64xf32> -> vector<40x64xf32>
    %12 = arith.addf %6, %11 : vector<40x64xf32>
    %c0_14 = arith.constant 0 : index
    %c2 = arith.constant 2 : index
    %c0_15 = arith.constant 0 : index
    %13 = vector.load %arg1[%c0_14, %c2, %c0_15] : memref<1x56x64xf32, #tpu.memory_space<vmem>>, vector<1x40x64xf32>
    %14 = vector.shape_cast %13 : vector<1x40x64xf32> to vector<40x64xf32>
    %15 = arith.truncf %14 : vector<40x64xf32> to vector<40x64xbf16>
    %c64 = arith.constant 64 : index
    %c0_16 = arith.constant 0 : index
    %16 = vector.load %arg4[%c64, %c0_16] : memref<576x64xbf16, #tpu.memory_space<vmem>>, vector<64x64xbf16>
    %cst_17 = arith.constant dense<0.000000e+00> : vector<40x64xf32>
    %17 = tpu.matmul %15, %16, %cst_17 {dimension_numbers = #tpu.dot_dimension_numbers<[1], [0], [0], [1], [0, 0, 1, 1], [], []>} : vector<40x64xbf16>, vector<64x64xbf16>, vector<40x64xf32> -> vector<40x64xf32>
    %18 = arith.addf %12, %17 : vector<40x64xf32>
    %c0_18 = arith.constant 0 : index
    %c3 = arith.constant 3 : index
    %c0_19 = arith.constant 0 : index
    %19 = vector.load %arg1[%c0_18, %c3, %c0_19] : memref<1x56x64xf32, #tpu.memory_space<vmem>>, vector<1x40x64xf32>
    %20 = vector.shape_cast %19 : vector<1x40x64xf32> to vector<40x64xf32>
    %21 = arith.truncf %20 : vector<40x64xf32> to vector<40x64xbf16>
    %c128 = arith.constant 128 : index
    %c0_20 = arith.constant 0 : index
    %22 = vector.load %arg4[%c128, %c0_20] : memref<576x64xbf16, #tpu.memory_space<vmem>>, vector<64x64xbf16>
    %cst_21 = arith.constant dense<0.000000e+00> : vector<40x64xf32>
    %23 = tpu.matmul %21, %22, %cst_21 {dimension_numbers = #tpu.dot_dimension_numbers<[1], [0], [0], [1], [0, 0, 1, 1], [], []>} : vector<40x64xbf16>, vector<64x64xbf16>, vector<40x64xf32> -> vector<40x64xf32>
    %24 = arith.addf %18, %23 : vector<40x64xf32>
    %c0_22 = arith.constant 0 : index
    %c7 = arith.constant 7 : index
    %c0_23 = arith.constant 0 : index
    %25 = vector.load %arg1[%c0_22, %c7, %c0_23] : memref<1x56x64xf32, #tpu.memory_space<vmem>>, vector<1x40x64xf32>
    %26 = vector.shape_cast %25 : vector<1x40x64xf32> to vector<40x64xf32>
    %27 = arith.truncf %26 : vector<40x64xf32> to vector<40x64xbf16>
    %c192 = arith.constant 192 : index
    %c0_24 = arith.constant 0 : index
    %28 = vector.load %arg4[%c192, %c0_24] : memref<576x64xbf16, #tpu.memory_space<vmem>>, vector<64x64xbf16>
    %cst_25 = arith.constant dense<0.000000e+00> : vector<40x64xf32>
    %29 = tpu.matmul %27, %28, %cst_25 {dimension_numbers = #tpu.dot_dimension_numbers<[1], [0], [0], [1], [0, 0, 1, 1], [], []>} : vector<40x64xbf16>, vector<64x64xbf16>, vector<40x64xf32> -> vector<40x64xf32>
    %30 = arith.addf %24, %29 : vector<40x64xf32>
    %c0_26 = arith.constant 0 : index
    %c8 = arith.constant 8 : index
    %c0_27 = arith.constant 0 : index
    %31 = vector.load %arg1[%c0_26, %c8, %c0_27] : memref<1x56x64xf32, #tpu.memory_space<vmem>>, vector<1x40x64xf32>
    %32 = vector.shape_cast %31 : vector<1x40x64xf32> to vector<40x64xf32>
    %33 = arith.truncf %32 : vector<40x64xf32> to vector<40x64xbf16>
    %c256 = arith.constant 256 : index
    %c0_28 = arith.constant 0 : index
    %34 = vector.load %arg4[%c256, %c0_28] : memref<576x64xbf16, #tpu.memory_space<vmem>>, vector<64x64xbf16>
    %cst_29 = arith.constant dense<0.000000e+00> : vector<40x64xf32>
    %35 = tpu.matmul %33, %34, %cst_29 {dimension_numbers = #tpu.dot_dimension_numbers<[1], [0], [0], [1], [0, 0, 1, 1], [], []>} : vector<40x64xbf16>, vector<64x64xbf16>, vector<40x64xf32> -> vector<40x64xf32>
    %36 = arith.addf %30, %35 : vector<40x64xf32>
    %c0_30 = arith.constant 0 : index
    %c9 = arith.constant 9 : index
    %c0_31 = arith.constant 0 : index
    %37 = vector.load %arg1[%c0_30, %c9, %c0_31] : memref<1x56x64xf32, #tpu.memory_space<vmem>>, vector<1x40x64xf32>
    %38 = vector.shape_cast %37 : vector<1x40x64xf32> to vector<40x64xf32>
    %39 = arith.truncf %38 : vector<40x64xf32> to vector<40x64xbf16>
    %c320 = arith.constant 320 : index
    %c0_32 = arith.constant 0 : index
    %40 = vector.load %arg4[%c320, %c0_32] : memref<576x64xbf16, #tpu.memory_space<vmem>>, vector<64x64xbf16>
    %cst_33 = arith.constant dense<0.000000e+00> : vector<40x64xf32>
    %41 = tpu.matmul %39, %40, %cst_33 {dimension_numbers = #tpu.dot_dimension_numbers<[1], [0], [0], [1], [0, 0, 1, 1], [], []>} : vector<40x64xbf16>, vector<64x64xbf16>, vector<40x64xf32> -> vector<40x64xf32>
    %42 = arith.addf %36, %41 : vector<40x64xf32>
    %c0_34 = arith.constant 0 : index
    %c13 = arith.constant 13 : index
    %c0_35 = arith.constant 0 : index
    %43 = vector.load %arg1[%c0_34, %c13, %c0_35] : memref<1x56x64xf32, #tpu.memory_space<vmem>>, vector<1x40x64xf32>
    %44 = vector.shape_cast %43 : vector<1x40x64xf32> to vector<40x64xf32>
    %45 = arith.truncf %44 : vector<40x64xf32> to vector<40x64xbf16>
    %c384 = arith.constant 384 : index
    %c0_36 = arith.constant 0 : index
    %46 = vector.load %arg4[%c384, %c0_36] : memref<576x64xbf16, #tpu.memory_space<vmem>>, vector<64x64xbf16>
    %cst_37 = arith.constant dense<0.000000e+00> : vector<40x64xf32>
    %47 = tpu.matmul %45, %46, %cst_37 {dimension_numbers = #tpu.dot_dimension_numbers<[1], [0], [0], [1], [0, 0, 1, 1], [], []>} : vector<40x64xbf16>, vector<64x64xbf16>, vector<40x64xf32> -> vector<40x64xf32>
    %48 = arith.addf %42, %47 : vector<40x64xf32>
    %c0_38 = arith.constant 0 : index
    %c14 = arith.constant 14 : index
    %c0_39 = arith.constant 0 : index
    %49 = vector.load %arg1[%c0_38, %c14, %c0_39] : memref<1x56x64xf32, #tpu.memory_space<vmem>>, vector<1x40x64xf32>
    %50 = vector.shape_cast %49 : vector<1x40x64xf32> to vector<40x64xf32>
    %51 = arith.truncf %50 : vector<40x64xf32> to vector<40x64xbf16>
    %c448 = arith.constant 448 : index
    %c0_40 = arith.constant 0 : index
    %52 = vector.load %arg4[%c448, %c0_40] : memref<576x64xbf16, #tpu.memory_space<vmem>>, vector<64x64xbf16>
    %cst_41 = arith.constant dense<0.000000e+00> : vector<40x64xf32>
    %53 = tpu.matmul %51, %52, %cst_41 {dimension_numbers = #tpu.dot_dimension_numbers<[1], [0], [0], [1], [0, 0, 1, 1], [], []>} : vector<40x64xbf16>, vector<64x64xbf16>, vector<40x64xf32> -> vector<40x64xf32>
    %54 = arith.addf %48, %53 : vector<40x64xf32>
    %c0_42 = arith.constant 0 : index
    %c15 = arith.constant 15 : index
    %c0_43 = arith.constant 0 : index
    %55 = vector.load %arg1[%c0_42, %c15, %c0_43] : memref<1x56x64xf32, #tpu.memory_space<vmem>>, vector<1x40x64xf32>
    %56 = vector.shape_cast %55 : vector<1x40x64xf32> to vector<40x64xf32>
    %57 = arith.truncf %56 : vector<40x64xf32> to vector<40x64xbf16>
    %c512 = arith.constant 512 : index
    %c0_44 = arith.constant 0 : index
    %58 = vector.load %arg4[%c512, %c0_44] : memref<576x64xbf16, #tpu.memory_space<vmem>>, vector<64x64xbf16>
    %cst_45 = arith.constant dense<0.000000e+00> : vector<40x64xf32>
    %59 = tpu.matmul %57, %58, %cst_45 {dimension_numbers = #tpu.dot_dimension_numbers<[1], [0], [0], [1], [0, 0, 1, 1], [], []>} : vector<40x64xbf16>, vector<64x64xbf16>, vector<40x64xf32> -> vector<40x64xf32>
    %60 = arith.addf %54, %59 : vector<40x64xf32>
    %c0_46 = arith.constant 0 : index
    %c0_47 = arith.constant 0 : index
    %61 = vector.load %arg5[%c0_46, %c0_47] : memref<1x64xf32, #tpu.memory_space<vmem>>, vector<1x64xf32>
    %62 = vector.broadcast %61 : vector<1x64xf32> to vector<40x64xf32>
    %63 = arith.mulf %60, %62 : vector<40x64xf32>
    %c0_48 = arith.constant 0 : index
    %c0_49 = arith.constant 0 : index
    %64 = vector.load %arg6[%c0_48, %c0_49] : memref<1x64xf32, #tpu.memory_space<vmem>>, vector<1x64xf32>
    %65 = vector.broadcast %64 : vector<1x64xf32> to vector<40x64xf32>
    %66 = arith.addf %63, %65 : vector<40x64xf32>
    %c0_50 = arith.constant 0 : index
    %c8_51 = arith.constant 8 : index
    %c0_52 = arith.constant 0 : index
    %67 = vector.load %arg2[%c0_50, %c8_51, %c0_52] : memref<1x56x64xf32, #tpu.memory_space<vmem>>, vector<1x40x64xf32>
    %68 = vector.shape_cast %67 : vector<1x40x64xf32> to vector<40x64xf32>
    %69 = arith.addf %66, %68 : vector<40x64xf32>
    %cst_53 = arith.constant 0.000000e+00 : f32
    %70 = vector.broadcast %cst_53 : f32 to vector<40x64xf32>
    %71 = arith.maximumf %69, %70 : vector<40x64xf32>
    %72 = vector.broadcast %0 : vector<40x1xf32> to vector<40x64xf32>
    %73 = arith.mulf %71, %72 : vector<40x64xf32>
    %c8_54 = arith.constant 8 : index
    %c0_55 = arith.constant 0 : index
    %74 = vector.load %arg14[%c8_54, %c0_55] : memref<56x64xf32, #tpu.memory_space<vmem>>, vector<40x64xf32>
    tpu.vector_store %arg14[%c8_54, %c0_55], %73 {strides = array<i32>} : memref<56x64xf32, #tpu.memory_space<vmem>>, vector<40x64xf32>,
    %cst_56 = arith.constant 0.000000e+00 : f32
    %75 = vector.broadcast %cst_56 : f32 to vector<40x64xf32>
    %c1_57 = arith.constant 1 : index
    %c0_58 = arith.constant 0 : index
    %76 = vector.load %arg14[%c1_57, %c0_58] : memref<56x64xf32, #tpu.memory_space<vmem>>, vector<40x64xf32>
    %77 = arith.truncf %76 : vector<40x64xf32> to vector<40x64xbf16>
    %c0_59 = arith.constant 0 : index
    %c0_60 = arith.constant 0 : index
    %78 = vector.load %arg7[%c0_59, %c0_60] : memref<576x64xbf16, #tpu.memory_space<vmem>>, vector<64x64xbf16>
    %cst_61 = arith.constant dense<0.000000e+00> : vector<40x64xf32>
    %79 = tpu.matmul %77, %78, %cst_61 {dimension_numbers = #tpu.dot_dimension_numbers<[1], [0], [0], [1], [0, 0, 1, 1], [], []>} : vector<40x64xbf16>, vector<64x64xbf16>, vector<40x64xf32> -> vector<40x64xf32>
    %80 = arith.addf %75, %79 : vector<40x64xf32>
    %c2_62 = arith.constant 2 : index
    %c0_63 = arith.constant 0 : index
    %81 = vector.load %arg14[%c2_62, %c0_63] : memref<56x64xf32, #tpu.memory_space<vmem>>, vector<40x64xf32>
    %82 = arith.truncf %81 : vector<40x64xf32> to vector<40x64xbf16>
    %c64_64 = arith.constant 64 : index
    %c0_65 = arith.constant 0 : index
    %83 = vector.load %arg7[%c64_64, %c0_65] : memref<576x64xbf16, #tpu.memory_space<vmem>>, vector<64x64xbf16>
    %cst_66 = arith.constant dense<0.000000e+00> : vector<40x64xf32>
    %84 = tpu.matmul %82, %83, %cst_66 {dimension_numbers = #tpu.dot_dimension_numbers<[1], [0], [0], [1], [0, 0, 1, 1], [], []>} : vector<40x64xbf16>, vector<64x64xbf16>, vector<40x64xf32> -> vector<40x64xf32>
    %85 = arith.addf %80, %84 : vector<40x64xf32>
    %c3_67 = arith.constant 3 : index
    %c0_68 = arith.constant 0 : index
    %86 = vector.load %arg14[%c3_67, %c0_68] : memref<56x64xf32, #tpu.memory_space<vmem>>, vector<40x64xf32>
    %87 = arith.truncf %86 : vector<40x64xf32> to vector<40x64xbf16>
    %c128_69 = arith.constant 128 : index
    %c0_70 = arith.constant 0 : index
    %88 = vector.load %arg7[%c128_69, %c0_70] : memref<576x64xbf16, #tpu.memory_space<vmem>>, vector<64x64xbf16>
    %cst_71 = arith.constant dense<0.000000e+00> : vector<40x64xf32>
    %89 = tpu.matmul %87, %88, %cst_71 {dimension_numbers = #tpu.dot_dimension_numbers<[1], [0], [0], [1], [0, 0, 1, 1], [], []>} : vector<40x64xbf16>, vector<64x64xbf16>, vector<40x64xf32> -> vector<40x64xf32>
    %90 = arith.addf %85, %89 : vector<40x64xf32>
    %c7_72 = arith.constant 7 : index
    %c0_73 = arith.constant 0 : index
    %91 = vector.load %arg14[%c7_72, %c0_73] : memref<56x64xf32, #tpu.memory_space<vmem>>, vector<40x64xf32>
    %92 = arith.truncf %91 : vector<40x64xf32> to vector<40x64xbf16>
    %c192_74 = arith.constant 192 : index
    %c0_75 = arith.constant 0 : index
    %93 = vector.load %arg7[%c192_74, %c0_75] : memref<576x64xbf16, #tpu.memory_space<vmem>>, vector<64x64xbf16>
    %cst_76 = arith.constant dense<0.000000e+00> : vector<40x64xf32>
    %94 = tpu.matmul %92, %93, %cst_76 {dimension_numbers = #tpu.dot_dimension_numbers<[1], [0], [0], [1], [0, 0, 1, 1], [], []>} : vector<40x64xbf16>, vector<64x64xbf16>, vector<40x64xf32> -> vector<40x64xf32>
    %95 = arith.addf %90, %94 : vector<40x64xf32>
    %c8_77 = arith.constant 8 : index
    %c0_78 = arith.constant 0 : index
    %96 = vector.load %arg14[%c8_77, %c0_78] : memref<56x64xf32, #tpu.memory_space<vmem>>, vector<40x64xf32>
    %97 = arith.truncf %96 : vector<40x64xf32> to vector<40x64xbf16>
    %c256_79 = arith.constant 256 : index
    %c0_80 = arith.constant 0 : index
    %98 = vector.load %arg7[%c256_79, %c0_80] : memref<576x64xbf16, #tpu.memory_space<vmem>>, vector<64x64xbf16>
    %cst_81 = arith.constant dense<0.000000e+00> : vector<40x64xf32>
    %99 = tpu.matmul %97, %98, %cst_81 {dimension_numbers = #tpu.dot_dimension_numbers<[1], [0], [0], [1], [0, 0, 1, 1], [], []>} : vector<40x64xbf16>, vector<64x64xbf16>, vector<40x64xf32> -> vector<40x64xf32>
    %100 = arith.addf %95, %99 : vector<40x64xf32>
    %c9_82 = arith.constant 9 : index
    %c0_83 = arith.constant 0 : index
    %101 = vector.load %arg14[%c9_82, %c0_83] : memref<56x64xf32, #tpu.memory_space<vmem>>, vector<40x64xf32>
    %102 = arith.truncf %101 : vector<40x64xf32> to vector<40x64xbf16>
    %c320_84 = arith.constant 320 : index
    %c0_85 = arith.constant 0 : index
    %103 = vector.load %arg7[%c320_84, %c0_85] : memref<576x64xbf16, #tpu.memory_space<vmem>>, vector<64x64xbf16>
    %cst_86 = arith.constant dense<0.000000e+00> : vector<40x64xf32>
    %104 = tpu.matmul %102, %103, %cst_86 {dimension_numbers = #tpu.dot_dimension_numbers<[1], [0], [0], [1], [0, 0, 1, 1], [], []>} : vector<40x64xbf16>, vector<64x64xbf16>, vector<40x64xf32> -> vector<40x64xf32>
    %105 = arith.addf %100, %104 : vector<40x64xf32>
    %c13_87 = arith.constant 13 : index
    %c0_88 = arith.constant 0 : index
    %106 = vector.load %arg14[%c13_87, %c0_88] : memref<56x64xf32, #tpu.memory_space<vmem>>, vector<40x64xf32>
    %107 = arith.truncf %106 : vector<40x64xf32> to vector<40x64xbf16>
    %c384_89 = arith.constant 384 : index
    %c0_90 = arith.constant 0 : index
    %108 = vector.load %arg7[%c384_89, %c0_90] : memref<576x64xbf16, #tpu.memory_space<vmem>>, vector<64x64xbf16>
    %cst_91 = arith.constant dense<0.000000e+00> : vector<40x64xf32>
    %109 = tpu.matmul %107, %108, %cst_91 {dimension_numbers = #tpu.dot_dimension_numbers<[1], [0], [0], [1], [0, 0, 1, 1], [], []>} : vector<40x64xbf16>, vector<64x64xbf16>, vector<40x64xf32> -> vector<40x64xf32>
    %110 = arith.addf %105, %109 : vector<40x64xf32>
    %c14_92 = arith.constant 14 : index
    %c0_93 = arith.constant 0 : index
    %111 = vector.load %arg14[%c14_92, %c0_93] : memref<56x64xf32, #tpu.memory_space<vmem>>, vector<40x64xf32>
    %112 = arith.truncf %111 : vector<40x64xf32> to vector<40x64xbf16>
    %c448_94 = arith.constant 448 : index
    %c0_95 = arith.constant 0 : index
    %113 = vector.load %arg7[%c448_94, %c0_95] : memref<576x64xbf16, #tpu.memory_space<vmem>>, vector<64x64xbf16>
    %cst_96 = arith.constant dense<0.000000e+00> : vector<40x64xf32>
    %114 = tpu.matmul %112, %113, %cst_96 {dimension_numbers = #tpu.dot_dimension_numbers<[1], [0], [0], [1], [0, 0, 1, 1], [], []>} : vector<40x64xbf16>, vector<64x64xbf16>, vector<40x64xf32> -> vector<40x64xf32>
    %115 = arith.addf %110, %114 : vector<40x64xf32>
    %c15_97 = arith.constant 15 : index
    %c0_98 = arith.constant 0 : index
    %116 = vector.load %arg14[%c15_97, %c0_98] : memref<56x64xf32, #tpu.memory_space<vmem>>, vector<40x64xf32>
    %117 = arith.truncf %116 : vector<40x64xf32> to vector<40x64xbf16>
    %c512_99 = arith.constant 512 : index
    %c0_100 = arith.constant 0 : index
    %118 = vector.load %arg7[%c512_99, %c0_100] : memref<576x64xbf16, #tpu.memory_space<vmem>>, vector<64x64xbf16>
    %cst_101 = arith.constant dense<0.000000e+00> : vector<40x64xf32>
    %119 = tpu.matmul %117, %118, %cst_101 {dimension_numbers = #tpu.dot_dimension_numbers<[1], [0], [0], [1], [0, 0, 1, 1], [], []>} : vector<40x64xbf16>, vector<64x64xbf16>, vector<40x64xf32> -> vector<40x64xf32>
    %120 = arith.addf %115, %119 : vector<40x64xf32>
    %c0_102 = arith.constant 0 : index
    %c0_103 = arith.constant 0 : index
    %121 = vector.load %arg8[%c0_102, %c0_103] : memref<1x64xf32, #tpu.memory_space<vmem>>, vector<1x64xf32>
    %122 = vector.broadcast %121 : vector<1x64xf32> to vector<40x64xf32>
    %123 = arith.mulf %120, %122 : vector<40x64xf32>
    %c0_104 = arith.constant 0 : index
    %c0_105 = arith.constant 0 : index
    %124 = vector.load %arg9[%c0_104, %c0_105] : memref<1x64xf32, #tpu.memory_space<vmem>>, vector<1x64xf32>
    %125 = vector.broadcast %124 : vector<1x64xf32> to vector<40x64xf32>
    %126 = arith.addf %123, %125 : vector<40x64xf32>
    %cst_106 = arith.constant 0.000000e+00 : f32
    %127 = vector.broadcast %cst_106 : f32 to vector<40x64xf32>
    %128 = arith.maximumf %126, %127 : vector<40x64xf32>
    %129 = vector.broadcast %0 : vector<40x1xf32> to vector<40x64xf32>
    %130 = arith.mulf %128, %129 : vector<40x64xf32>
    %c8_107 = arith.constant 8 : index
    %c0_108 = arith.constant 0 : index
    %131 = vector.load %arg15[%c8_107, %c0_108] : memref<56x64xf32, #tpu.memory_space<vmem>>, vector<40x64xf32>
    tpu.vector_store %arg15[%c8_107, %c0_108], %130 {strides = array<i32>} : memref<56x64xf32, #tpu.memory_space<vmem>>, vector<40x64xf32>,
    %cst_109 = arith.constant 0.000000e+00 : f32
    %132 = vector.broadcast %cst_109 : f32 to vector<40x64xf32>
    %c1_110 = arith.constant 1 : index
    %c0_111 = arith.constant 0 : index
    %133 = vector.load %arg15[%c1_110, %c0_111] : memref<56x64xf32, #tpu.memory_space<vmem>>, vector<40x64xf32>
    %134 = arith.truncf %133 : vector<40x64xf32> to vector<40x64xbf16>
    %c0_112 = arith.constant 0 : index
    %c0_113 = arith.constant 0 : index
    %135 = vector.load %arg10[%c0_112, %c0_113] : memref<576x64xbf16, #tpu.memory_space<vmem>>, vector<64x64xbf16>
    %cst_114 = arith.constant dense<0.000000e+00> : vector<40x64xf32>
    %136 = tpu.matmul %134, %135, %cst_114 {dimension_numbers = #tpu.dot_dimension_numbers<[1], [0], [0], [1], [0, 0, 1, 1], [], []>} : vector<40x64xbf16>, vector<64x64xbf16>, vector<40x64xf32> -> vector<40x64xf32>
    %137 = arith.addf %132, %136 : vector<40x64xf32>
    %c2_115 = arith.constant 2 : index
    %c0_116 = arith.constant 0 : index
    %138 = vector.load %arg15[%c2_115, %c0_116] : memref<56x64xf32, #tpu.memory_space<vmem>>, vector<40x64xf32>
    %139 = arith.truncf %138 : vector<40x64xf32> to vector<40x64xbf16>
    %c64_117 = arith.constant 64 : index
    %c0_118 = arith.constant 0 : index
    %140 = vector.load %arg10[%c64_117, %c0_118] : memref<576x64xbf16, #tpu.memory_space<vmem>>, vector<64x64xbf16>
    %cst_119 = arith.constant dense<0.000000e+00> : vector<40x64xf32>
    %141 = tpu.matmul %139, %140, %cst_119 {dimension_numbers = #tpu.dot_dimension_numbers<[1], [0], [0], [1], [0, 0, 1, 1], [], []>} : vector<40x64xbf16>, vector<64x64xbf16>, vector<40x64xf32> -> vector<40x64xf32>
    %142 = arith.addf %137, %141 : vector<40x64xf32>
    %c3_120 = arith.constant 3 : index
    %c0_121 = arith.constant 0 : index
    %143 = vector.load %arg15[%c3_120, %c0_121] : memref<56x64xf32, #tpu.memory_space<vmem>>, vector<40x64xf32>
    %144 = arith.truncf %143 : vector<40x64xf32> to vector<40x64xbf16>
    %c128_122 = arith.constant 128 : index
    %c0_123 = arith.constant 0 : index
    %145 = vector.load %arg10[%c128_122, %c0_123] : memref<576x64xbf16, #tpu.memory_space<vmem>>, vector<64x64xbf16>
    %cst_124 = arith.constant dense<0.000000e+00> : vector<40x64xf32>
    %146 = tpu.matmul %144, %145, %cst_124 {dimension_numbers = #tpu.dot_dimension_numbers<[1], [0], [0], [1], [0, 0, 1, 1], [], []>} : vector<40x64xbf16>, vector<64x64xbf16>, vector<40x64xf32> -> vector<40x64xf32>
    %147 = arith.addf %142, %146 : vector<40x64xf32>
    %c7_125 = arith.constant 7 : index
    %c0_126 = arith.constant 0 : index
    %148 = vector.load %arg15[%c7_125, %c0_126] : memref<56x64xf32, #tpu.memory_space<vmem>>, vector<40x64xf32>
    %149 = arith.truncf %148 : vector<40x64xf32> to vector<40x64xbf16>
    %c192_127 = arith.constant 192 : index
    %c0_128 = arith.constant 0 : index
    %150 = vector.load %arg10[%c192_127, %c0_128] : memref<576x64xbf16, #tpu.memory_space<vmem>>, vector<64x64xbf16>
    %cst_129 = arith.constant dense<0.000000e+00> : vector<40x64xf32>
    %151 = tpu.matmul %149, %150, %cst_129 {dimension_numbers = #tpu.dot_dimension_numbers<[1], [0], [0], [1], [0, 0, 1, 1], [], []>} : vector<40x64xbf16>, vector<64x64xbf16>, vector<40x64xf32> -> vector<40x64xf32>
    %152 = arith.addf %147, %151 : vector<40x64xf32>
    %c8_130 = arith.constant 8 : index
    %c0_131 = arith.constant 0 : index
    %153 = vector.load %arg15[%c8_130, %c0_131] : memref<56x64xf32, #tpu.memory_space<vmem>>, vector<40x64xf32>
    %154 = arith.truncf %153 : vector<40x64xf32> to vector<40x64xbf16>
    %c256_132 = arith.constant 256 : index
    %c0_133 = arith.constant 0 : index
    %155 = vector.load %arg10[%c256_132, %c0_133] : memref<576x64xbf16, #tpu.memory_space<vmem>>, vector<64x64xbf16>
    %cst_134 = arith.constant dense<0.000000e+00> : vector<40x64xf32>
    %156 = tpu.matmul %154, %155, %cst_134 {dimension_numbers = #tpu.dot_dimension_numbers<[1], [0], [0], [1], [0, 0, 1, 1], [], []>} : vector<40x64xbf16>, vector<64x64xbf16>, vector<40x64xf32> -> vector<40x64xf32>
    %157 = arith.addf %152, %156 : vector<40x64xf32>
    %c9_135 = arith.constant 9 : index
    %c0_136 = arith.constant 0 : index
    %158 = vector.load %arg15[%c9_135, %c0_136] : memref<56x64xf32, #tpu.memory_space<vmem>>, vector<40x64xf32>
    %159 = arith.truncf %158 : vector<40x64xf32> to vector<40x64xbf16>
    %c320_137 = arith.constant 320 : index
    %c0_138 = arith.constant 0 : index
    %160 = vector.load %arg10[%c320_137, %c0_138] : memref<576x64xbf16, #tpu.memory_space<vmem>>, vector<64x64xbf16>
    %cst_139 = arith.constant dense<0.000000e+00> : vector<40x64xf32>
    %161 = tpu.matmul %159, %160, %cst_139 {dimension_numbers = #tpu.dot_dimension_numbers<[1], [0], [0], [1], [0, 0, 1, 1], [], []>} : vector<40x64xbf16>, vector<64x64xbf16>, vector<40x64xf32> -> vector<40x64xf32>
    %162 = arith.addf %157, %161 : vector<40x64xf32>
    %c13_140 = arith.constant 13 : index
    %c0_141 = arith.constant 0 : index
    %163 = vector.load %arg15[%c13_140, %c0_141] : memref<56x64xf32, #tpu.memory_space<vmem>>, vector<40x64xf32>
    %164 = arith.truncf %163 : vector<40x64xf32> to vector<40x64xbf16>
    %c384_142 = arith.constant 384 : index
    %c0_143 = arith.constant 0 : index
    %165 = vector.load %arg10[%c384_142, %c0_143] : memref<576x64xbf16, #tpu.memory_space<vmem>>, vector<64x64xbf16>
    %cst_144 = arith.constant dense<0.000000e+00> : vector<40x64xf32>
    %166 = tpu.matmul %164, %165, %cst_144 {dimension_numbers = #tpu.dot_dimension_numbers<[1], [0], [0], [1], [0, 0, 1, 1], [], []>} : vector<40x64xbf16>, vector<64x64xbf16>, vector<40x64xf32> -> vector<40x64xf32>
    %167 = arith.addf %162, %166 : vector<40x64xf32>
    %c14_145 = arith.constant 14 : index
    %c0_146 = arith.constant 0 : index
    %168 = vector.load %arg15[%c14_145, %c0_146] : memref<56x64xf32, #tpu.memory_space<vmem>>, vector<40x64xf32>
    %169 = arith.truncf %168 : vector<40x64xf32> to vector<40x64xbf16>
    %c448_147 = arith.constant 448 : index
    %c0_148 = arith.constant 0 : index
    %170 = vector.load %arg10[%c448_147, %c0_148] : memref<576x64xbf16, #tpu.memory_space<vmem>>, vector<64x64xbf16>
    %cst_149 = arith.constant dense<0.000000e+00> : vector<40x64xf32>
    %171 = tpu.matmul %169, %170, %cst_149 {dimension_numbers = #tpu.dot_dimension_numbers<[1], [0], [0], [1], [0, 0, 1, 1], [], []>} : vector<40x64xbf16>, vector<64x64xbf16>, vector<40x64xf32> -> vector<40x64xf32>
    %172 = arith.addf %167, %171 : vector<40x64xf32>
    %c15_150 = arith.constant 15 : index
    %c0_151 = arith.constant 0 : index
    %173 = vector.load %arg15[%c15_150, %c0_151] : memref<56x64xf32, #tpu.memory_space<vmem>>, vector<40x64xf32>
    %174 = arith.truncf %173 : vector<40x64xf32> to vector<40x64xbf16>
    %c512_152 = arith.constant 512 : index
    %c0_153 = arith.constant 0 : index
    %175 = vector.load %arg10[%c512_152, %c0_153] : memref<576x64xbf16, #tpu.memory_space<vmem>>, vector<64x64xbf16>
    %cst_154 = arith.constant dense<0.000000e+00> : vector<40x64xf32>
    %176 = tpu.matmul %174, %175, %cst_154 {dimension_numbers = #tpu.dot_dimension_numbers<[1], [0], [0], [1], [0, 0, 1, 1], [], []>} : vector<40x64xbf16>, vector<64x64xbf16>, vector<40x64xf32> -> vector<40x64xf32>
    %177 = arith.addf %172, %176 : vector<40x64xf32>
    %c0_155 = arith.constant 0 : index
    %c0_156 = arith.constant 0 : index
    %178 = vector.load %arg11[%c0_155, %c0_156] : memref<1x64xf32, #tpu.memory_space<vmem>>, vector<1x64xf32>
    %179 = vector.broadcast %178 : vector<1x64xf32> to vector<40x64xf32>
    %180 = arith.mulf %177, %179 : vector<40x64xf32>
    %c0_157 = arith.constant 0 : index
    %c0_158 = arith.constant 0 : index
    %181 = vector.load %arg12[%c0_157, %c0_158] : memref<1x64xf32, #tpu.memory_space<vmem>>, vector<1x64xf32>
    %182 = vector.broadcast %181 : vector<1x64xf32> to vector<40x64xf32>
    %183 = arith.addf %180, %182 : vector<40x64xf32>
    %184 = arith.addf %183, %73 : vector<40x64xf32>
    %cst_159 = arith.constant 0.000000e+00 : f32
    %185 = vector.broadcast %cst_159 : f32 to vector<40x64xf32>
    %186 = arith.maximumf %184, %185 : vector<40x64xf32>
    %187 = vector.broadcast %0 : vector<40x1xf32> to vector<40x64xf32>
    %188 = arith.mulf %186, %187 : vector<40x64xf32>
    %c0_160 = arith.constant 0 : index
    %c0_161 = arith.constant 0 : index
    %c0_162 = arith.constant 0 : index
    %189 = vector.load %arg13[%c0_160, %c0_161, %c0_162] : memref<1x56x64xf32, #tpu.memory_space<vmem>>, vector<1x8x64xf32>
    %190 = vector.shape_cast %189 : vector<1x8x64xf32> to vector<8x64xf32>
    %191 = vector.shape_cast %1 : vector<8x64xf32> to vector<1x8x64xf32>
    tpu.vector_store %arg13[%c0_160, %c0_161, %c0_162], %191 {strides = array<i32>} : memref<1x56x64xf32, #tpu.memory_space<vmem>>, vector<1x8x64xf32>,
    %c0_163 = arith.constant 0 : index
    %c8_164 = arith.constant 8 : index
    %c0_165 = arith.constant 0 : index
    %192 = vector.load %arg13[%c0_163, %c8_164, %c0_165] : memref<1x56x64xf32, #tpu.memory_space<vmem>>, vector<1x40x64xf32>
    %193 = vector.shape_cast %192 : vector<1x40x64xf32> to vector<40x64xf32>
    %194 = vector.shape_cast %188 : vector<40x64xf32> to vector<1x40x64xf32>
    tpu.vector_store %arg13[%c0_163, %c8_164, %c0_165], %194 {strides = array<i32>} : memref<1x56x64xf32, #tpu.memory_space<vmem>>, vector<1x40x64xf32>,
    %c0_166 = arith.constant 0 : index
    %c48_167 = arith.constant 48 : index
    %c0_168 = arith.constant 0 : index
    %195 = vector.load %arg13[%c0_166, %c48_167, %c0_168] : memref<1x56x64xf32, #tpu.memory_space<vmem>>, vector<1x8x64xf32>
    %196 = vector.shape_cast %195 : vector<1x8x64xf32> to vector<8x64xf32>
    %197 = vector.shape_cast %1 : vector<8x64xf32> to vector<1x8x64xf32>
    tpu.vector_store %arg13[%c0_166, %c48_167, %c0_168], %197 {strides = array<i32>} : memref<1x56x64xf32, #tpu.memory_space<vmem>>, vector<1x8x64xf32>,
    return
  }
  func.func @transform_0(%arg0: i32) -> (i32, i32, i32) {
    %c0_i32 = arith.constant 0 : i32
    %c0_i32_0 = arith.constant 0 : i32
    %c0_i32_1 = arith.constant 0 : i32
    return %arg0, %c0_i32, %c0_i32_0 : i32, i32, i32
  }
  func.func @transform_1(%arg0: i32) -> (i32, i32, i32) {
    %c0_i32 = arith.constant 0 : i32
    %c0_i32_0 = arith.constant 0 : i32
    %c0_i32_1 = arith.constant 0 : i32
    return %arg0, %c0_i32, %c0_i32_0 : i32, i32, i32
  }
  func.func @transform_2(%arg0: i32) -> (i32, i32) {
    %c0_i32 = arith.constant 0 : i32
    %c0_i32_0 = arith.constant 0 : i32
    %c0_i32_1 = arith.constant 0 : i32
    return %c0_i32, %c0_i32_0 : i32, i32
  }
  func.func @transform_3(%arg0: i32) -> (i32, i32) {
    %c0_i32 = arith.constant 0 : i32
    %c0_i32_0 = arith.constant 0 : i32
    %c0_i32_1 = arith.constant 0 : i32
    return %c0_i32, %c0_i32_0 : i32, i32
  }
  func.func @transform_4(%arg0: i32) -> (i32, i32) {
    %c0_i32 = arith.constant 0 : i32
    %c0_i32_0 = arith.constant 0 : i32
    %c0_i32_1 = arith.constant 0 : i32
    return %c0_i32, %c0_i32_0 : i32, i32
  }
  func.func @transform_5(%arg0: i32) -> (i32, i32) {
    %c0_i32 = arith.constant 0 : i32
    %c0_i32_0 = arith.constant 0 : i32
    %c0_i32_1 = arith.constant 0 : i32
    return %c0_i32, %c0_i32_0 : i32, i32
  }
  func.func @transform_6(%arg0: i32) -> (i32, i32) {
    %c0_i32 = arith.constant 0 : i32
    %c0_i32_0 = arith.constant 0 : i32
    %c0_i32_1 = arith.constant 0 : i32
    return %c0_i32, %c0_i32_0 : i32, i32
  }
  func.func @transform_7(%arg0: i32) -> (i32, i32) {
    %c0_i32 = arith.constant 0 : i32
    %c0_i32_0 = arith.constant 0 : i32
    %c0_i32_1 = arith.constant 0 : i32
    return %c0_i32, %c0_i32_0 : i32, i32
  }
  func.func @transform_8(%arg0: i32) -> (i32, i32) {
    %c0_i32 = arith.constant 0 : i32
    %c0_i32_0 = arith.constant 0 : i32
    %c0_i32_1 = arith.constant 0 : i32
    return %c0_i32, %c0_i32_0 : i32, i32
  }
  func.func @transform_9(%arg0: i32) -> (i32, i32) {
    %c0_i32 = arith.constant 0 : i32
    %c0_i32_0 = arith.constant 0 : i32
    %c0_i32_1 = arith.constant 0 : i32
    return %c0_i32, %c0_i32_0 : i32, i32
  }
  func.func @transform_10(%arg0: i32) -> (i32, i32) {
    %c0_i32 = arith.constant 0 : i32
    %c0_i32_0 = arith.constant 0 : i32
    %c0_i32_1 = arith.constant 0 : i32
    return %c0_i32, %c0_i32_0 : i32, i32
  }
  func.func @transform_11(%arg0: i32) -> (i32, i32) {
    %c0_i32 = arith.constant 0 : i32
    %c0_i32_0 = arith.constant 0 : i32
    %c0_i32_1 = arith.constant 0 : i32
    return %c0_i32, %c0_i32_0 : i32, i32
  }
  func.func @transform_12(%arg0: i32) -> (i32, i32, i32) {
    %c0_i32 = arith.constant 0 : i32
    %c0_i32_0 = arith.constant 0 : i32
    %c0_i32_1 = arith.constant 0 : i32
    return %arg0, %c0_i32, %c0_i32_0 : i32, i32, i32
  }
}

module attributes {stable_mosaic.version = 11 : i64} {
  func.func @_transition_kernel(%arg0: i32, %arg1: memref<8x576xbf16, #tpu.memory_space<vmem>>, %arg2: memref<576x256xbf16, #tpu.memory_space<vmem>>, %arg3: memref<1x256xf32, #tpu.memory_space<vmem>>, %arg4: memref<1x256xf32, #tpu.memory_space<vmem>>, %arg5: memref<1x256xf32, #tpu.memory_space<vmem>>, %arg6: memref<8x256xf32, #tpu.memory_space<vmem>>) attributes {dimension_semantics = [#tpu.dimension_semantics<parallel>], iteration_bounds = array<i64: 1>, scalar_prefetch = 0 : i64, scratch_operands = 0 : i64, tpu.core_type = #tpu.core_type<tc>, window_params = [{transform_indices = @transform_0, window_bounds = array<i64: 8, 576>}, {pipeline_mode = #tpu.pipeline_mode<synchronous>, transform_indices = @transform_1, window_bounds = array<i64: 576, 256>}, {pipeline_mode = #tpu.pipeline_mode<synchronous>, transform_indices = @transform_2, window_bounds = array<i64: 1, 256>}, {pipeline_mode = #tpu.pipeline_mode<synchronous>, transform_indices = @transform_3, window_bounds = array<i64: 1, 256>}, {pipeline_mode = #tpu.pipeline_mode<synchronous>, transform_indices = @transform_4, window_bounds = array<i64: 1, 256>}, {transform_indices = @transform_5, window_bounds = array<i64: 8, 256>}]} {
    %c0 = arith.constant 0 : index
    %c0_0 = arith.constant 0 : index
    %0 = vector.load %arg1[%c0, %c0_0] : memref<8x576xbf16, #tpu.memory_space<vmem>>, vector<8x576xbf16>
    %c0_1 = arith.constant 0 : index
    %c0_2 = arith.constant 0 : index
    %1 = vector.load %arg2[%c0_1, %c0_2] : memref<576x256xbf16, #tpu.memory_space<vmem>>, vector<576x256xbf16>
    %cst = arith.constant dense<0.000000e+00> : vector<8x256xf32>
    %2 = tpu.matmul %0, %1, %cst {dimension_numbers = #tpu.dot_dimension_numbers<[1], [0], [0], [1], [0, 0, 1, 1], [], []>} : vector<8x576xbf16>, vector<576x256xbf16>, vector<8x256xf32> -> vector<8x256xf32>
    %c0_3 = arith.constant 0 : index
    %c0_4 = arith.constant 0 : index
    %3 = vector.load %arg3[%c0_3, %c0_4] : memref<1x256xf32, #tpu.memory_space<vmem>>, vector<1x256xf32>
    %4 = vector.broadcast %3 : vector<1x256xf32> to vector<8x256xf32>
    %5 = arith.mulf %2, %4 : vector<8x256xf32>
    %c0_5 = arith.constant 0 : index
    %c0_6 = arith.constant 0 : index
    %6 = vector.load %arg4[%c0_5, %c0_6] : memref<1x256xf32, #tpu.memory_space<vmem>>, vector<1x256xf32>
    %7 = vector.broadcast %6 : vector<1x256xf32> to vector<8x256xf32>
    %8 = arith.addf %5, %7 : vector<8x256xf32>
    %c0_7 = arith.constant 0 : index
    %c0_8 = arith.constant 0 : index
    %9 = vector.load %arg5[%c0_7, %c0_8] : memref<1x256xf32, #tpu.memory_space<vmem>>, vector<1x256xf32>
    %cst_9 = arith.constant 0.000000e+00 : f32
    %10 = vector.broadcast %cst_9 : f32 to vector<1x256xf32>
    %11 = arith.cmpf one, %9, %10 : vector<1x256xf32>
    %cst_10 = arith.constant 0.000000e+00 : f32
    %12 = vector.broadcast %cst_10 : f32 to vector<8x256xf32>
    %13 = arith.maximumf %8, %12 : vector<8x256xf32>
    %14 = vector.shape_cast %11 : vector<1x256xi1> to vector<1x256xi1>
    %15 = vector.broadcast %14 : vector<1x256xi1> to vector<8x256xi1>
    %16 = arith.select %15, %13, %8 : vector<8x256xi1>, vector<8x256xf32>
    %c0_11 = arith.constant 0 : index
    %c0_12 = arith.constant 0 : index
    %17 = vector.load %arg6[%c0_11, %c0_12] : memref<8x256xf32, #tpu.memory_space<vmem>>, vector<8x256xf32>
    tpu.vector_store %arg6[%c0_11, %c0_12], %16 {strides = array<i32>} : memref<8x256xf32, #tpu.memory_space<vmem>>, vector<8x256xf32>,
    return
  }
  func.func @transform_0(%arg0: i32) -> (i32, i32) {
    %c0_i32 = arith.constant 0 : i32
    %c0_i32_0 = arith.constant 0 : i32
    return %arg0, %c0_i32 : i32, i32
  }
  func.func @transform_1(%arg0: i32) -> (i32, i32) {
    %c0_i32 = arith.constant 0 : i32
    %c0_i32_0 = arith.constant 0 : i32
    %c0_i32_1 = arith.constant 0 : i32
    return %c0_i32, %c0_i32_0 : i32, i32
  }
  func.func @transform_2(%arg0: i32) -> (i32, i32) {
    %c0_i32 = arith.constant 0 : i32
    %c0_i32_0 = arith.constant 0 : i32
    %c0_i32_1 = arith.constant 0 : i32
    return %c0_i32, %c0_i32_0 : i32, i32
  }
  func.func @transform_3(%arg0: i32) -> (i32, i32) {
    %c0_i32 = arith.constant 0 : i32
    %c0_i32_0 = arith.constant 0 : i32
    %c0_i32_1 = arith.constant 0 : i32
    return %c0_i32, %c0_i32_0 : i32, i32
  }
  func.func @transform_4(%arg0: i32) -> (i32, i32) {
    %c0_i32 = arith.constant 0 : i32
    %c0_i32_0 = arith.constant 0 : i32
    %c0_i32_1 = arith.constant 0 : i32
    return %c0_i32, %c0_i32_0 : i32, i32
  }
  func.func @transform_5(%arg0: i32) -> (i32, i32) {
    %c0_i32 = arith.constant 0 : i32
    %c0_i32_0 = arith.constant 0 : i32
    return %arg0, %c0_i32 : i32, i32
  }
}

module attributes {stable_mosaic.version = 11 : i64} {
  func.func @_stage_tail_kernel(%arg0: i32, %arg1: memref<1x32x128xf32, #tpu.memory_space<vmem>>, %arg2: memref<1x32x128xf32, #tpu.memory_space<vmem>>, %arg3: memref<16x1xf32, #tpu.memory_space<vmem>>, %arg4: memref<1152x128xbf16, #tpu.memory_space<vmem>>, %arg5: memref<1x128xf32, #tpu.memory_space<vmem>>, %arg6: memref<1x128xf32, #tpu.memory_space<vmem>>, %arg7: memref<1152x128xbf16, #tpu.memory_space<vmem>>, %arg8: memref<1x128xf32, #tpu.memory_space<vmem>>, %arg9: memref<1x128xf32, #tpu.memory_space<vmem>>, %arg10: memref<1152x128xbf16, #tpu.memory_space<vmem>>, %arg11: memref<1x128xf32, #tpu.memory_space<vmem>>, %arg12: memref<1x128xf32, #tpu.memory_space<vmem>>, %arg13: memref<1x32x128xf32, #tpu.memory_space<vmem>>, %arg14: memref<32x128xf32, #tpu.memory_space<vmem>>, %arg15: memref<32x128xf32, #tpu.memory_space<vmem>>) attributes {dimension_semantics = [#tpu.dimension_semantics<parallel>], iteration_bounds = array<i64: 2>, scalar_prefetch = 0 : i64, scratch_operands = 2 : i64, tpu.core_type = #tpu.core_type<tc>, window_params = [{transform_indices = @transform_0, window_bounds = array<i64: 1, 32, 128>}, {transform_indices = @transform_1, window_bounds = array<i64: 1, 32, 128>}, {pipeline_mode = #tpu.pipeline_mode<synchronous>, transform_indices = @transform_2, window_bounds = array<i64: 16, 1>}, {pipeline_mode = #tpu.pipeline_mode<synchronous>, transform_indices = @transform_3, window_bounds = array<i64: 1152, 128>}, {pipeline_mode = #tpu.pipeline_mode<synchronous>, transform_indices = @transform_4, window_bounds = array<i64: 1, 128>}, {pipeline_mode = #tpu.pipeline_mode<synchronous>, transform_indices = @transform_5, window_bounds = array<i64: 1, 128>}, {pipeline_mode = #tpu.pipeline_mode<synchronous>, transform_indices = @transform_6, window_bounds = array<i64: 1152, 128>}, {pipeline_mode = #tpu.pipeline_mode<synchronous>, transform_indices = @transform_7, window_bounds = array<i64: 1, 128>}, {pipeline_mode = #tpu.pipeline_mode<synchronous>, transform_indices = @transform_8, window_bounds = array<i64: 1, 128>}, {pipeline_mode = #tpu.pipeline_mode<synchronous>, transform_indices = @transform_9, window_bounds = array<i64: 1152, 128>}, {pipeline_mode = #tpu.pipeline_mode<synchronous>, transform_indices = @transform_10, window_bounds = array<i64: 1, 128>}, {pipeline_mode = #tpu.pipeline_mode<synchronous>, transform_indices = @transform_11, window_bounds = array<i64: 1, 128>}, {transform_indices = @transform_12, window_bounds = array<i64: 1, 32, 128>}]} {
    %c0 = arith.constant 0 : index
    %c0_0 = arith.constant 0 : index
    %0 = vector.load %arg3[%c0, %c0_0] : memref<16x1xf32, #tpu.memory_space<vmem>>, vector<16x1xf32>
    %cst = arith.constant 0.000000e+00 : f32
    %1 = vector.broadcast %cst : f32 to vector<8x128xf32>
    %c0_1 = arith.constant 0 : index
    %c0_2 = arith.constant 0 : index
    %2 = vector.load %arg14[%c0_1, %c0_2] : memref<32x128xf32, #tpu.memory_space<vmem>>, vector<8x128xf32>
    tpu.vector_store %arg14[%c0_1, %c0_2], %1 {strides = array<i32>} : memref<32x128xf32, #tpu.memory_space<vmem>>, vector<8x128xf32>,
    %c24 = arith.constant 24 : index
    %c0_3 = arith.constant 0 : index
    %3 = vector.load %arg14[%c24, %c0_3] : memref<32x128xf32, #tpu.memory_space<vmem>>, vector<8x128xf32>
    tpu.vector_store %arg14[%c24, %c0_3], %1 {strides = array<i32>} : memref<32x128xf32, #tpu.memory_space<vmem>>, vector<8x128xf32>,
    %c0_4 = arith.constant 0 : index
    %c0_5 = arith.constant 0 : index
    %4 = vector.load %arg15[%c0_4, %c0_5] : memref<32x128xf32, #tpu.memory_space<vmem>>, vector<8x128xf32>
    tpu.vector_store %arg15[%c0_4, %c0_5], %1 {strides = array<i32>} : memref<32x128xf32, #tpu.memory_space<vmem>>, vector<8x128xf32>,
    %c24_6 = arith.constant 24 : index
    %c0_7 = arith.constant 0 : index
    %5 = vector.load %arg15[%c24_6, %c0_7] : memref<32x128xf32, #tpu.memory_space<vmem>>, vector<8x128xf32>
    tpu.vector_store %arg15[%c24_6, %c0_7], %1 {strides = array<i32>} : memref<32x128xf32, #tpu.memory_space<vmem>>, vector<8x128xf32>,
    %cst_8 = arith.constant 0.000000e+00 : f32
    %6 = vector.broadcast %cst_8 : f32 to vector<16x128xf32>
    %c0_9 = arith.constant 0 : index
    %c3 = arith.constant 3 : index
    %c0_10 = arith.constant 0 : index
    %7 = vector.load %arg1[%c0_9, %c3, %c0_10] : memref<1x32x128xf32, #tpu.memory_space<vmem>>, vector<1x16x128xf32>
    %8 = vector.shape_cast %7 : vector<1x16x128xf32> to vector<16x128xf32>
    %9 = arith.truncf %8 : vector<16x128xf32> to vector<16x128xbf16>
    %c0_11 = arith.constant 0 : index
    %c0_12 = arith.constant 0 : index
    %10 = vector.load %arg4[%c0_11, %c0_12] : memref<1152x128xbf16, #tpu.memory_space<vmem>>, vector<128x128xbf16>
    %cst_13 = arith.constant dense<0.000000e+00> : vector<16x128xf32>
    %11 = tpu.matmul %9, %10, %cst_13 {dimension_numbers = #tpu.dot_dimension_numbers<[1], [0], [0], [1], [0, 0, 1, 1], [], []>} : vector<16x128xbf16>, vector<128x128xbf16>, vector<16x128xf32> -> vector<16x128xf32>
    %12 = arith.addf %6, %11 : vector<16x128xf32>
    %c0_14 = arith.constant 0 : index
    %c4 = arith.constant 4 : index
    %c0_15 = arith.constant 0 : index
    %13 = vector.load %arg1[%c0_14, %c4, %c0_15] : memref<1x32x128xf32, #tpu.memory_space<vmem>>, vector<1x16x128xf32>
    %14 = vector.shape_cast %13 : vector<1x16x128xf32> to vector<16x128xf32>
    %15 = arith.truncf %14 : vector<16x128xf32> to vector<16x128xbf16>
    %c128 = arith.constant 128 : index
    %c0_16 = arith.constant 0 : index
    %16 = vector.load %arg4[%c128, %c0_16] : memref<1152x128xbf16, #tpu.memory_space<vmem>>, vector<128x128xbf16>
    %cst_17 = arith.constant dense<0.000000e+00> : vector<16x128xf32>
    %17 = tpu.matmul %15, %16, %cst_17 {dimension_numbers = #tpu.dot_dimension_numbers<[1], [0], [0], [1], [0, 0, 1, 1], [], []>} : vector<16x128xbf16>, vector<128x128xbf16>, vector<16x128xf32> -> vector<16x128xf32>
    %18 = arith.addf %12, %17 : vector<16x128xf32>
    %c0_18 = arith.constant 0 : index
    %c5 = arith.constant 5 : index
    %c0_19 = arith.constant 0 : index
    %19 = vector.load %arg1[%c0_18, %c5, %c0_19] : memref<1x32x128xf32, #tpu.memory_space<vmem>>, vector<1x16x128xf32>
    %20 = vector.shape_cast %19 : vector<1x16x128xf32> to vector<16x128xf32>
    %21 = arith.truncf %20 : vector<16x128xf32> to vector<16x128xbf16>
    %c256 = arith.constant 256 : index
    %c0_20 = arith.constant 0 : index
    %22 = vector.load %arg4[%c256, %c0_20] : memref<1152x128xbf16, #tpu.memory_space<vmem>>, vector<128x128xbf16>
    %cst_21 = arith.constant dense<0.000000e+00> : vector<16x128xf32>
    %23 = tpu.matmul %21, %22, %cst_21 {dimension_numbers = #tpu.dot_dimension_numbers<[1], [0], [0], [1], [0, 0, 1, 1], [], []>} : vector<16x128xbf16>, vector<128x128xbf16>, vector<16x128xf32> -> vector<16x128xf32>
    %24 = arith.addf %18, %23 : vector<16x128xf32>
    %c0_22 = arith.constant 0 : index
    %c7 = arith.constant 7 : index
    %c0_23 = arith.constant 0 : index
    %25 = vector.load %arg1[%c0_22, %c7, %c0_23] : memref<1x32x128xf32, #tpu.memory_space<vmem>>, vector<1x16x128xf32>
    %26 = vector.shape_cast %25 : vector<1x16x128xf32> to vector<16x128xf32>
    %27 = arith.truncf %26 : vector<16x128xf32> to vector<16x128xbf16>
    %c384 = arith.constant 384 : index
    %c0_24 = arith.constant 0 : index
    %28 = vector.load %arg4[%c384, %c0_24] : memref<1152x128xbf16, #tpu.memory_space<vmem>>, vector<128x128xbf16>
    %cst_25 = arith.constant dense<0.000000e+00> : vector<16x128xf32>
    %29 = tpu.matmul %27, %28, %cst_25 {dimension_numbers = #tpu.dot_dimension_numbers<[1], [0], [0], [1], [0, 0, 1, 1], [], []>} : vector<16x128xbf16>, vector<128x128xbf16>, vector<16x128xf32> -> vector<16x128xf32>
    %30 = arith.addf %24, %29 : vector<16x128xf32>
    %c0_26 = arith.constant 0 : index
    %c8 = arith.constant 8 : index
    %c0_27 = arith.constant 0 : index
    %31 = vector.load %arg1[%c0_26, %c8, %c0_27] : memref<1x32x128xf32, #tpu.memory_space<vmem>>, vector<1x16x128xf32>
    %32 = vector.shape_cast %31 : vector<1x16x128xf32> to vector<16x128xf32>
    %33 = arith.truncf %32 : vector<16x128xf32> to vector<16x128xbf16>
    %c512 = arith.constant 512 : index
    %c0_28 = arith.constant 0 : index
    %34 = vector.load %arg4[%c512, %c0_28] : memref<1152x128xbf16, #tpu.memory_space<vmem>>, vector<128x128xbf16>
    %cst_29 = arith.constant dense<0.000000e+00> : vector<16x128xf32>
    %35 = tpu.matmul %33, %34, %cst_29 {dimension_numbers = #tpu.dot_dimension_numbers<[1], [0], [0], [1], [0, 0, 1, 1], [], []>} : vector<16x128xbf16>, vector<128x128xbf16>, vector<16x128xf32> -> vector<16x128xf32>
    %36 = arith.addf %30, %35 : vector<16x128xf32>
    %c0_30 = arith.constant 0 : index
    %c9 = arith.constant 9 : index
    %c0_31 = arith.constant 0 : index
    %37 = vector.load %arg1[%c0_30, %c9, %c0_31] : memref<1x32x128xf32, #tpu.memory_space<vmem>>, vector<1x16x128xf32>
    %38 = vector.shape_cast %37 : vector<1x16x128xf32> to vector<16x128xf32>
    %39 = arith.truncf %38 : vector<16x128xf32> to vector<16x128xbf16>
    %c640 = arith.constant 640 : index
    %c0_32 = arith.constant 0 : index
    %40 = vector.load %arg4[%c640, %c0_32] : memref<1152x128xbf16, #tpu.memory_space<vmem>>, vector<128x128xbf16>
    %cst_33 = arith.constant dense<0.000000e+00> : vector<16x128xf32>
    %41 = tpu.matmul %39, %40, %cst_33 {dimension_numbers = #tpu.dot_dimension_numbers<[1], [0], [0], [1], [0, 0, 1, 1], [], []>} : vector<16x128xbf16>, vector<128x128xbf16>, vector<16x128xf32> -> vector<16x128xf32>
    %42 = arith.addf %36, %41 : vector<16x128xf32>
    %c0_34 = arith.constant 0 : index
    %c11 = arith.constant 11 : index
    %c0_35 = arith.constant 0 : index
    %43 = vector.load %arg1[%c0_34, %c11, %c0_35] : memref<1x32x128xf32, #tpu.memory_space<vmem>>, vector<1x16x128xf32>
    %44 = vector.shape_cast %43 : vector<1x16x128xf32> to vector<16x128xf32>
    %45 = arith.truncf %44 : vector<16x128xf32> to vector<16x128xbf16>
    %c768 = arith.constant 768 : index
    %c0_36 = arith.constant 0 : index
    %46 = vector.load %arg4[%c768, %c0_36] : memref<1152x128xbf16, #tpu.memory_space<vmem>>, vector<128x128xbf16>
    %cst_37 = arith.constant dense<0.000000e+00> : vector<16x128xf32>
    %47 = tpu.matmul %45, %46, %cst_37 {dimension_numbers = #tpu.dot_dimension_numbers<[1], [0], [0], [1], [0, 0, 1, 1], [], []>} : vector<16x128xbf16>, vector<128x128xbf16>, vector<16x128xf32> -> vector<16x128xf32>
    %48 = arith.addf %42, %47 : vector<16x128xf32>
    %c0_38 = arith.constant 0 : index
    %c12 = arith.constant 12 : index
    %c0_39 = arith.constant 0 : index
    %49 = vector.load %arg1[%c0_38, %c12, %c0_39] : memref<1x32x128xf32, #tpu.memory_space<vmem>>, vector<1x16x128xf32>
    %50 = vector.shape_cast %49 : vector<1x16x128xf32> to vector<16x128xf32>
    %51 = arith.truncf %50 : vector<16x128xf32> to vector<16x128xbf16>
    %c896 = arith.constant 896 : index
    %c0_40 = arith.constant 0 : index
    %52 = vector.load %arg4[%c896, %c0_40] : memref<1152x128xbf16, #tpu.memory_space<vmem>>, vector<128x128xbf16>
    %cst_41 = arith.constant dense<0.000000e+00> : vector<16x128xf32>
    %53 = tpu.matmul %51, %52, %cst_41 {dimension_numbers = #tpu.dot_dimension_numbers<[1], [0], [0], [1], [0, 0, 1, 1], [], []>} : vector<16x128xbf16>, vector<128x128xbf16>, vector<16x128xf32> -> vector<16x128xf32>
    %54 = arith.addf %48, %53 : vector<16x128xf32>
    %c0_42 = arith.constant 0 : index
    %c13 = arith.constant 13 : index
    %c0_43 = arith.constant 0 : index
    %55 = vector.load %arg1[%c0_42, %c13, %c0_43] : memref<1x32x128xf32, #tpu.memory_space<vmem>>, vector<1x16x128xf32>
    %56 = vector.shape_cast %55 : vector<1x16x128xf32> to vector<16x128xf32>
    %57 = arith.truncf %56 : vector<16x128xf32> to vector<16x128xbf16>
    %c1024 = arith.constant 1024 : index
    %c0_44 = arith.constant 0 : index
    %58 = vector.load %arg4[%c1024, %c0_44] : memref<1152x128xbf16, #tpu.memory_space<vmem>>, vector<128x128xbf16>
    %cst_45 = arith.constant dense<0.000000e+00> : vector<16x128xf32>
    %59 = tpu.matmul %57, %58, %cst_45 {dimension_numbers = #tpu.dot_dimension_numbers<[1], [0], [0], [1], [0, 0, 1, 1], [], []>} : vector<16x128xbf16>, vector<128x128xbf16>, vector<16x128xf32> -> vector<16x128xf32>
    %60 = arith.addf %54, %59 : vector<16x128xf32>
    %c0_46 = arith.constant 0 : index
    %c0_47 = arith.constant 0 : index
    %61 = vector.load %arg5[%c0_46, %c0_47] : memref<1x128xf32, #tpu.memory_space<vmem>>, vector<1x128xf32>
    %62 = vector.broadcast %61 : vector<1x128xf32> to vector<16x128xf32>
    %63 = arith.mulf %60, %62 : vector<16x128xf32>
    %c0_48 = arith.constant 0 : index
    %c0_49 = arith.constant 0 : index
    %64 = vector.load %arg6[%c0_48, %c0_49] : memref<1x128xf32, #tpu.memory_space<vmem>>, vector<1x128xf32>
    %65 = vector.broadcast %64 : vector<1x128xf32> to vector<16x128xf32>
    %66 = arith.addf %63, %65 : vector<16x128xf32>
    %c0_50 = arith.constant 0 : index
    %c8_51 = arith.constant 8 : index
    %c0_52 = arith.constant 0 : index
    %67 = vector.load %arg2[%c0_50, %c8_51, %c0_52] : memref<1x32x128xf32, #tpu.memory_space<vmem>>, vector<1x16x128xf32>
    %68 = vector.shape_cast %67 : vector<1x16x128xf32> to vector<16x128xf32>
    %69 = arith.addf %66, %68 : vector<16x128xf32>
    %cst_53 = arith.constant 0.000000e+00 : f32
    %70 = vector.broadcast %cst_53 : f32 to vector<16x128xf32>
    %71 = arith.maximumf %69, %70 : vector<16x128xf32>
    %72 = vector.broadcast %0 : vector<16x1xf32> to vector<16x128xf32>
    %73 = arith.mulf %71, %72 : vector<16x128xf32>
    %c8_54 = arith.constant 8 : index
    %c0_55 = arith.constant 0 : index
    %74 = vector.load %arg14[%c8_54, %c0_55] : memref<32x128xf32, #tpu.memory_space<vmem>>, vector<16x128xf32>
    tpu.vector_store %arg14[%c8_54, %c0_55], %73 {strides = array<i32>} : memref<32x128xf32, #tpu.memory_space<vmem>>, vector<16x128xf32>,
    %cst_56 = arith.constant 0.000000e+00 : f32
    %75 = vector.broadcast %cst_56 : f32 to vector<16x128xf32>
    %c3_57 = arith.constant 3 : index
    %c0_58 = arith.constant 0 : index
    %76 = vector.load %arg14[%c3_57, %c0_58] : memref<32x128xf32, #tpu.memory_space<vmem>>, vector<16x128xf32>
    %77 = arith.truncf %76 : vector<16x128xf32> to vector<16x128xbf16>
    %c0_59 = arith.constant 0 : index
    %c0_60 = arith.constant 0 : index
    %78 = vector.load %arg7[%c0_59, %c0_60] : memref<1152x128xbf16, #tpu.memory_space<vmem>>, vector<128x128xbf16>
    %cst_61 = arith.constant dense<0.000000e+00> : vector<16x128xf32>
    %79 = tpu.matmul %77, %78, %cst_61 {dimension_numbers = #tpu.dot_dimension_numbers<[1], [0], [0], [1], [0, 0, 1, 1], [], []>} : vector<16x128xbf16>, vector<128x128xbf16>, vector<16x128xf32> -> vector<16x128xf32>
    %80 = arith.addf %75, %79 : vector<16x128xf32>
    %c4_62 = arith.constant 4 : index
    %c0_63 = arith.constant 0 : index
    %81 = vector.load %arg14[%c4_62, %c0_63] : memref<32x128xf32, #tpu.memory_space<vmem>>, vector<16x128xf32>
    %82 = arith.truncf %81 : vector<16x128xf32> to vector<16x128xbf16>
    %c128_64 = arith.constant 128 : index
    %c0_65 = arith.constant 0 : index
    %83 = vector.load %arg7[%c128_64, %c0_65] : memref<1152x128xbf16, #tpu.memory_space<vmem>>, vector<128x128xbf16>
    %cst_66 = arith.constant dense<0.000000e+00> : vector<16x128xf32>
    %84 = tpu.matmul %82, %83, %cst_66 {dimension_numbers = #tpu.dot_dimension_numbers<[1], [0], [0], [1], [0, 0, 1, 1], [], []>} : vector<16x128xbf16>, vector<128x128xbf16>, vector<16x128xf32> -> vector<16x128xf32>
    %85 = arith.addf %80, %84 : vector<16x128xf32>
    %c5_67 = arith.constant 5 : index
    %c0_68 = arith.constant 0 : index
    %86 = vector.load %arg14[%c5_67, %c0_68] : memref<32x128xf32, #tpu.memory_space<vmem>>, vector<16x128xf32>
    %87 = arith.truncf %86 : vector<16x128xf32> to vector<16x128xbf16>
    %c256_69 = arith.constant 256 : index
    %c0_70 = arith.constant 0 : index
    %88 = vector.load %arg7[%c256_69, %c0_70] : memref<1152x128xbf16, #tpu.memory_space<vmem>>, vector<128x128xbf16>
    %cst_71 = arith.constant dense<0.000000e+00> : vector<16x128xf32>
    %89 = tpu.matmul %87, %88, %cst_71 {dimension_numbers = #tpu.dot_dimension_numbers<[1], [0], [0], [1], [0, 0, 1, 1], [], []>} : vector<16x128xbf16>, vector<128x128xbf16>, vector<16x128xf32> -> vector<16x128xf32>
    %90 = arith.addf %85, %89 : vector<16x128xf32>
    %c7_72 = arith.constant 7 : index
    %c0_73 = arith.constant 0 : index
    %91 = vector.load %arg14[%c7_72, %c0_73] : memref<32x128xf32, #tpu.memory_space<vmem>>, vector<16x128xf32>
    %92 = arith.truncf %91 : vector<16x128xf32> to vector<16x128xbf16>
    %c384_74 = arith.constant 384 : index
    %c0_75 = arith.constant 0 : index
    %93 = vector.load %arg7[%c384_74, %c0_75] : memref<1152x128xbf16, #tpu.memory_space<vmem>>, vector<128x128xbf16>
    %cst_76 = arith.constant dense<0.000000e+00> : vector<16x128xf32>
    %94 = tpu.matmul %92, %93, %cst_76 {dimension_numbers = #tpu.dot_dimension_numbers<[1], [0], [0], [1], [0, 0, 1, 1], [], []>} : vector<16x128xbf16>, vector<128x128xbf16>, vector<16x128xf32> -> vector<16x128xf32>
    %95 = arith.addf %90, %94 : vector<16x128xf32>
    %c8_77 = arith.constant 8 : index
    %c0_78 = arith.constant 0 : index
    %96 = vector.load %arg14[%c8_77, %c0_78] : memref<32x128xf32, #tpu.memory_space<vmem>>, vector<16x128xf32>
    %97 = arith.truncf %96 : vector<16x128xf32> to vector<16x128xbf16>
    %c512_79 = arith.constant 512 : index
    %c0_80 = arith.constant 0 : index
    %98 = vector.load %arg7[%c512_79, %c0_80] : memref<1152x128xbf16, #tpu.memory_space<vmem>>, vector<128x128xbf16>
    %cst_81 = arith.constant dense<0.000000e+00> : vector<16x128xf32>
    %99 = tpu.matmul %97, %98, %cst_81 {dimension_numbers = #tpu.dot_dimension_numbers<[1], [0], [0], [1], [0, 0, 1, 1], [], []>} : vector<16x128xbf16>, vector<128x128xbf16>, vector<16x128xf32> -> vector<16x128xf32>
    %100 = arith.addf %95, %99 : vector<16x128xf32>
    %c9_82 = arith.constant 9 : index
    %c0_83 = arith.constant 0 : index
    %101 = vector.load %arg14[%c9_82, %c0_83] : memref<32x128xf32, #tpu.memory_space<vmem>>, vector<16x128xf32>
    %102 = arith.truncf %101 : vector<16x128xf32> to vector<16x128xbf16>
    %c640_84 = arith.constant 640 : index
    %c0_85 = arith.constant 0 : index
    %103 = vector.load %arg7[%c640_84, %c0_85] : memref<1152x128xbf16, #tpu.memory_space<vmem>>, vector<128x128xbf16>
    %cst_86 = arith.constant dense<0.000000e+00> : vector<16x128xf32>
    %104 = tpu.matmul %102, %103, %cst_86 {dimension_numbers = #tpu.dot_dimension_numbers<[1], [0], [0], [1], [0, 0, 1, 1], [], []>} : vector<16x128xbf16>, vector<128x128xbf16>, vector<16x128xf32> -> vector<16x128xf32>
    %105 = arith.addf %100, %104 : vector<16x128xf32>
    %c11_87 = arith.constant 11 : index
    %c0_88 = arith.constant 0 : index
    %106 = vector.load %arg14[%c11_87, %c0_88] : memref<32x128xf32, #tpu.memory_space<vmem>>, vector<16x128xf32>
    %107 = arith.truncf %106 : vector<16x128xf32> to vector<16x128xbf16>
    %c768_89 = arith.constant 768 : index
    %c0_90 = arith.constant 0 : index
    %108 = vector.load %arg7[%c768_89, %c0_90] : memref<1152x128xbf16, #tpu.memory_space<vmem>>, vector<128x128xbf16>
    %cst_91 = arith.constant dense<0.000000e+00> : vector<16x128xf32>
    %109 = tpu.matmul %107, %108, %cst_91 {dimension_numbers = #tpu.dot_dimension_numbers<[1], [0], [0], [1], [0, 0, 1, 1], [], []>} : vector<16x128xbf16>, vector<128x128xbf16>, vector<16x128xf32> -> vector<16x128xf32>
    %110 = arith.addf %105, %109 : vector<16x128xf32>
    %c12_92 = arith.constant 12 : index
    %c0_93 = arith.constant 0 : index
    %111 = vector.load %arg14[%c12_92, %c0_93] : memref<32x128xf32, #tpu.memory_space<vmem>>, vector<16x128xf32>
    %112 = arith.truncf %111 : vector<16x128xf32> to vector<16x128xbf16>
    %c896_94 = arith.constant 896 : index
    %c0_95 = arith.constant 0 : index
    %113 = vector.load %arg7[%c896_94, %c0_95] : memref<1152x128xbf16, #tpu.memory_space<vmem>>, vector<128x128xbf16>
    %cst_96 = arith.constant dense<0.000000e+00> : vector<16x128xf32>
    %114 = tpu.matmul %112, %113, %cst_96 {dimension_numbers = #tpu.dot_dimension_numbers<[1], [0], [0], [1], [0, 0, 1, 1], [], []>} : vector<16x128xbf16>, vector<128x128xbf16>, vector<16x128xf32> -> vector<16x128xf32>
    %115 = arith.addf %110, %114 : vector<16x128xf32>
    %c13_97 = arith.constant 13 : index
    %c0_98 = arith.constant 0 : index
    %116 = vector.load %arg14[%c13_97, %c0_98] : memref<32x128xf32, #tpu.memory_space<vmem>>, vector<16x128xf32>
    %117 = arith.truncf %116 : vector<16x128xf32> to vector<16x128xbf16>
    %c1024_99 = arith.constant 1024 : index
    %c0_100 = arith.constant 0 : index
    %118 = vector.load %arg7[%c1024_99, %c0_100] : memref<1152x128xbf16, #tpu.memory_space<vmem>>, vector<128x128xbf16>
    %cst_101 = arith.constant dense<0.000000e+00> : vector<16x128xf32>
    %119 = tpu.matmul %117, %118, %cst_101 {dimension_numbers = #tpu.dot_dimension_numbers<[1], [0], [0], [1], [0, 0, 1, 1], [], []>} : vector<16x128xbf16>, vector<128x128xbf16>, vector<16x128xf32> -> vector<16x128xf32>
    %120 = arith.addf %115, %119 : vector<16x128xf32>
    %c0_102 = arith.constant 0 : index
    %c0_103 = arith.constant 0 : index
    %121 = vector.load %arg8[%c0_102, %c0_103] : memref<1x128xf32, #tpu.memory_space<vmem>>, vector<1x128xf32>
    %122 = vector.broadcast %121 : vector<1x128xf32> to vector<16x128xf32>
    %123 = arith.mulf %120, %122 : vector<16x128xf32>
    %c0_104 = arith.constant 0 : index
    %c0_105 = arith.constant 0 : index
    %124 = vector.load %arg9[%c0_104, %c0_105] : memref<1x128xf32, #tpu.memory_space<vmem>>, vector<1x128xf32>
    %125 = vector.broadcast %124 : vector<1x128xf32> to vector<16x128xf32>
    %126 = arith.addf %123, %125 : vector<16x128xf32>
    %cst_106 = arith.constant 0.000000e+00 : f32
    %127 = vector.broadcast %cst_106 : f32 to vector<16x128xf32>
    %128 = arith.maximumf %126, %127 : vector<16x128xf32>
    %129 = vector.broadcast %0 : vector<16x1xf32> to vector<16x128xf32>
    %130 = arith.mulf %128, %129 : vector<16x128xf32>
    %c8_107 = arith.constant 8 : index
    %c0_108 = arith.constant 0 : index
    %131 = vector.load %arg15[%c8_107, %c0_108] : memref<32x128xf32, #tpu.memory_space<vmem>>, vector<16x128xf32>
    tpu.vector_store %arg15[%c8_107, %c0_108], %130 {strides = array<i32>} : memref<32x128xf32, #tpu.memory_space<vmem>>, vector<16x128xf32>,
    %cst_109 = arith.constant 0.000000e+00 : f32
    %132 = vector.broadcast %cst_109 : f32 to vector<16x128xf32>
    %c3_110 = arith.constant 3 : index
    %c0_111 = arith.constant 0 : index
    %133 = vector.load %arg15[%c3_110, %c0_111] : memref<32x128xf32, #tpu.memory_space<vmem>>, vector<16x128xf32>
    %134 = arith.truncf %133 : vector<16x128xf32> to vector<16x128xbf16>
    %c0_112 = arith.constant 0 : index
    %c0_113 = arith.constant 0 : index
    %135 = vector.load %arg10[%c0_112, %c0_113] : memref<1152x128xbf16, #tpu.memory_space<vmem>>, vector<128x128xbf16>
    %cst_114 = arith.constant dense<0.000000e+00> : vector<16x128xf32>
    %136 = tpu.matmul %134, %135, %cst_114 {dimension_numbers = #tpu.dot_dimension_numbers<[1], [0], [0], [1], [0, 0, 1, 1], [], []>} : vector<16x128xbf16>, vector<128x128xbf16>, vector<16x128xf32> -> vector<16x128xf32>
    %137 = arith.addf %132, %136 : vector<16x128xf32>
    %c4_115 = arith.constant 4 : index
    %c0_116 = arith.constant 0 : index
    %138 = vector.load %arg15[%c4_115, %c0_116] : memref<32x128xf32, #tpu.memory_space<vmem>>, vector<16x128xf32>
    %139 = arith.truncf %138 : vector<16x128xf32> to vector<16x128xbf16>
    %c128_117 = arith.constant 128 : index
    %c0_118 = arith.constant 0 : index
    %140 = vector.load %arg10[%c128_117, %c0_118] : memref<1152x128xbf16, #tpu.memory_space<vmem>>, vector<128x128xbf16>
    %cst_119 = arith.constant dense<0.000000e+00> : vector<16x128xf32>
    %141 = tpu.matmul %139, %140, %cst_119 {dimension_numbers = #tpu.dot_dimension_numbers<[1], [0], [0], [1], [0, 0, 1, 1], [], []>} : vector<16x128xbf16>, vector<128x128xbf16>, vector<16x128xf32> -> vector<16x128xf32>
    %142 = arith.addf %137, %141 : vector<16x128xf32>
    %c5_120 = arith.constant 5 : index
    %c0_121 = arith.constant 0 : index
    %143 = vector.load %arg15[%c5_120, %c0_121] : memref<32x128xf32, #tpu.memory_space<vmem>>, vector<16x128xf32>
    %144 = arith.truncf %143 : vector<16x128xf32> to vector<16x128xbf16>
    %c256_122 = arith.constant 256 : index
    %c0_123 = arith.constant 0 : index
    %145 = vector.load %arg10[%c256_122, %c0_123] : memref<1152x128xbf16, #tpu.memory_space<vmem>>, vector<128x128xbf16>
    %cst_124 = arith.constant dense<0.000000e+00> : vector<16x128xf32>
    %146 = tpu.matmul %144, %145, %cst_124 {dimension_numbers = #tpu.dot_dimension_numbers<[1], [0], [0], [1], [0, 0, 1, 1], [], []>} : vector<16x128xbf16>, vector<128x128xbf16>, vector<16x128xf32> -> vector<16x128xf32>
    %147 = arith.addf %142, %146 : vector<16x128xf32>
    %c7_125 = arith.constant 7 : index
    %c0_126 = arith.constant 0 : index
    %148 = vector.load %arg15[%c7_125, %c0_126] : memref<32x128xf32, #tpu.memory_space<vmem>>, vector<16x128xf32>
    %149 = arith.truncf %148 : vector<16x128xf32> to vector<16x128xbf16>
    %c384_127 = arith.constant 384 : index
    %c0_128 = arith.constant 0 : index
    %150 = vector.load %arg10[%c384_127, %c0_128] : memref<1152x128xbf16, #tpu.memory_space<vmem>>, vector<128x128xbf16>
    %cst_129 = arith.constant dense<0.000000e+00> : vector<16x128xf32>
    %151 = tpu.matmul %149, %150, %cst_129 {dimension_numbers = #tpu.dot_dimension_numbers<[1], [0], [0], [1], [0, 0, 1, 1], [], []>} : vector<16x128xbf16>, vector<128x128xbf16>, vector<16x128xf32> -> vector<16x128xf32>
    %152 = arith.addf %147, %151 : vector<16x128xf32>
    %c8_130 = arith.constant 8 : index
    %c0_131 = arith.constant 0 : index
    %153 = vector.load %arg15[%c8_130, %c0_131] : memref<32x128xf32, #tpu.memory_space<vmem>>, vector<16x128xf32>
    %154 = arith.truncf %153 : vector<16x128xf32> to vector<16x128xbf16>
    %c512_132 = arith.constant 512 : index
    %c0_133 = arith.constant 0 : index
    %155 = vector.load %arg10[%c512_132, %c0_133] : memref<1152x128xbf16, #tpu.memory_space<vmem>>, vector<128x128xbf16>
    %cst_134 = arith.constant dense<0.000000e+00> : vector<16x128xf32>
    %156 = tpu.matmul %154, %155, %cst_134 {dimension_numbers = #tpu.dot_dimension_numbers<[1], [0], [0], [1], [0, 0, 1, 1], [], []>} : vector<16x128xbf16>, vector<128x128xbf16>, vector<16x128xf32> -> vector<16x128xf32>
    %157 = arith.addf %152, %156 : vector<16x128xf32>
    %c9_135 = arith.constant 9 : index
    %c0_136 = arith.constant 0 : index
    %158 = vector.load %arg15[%c9_135, %c0_136] : memref<32x128xf32, #tpu.memory_space<vmem>>, vector<16x128xf32>
    %159 = arith.truncf %158 : vector<16x128xf32> to vector<16x128xbf16>
    %c640_137 = arith.constant 640 : index
    %c0_138 = arith.constant 0 : index
    %160 = vector.load %arg10[%c640_137, %c0_138] : memref<1152x128xbf16, #tpu.memory_space<vmem>>, vector<128x128xbf16>
    %cst_139 = arith.constant dense<0.000000e+00> : vector<16x128xf32>
    %161 = tpu.matmul %159, %160, %cst_139 {dimension_numbers = #tpu.dot_dimension_numbers<[1], [0], [0], [1], [0, 0, 1, 1], [], []>} : vector<16x128xbf16>, vector<128x128xbf16>, vector<16x128xf32> -> vector<16x128xf32>
    %162 = arith.addf %157, %161 : vector<16x128xf32>
    %c11_140 = arith.constant 11 : index
    %c0_141 = arith.constant 0 : index
    %163 = vector.load %arg15[%c11_140, %c0_141] : memref<32x128xf32, #tpu.memory_space<vmem>>, vector<16x128xf32>
    %164 = arith.truncf %163 : vector<16x128xf32> to vector<16x128xbf16>
    %c768_142 = arith.constant 768 : index
    %c0_143 = arith.constant 0 : index
    %165 = vector.load %arg10[%c768_142, %c0_143] : memref<1152x128xbf16, #tpu.memory_space<vmem>>, vector<128x128xbf16>
    %cst_144 = arith.constant dense<0.000000e+00> : vector<16x128xf32>
    %166 = tpu.matmul %164, %165, %cst_144 {dimension_numbers = #tpu.dot_dimension_numbers<[1], [0], [0], [1], [0, 0, 1, 1], [], []>} : vector<16x128xbf16>, vector<128x128xbf16>, vector<16x128xf32> -> vector<16x128xf32>
    %167 = arith.addf %162, %166 : vector<16x128xf32>
    %c12_145 = arith.constant 12 : index
    %c0_146 = arith.constant 0 : index
    %168 = vector.load %arg15[%c12_145, %c0_146] : memref<32x128xf32, #tpu.memory_space<vmem>>, vector<16x128xf32>
    %169 = arith.truncf %168 : vector<16x128xf32> to vector<16x128xbf16>
    %c896_147 = arith.constant 896 : index
    %c0_148 = arith.constant 0 : index
    %170 = vector.load %arg10[%c896_147, %c0_148] : memref<1152x128xbf16, #tpu.memory_space<vmem>>, vector<128x128xbf16>
    %cst_149 = arith.constant dense<0.000000e+00> : vector<16x128xf32>
    %171 = tpu.matmul %169, %170, %cst_149 {dimension_numbers = #tpu.dot_dimension_numbers<[1], [0], [0], [1], [0, 0, 1, 1], [], []>} : vector<16x128xbf16>, vector<128x128xbf16>, vector<16x128xf32> -> vector<16x128xf32>
    %172 = arith.addf %167, %171 : vector<16x128xf32>
    %c13_150 = arith.constant 13 : index
    %c0_151 = arith.constant 0 : index
    %173 = vector.load %arg15[%c13_150, %c0_151] : memref<32x128xf32, #tpu.memory_space<vmem>>, vector<16x128xf32>
    %174 = arith.truncf %173 : vector<16x128xf32> to vector<16x128xbf16>
    %c1024_152 = arith.constant 1024 : index
    %c0_153 = arith.constant 0 : index
    %175 = vector.load %arg10[%c1024_152, %c0_153] : memref<1152x128xbf16, #tpu.memory_space<vmem>>, vector<128x128xbf16>
    %cst_154 = arith.constant dense<0.000000e+00> : vector<16x128xf32>
    %176 = tpu.matmul %174, %175, %cst_154 {dimension_numbers = #tpu.dot_dimension_numbers<[1], [0], [0], [1], [0, 0, 1, 1], [], []>} : vector<16x128xbf16>, vector<128x128xbf16>, vector<16x128xf32> -> vector<16x128xf32>
    %177 = arith.addf %172, %176 : vector<16x128xf32>
    %c0_155 = arith.constant 0 : index
    %c0_156 = arith.constant 0 : index
    %178 = vector.load %arg11[%c0_155, %c0_156] : memref<1x128xf32, #tpu.memory_space<vmem>>, vector<1x128xf32>
    %179 = vector.broadcast %178 : vector<1x128xf32> to vector<16x128xf32>
    %180 = arith.mulf %177, %179 : vector<16x128xf32>
    %c0_157 = arith.constant 0 : index
    %c0_158 = arith.constant 0 : index
    %181 = vector.load %arg12[%c0_157, %c0_158] : memref<1x128xf32, #tpu.memory_space<vmem>>, vector<1x128xf32>
    %182 = vector.broadcast %181 : vector<1x128xf32> to vector<16x128xf32>
    %183 = arith.addf %180, %182 : vector<16x128xf32>
    %184 = arith.addf %183, %73 : vector<16x128xf32>
    %cst_159 = arith.constant 0.000000e+00 : f32
    %185 = vector.broadcast %cst_159 : f32 to vector<16x128xf32>
    %186 = arith.maximumf %184, %185 : vector<16x128xf32>
    %187 = vector.broadcast %0 : vector<16x1xf32> to vector<16x128xf32>
    %188 = arith.mulf %186, %187 : vector<16x128xf32>
    %c0_160 = arith.constant 0 : index
    %c0_161 = arith.constant 0 : index
    %c0_162 = arith.constant 0 : index
    %189 = vector.load %arg13[%c0_160, %c0_161, %c0_162] : memref<1x32x128xf32, #tpu.memory_space<vmem>>, vector<1x8x128xf32>
    %190 = vector.shape_cast %189 : vector<1x8x128xf32> to vector<8x128xf32>
    %191 = vector.shape_cast %1 : vector<8x128xf32> to vector<1x8x128xf32>
    tpu.vector_store %arg13[%c0_160, %c0_161, %c0_162], %191 {strides = array<i32>} : memref<1x32x128xf32, #tpu.memory_space<vmem>>, vector<1x8x128xf32>,
    %c0_163 = arith.constant 0 : index
    %c8_164 = arith.constant 8 : index
    %c0_165 = arith.constant 0 : index
    %192 = vector.load %arg13[%c0_163, %c8_164, %c0_165] : memref<1x32x128xf32, #tpu.memory_space<vmem>>, vector<1x16x128xf32>
    %193 = vector.shape_cast %192 : vector<1x16x128xf32> to vector<16x128xf32>
    %194 = vector.shape_cast %188 : vector<16x128xf32> to vector<1x16x128xf32>
    tpu.vector_store %arg13[%c0_163, %c8_164, %c0_165], %194 {strides = array<i32>} : memref<1x32x128xf32, #tpu.memory_space<vmem>>, vector<1x16x128xf32>,
    %c0_166 = arith.constant 0 : index
    %c24_167 = arith.constant 24 : index
    %c0_168 = arith.constant 0 : index
    %195 = vector.load %arg13[%c0_166, %c24_167, %c0_168] : memref<1x32x128xf32, #tpu.memory_space<vmem>>, vector<1x8x128xf32>
    %196 = vector.shape_cast %195 : vector<1x8x128xf32> to vector<8x128xf32>
    %197 = vector.shape_cast %1 : vector<8x128xf32> to vector<1x8x128xf32>
    tpu.vector_store %arg13[%c0_166, %c24_167, %c0_168], %197 {strides = array<i32>} : memref<1x32x128xf32, #tpu.memory_space<vmem>>, vector<1x8x128xf32>,
    return
  }
  func.func @transform_0(%arg0: i32) -> (i32, i32, i32) {
    %c0_i32 = arith.constant 0 : i32
    %c0_i32_0 = arith.constant 0 : i32
    %c0_i32_1 = arith.constant 0 : i32
    return %arg0, %c0_i32, %c0_i32_0 : i32, i32, i32
  }
  func.func @transform_1(%arg0: i32) -> (i32, i32, i32) {
    %c0_i32 = arith.constant 0 : i32
    %c0_i32_0 = arith.constant 0 : i32
    %c0_i32_1 = arith.constant 0 : i32
    return %arg0, %c0_i32, %c0_i32_0 : i32, i32, i32
  }
  func.func @transform_2(%arg0: i32) -> (i32, i32) {
    %c0_i32 = arith.constant 0 : i32
    %c0_i32_0 = arith.constant 0 : i32
    %c0_i32_1 = arith.constant 0 : i32
    return %c0_i32, %c0_i32_0 : i32, i32
  }
  func.func @transform_3(%arg0: i32) -> (i32, i32) {
    %c0_i32 = arith.constant 0 : i32
    %c0_i32_0 = arith.constant 0 : i32
    %c0_i32_1 = arith.constant 0 : i32
    return %c0_i32, %c0_i32_0 : i32, i32
  }
  func.func @transform_4(%arg0: i32) -> (i32, i32) {
    %c0_i32 = arith.constant 0 : i32
    %c0_i32_0 = arith.constant 0 : i32
    %c0_i32_1 = arith.constant 0 : i32
    return %c0_i32, %c0_i32_0 : i32, i32
  }
  func.func @transform_5(%arg0: i32) -> (i32, i32) {
    %c0_i32 = arith.constant 0 : i32
    %c0_i32_0 = arith.constant 0 : i32
    %c0_i32_1 = arith.constant 0 : i32
    return %c0_i32, %c0_i32_0 : i32, i32
  }
  func.func @transform_6(%arg0: i32) -> (i32, i32) {
    %c0_i32 = arith.constant 0 : i32
    %c0_i32_0 = arith.constant 0 : i32
    %c0_i32_1 = arith.constant 0 : i32
    return %c0_i32, %c0_i32_0 : i32, i32
  }
  func.func @transform_7(%arg0: i32) -> (i32, i32) {
    %c0_i32 = arith.constant 0 : i32
    %c0_i32_0 = arith.constant 0 : i32
    %c0_i32_1 = arith.constant 0 : i32
    return %c0_i32, %c0_i32_0 : i32, i32
  }
  func.func @transform_8(%arg0: i32) -> (i32, i32) {
    %c0_i32 = arith.constant 0 : i32
    %c0_i32_0 = arith.constant 0 : i32
    %c0_i32_1 = arith.constant 0 : i32
    return %c0_i32, %c0_i32_0 : i32, i32
  }
  func.func @transform_9(%arg0: i32) -> (i32, i32) {
    %c0_i32 = arith.constant 0 : i32
    %c0_i32_0 = arith.constant 0 : i32
    %c0_i32_1 = arith.constant 0 : i32
    return %c0_i32, %c0_i32_0 : i32, i32
  }
  func.func @transform_10(%arg0: i32) -> (i32, i32) {
    %c0_i32 = arith.constant 0 : i32
    %c0_i32_0 = arith.constant 0 : i32
    %c0_i32_1 = arith.constant 0 : i32
    return %c0_i32, %c0_i32_0 : i32, i32
  }
  func.func @transform_11(%arg0: i32) -> (i32, i32) {
    %c0_i32 = arith.constant 0 : i32
    %c0_i32_0 = arith.constant 0 : i32
    %c0_i32_1 = arith.constant 0 : i32
    return %c0_i32, %c0_i32_0 : i32, i32
  }
  func.func @transform_12(%arg0: i32) -> (i32, i32, i32) {
    %c0_i32 = arith.constant 0 : i32
    %c0_i32_0 = arith.constant 0 : i32
    %c0_i32_1 = arith.constant 0 : i32
    return %arg0, %c0_i32, %c0_i32_0 : i32, i32, i32
  }
}

module attributes {stable_mosaic.version = 11 : i64} {
  func.func @_head_kernel(%arg0: memref<2x16x128xf32, #tpu.memory_space<vmem>>, %arg1: memref<1x128xf32, #tpu.memory_space<vmem>>, %arg2: memref<1x128xf32, #tpu.memory_space<vmem>>, %arg3: memref<128x10xf32, #tpu.memory_space<vmem>>, %arg4: memref<1x10xf32, #tpu.memory_space<vmem>>, %arg5: memref<1x10xf32, #tpu.memory_space<vmem>>, %arg6: memref<1x10xf32, #tpu.memory_space<vmem>>, %arg7: memref<2x10xf32, #tpu.memory_space<vmem>>) attributes {dimension_semantics = [], scalar_prefetch = 0 : i64, scratch_operands = 0 : i64, tpu.core_type = #tpu.core_type<tc>} {
    %c0 = arith.constant 0 : index
    %c0_0 = arith.constant 0 : index
    %c0_1 = arith.constant 0 : index
    %0 = vector.load %arg0[%c0, %c0_0, %c0_1] : memref<2x16x128xf32, #tpu.memory_space<vmem>>, vector<2x16x128xf32>
    %cst = arith.constant dense<0.000000e+00> : vector<2x128xf32>
    %1 = vector.multi_reduction <add>, %0, %cst [1] : vector<2x16x128xf32> to vector<2x128xf32>
    %cst_2 = arith.constant 2.500000e-01 : f32
    %2 = vector.broadcast %cst_2 : f32 to vector<2x128xf32>
    %3 = arith.mulf %1, %2 : vector<2x128xf32>
    %c0_3 = arith.constant 0 : index
    %c0_4 = arith.constant 0 : index
    %4 = vector.load %arg1[%c0_3, %c0_4] : memref<1x128xf32, #tpu.memory_space<vmem>>, vector<1x128xf32>
    %5 = vector.broadcast %4 : vector<1x128xf32> to vector<2x128xf32>
    %6 = arith.mulf %3, %5 : vector<2x128xf32>
    %c0_5 = arith.constant 0 : index
    %c0_6 = arith.constant 0 : index
    %7 = vector.load %arg2[%c0_5, %c0_6] : memref<1x128xf32, #tpu.memory_space<vmem>>, vector<1x128xf32>
    %8 = vector.broadcast %7 : vector<1x128xf32> to vector<2x128xf32>
    %9 = arith.addf %6, %8 : vector<2x128xf32>
    %c0_7 = arith.constant 0 : index
    %c0_8 = arith.constant 0 : index
    %10 = vector.load %arg3[%c0_7, %c0_8] : memref<128x10xf32, #tpu.memory_space<vmem>>, vector<128x10xf32>
    %cst_9 = arith.constant dense<0.000000e+00> : vector<2x10xf32>
    %11 = tpu.matmul %9, %10, %cst_9 {dimension_numbers = #tpu.dot_dimension_numbers<[1], [0], [0], [1], [0, 0, 1, 1], [], []>} : vector<2x128xf32>, vector<128x10xf32>, vector<2x10xf32> -> vector<2x10xf32>
    %c0_10 = arith.constant 0 : index
    %c0_11 = arith.constant 0 : index
    %12 = vector.load %arg4[%c0_10, %c0_11] : memref<1x10xf32, #tpu.memory_space<vmem>>, vector<1x10xf32>
    %13 = vector.broadcast %12 : vector<1x10xf32> to vector<2x10xf32>
    %14 = arith.addf %11, %13 : vector<2x10xf32>
    %c0_12 = arith.constant 0 : index
    %c0_13 = arith.constant 0 : index
    %15 = vector.load %arg5[%c0_12, %c0_13] : memref<1x10xf32, #tpu.memory_space<vmem>>, vector<1x10xf32>
    %16 = vector.broadcast %15 : vector<1x10xf32> to vector<2x10xf32>
    %17 = arith.mulf %14, %16 : vector<2x10xf32>
    %c0_14 = arith.constant 0 : index
    %c0_15 = arith.constant 0 : index
    %18 = vector.load %arg6[%c0_14, %c0_15] : memref<1x10xf32, #tpu.memory_space<vmem>>, vector<1x10xf32>
    %19 = vector.broadcast %18 : vector<1x10xf32> to vector<2x10xf32>
    %20 = arith.addf %17, %19 : vector<2x10xf32>
    %cst_16 = arith.constant dense<0xFF800000> : vector<2xf32>
    %21 = vector.multi_reduction <maximumf>, %20, %cst_16 [1] : vector<2x10xf32> to vector<2xf32>
    %22 = vector.shape_cast %21 : vector<2xf32> to vector<2x1xf32>
    %23 = vector.broadcast %22 : vector<2x1xf32> to vector<2x10xf32>
    %24 = arith.subf %20, %23 : vector<2x10xf32>
    %25 = math.exp %24 : vector<2x10xf32>
    %cst_17 = arith.constant dense<0.000000e+00> : vector<2xf32>
    %26 = vector.multi_reduction <add>, %25, %cst_17 [1] : vector<2x10xf32> to vector<2xf32>
    %27 = vector.shape_cast %26 : vector<2xf32> to vector<2x1xf32>
    %28 = math.log %27 : vector<2x1xf32>
    %29 = arith.addf %22, %28 : vector<2x1xf32>
    %30 = vector.broadcast %29 : vector<2x1xf32> to vector<2x10xf32>
    %31 = arith.subf %20, %30 : vector<2x10xf32>
    %c0_18 = arith.constant 0 : index
    %c0_19 = arith.constant 0 : index
    %32 = vector.load %arg7[%c0_18, %c0_19] : memref<2x10xf32, #tpu.memory_space<vmem>>, vector<2x10xf32>
    tpu.vector_store %arg7[%c0_18, %c0_19], %31 {strides = array<i32>} : memref<2x10xf32, #tpu.memory_space<vmem>>, vector<2x10xf32>,
    return
  }
}

</mosaic_0001>

<bundles_post_ra>
// kernel: resnet_forward.7
= control target key start
LH: loop header
LB: loop body
LE: loop exit
PB: predicated region body
PF: predicated region fallthrough
CT: control target
= control target key end

     0   :  { %vm181_vm0 = vcmask 130048   ;;  %v547_v63 = vmov 0   ;;  %vm381_vm3 = vcmask 523264   ;;  %s860_s1 = inlined_call_operand.vmem [shape: bf16[144,64], index: 1, kind: input, shape index: {}]   ;;  %s861_s0 = inlined_call_operand.vmem [shape: bf16[128,144], index: 0, kind: input, shape index: {}]   ;;  %s862_s2 = inlined_call_operand.vmem [shape: f32[1,64], index: 2, kind: input, shape index: {}]   ;;  %s863_s3 = inlined_call_operand.vmem [shape: f32[1,64], index: 3, kind: input, shape index: {}]   ;;  %s864_s4 = inlined_call_operand.vmem [shape: f32[1,64], index: 4, kind: input, shape index: {}]   ;;  %s865_s5 = inlined_call_operand.vmem [shape: f32[128,64], index: 5, kind: output, shape index: {}]  }
   0x1   :  { %v533_v0 = vld [vmem:[%s860_s1 + $0x38] sm:$0xff]  ;;  %v534_v1 = vld [vmem:[%s860_s1 + $0x40] sm:$0xff]  ;;  %v406_v3 = vld [vmem:[%s861_s0 + $0x8] sm:$0xf0] }
   0x2   :  { %v510_v2 = vld [vmem:[%s861_s0 + $0x4] sm:$0xf]  ;;  %206 = vmatpush.bf16.msra.mxu0 %v533_v0  ;;  %535 = vmatpush.bf16.msra.mxu2 %v533_v0  ;;  %v532_v5 = vld [vmem:[%s860_s1 + $0x30] sm:$0xff]  ;;  %v531_v6 = vld [vmem:[%s860_s1 + $0x28] sm:$0xff] }
   0x3   :  { %v409_v4 = vor.u32 %v510_v2, %v406_v3  ;;  %262 = vmatpush.bf16.msra.mxu1 %v534_v1  ;;  %543 = vmatpush.bf16.msra.mxu3 %v534_v1  ;;  %v520_v7 = vld [vmem:[%s861_s0 + $0x54] sm:$0xf]  ;;  %v446_v8 = vld [vmem:[%s861_s0 + $0x58] sm:$0xf0]  ;;  %v530_v10 = vld [vmem:[%s860_s1 + $0x20] sm:$0xff] }
   0x4   :  { %v449_v9 = vor.u32 %v520_v7, %v446_v8  ;;  %v529_v11 = vld [vmem:[%s860_s1 + $0x18] sm:$0xff]  ;;  %v512_v12 = vld [vmem:[%s861_s0 + $0x14] sm:$0xf]  ;;  %v527_v16 = vld [vmem:[%s860_s1 + $0x8] sm:$0xff] }
   0x5   :  { %v414_v13 = vld [vmem:[%s861_s0 + $0x18] sm:$0xf0]  ;;  %v528_v15 = vld [vmem:[%s860_s1 + $0x10] sm:$0xff]  ;;  %v522_v17 = vld [vmem:[%s861_s0 + $0x64] sm:$0xf] }
   0x6   :  { %502 = vmatmul.msk.bf16.vlgmr.msra.gmra.mxu1 %vm181_vm0, %v409_v4  ;;  %207 = vmatpush.bf16.msra.mxu0 %v532_v5  ;;  %v417_v14 = vor.u32 %v512_v12, %v414_v13  ;;  %v454_v18 = vld [vmem:[%s861_s0 + $0x68] sm:$0xf0]  ;;  %v526_v20 = vld [vmem:[%s860_s1] sm:$0xff]  ;;  %v511_v22 = vld [vmem:[%s861_s0 + $0x4] sm:$0xf0] }
   0x7   :  { %536 = vmatpush.bf16.msra.mxu2 %v532_v5  ;;  %507 = vmatmul.msk.bf16.vlgmr.msra.gmra.mxu3 %vm181_vm0, %v449_v9  ;;  %v457_v19 = vor.u32 %v522_v17, %v454_v18  ;;  %v404_v21 = vld [vmem:[%s861_s0] sm:$0xf]  ;;  %v519_v24 = vld [vmem:[%s861_s0 + $0x44] sm:$0xf0]  ;;  %v514_v27 = vld [vmem:[%s861_s0 + $0x24] sm:$0xf] }
   0x8   :  { %v436_v23 = vld [vmem:[%s861_s0 + $0x40] sm:$0xf]  ;;  %v405_v25 = vor.u32 %v511_v22, %v404_v21  ;;  %v422_v28 = vld [vmem:[%s861_s0 + $0x28] sm:$0xf0]  ;;  %v524_v30 = vld [vmem:[%s861_s0 + $0x74] sm:$0xf] }
   0x9   :  { %v437_v26 = vor.u32 %v519_v24, %v436_v23  ;;  %v425_v29 = vor.u32 %v514_v27, %v422_v28  ;;  %v462_v31 = vld [vmem:[%s861_s0 + $0x78] sm:$0xf0]  ;;  %v412_v33 = vld [vmem:[%s861_s0 + $0x10] sm:$0xf]  ;;  %v513_v34 = vld [vmem:[%s861_s0 + $0x14] sm:$0xf0] }
   0xa   :  { %208 = vmatpush.bf16.msra.mxu0 %v531_v6  ;;  %v465_v32 = vor.u32 %v524_v30, %v462_v31  ;;  %v444_v35 = vld [vmem:[%s861_s0 + $0x50] sm:$0xf]  ;;  %v521_v36 = vld [vmem:[%s861_s0 + $0x54] sm:$0xf0]  ;;  %v413_v37 = vor.u32 %v513_v34, %v412_v33  ;;  %v516_v39 = vld [vmem:[%s861_s0 + $0x34] sm:$0xf] }
   0xb   :  { %537 = vmatpush.bf16.msra.mxu2 %v531_v6  ;;  %v445_v38 = vor.u32 %v521_v36, %v444_v35  ;;  %v430_v40 = vld [vmem:[%s861_s0 + $0x38] sm:$0xf0]  ;;  %v420_v42 = vld [vmem:[%s861_s0 + $0x20] sm:$0xf]  ;;  %v515_v43 = vld [vmem:[%s861_s0 + $0x24] sm:$0xf0] }
   0xc   :  { %v433_v41 = vor.u32 %v516_v39, %v430_v40  ;;  %v452_v44 = vld [vmem:[%s861_s0 + $0x60] sm:$0xf]  ;;  %v523_v45 = vld [vmem:[%s861_s0 + $0x64] sm:$0xf0]  ;;  %v421_v46 = vor.u32 %v515_v43, %v420_v42  ;;  %v518_v48 = vld [vmem:[%s861_s0 + $0x44] sm:$0xf] }
   0xd   :  { %v453_v47 = vor.u32 %v523_v45, %v452_v44  ;;  %v438_v49 = vld [vmem:[%s861_s0 + $0x48] sm:$0xf0]  ;;  %v428_v51 = vld [vmem:[%s861_s0 + $0x30] sm:$0xf]  ;;  %v517_v52 = vld [vmem:[%s861_s0 + $0x34] sm:$0xf0] }
   0xe   :  { %209 = vmatpush.bf16.msra.mxu0 %v530_v10  ;;  %v441_v50 = vor.u32 %v518_v48, %v438_v49  ;;  %v460_v53 = vld [vmem:[%s861_s0 + $0x70] sm:$0xf]  ;;  %v525_v54 = vld [vmem:[%s861_s0 + $0x74] sm:$0xf0]  ;;  %v429_v55 = vor.u32 %v517_v52, %v428_v51  ;;  %v344_v60 = vld [vmem:[%s864_s4] sm:$0x1] }
   0xf   :  { %538 = vmatpush.bf16.msra.mxu2 %v530_v10  ;;  %v461_v56 = vor.u32 %v525_v54, %v460_v53  ;;  %vm345_vm1 = vcmp.ne.f32.partialorder %v344_v60, 0.0  ;;  %v715_v62 = vld [vmem:[%s862_s2] ss:$0 sm:$0xff] }
  0x10   :  { %v362_v0 = vsel %vm345_vm1, 1, %v547_v63  ;;  %v720_v3 = vld [vmem:[%s863_s3] ss:$0 sm:$0xff] }
  0x11   :  { %v363_v4 = vperm.slane %v362_v0, 0 }
  0x12   :  { %210 = vmatpush.bf16.msra.mxu0 %v529_v11 }
  0x13   :  { %539 = vmatpush.bf16.msra.mxu2 %v529_v11  ;;  %vm724_vm2 = vcmp.eq.s32.totalorder %v363_v4, 1 }
  0x16   :  { %503 = vmatmul.msk.bf16.gmra.mxu1 %vm181_vm0, %v417_v14  ;;  %211 = vmatpush.bf16.msra.mxu0 %v528_v15 }
  0x17   :  { %540 = vmatpush.bf16.msra.mxu2 %v528_v15  ;;  %508 = vmatmul.msk.bf16.gmra.mxu3 %vm181_vm0, %v457_v19 }
  0x1a   :  { %212 = vmatpush.bf16.msra.mxu0 %v527_v16 }
  0x1b   :  { %541 = vmatpush.bf16.msra.mxu2 %v527_v16 }
  0x1e   :  { %213 = vmatpush.bf16.msra.mxu0 %v526_v20 }
  0x1f   :  { %542 = vmatpush.bf16.msra.mxu2 %v526_v20 }
  0x21   :  { %214 = vmatmul.bf16.vlgmr.msra.gmra.mxu0 %v405_v25 }
  0x22   :  { %234 = vmatmul.bf16.vlgmr.msra.gmra.mxu2 %v437_v26 }
  0x26   :  { %504 = vmatmul.msk.bf16.gmra.mxu1 %vm181_vm0, %v425_v29 }
  0x27   :  { %509 = vmatmul.msk.bf16.gmra.mxu3 %vm181_vm0, %v465_v32 }
  0x31   :  { %219 = vmatmul.bf16.gmra.mxu0 %v413_v37 }
  0x32   :  { %239 = vmatmul.bf16.gmra.mxu2 %v445_v38 }
  0x36   :  { %505 = vmatmul.msk.bf16.gmra.mxu1 %vm181_vm0, %v433_v41 }
  0x41   :  { %224 = vmatmul.bf16.gmra.mxu0 %v421_v46 }
  0x42   :  { %244 = vmatmul.bf16.gmra.mxu2 %v453_v47 }
  0x46   :  { %506 = vmatmul.msk.bf16.gmra.mxu1 %vm181_vm0, %v441_v50 }
  0x51   :  { %229 = vmatmul.bf16.gmra.mxu0 %v429_v55 }
  0x52   :  { %249 = vmatmul.bf16.gmra.mxu2 %v461_v56 }
  0x83   :  { %v264_v57 = vpop.f32.mrf.mxu1 }
  0x8a   :  { %v289_v17 = vpop.f32.mrf.mxu3 }
  0x8b   :  { %v266_v58 = vpop.f32.mrf.mxu1 }
  0x92   :  { %v291_v28 = vpop.f32.mrf.mxu3 }
  0x93   :  { %v269_v59 = vpop.f32.mrf.mxu1 }
  0x9a   :  { %v294_v45 = vpop.f32.mrf.mxu3 }
  0x9b   :  { %v271_v61 = vpop.f32.mrf.mxu1 }
  0x9e   :  { %v215_v1 = vpop.f32.mrf.mxu0 }
  0x9f   :  { %v265_v2 = vadd.f32 %v264_v57, %v215_v1 }
  0xa1   :  { %v308_v5 = vmul.f32 %v715_v62, %v265_v2 }
  0xa2   :  { %v296_v1 = vpop.f32.mrf.mxu3 }
  0xa3   :  { %v328_v6 = vadd.f32 %v720_v3, %v308_v5  ;;  %v274_v7 = vpop.f32.mrf.mxu1 }
  0xa5   :  { %v346_v9 = vmax.f32 %v328_v6, 0.0  ;;  %v235_v10 = vpop.f32.mrf.mxu2 }
  0xa6   :  { %v217_v11 = vpop.f32.mrf.mxu0 }
  0xa7   :  { %v365_v12 = vsel %vm724_vm2, %v346_v9, %v328_v6  ;;  %v267_v13 = vadd.f32 %v266_v58, %v217_v11 }
  0xa8   :  { %382 = vst.msk [vmem:[%s865_s5] sm:$0xff] %vm381_vm3, %v365_v12 }
  0xa9   :  { %v309_v14 = vmul.f32 %v715_v62, %v267_v13 }
  0xab   :  { %v329_v15 = vadd.f32 %v720_v3, %v309_v14  ;;  %v276_v16 = vpop.f32.mrf.mxu1 }
  0xad   :  { %v347_v18 = vmax.f32 %v329_v15, 0.0  ;;  %v237_v19 = vpop.f32.mrf.mxu2 }
  0xae   :  { %v220_v20 = vpop.f32.mrf.mxu0 }
  0xaf   :  { %v366_v21 = vsel %vm724_vm2, %v347_v18, %v329_v15  ;;  %v270_v22 = vadd.f32 %v269_v59, %v220_v20 }
  0xb0   :  { %383 = vst.msk [vmem:[%s865_s5 + $0x8] sm:$0xff] %vm381_vm3, %v366_v21 }
  0xb1   :  { %v310_v23 = vmul.f32 %v715_v62, %v270_v22 }
  0xb3   :  { %v330_v24 = vadd.f32 %v720_v3, %v310_v23  ;;  %v744_v25 = vpop.f32.mrf.mxu1 }
  0xb5   :  { %v348_v26 = vmax.f32 %v330_v24, 0.0  ;;  %v240_v27 = vpop.f32.mrf.mxu2 }
  0xb6   :  { %v290_v29 = vadd.f32 %v289_v17, %v240_v27  ;;  %v222_v30 = vpop.f32.mrf.mxu0 }
  0xb7   :  { %v367_v31 = vsel %vm724_vm2, %v348_v26, %v330_v24  ;;  %v272_v32 = vadd.f32 %v271_v61, %v222_v30  ;;  %v299_v26 = vpop.f32.mrf.mxu3 }
  0xb8   :  { %384 = vst.msk [vmem:[%s865_s5 + $0x10] sm:$0xff] %vm381_vm3, %v367_v31  ;;  %v318_v33 = vmul.f32 %v715_v62, %v290_v29 }
  0xb9   :  { %v311_v34 = vmul.f32 %v715_v62, %v272_v32 }
  0xba   :  { %v338_v35 = vadd.f32 %v720_v3, %v318_v33 }
  0xbb   :  { %v331_v36 = vadd.f32 %v720_v3, %v311_v34  ;;  %v756_v37 = vpop.f32.mrf.mxu1 }
  0xbc   :  { %v356_v38 = vmax.f32 %v338_v35, 0.0 }
  0xbd   :  { %v349_v39 = vmax.f32 %v331_v36, 0.0  ;;  %v242_v40 = vpop.f32.mrf.mxu2 }
  0xbe   :  { %v375_v41 = vsel %vm724_vm2, %v356_v38, %v338_v35  ;;  %v292_v42 = vadd.f32 %v291_v28, %v242_v40  ;;  %v225_v43 = vpop.f32.mrf.mxu0 }
  0xbf   :  { %392 = vst.msk [vmem:[%s865_s5 + $0x50] sm:$0xff] %vm381_vm3, %v375_v41  ;;  %v368_v44 = vsel %vm724_vm2, %v349_v39, %v331_v36  ;;  %v275_v46 = vadd.f32 %v274_v7, %v225_v43 }
  0xc0   :  { %385 = vst.msk [vmem:[%s865_s5 + $0x18] sm:$0xff] %vm381_vm3, %v368_v44  ;;  %v319_v47 = vmul.f32 %v715_v62, %v292_v42  ;;  %v301_v42 = vpop.f32.mrf.mxu3 }
  0xc1   :  { %v312_v48 = vmul.f32 %v715_v62, %v275_v46 }
  0xc2   :  { %v339_v49 = vadd.f32 %v720_v3, %v319_v47 }
  0xc3   :  { %v332_v50 = vadd.f32 %v720_v3, %v312_v48  ;;  %v284_v51 = vpop.f32.mrf.mxu1 }
  0xc4   :  { %v357_v52 = vmax.f32 %v339_v49, 0.0  ;;  %v285_v53 = vadd.f32 %v284_v51, %v235_v10 }
  0xc5   :  { %v350_v54 = vmax.f32 %v332_v50, 0.0  ;;  %v245_v55 = vpop.f32.mrf.mxu2 }
  0xc6   :  { %v376_v56 = vsel %vm724_vm2, %v357_v52, %v339_v49  ;;  %v316_v57 = vmul.f32 %v715_v62, %v285_v53  ;;  %v295_v58 = vadd.f32 %v294_v45, %v245_v55  ;;  %v227_v59 = vpop.f32.mrf.mxu0 }
  0xc7   :  { %393 = vst.msk [vmem:[%s865_s5 + $0x58] sm:$0xff] %vm381_vm3, %v376_v56  ;;  %v369_v60 = vsel %vm724_vm2, %v350_v54, %v332_v50  ;;  %v277_v61 = vadd.f32 %v276_v16, %v227_v59 }
  0xc8   :  { %386 = vst.msk [vmem:[%s865_s5 + $0x20] sm:$0xff] %vm381_vm3, %v369_v60  ;;  %v336_v63 = vadd.f32 %v720_v3, %v316_v57  ;;  %v320_v0 = vmul.f32 %v715_v62, %v295_v58 }
  0xc9   :  { %v313_v2 = vmul.f32 %v715_v62, %v277_v61 }
  0xca   :  { %v354_v4 = vmax.f32 %v336_v63, 0.0  ;;  %v340_v5 = vadd.f32 %v720_v3, %v320_v0 }
  0xcb   :  { %v333_v6 = vadd.f32 %v720_v3, %v313_v2  ;;  %v286_v7 = vpop.f32.mrf.mxu1 }
  0xcc   :  { %v373_v9 = vsel %vm724_vm2, %v354_v4, %v336_v63  ;;  %v358_v10 = vmax.f32 %v340_v5, 0.0  ;;  %v287_v11 = vadd.f32 %v286_v7, %v237_v19 }
  0xcd   :  { %390 = vst.msk [vmem:[%s865_s5 + $0x40] sm:$0xff] %vm381_vm3, %v373_v9  ;;  %v351_v12 = vmax.f32 %v333_v6, 0.0  ;;  %v247_v13 = vpop.f32.mrf.mxu2 }
  0xce   :  { %v377_v14 = vsel %vm724_vm2, %v358_v10, %v340_v5  ;;  %v317_v15 = vmul.f32 %v715_v62, %v287_v11  ;;  %v297_v16 = vadd.f32 %v296_v1, %v247_v13  ;;  %v230_v17 = vpop.f32.mrf.mxu0 }
  0xcf   :  { %394 = vst.msk [vmem:[%s865_s5 + $0x60] sm:$0xff] %vm381_vm3, %v377_v14  ;;  %v370_v18 = vsel %vm724_vm2, %v351_v12, %v333_v6  ;;  %v280_v19 = vadd.f32 %v744_v25, %v230_v17 }
  0xd0   :  { %387 = vst.msk [vmem:[%s865_s5 + $0x28] sm:$0xff] %vm381_vm3, %v370_v18  ;;  %v337_v20 = vadd.f32 %v720_v3, %v317_v15  ;;  %v321_v21 = vmul.f32 %v715_v62, %v297_v16 }
  0xd1   :  { %v314_v22 = vmul.f32 %v715_v62, %v280_v19 }
  0xd2   :  { %v355_v23 = vmax.f32 %v337_v20, 0.0  ;;  %v341_v24 = vadd.f32 %v720_v3, %v321_v21 }
  0xd3   :  { %v334_v27 = vadd.f32 %v720_v3, %v314_v22 }
  0xd4   :  { %v374_v25 = vsel %vm724_vm2, %v355_v23, %v337_v20  ;;  %v359_v28 = vmax.f32 %v341_v24, 0.0 }
  0xd5   :  { %391 = vst.msk [vmem:[%s865_s5 + $0x48] sm:$0xff] %vm381_vm3, %v374_v25  ;;  %v352_v29 = vmax.f32 %v334_v27, 0.0  ;;  %v250_v30 = vpop.f32.mrf.mxu2 }
  0xd6   :  { %v378_v31 = vsel %vm724_vm2, %v359_v28, %v341_v24  ;;  %v300_v32 = vadd.f32 %v299_v26, %v250_v30  ;;  %v232_v33 = vpop.f32.mrf.mxu0 }
  0xd7   :  { %395 = vst.msk [vmem:[%s865_s5 + $0x68] sm:$0xff] %vm381_vm3, %v378_v31  ;;  %v371_v34 = vsel %vm724_vm2, %v352_v29, %v334_v27  ;;  %v282_v35 = vadd.f32 %v756_v37, %v232_v33 }
  0xd8   :  { %388 = vst.msk [vmem:[%s865_s5 + $0x30] sm:$0xff] %vm381_vm3, %v371_v34  ;;  %v322_v36 = vmul.f32 %v715_v62, %v300_v32 }
  0xd9   :  { %v315_v38 = vmul.f32 %v715_v62, %v282_v35 }
  0xda   :  { %v342_v39 = vadd.f32 %v720_v3, %v322_v36 }
  0xdb   :  { %v335_v40 = vadd.f32 %v720_v3, %v315_v38 }
  0xdc   :  { %v360_v41 = vmax.f32 %v342_v39, 0.0 }
  0xdd   :  { %v353_v43 = vmax.f32 %v335_v40, 0.0  ;;  %v252_v44 = vpop.f32.mrf.mxu2 }
  0xde   :  { %v379_v37 = vsel %vm724_vm2, %v360_v41, %v342_v39  ;;  %v302_v45 = vadd.f32 %v301_v42, %v252_v44 }
  0xdf   :  { %396 = vst.msk [vmem:[%s865_s5 + $0x70] sm:$0xff] %vm381_vm3, %v379_v37  ;;  %v372_v46 = vsel %vm724_vm2, %v353_v43, %v335_v40 }
  0xe0   :  { %389 = vst.msk [vmem:[%s865_s5 + $0x38] sm:$0xff] %vm381_vm3, %v372_v46  ;;  %v323_v47 = vmul.f32 %v715_v62, %v302_v45 }
  0xe2   :  { %v343_v48 = vadd.f32 %v720_v3, %v323_v47 }
  0xe4   :  { %v361_v49 = vmax.f32 %v343_v48, 0.0 }
  0xe6   :  { %v380_v50 = vsel %vm724_vm2, %v361_v49, %v343_v48 }
  0xe7   :  { %397 = vst.msk [vmem:[%s865_s5 + $0x78] sm:$0xff] %vm381_vm3, %v380_v50 }

// kernel: resnet_forward.9
= control target key start
LH: loop header
LB: loop body
LE: loop exit
PB: predicated region body
PF: predicated region fallthrough
CT: control target
= control target key end

     0   :  { %vm203_vm0 = vcmask 261120   ;;  %v437_v42 = vmov 0   ;;  %s593_s1 = inlined_call_operand.vmem [shape: bf16[288,128], index: 1, kind: input, shape index: {}]   ;;  %s594_s0 = inlined_call_operand.vmem [shape: bf16[32,288], index: 0, kind: input, shape index: {}]   ;;  %s595_s2 = inlined_call_operand.vmem [shape: f32[1,128], index: 2, kind: input, shape index: {}]   ;;  %s596_s3 = inlined_call_operand.vmem [shape: f32[1,128], index: 3, kind: input, shape index: {}]   ;;  %s597_s4 = inlined_call_operand.vmem [shape: f32[1,128], index: 4, kind: input, shape index: {}]   ;;  %s598_s5 = inlined_call_operand.vmem [shape: f32[32,128], index: 5, kind: output, shape index: {}]  }
   0x1   :  { %v415_v0 = vld [vmem:[%s593_s1 + $0x38] sm:$0xff]  ;;  %v414_v2 = vld [vmem:[%s593_s1 + $0x30] sm:$0xff]  ;;  %v425_v4 = vld [vmem:[%s593_s1 + $0x88] sm:$0xff] }
   0x2   :  { %v423_v1 = vld [vmem:[%s593_s1 + $0x78] sm:$0xff]  ;;  %210 = vmatpush.bf16.msra.mxu0 %v415_v0  ;;  %v422_v3 = vld [vmem:[%s593_s1 + $0x70] sm:$0xff]  ;;  %426 = vmatpush.bf16.msra.mxu3 %v415_v0  ;;  %v424_v5 = vld [vmem:[%s593_s1 + $0x80] sm:$0xff] }
   0x3   :  { %229 = vmatpush.bf16.msra.mxu1 %v423_v1  ;;  %254 = vmatpush.bf16.msra.mxu2 %v425_v4  ;;  %v314_v6 = vld [vmem:[%s594_s0 + $0x8] sm:$0xf]  ;;  %v404_v7 = vld [vmem:[%s594_s0 + $0x10] sm:$0xf0]  ;;  %v412_v11 = vld [vmem:[%s593_s1 + $0x20] sm:$0xff] }
   0x4   :  { %v413_v8 = vld [vmem:[%s593_s1 + $0x28] sm:$0xff]  ;;  %v315_v10 = vor.u32 %v404_v7, %v314_v6  ;;  %v420_v12 = vld [vmem:[%s593_s1 + $0x60] sm:$0xff]  ;;  %v411_v13 = vld [vmem:[%s593_s1 + $0x18] sm:$0xff] }
   0x5   :  { %v421_v9 = vld [vmem:[%s593_s1 + $0x68] sm:$0xff]  ;;  %v419_v14 = vld [vmem:[%s593_s1 + $0x58] sm:$0xff]  ;;  %v410_v15 = vld [vmem:[%s593_s1 + $0x10] sm:$0xff] }
   0x6   :  { %211 = vmatpush.bf16.msra.mxu0 %v414_v2  ;;  %427 = vmatpush.bf16.msra.mxu3 %v414_v2  ;;  %v418_v16 = vld [vmem:[%s593_s1 + $0x50] sm:$0xff]  ;;  %v326_v17 = vld [vmem:[%s594_s0 + $0x20] sm:$0xf]  ;;  %v407_v18 = vld [vmem:[%s594_s0 + $0x28] sm:$0xf0] }
   0x7   :  { %230 = vmatpush.bf16.msra.mxu1 %v422_v3  ;;  %255 = vmatpush.bf16.msra.mxu2 %v424_v5  ;;  %v409_v19 = vld [vmem:[%s593_s1 + $0x8] sm:$0xff]  ;;  %v327_v21 = vor.u32 %v407_v18, %v326_v17  ;;  %v408_v22 = vld [vmem:[%s593_s1] sm:$0xff]  ;;  %v308_v27 = vld [vmem:[%s594_s0 + $0xc] sm:$0xf0] }
   0x8   :  { %v417_v20 = vld [vmem:[%s593_s1 + $0x48] sm:$0xff]  ;;  %v416_v23 = vld [vmem:[%s593_s1 + $0x40] sm:$0xff]  ;;  %v318_v28 = vld [vmem:[%s594_s0 + $0x18] sm:$0xf] }
   0x9   :  { %v306_v24 = vld [vmem:[%s594_s0] sm:$0xf]  ;;  %v403_v25 = vld [vmem:[%s594_s0 + $0x8] sm:$0xf0]  ;;  %v402_v26 = vld [vmem:[%s594_s0 + $0x4] sm:$0xf] }
   0xa   :  { %212 = vmatpush.bf16.msra.mxu0 %v413_v8  ;;  %428 = vmatpush.bf16.msra.mxu3 %v413_v8  ;;  %v406_v29 = vld [vmem:[%s594_s0 + $0x20] sm:$0xf0]  ;;  %v307_v30 = vor.u32 %v403_v25, %v306_v24  ;;  %v311_v31 = vor.u32 %v402_v26, %v308_v27  ;;  %v405_v33 = vld [vmem:[%s594_s0 + $0x1c] sm:$0xf]  ;;  %v320_v34 = vld [vmem:[%s594_s0 + $0x24] sm:$0xf0] }
   0xb   :  { %231 = vmatpush.bf16.msra.mxu1 %v421_v9  ;;  %400 = vmatmul.msk.bf16.vlgmr.msra.gmra.mxu2 %vm203_vm0, %v315_v10  ;;  %v319_v32 = vor.u32 %v406_v29, %v318_v28  ;;  %v323_v35 = vor.u32 %v405_v33, %v320_v34  ;;  %v283_v36 = vld [vmem:[%s597_s4] sm:$0x1] }
   0xc   :  { %vm284_vm1 = vcmp.ne.f32.partialorder %v283_v36, 0.0  ;;  %v435_v41 = vld [vmem:[%s595_s2] ss:$0 sm:$0xff] }
   0xd   :  { %v289_v43 = vsel %vm284_vm1, 1, %v437_v42  ;;  %v436_v45 = vld [vmem:[%s596_s3] ss:$0 sm:$0xff] }
   0xe   :  { %213 = vmatpush.bf16.msra.mxu0 %v412_v11  ;;  %429 = vmatpush.bf16.msra.mxu3 %v412_v11  ;;  %v290_v46 = vperm.slane %v289_v43, 0 }
   0xf   :  { %232 = vmatpush.bf16.msra.mxu1 %v420_v12 }
  0x10   :  { %vm569_vm2 = vcmp.eq.s32.totalorder %v290_v46, 1 }
  0x12   :  { %214 = vmatpush.bf16.msra.mxu0 %v411_v13  ;;  %430 = vmatpush.bf16.msra.mxu3 %v411_v13 }
  0x13   :  { %233 = vmatpush.bf16.msra.mxu1 %v419_v14 }
  0x16   :  { %215 = vmatpush.bf16.msra.mxu0 %v410_v15  ;;  %431 = vmatpush.bf16.msra.mxu3 %v410_v15 }
  0x17   :  { %234 = vmatpush.bf16.msra.mxu1 %v418_v16 }
  0x1a   :  { %216 = vmatpush.bf16.msra.mxu0 %v409_v19  ;;  %432 = vmatpush.bf16.msra.mxu3 %v409_v19 }
  0x1b   :  { %235 = vmatpush.bf16.msra.mxu1 %v417_v20  ;;  %401 = vmatmul.msk.bf16.gmra.mxu2 %vm203_vm0, %v327_v21 }
  0x1e   :  { %217 = vmatpush.bf16.msra.mxu0 %v408_v22  ;;  %433 = vmatpush.bf16.msra.mxu3 %v408_v22 }
  0x1f   :  { %236 = vmatpush.bf16.msra.mxu1 %v416_v23 }
  0x21   :  { %218 = vmatmul.bf16.vlgmr.msra.gmra.mxu0 %v307_v30  ;;  %223 = vmatmul.bf16.vlgmr.msra.gmra.mxu3 %v319_v32 }
  0x22   :  { %237 = vmatmul.bf16.vlgmr.msra.gmra.mxu1 %v311_v31 }
  0x32   :  { %242 = vmatmul.bf16.gmra.mxu1 %v323_v35 }
  0x8e   :  { %v257_v37 = vpop.f32.mrf.mxu2 }
  0x96   :  { %v259_v48 = vpop.f32.mrf.mxu2 }
  0x9e   :  { %v219_v38 = vpop.f32.mrf.mxu0  ;;  %v262_v60 = vpop.f32.mrf.mxu2 }
  0x9f   :  { %v238_v39 = vpop.f32.mrf.mxu1 }
  0xa0   :  { %v239_v40 = vadd.f32 %v238_v39, %v219_v38 }
  0xa2   :  { %v258_v44 = vadd.f32 %v257_v37, %v239_v40 }
  0xa4   :  { %v271_v47 = vmul.f32 %v435_v41, %v258_v44  ;;  %v224_v58 = vpop.f32.mrf.mxu3 }
  0xa6   :  { %v279_v49 = vadd.f32 %v436_v45, %v271_v47  ;;  %v221_v51 = vpop.f32.mrf.mxu0  ;;  %v264_v8 = vpop.f32.mrf.mxu2 }
  0xa7   :  { %v240_v52 = vpop.f32.mrf.mxu1 }
  0xa8   :  { %v285_v53 = vmax.f32 %v279_v49, 0.0  ;;  %v241_v54 = vadd.f32 %v240_v52, %v221_v51 }
  0xaa   :  { %v292_v55 = vsel %vm569_vm2, %v285_v53, %v279_v49  ;;  %v260_v56 = vadd.f32 %v259_v48, %v241_v54 }
  0xab   :  { %296 = vst [vmem:[%s598_s5] sm:$0xff] %v292_v55 }
  0xac   :  { %v272_v57 = vmul.f32 %v435_v41, %v260_v56  ;;  %v226_v4 = vpop.f32.mrf.mxu3 }
  0xae   :  { %v280_v59 = vadd.f32 %v436_v45, %v272_v57 }
  0xaf   :  { %v243_v61 = vpop.f32.mrf.mxu1 }
  0xb0   :  { %v286_v62 = vmax.f32 %v280_v59, 0.0  ;;  %v244_v63 = vadd.f32 %v243_v61, %v224_v58 }
  0xb2   :  { %v293_v0 = vsel %vm569_vm2, %v286_v62, %v280_v59  ;;  %v263_v1 = vadd.f32 %v262_v60, %v244_v63 }
  0xb3   :  { %297 = vst [vmem:[%s598_s5 + $0x8] sm:$0xff] %v293_v0 }
  0xb4   :  { %v273_v2 = vmul.f32 %v435_v41, %v263_v1 }
  0xb6   :  { %v281_v3 = vadd.f32 %v436_v45, %v273_v2 }
  0xb7   :  { %v245_v5 = vpop.f32.mrf.mxu1 }
  0xb8   :  { %v287_v6 = vmax.f32 %v281_v3, 0.0  ;;  %v246_v7 = vadd.f32 %v245_v5, %v226_v4 }
  0xba   :  { %v294_v9 = vsel %vm569_vm2, %v287_v6, %v281_v3  ;;  %v265_v10 = vadd.f32 %v264_v8, %v246_v7 }
  0xbb   :  { %298 = vst [vmem:[%s598_s5 + $0x10] sm:$0xff] %v294_v9 }
  0xbc   :  { %v274_v11 = vmul.f32 %v435_v41, %v265_v10 }
  0xbe   :  { %v282_v12 = vadd.f32 %v436_v45, %v274_v11 }
  0xc0   :  { %v288_v13 = vmax.f32 %v282_v12, 0.0 }
  0xc2   :  { %v295_v14 = vsel %vm569_vm2, %v288_v13, %v282_v12 }
  0xc3   :  { %299 = vst [vmem:[%s598_s5 + $0x18] sm:$0xff] %v295_v14 }

// kernel: resnet_forward.8
= control target key start
LH: loop header
LB: loop body
LE: loop exit
PB: predicated region body
PF: predicated region fallthrough
CT: control target
= control target key end

     0   :  { %s4394_s21 = smov 0   ;;  %s5725_s0 = inlined_call_operand.vmem [shape: f32[2,136,32], index: 0, kind: input, shape index: {}]   ;;  %s5726_s1 = inlined_call_operand.vmem [shape: f32[2,136,32], index: 1, kind: input, shape index: {}]   ;;  %s5727_s2 = inlined_call_operand.vmem [shape: f32[104,1], index: 2, kind: input, shape index: {}]   ;;  %s5728_s3 = inlined_call_operand.vmem [shape: bf16[288,32], index: 3, kind: input, shape index: {}]   ;;  %s5729_s4 = inlined_call_operand.vmem [shape: f32[1,32], index: 4, kind: input, shape index: {}]   ;;  %s5730_s5 = inlined_call_operand.vmem [shape: f32[1,32], index: 5, kind: input, shape index: {}]   ;;  %s5731_s6 = inlined_call_operand.vmem [shape: bf16[288,32], index: 6, kind: input, shape index: {}]   ;;  %s5732_s7 = inlined_call_operand.vmem [shape: f32[1,32], index: 7, kind: input, shape index: {}]   ;;  %s5733_s8 = inlined_call_operand.vmem [shape: f32[1,32], index: 8, kind: input, shape index: {}]   ;;  %s5734_s9 = inlined_call_operand.vmem [shape: bf16[288,32], index: 9, kind: input, shape index: {}]   ;;  %s5735_s10 = inlined_call_operand.vmem [shape: f32[1,32], index: 10, kind: input, shape index: {}]   ;;  %s5736_s11 = inlined_call_operand.vmem [shape: f32[1,32], index: 11, kind: input, shape index: {}]   ;;  %s5737_s12 = inlined_call_operand.vmem [shape: f32[2,136,32], index: 12, kind: output, shape index: {}]  }
   0x1 LB: > { %s3824_s22 = sadd.s32 4294967295, %s4325_s21   ;;  %p3828_p0 = scmp.ge.s32.totalorder %s4325_s21, 1  ;;  %s4325_s21 = sphi %s4394_s21, %s22_s21  }
   0x2   : > { %p372_p1 = scmp.lt.s32.totalorder %s4325_s21, 3 }
   0x4   : > { %p373_p2 = pnand %p3828_p0, %p372_p1 }
   0x6   : > { %376 = sbr.rel (%p373_p2) target bundleno = 1221 (0x4c5), region = 68 }
   0xb   : > { %v4242_v0 = vld [vmem:[%s5728_s3 + $0x18] sm:$0xff]  ;;  %v4244_v1 = vld [vmem:[%s5728_s3 + $0x28] sm:$0xff]  ;;  %v4241_v2 = vld [vmem:[%s5728_s3 + $0x10] sm:$0xff]  ;;  %p419_p3 = scmp.lt.s32.totalorder %s3824_s22, 1  ;;  %vm448_vm0 = vcmask 261120  }
   0xc   : > { %v4240_v3 = vld [vmem:[%s5728_s3 + $0x8] sm:$0xff]  ;;  %v4243_v4 = vld [vmem:[%s5728_s3 + $0x20] sm:$0xff]  ;;  %v4246_v5 = vld [vmem:[%s5728_s3 + $0x38] sm:$0xff]  ;;  %4293 = vmatpush.bf16.msra.mxu3 %v4242_v0  ;;  %4297 = vmatpush.bf16.msra.mxu2 %v4244_v1 }
   0xd   : > { %s5807_s22 = smov (!%p419_p3, %s3824_s22), 1  ;;  %v4239_v6 = vld [vmem:[%s5728_s3] sm:$0xff]  ;;  %4295 = vmatpush.bf16.msra.mxu1 %v4240_v3  ;;  %544 = vmatpush.bf16.msra.mxu0 %v4242_v0  ;;  %v4245_v31 = vld [vmem:[%s5728_s3 + $0x30] sm:$0xff]  ;;  %v4248_v53 = vld [vmem:[%s5728_s3 + $0x48] sm:$0xff] }
   0xe   : > { %s4423_s19 = smul.u32 136, %s5807_s22  ;;  %v4252_v54 = vld [vmem:[%s5728_s3 + $0x68] sm:$0xff]  ;;  %v4247_v55 = vld [vmem:[%s5728_s3 + $0x40] sm:$0xff] }
  0x10   : > { %4294 = vmatpush.bf16.msra.mxu3 %v4241_v2  ;;  %4298 = vmatpush.bf16.msra.mxu2 %v4243_v4  ;;  %s4429_s24 = scalar_lea.vmem %s5725_s0, %s4423_s19 }
  0x11   : > { %v483_v7 = vld [vmem:[%s4429_s24 + $0x16] sm:$0xff]  ;;  %v484_v8 = vld [vmem:[%s4429_s24 + $0x1e] sm:$0xff]  ;;  %4296 = vmatpush.bf16.msra.mxu1 %v4239_v6  ;;  %545 = vmatpush.bf16.msra.mxu0 %v4241_v2  ;;  %v481_v16 = vld [vmem:[%s4429_s24 + $0x6] sm:$0xff] }
  0x12   : > { %v4434_v9 = vld [vmem:[%s4429_s24 + $0x17] sm:$0xff]  ;;  %v495_v10 = vpack.c.bf16 %v484_v8, %v483_v7  ;;  %v4437_v11 = vld [vmem:[%s4429_s24 + $0x1f] sm:$0xff]  ;;  %v482_v17 = vld [vmem:[%s4429_s24 + $0xe] sm:$0xff] }
  0x13   : > { %v459_v12 = vld [vmem:[%s4429_s24 + $0x15] sm:$0xff]  ;;  %v460_v13 = vld [vmem:[%s4429_s24 + $0x1d] sm:$0xff]  ;;  %v671_v14 = vpack.c.bf16 %v4437_v11, %v4434_v9  ;;  %v494_v18 = vpack.c.bf16 %v482_v17, %v481_v16  ;;  %v485_v19 = vld [vmem:[%s4429_s24 + $0x26] sm:$0xff] }
  0x14   : > { %833 = vmatpush.bf16.msrb.mxu3 %v4246_v5  ;;  %v471_v15 = vpack.c.bf16 %v460_v13, %v459_v12  ;;  %v486_v20 = vld [vmem:[%s4429_s24 + $0x2e] sm:$0xff]  ;;  %v461_v23 = vld [vmem:[%s4429_s24 + $0x25] sm:$0xff]  ;;  %v487_v32 = vld [vmem:[%s4429_s24 + $0x36] sm:$0xff]  ;;  %1172 = vmatpush.bf16.msrb.mxu2 %v4252_v54 }
  0x15   : > { %620 = vmatpush.bf16.msrb.mxu0 %v4240_v3  ;;  %3841 = vmatmul.msk.bf16.vlgmr.msra.gmra.mxu3 %vm448_vm0, %v495_v10  ;;  %v4452_v21 = vld [vmem:[%s4429_s24 + $0x27] sm:$0xff]  ;;  %v4455_v22 = vld [vmem:[%s4429_s24 + $0x2f] sm:$0xff]  ;;  %v496_v25 = vpack.c.bf16 %v486_v20, %v485_v19  ;;  %v488_v33 = vld [vmem:[%s4429_s24 + $0x3e] sm:$0xff] }
  0x16   : > { %3871 = vmatmul.msk.bf16.vlgmr.msra.gmra.mxu2 %vm448_vm0, %v671_v14  ;;  %3856 = vmatmul.msk.bf16.vlgmr.msra.gmra.mxu1 %vm448_vm0, %v471_v15  ;;  %v462_v24 = vld [vmem:[%s4429_s24 + $0x2d] sm:$0xff]  ;;  %v457_v26 = vld [vmem:[%s4429_s24 + $0x5] sm:$0xff]  ;;  %v672_v28 = vpack.c.bf16 %v4455_v22, %v4452_v21  ;;  %v4473_v34 = vld [vmem:[%s4429_s24 + $0x37] sm:$0xff]  ;;  %v497_v38 = vpack.c.bf16 %v488_v33, %v487_v32 }
  0x17   : > { %3840 = vmatmul.msk.bf16.vlgmr.msra.gmra.mxu0 %vm448_vm0, %v494_v18  ;;  %v458_v27 = vld [vmem:[%s4429_s24 + $0xd] sm:$0xff]  ;;  %v472_v29 = vpack.c.bf16 %v462_v24, %v461_v23  ;;  %v4476_v35 = vld [vmem:[%s4429_s24 + $0x3f] sm:$0xff]  ;;  %v463_v36 = vld [vmem:[%s4429_s24 + $0x35] sm:$0xff] }
  0x18   : > { %v470_v30 = vpack.c.bf16 %v458_v27, %v457_v26  ;;  %834 = vmatpush.bf16.msrb.mxu3 %v4245_v31  ;;  %v464_v37 = vld [vmem:[%s4429_s24 + $0x3d] sm:$0xff]  ;;  %v657_v39 = vld [vmem:[%s4429_s24 + $0x7] sm:$0xff]  ;;  %v4482_v40 = vld [vmem:[%s4429_s24 + $0xf] sm:$0xff]  ;;  %v673_v41 = vpack.c.bf16 %v4476_v35, %v4473_v34 }
  0x19   : > { %621 = vmatpush.bf16.msrb.mxu0 %v4239_v6  ;;  %v473_v42 = vpack.c.bf16 %v464_v37, %v463_v36  ;;  %v670_v43 = vpack.c.bf16 %v4482_v40, %v657_v39  ;;  %v489_v44 = vld [vmem:[%s4429_s24 + $0x46] sm:$0xff]  ;;  %v490_v45 = vld [vmem:[%s4429_s24 + $0x4e] sm:$0xff]  ;;  %v491_v56 = vld [vmem:[%s4429_s24 + $0x56] sm:$0xff] }
  0x1a   : > { %v4494_v46 = vld [vmem:[%s4429_s24 + $0x47] sm:$0xff]  ;;  %v4497_v47 = vld [vmem:[%s4429_s24 + $0x4f] sm:$0xff]  ;;  %v498_v50 = vpack.c.bf16 %v490_v45, %v489_v44  ;;  %v492_v57 = vld [vmem:[%s4429_s24 + $0x5e] sm:$0xff] }
  0x1b   : > { %v465_v48 = vld [vmem:[%s4429_s24 + $0x45] sm:$0xff]  ;;  %v466_v49 = vld [vmem:[%s4429_s24 + $0x4d] sm:$0xff]  ;;  %v674_v51 = vpack.c.bf16 %v4497_v47, %v4494_v46  ;;  %v4518_v58 = vld [vmem:[%s4429_s24 + $0x57] sm:$0xff]  ;;  %v499_v62 = vpack.c.bf16 %v492_v57, %v491_v56 }
  0x1c   : > { %v474_v52 = vpack.c.bf16 %v466_v49, %v465_v48  ;;  %v4521_v59 = vld [vmem:[%s4429_s24 + $0x5f] sm:$0xff]  ;;  %v467_v60 = vld [vmem:[%s4429_s24 + $0x55] sm:$0xff]  ;;  %v4256_v8 = vld [vmem:[%s5728_s3 + $0x88] sm:$0xff] }
  0x1d   : > { %720 = vmatpush.bf16.msra.mxu0 %v4244_v1  ;;  %v468_v61 = vld [vmem:[%s4429_s24 + $0x5d] sm:$0xff]  ;;  %v675_v63 = vpack.c.bf16 %v4521_v59, %v4518_v58  ;;  %v883_v1 = vld [vmem:[%s4429_s24 + $0x10] sm:$0xff]  ;;  %v493_v10 = vld [vmem:[%s4429_s24 + $0x66] sm:$0xff] }
  0x1e   : > { %v475_v0 = vpack.c.bf16 %v468_v61, %v467_v60  ;;  %v884_v2 = vld [vmem:[%s4429_s24 + $0x18] sm:$0xff]  ;;  %v4251_v6 = vld [vmem:[%s5728_s3 + $0x60] sm:$0xff]  ;;  %v4249_v7 = vld [vmem:[%s5728_s3 + $0x50] sm:$0xff]  ;;  %v500_v14 = vpack.c.bf16 %v493_v10, %v493_v10 }
  0x1f   : > { %v896_v3 = vpack.c.bf16 %v884_v2, %v883_v1  ;;  %v4250_v5 = vld [vmem:[%s5728_s3 + $0x58] sm:$0xff]  ;;  %1173 = vmatpush.bf16.msrb.mxu2 %v4251_v6  ;;  %v4550_v12 = vld [vmem:[%s4429_s24 + $0x67] sm:$0xff]  ;;  %v891_v44 = vld [vmem:[%s4429_s24 + $0x50] sm:$0xff] }
  0x20   : > { %1059 = vmatpush.bf16.msrb.mxu1 %v4250_v5  ;;  %v469_v13 = vld [vmem:[%s4429_s24 + $0x65] sm:$0xff]  ;;  %v676_v15 = vpack.c.bf16 %v4550_v12, %v4550_v12  ;;  %v1109_v20 = vld [vmem:[%s4429_s24 + $0x19] sm:$0xff]  ;;  %v996_v24 = vld [vmem:[%s4429_s24 + $0x11] sm:$0xff] }
  0x21   : > { %721 = vmatpush.bf16.msra.mxu0 %v4243_v4  ;;  %v4254_v4 = vld [vmem:[%s5728_s3 + $0x78] sm:$0xff]  ;;  %v476_v16 = vpack.c.bf16 %v469_v13, %v469_v13  ;;  %v885_v17 = vld [vmem:[%s4429_s24 + $0x20] sm:$0xff]  ;;  %v886_v18 = vld [vmem:[%s4429_s24 + $0x28] sm:$0xff]  ;;  %v1009_v27 = vpack.c.bf16 %v1109_v20, %v996_v24 }
  0x22   : > { %1285 = vmatpush.bf16.msra.mxu3 %v4254_v4  ;;  %v897_v19 = vpack.c.bf16 %v886_v18, %v885_v17  ;;  %v1110_v23 = vld [vmem:[%s4429_s24 + $0x21] sm:$0xff]  ;;  %v1111_v31 = vld [vmem:[%s4429_s24 + $0x29] sm:$0xff]  ;;  %v1112_v32 = vld [vmem:[%s4429_s24 + $0x31] sm:$0xff] }
  0x23   : > { %v1122_v26 = vpack.c.bf16 %v1110_v23, %v1109_v20  ;;  %v1123_v33 = vpack.c.bf16 %v1112_v32, %v1111_v31  ;;  %v1010_v36 = vpack.c.bf16 %v1111_v31, %v1110_v23  ;;  %v889_v37 = vld [vmem:[%s4429_s24 + $0x40] sm:$0xff]  ;;  %v892_v45 = vld [vmem:[%s4429_s24 + $0x58] sm:$0xff]  ;;  %v1115_v56 = vld [vmem:[%s4429_s24 + $0x49] sm:$0xff]  ;;  %v787_v20 = vpack.c.bf16 %v4518_v58, %v4497_v47 }
  0x24   : > { %1060 = vmatpush.bf16.msrb.mxu1 %v4249_v7  ;;  %v900_v49 = vpack.c.bf16 %v892_v45, %v891_v44  ;;  %v1116_v57 = vld [vmem:[%s4429_s24 + $0x51] sm:$0xff]  ;;  %v893_v2 = vld [vmem:[%s4429_s24 + $0x60] sm:$0xff] }
  0x25   : > { %3842 = vmatmul.msk.bf16.gmra.mxu3 %vm448_vm0, %v496_v25  ;;  %v783_v25 = vpack.c.bf16 %v4434_v9, %v4482_v40  ;;  %v784_v9 = vpack.c.bf16 %v4452_v21, %v4437_v11  ;;  %v4253_v40 = vld [vmem:[%s5728_s3 + $0x70] sm:$0xff]  ;;  %v1113_v11 = vld [vmem:[%s4429_s24 + $0x39] sm:$0xff]  ;;  %v1114_v21 = vld [vmem:[%s4429_s24 + $0x41] sm:$0xff] }
  0x26   : > { %3872 = vmatmul.msk.bf16.gmra.mxu2 %vm448_vm0, %v672_v28  ;;  %3857 = vmatmul.msk.bf16.gmra.mxu1 %vm448_vm0, %v472_v29  ;;  %v887_v28 = vld [vmem:[%s4429_s24 + $0x30] sm:$0xff]  ;;  %v888_v29 = vld [vmem:[%s4429_s24 + $0x38] sm:$0xff]  ;;  %v1012_v1 = vpack.c.bf16 %v1115_v56, %v1114_v21  ;;  %v1118_v17 = vld [vmem:[%s4429_s24 + $0x61] sm:$0xff] }
  0x27   : > { %3855 = vmatmul.msk.bf16.vlgmr.msrb.gmra.mxu0 %vm448_vm0, %v470_v30  ;;  %v898_v30 = vpack.c.bf16 %v888_v29, %v887_v28  ;;  %1286 = vmatpush.bf16.msra.mxu3 %v4253_v40  ;;  %v435_v40 = vld [vmem:[%s5727_s2] sm:$0xff] }
  0x28   : > { %946 = vmatpush.bf16.msrb.mxu0 %v4248_v53 }
  0x2c   : > { %947 = vmatpush.bf16.msrb.mxu0 %v4247_v55 }
  0x35   : > { %3843 = vmatmul.msk.bf16.gmra.mxu3 %vm448_vm0, %v497_v38  ;;  %v890_v38 = vld [vmem:[%s4429_s24 + $0x48] sm:$0xff] }
  0x36   : > { %3873 = vmatmul.msk.bf16.gmra.mxu2 %vm448_vm0, %v673_v41  ;;  %3858 = vmatmul.msk.bf16.gmra.mxu1 %vm448_vm0, %v473_v42  ;;  %v899_v39 = vpack.c.bf16 %v890_v38, %v889_v37  ;;  %v785_v41 = vpack.c.bf16 %v4473_v34, %v4455_v22  ;;  %v1124_v42 = vpack.c.bf16 %v1114_v21, %v1113_v11 }
  0x37   : > { %3870 = vmatmul.msk.bf16.vlgmr.msra.gmra.mxu0 %vm448_vm0, %v670_v43  ;;  %v1011_v43 = vpack.c.bf16 %v1113_v11, %v1112_v32  ;;  %v788_v38 = vpack.c.bf16 %v4550_v12, %v4521_v59 }
  0x38   : > { %1398 = vmatpush.bf16.msra.mxu0 %v4256_v8 }
  0x45   : > { %3844 = vmatmul.msk.bf16.gmra.mxu3 %vm448_vm0, %v498_v50 }
  0x46   : > { %3874 = vmatmul.msk.bf16.gmra.mxu2 %vm448_vm0, %v674_v51  ;;  %3859 = vmatmul.msk.bf16.gmra.mxu1 %vm448_vm0, %v474_v52  ;;  %v4255_v51 = vld [vmem:[%s5728_s3 + $0x80] sm:$0xff] }
  0x47   : > { %3900 = vmatmul.msk.bf16.vlgmr.msrb.gmra.mxu0 %vm448_vm0, %v896_v3  ;;  %v894_v3 = vld [vmem:[%s4429_s24 + $0x68] sm:$0xff] }
  0x48   : > { %1399 = vmatpush.bf16.msra.mxu0 %v4255_v51  ;;  %v901_v6 = vpack.c.bf16 %v894_v3, %v893_v2 }
  0x55   : > { %3845 = vmatmul.msk.bf16.gmra.mxu3 %vm448_vm0, %v499_v62 }
  0x56   : > { %3875 = vmatmul.msk.bf16.gmra.mxu2 %vm448_vm0, %v675_v63  ;;  %3860 = vmatmul.msk.bf16.gmra.mxu1 %vm448_vm0, %v475_v0  ;;  %v786_v63 = vpack.c.bf16 %v4494_v46, %v4476_v35  ;;  %v1125_v0 = vpack.c.bf16 %v1116_v57, %v1115_v56 }
  0x57   : > { %3901 = vmatmul.msk.bf16.gmra.mxu0 %vm448_vm0, %v897_v19 }
  0x65   : > { %3846 = vmatmul.msk.bf16.gmra.mxu3 %vm448_vm0, %v500_v14 }
  0x66   : > { %3876 = vmatmul.msk.bf16.gmra.mxu2 %vm448_vm0, %v676_v15  ;;  %3861 = vmatmul.msk.bf16.gmra.mxu1 %vm448_vm0, %v476_v16  ;;  %v1117_v16 = vld [vmem:[%s4429_s24 + $0x59] sm:$0xff] }
  0x67   : > { %3902 = vmatmul.msk.bf16.gmra.mxu0 %vm448_vm0, %v898_v30  ;;  %v1126_v23 = vpack.c.bf16 %v1118_v17, %v1117_v16  ;;  %v1013_v24 = vpack.c.bf16 %v1117_v16, %v1116_v57  ;;  %v1222_v16 = vld [vmem:[%s4429_s24 + $0x1a] sm:$0xff] }
  0x75   : > { %3885 = vmatmul.msk.bf16.vlgmr.msrb.gmra.mxu3 %vm448_vm0, %v783_v25  ;;  %v895_v25 = vld [vmem:[%s4429_s24 + $0x70] sm:$0xff] }
  0x76   : > { %3930 = vmatmul.msk.bf16.vlgmr.msrb.gmra.mxu2 %vm448_vm0, %v1122_v26  ;;  %3915 = vmatmul.msk.bf16.vlgmr.msrb.gmra.mxu1 %vm448_vm0, %v1009_v27  ;;  %v902_v27 = vpack.c.bf16 %v895_v25, %v895_v25  ;;  %v438_v25 = vld [vmem:[%s5727_s2 + $0x18] sm:$0xff] }
  0x77   : > { %3903 = vmatmul.msk.bf16.gmra.mxu0 %vm448_vm0, %v899_v39  ;;  %v4327_v39 = vmov 0  }
  0x78   : > { %4310 = vset.pattern.permute.xlu0 %v4327_v39  ;;  %4311 = vset.pattern.permute.xlu1 %v4327_v39 }
  0x79   : > { %1523 = vperm.xlu0 %4310, %v435_v40   ;;  %4312 = vset.pattern.permute.xlu2 %v4327_v39  ;;  %v442_v39 = vld [vmem:[%s5727_s2 + $0x38] sm:$0xff] }
  0x85   : > { %3886 = vmatmul.msk.bf16.gmra.mxu3 %vm448_vm0, %v784_v9  ;;  %v1119_v9 = vld [vmem:[%s4429_s24 + $0x69] sm:$0xff] }
  0x86   : > { %3931 = vmatmul.msk.bf16.gmra.mxu2 %vm448_vm0, %v1123_v33  ;;  %3916 = vmatmul.msk.bf16.gmra.mxu1 %vm448_vm0, %v1010_v36  ;;  %v1120_v33 = vld [vmem:[%s4429_s24 + $0x71] sm:$0xff]  ;;  %v1014_v21 = vpack.c.bf16 %v1119_v9, %v1118_v17  ;;  %v1223_v17 = vld [vmem:[%s4429_s24 + $0x22] sm:$0xff] }
  0x87   : > { %3904 = vmatmul.msk.bf16.gmra.mxu0 %vm448_vm0, %v900_v49  ;;  %v1127_v11 = vpack.c.bf16 %v1120_v33, %v1119_v9 }
  0x93   : > { %v628_v48 = vpop.f32.mrf.mxu1 }
  0x94   : > { %v547_v50 = vpop.f32.mrf.mxu0 }
  0x95   : > { %3887 = vmatmul.msk.bf16.gmra.mxu3 %vm448_vm0, %v785_v41  ;;  %v1335_v41 = vld [vmem:[%s4429_s24 + $0x1b] sm:$0xff] }
  0x96   : > { %3932 = vmatmul.msk.bf16.gmra.mxu2 %vm448_vm0, %v1124_v42  ;;  %3917 = vmatmul.msk.bf16.gmra.mxu1 %vm448_vm0, %v1011_v43  ;;  %v1336_v43 = vld [vmem:[%s4429_s24 + $0x23] sm:$0xff] }
  0x97   : > { %3905 = vmatmul.msk.bf16.gmra.mxu0 %vm448_vm0, %v901_v6  ;;  %v1348_v44 = vpack.c.bf16 %v1336_v43, %v1335_v41  ;;  %v1224_v41 = vld [vmem:[%s4429_s24 + $0x2a] sm:$0xff] }
  0x98   : > { %v552_v22 = vpop.f32.mrf.mxu3 }
  0x99   : > { %v629_v34 = vadd.f32 %v628_v48, %v552_v22  ;;  %v728_v52 = vpop.f32.mrf.mxu2  ;;  %v436_v48 = vld [vmem:[%s5727_s2 + $0x8] sm:$0xff] }
  0x9a   : > { %1528 = vperm.xlu0 %4310, %v436_v48   ;;  %v782_v22 = vld [vmem:[%s4429_s24 + $0x6f] sm:$0xff] }
  0x9b   : > { %v4598_v53 = vadd.f32 %v728_v52, %v629_v34  ;;  %v630_v54 = vpop.f32.mrf.mxu1  ;;  %v1121_v34 = vld [vmem:[%s4429_s24 + $0x79] sm:$0xff]  ;;  %v789_v57 = vpack.c.bf16 %v782_v22, %v782_v22  ;;  %v1341_v22 = vld [vmem:[%s4429_s24 + $0x4b] sm:$0xff] }
  0x9c   : > { %v4600_v55 = vpop.f32.mrf.mxu0 }
  0xa0   : > { %v554_v60 = vpop.f32.mrf.mxu3 }
  0xa1   : > { %v631_v61 = vadd.f32 %v630_v54, %v554_v60  ;;  %v730_v62 = vpop.f32.mrf.mxu2  ;;  %v441_v54 = vld [vmem:[%s5727_s2 + $0x30] sm:$0xff]  ;;  %v1128_v60 = vpack.c.bf16 %v1121_v34, %v1121_v34 }
  0xa2   : > { %1553 = vperm.xlu0 %4310, %v441_v54   ;;  %v1342_v54 = vld [vmem:[%s4429_s24 + $0x53] sm:$0xff] }
  0xa3   : > { %v4608_v4 = vadd.f32 %v730_v62, %v631_v61  ;;  %v633_v5 = vpop.f32.mrf.mxu1  ;;  %v1015_v61 = vpack.c.bf16 %v1120_v33, %v1120_v33 }
  0xa4   : > { %v623_v7 = vpop.f32.mrf.mxu0 }
  0xa5   : > { %3888 = vmatmul.msk.bf16.gmra.mxu3 %vm448_vm0, %v786_v63  ;;  %v624_v35 = vadd.f32 %v623_v7, %v547_v50  ;;  %v1337_v63 = vld [vmem:[%s4429_s24 + $0x2b] sm:$0xff] }
  0xa6   : > { %3933 = vmatmul.msk.bf16.gmra.mxu2 %vm448_vm0, %v1125_v0  ;;  %3918 = vmatmul.msk.bf16.gmra.mxu1 %vm448_vm0, %v1012_v1  ;;  %v1338_v0 = vld [vmem:[%s4429_s24 + $0x33] sm:$0xff] }
  0xa7   : > { %3906 = vmatmul.msk.bf16.gmra.mxu0 %vm448_vm0, %v902_v27  ;;  %v1349_v2 = vpack.c.bf16 %v1338_v0, %v1337_v63  ;;  %v437_v7 = vld [vmem:[%s5727_s2 + $0x10] sm:$0xff] }
  0xa8   : > { %v557_v46 = vpop.f32.mrf.mxu3  ;;  %1533 = vperm.xlu1 %4311, %v437_v7   ;;  %v1227_v7 = vld [vmem:[%s4429_s24 + $0x42] sm:$0xff] }
  0xa9   : > { %v634_v8 = vadd.f32 %v633_v5, %v557_v46  ;;  %v733_v10 = vpop.f32.mrf.mxu2 }
  0xab   : > { %v4614_v13 = vadd.f32 %v733_v10, %v634_v8  ;;  %v4616_v14 = vpop.f32.mrf.mxu1 }
  0xac   : > { %v4618_v15 = vpop.f32.mrf.mxu0 }
  0xb0   : > { %v4622_v18 = vpop.f32.mrf.mxu3  ;;  %1538 = vperm.xlu1 %4311, %v438_v25  }
  0xb1   : > { %v4624_v19 = vpop.f32.mrf.mxu2 }
  0xb3   : > { %v638_v26 = vpop.f32.mrf.mxu1 }
  0xb4   : > { %v723_v28 = vpop.f32.mrf.mxu0 }
  0xb5   : > { %3889 = vmatmul.msk.bf16.gmra.mxu3 %vm448_vm0, %v787_v20  ;;  %v4633_v29 = vadd.f32 %v723_v28, %v624_v35  ;;  %v444_v35 = vld [vmem:[%s5727_s2 + $0x48] sm:$0xff]  ;;  %v1339_v28 = vld [vmem:[%s4429_s24 + $0x3b] sm:$0xff] }
  0xb6   : > { %3934 = vmatmul.msk.bf16.gmra.mxu2 %vm448_vm0, %v1126_v23  ;;  %3919 = vmatmul.msk.bf16.gmra.mxu1 %vm448_vm0, %v1013_v24  ;;  %v1235_v24 = vpack.c.bf16 %v1223_v17, %v1222_v16 }
  0xb7   : > { %3960 = vmatmul.msk.bf16.vlgmr.msra.gmra.mxu0 %vm448_vm0, %v1348_v44  ;;  %1568 = vperm.xlu0 %4310, %v444_v35  }
  0xb8   : > { %v562_v30 = vpop.f32.mrf.mxu3  ;;  %1558 = vperm.xlu1 %4311, %v442_v39  }
  0xb9   : > { %v639_v47 = vadd.f32 %v638_v26, %v562_v30  ;;  %v738_v58 = vpop.f32.mrf.mxu2  ;;  %v447_v26 = vld [vmem:[%s5727_s2 + $0x60] sm:$0xff] }
  0xbb   : > { %v4635_v31 = vadd.f32 %v738_v58, %v639_v47  ;;  %v4637_v32 = vpop.f32.mrf.mxu1  ;;  %v1340_v47 = vld [vmem:[%s4429_s24 + $0x43] sm:$0xff] }
  0xbc   : > { %v4659_v49 = vpop.f32.mrf.mxu0  ;;  %v1350_v58 = vpack.c.bf16 %v1340_v47, %v1339_v28  ;;  %v1344_v28 = vld [vmem:[%s4429_s24 + $0x63] sm:$0xff] }
  0xbf   : > { %1583 = vperm.xlu0 %4310, %v447_v26  }
  0xc0   : > { %v4641_v36 = vpop.f32.mrf.mxu3 }
  0xc1   : > { %v4643_v37 = vpop.f32.mrf.mxu2 }
  0xc3   : > { %v643_v42 = vpop.f32.mrf.mxu1 }
  0xc4   : > { %v4674_v62 = vpop.f32.mrf.mxu0 }
  0xc5   : > { %3890 = vmatmul.msk.bf16.gmra.mxu3 %vm448_vm0, %v788_v38 }
  0xc6   : > { %3935 = vmatmul.msk.bf16.gmra.mxu2 %vm448_vm0, %v1127_v11  ;;  %3920 = vmatmul.msk.bf16.gmra.mxu1 %vm448_vm0, %v1014_v21 }
  0xc7   : > { %3961 = vmatmul.msk.bf16.gmra.mxu0 %vm448_vm0, %v1349_v2 }
  0xc8   : > { %v567_v59 = vpop.f32.mrf.mxu3 }
  0xc9   : > { %v644_v12 = vadd.f32 %v643_v42, %v567_v59  ;;  %v743_v45 = vpop.f32.mrf.mxu2  ;;  %v1225_v42 = vld [vmem:[%s4429_s24 + $0x32] sm:$0xff] }
  0xca   : > { %v1236_v44 = vpack.c.bf16 %v1225_v42, %v1224_v41  ;;  %v1228_v41 = vld [vmem:[%s4429_s24 + $0x4a] sm:$0xff]  ;;  %v1229_v42 = vld [vmem:[%s4429_s24 + $0x52] sm:$0xff] }
  0xcb   : > { %v4661_v50 = vadd.f32 %v743_v45, %v644_v12  ;;  %v4663_v51 = vpop.f32.mrf.mxu1  ;;  %v4260_v12 = vld [vmem:[%s5731_s6 + $0x18] sm:$0xff]  ;;  %v445_v45 = vld [vmem:[%s5727_s2 + $0x50] sm:$0xff] }
  0xcc   : > { %v4688_v46 = vpop.f32.mrf.mxu0  ;;  %1573 = vperm.xlu1 %4311, %v445_v45   ;;  %1699 = vmatpush.bf16.msra.mxu1 %v4260_v12  ;;  %v443_v45 = vld [vmem:[%s5727_s2 + $0x40] sm:$0xff] }
  0xd0   : > { %v4667_v52 = vpop.f32.mrf.mxu3 }
  0xd1   : > { %v4672_v56 = vpop.f32.mrf.mxu2 }
  0xd3   : > { %v648_v1 = vpop.f32.mrf.mxu1 }
  0xd4   : > { %v4706_v27 = vpop.f32.mrf.mxu0 }
  0xd5   : > { %3891 = vmatmul.msk.bf16.gmra.mxu3 %vm448_vm0, %v789_v57  ;;  %v1351_v57 = vpack.c.bf16 %v1342_v54, %v1341_v22  ;;  %v1345_v22 = vld [vmem:[%s4429_s24 + $0x6b] sm:$0xff] }
  0xd6   : > { %3936 = vmatmul.msk.bf16.gmra.mxu2 %vm448_vm0, %v1128_v60  ;;  %3921 = vmatmul.msk.bf16.gmra.mxu1 %vm448_vm0, %v1015_v61 }
  0xd7   : > { %3962 = vmatmul.msk.bf16.gmra.mxu0 %vm448_vm0, %v1350_v58 }
  0xd8   : > { %v572_v3 = vpop.f32.mrf.mxu3 }
  0xd9   : > { %v649_v5 = vadd.f32 %v648_v1, %v572_v3  ;;  %v748_v6 = vpop.f32.mrf.mxu2  ;;  %v626_v1 = vadd.f32 %v4618_v15, %v4600_v55  ;;  %v439_v55 = vld [vmem:[%s5727_s2 + $0x20] sm:$0xff] }
  0xda   : > { %1543 = vperm.xlu2 %4312, %v439_v55  }
  0xdb   : > { %v4690_v8 = vadd.f32 %v748_v6, %v649_v5  ;;  %v4692_v10 = vpop.f32.mrf.mxu1  ;;  %v1226_v6 = vld [vmem:[%s4429_s24 + $0x3a] sm:$0xff]  ;;  %v758_v35 = vadd.f32 %v4659_v49, %v626_v1 }
  0xdc   : > { %v4715_v40 = vpop.f32.mrf.mxu0  ;;  %v446_v1 = vld [vmem:[%s5727_s2 + $0x58] sm:$0xff] }
  0xe0   : > { %v4696_v20 = vpop.f32.mrf.mxu3 }
  0xe1   : > { %v4698_v23 = vpop.f32.mrf.mxu2 }
  0xe3   : > { %v653_v30 = vpop.f32.mrf.mxu1 }
  0xe4   : > { %v4727_v48 = vpop.f32.mrf.mxu0 }
  0xe5   : > { %3945 = vmatmul.msk.bf16.vlgmr.msra.gmra.mxu3 %vm448_vm0, %v1235_v24  ;;  %v1237_v24 = vpack.c.bf16 %v1227_v7, %v1226_v6  ;;  %v1230_v7 = vld [vmem:[%s4429_s24 + $0x5a] sm:$0xff] }
  0xe7   : > { %3963 = vmatmul.msk.bf16.gmra.mxu0 %vm448_vm0, %v1351_v57  ;;  %v1346_v57 = vld [vmem:[%s4429_s24 + $0x73] sm:$0xff] }
  0xe8   : > { %v577_v9 = vpop.f32.mrf.mxu3 }
  0xe9   : > { %v654_v33 = vadd.f32 %v653_v30, %v577_v9  ;;  %v753_v38 = vpop.f32.mrf.mxu2 }
  0xeb   : > { %v4717_v11 = vadd.f32 %v753_v38, %v654_v33  ;;  %v655_v21 = vpop.f32.mrf.mxu1  ;;  %v440_v33 = vld [vmem:[%s5727_s2 + $0x28] sm:$0xff] }
  0xec   : > { %v4734_v0 = vpop.f32.mrf.mxu0  ;;  %1548 = vperm.xlu2 %4312, %v440_v33  }
  0xf0   : > { %v579_v43 = vpop.f32.mrf.mxu3 }
  0xf1   : > { %v755_v59 = vpop.f32.mrf.mxu2 }
  0xf2   : > { %v1238_v59 = vpack.c.bf16 %v1229_v42, %v1228_v41  ;;  %v1232_v41 = vld [vmem:[%s4429_s24 + $0x6a] sm:$0xff]  ;;  %v1233_v42 = vld [vmem:[%s4429_s24 + $0x72] sm:$0xff] }
  0xf3   : > { %v1062_v34 = vpop.f32.mrf.mxu1 }
  0xf4   : > { %v964_v15 = vpop.f32.mrf.mxu0  ;;  %1563 = vperm.xlu2 %4312, %v443_v45  }
  0xf5   : > { %3946 = vmatmul.msk.bf16.gmra.mxu3 %vm448_vm0, %v1236_v44 }
  0xf8   : > { %v836_v60 = vpop.f32.mrf.mxu3 }
  0xf9   : > { %v870_v61 = vadd.f32 %v836_v60, %v4633_v29  ;;  %v1175_v63 = vpop.f32.mrf.mxu2  ;;  %v1353_v60 = vpack.c.bf16 %v1346_v57, %v1345_v22 }
  0xfb   : > { %v983_v2 = vadd.f32 %v4674_v62, %v870_v61  ;;  %v4739_v3 = vpop.f32.mrf.mxu1  ;;  %v1343_v62 = vld [vmem:[%s4429_s24 + $0x5b] sm:$0xff] }
  0xfc   : > { %v1352_v30 = vpack.c.bf16 %v1344_v28, %v1343_v62  ;;  %1578 = vperm.xlu2 %4312, %v446_v1   ;;  %v1234_v1 = vld [vmem:[%s4429_s24 + $0x7a] sm:$0xff] }
  0xfd   : > { %v1096_v5 = vadd.f32 %v1062_v34, %v983_v2 }
  0xfe   : > { %3964 = vmatmul.msk.bf16.gmra.mxu0 %vm448_vm0, %v1352_v30  ;;  %v4259_v30 = vld [vmem:[%s5731_s6 + $0x10] sm:$0xff] }
  0xff   : > { %v4744_v16 = vadd.f32 %v1175_v63, %v1096_v5  ;;  %1700 = vmatpush.bf16.msra.mxu1 %v4259_v30 }
 0x100   : > { %v838_v29 = vpop.f32.mrf.mxu3 }
 0x101   : > { %v871_v17 = vadd.f32 %v838_v29, %v758_v35  ;;  %v4746_v25 = vpop.f32.mrf.mxu2  ;;  %v1231_v35 = vld [vmem:[%s4429_s24 + $0x62] sm:$0xff] }
 0x103   : > { %v4753_v26 = vadd.f32 %v4688_v46, %v871_v17  ;;  %v1067_v49 = vpop.f32.mrf.mxu1  ;;  %v4762_v46 = vpop.f32.mrf.mxu0 }
 0x105   : > { %3947 = vmatmul.msk.bf16.gmra.mxu3 %vm448_vm0, %v1237_v24 }
 0x108   : > { %v841_v47 = vpop.f32.mrf.mxu3 }
 0x109   : > { %v872_v58 = vadd.f32 %v841_v47, %v4598_v53  ;;  %v1180_v9 = vpop.f32.mrf.mxu2 }
 0x10b   : > { %v985_v38 = vadd.f32 %v4706_v27, %v872_v58  ;;  %v4765_v39 = vpop.f32.mrf.mxu1  ;;  %v969_v27 = vpop.f32.mrf.mxu0  ;;  %v1347_v58 = vld [vmem:[%s4429_s24 + $0x7b] sm:$0xff]  ;;  %s4896_s24 = scalar_lea.vmem %s5726_s1, %s4423_s19 }
 0x10d   : > { %v1098_v21 = vadd.f32 %v1067_v49, %v985_v38  ;;  %v1354_v38 = vpack.c.bf16 %v1347_v58, %v1347_v58 }
 0x10e   : > { %3965 = vmatmul.msk.bf16.gmra.mxu0 %vm448_vm0, %v1353_v60 }
 0x10f   : > { %v4769_v43 = vadd.f32 %v1180_v9, %v1098_v21 }
 0x110   : > { %v843_v53 = vpop.f32.mrf.mxu3 }
 0x111   : > { %v873_v44 = vadd.f32 %v843_v53, %v4608_v4  ;;  %v4772_v12 = vpop.f32.mrf.mxu2 }
 0x113   : > { %v4779_v34 = vadd.f32 %v4715_v40, %v873_v44  ;;  %v1072_v54 = vpop.f32.mrf.mxu1  ;;  %v4788_v2 = vpop.f32.mrf.mxu0  ;;  %v1240_v44 = vpack.c.bf16 %v1233_v42, %v1232_v41 }
 0x115   : > { %3948 = vmatmul.msk.bf16.gmra.mxu3 %vm448_vm0, %v1238_v59 }
 0x118   : > { %v846_v4 = vpop.f32.mrf.mxu3 }
 0x119   : > { %v874_v61 = vadd.f32 %v846_v4, %v4614_v13  ;;  %v1185_v63 = vpop.f32.mrf.mxu2  ;;  %v1239_v13 = vpack.c.bf16 %v1231_v35, %v1230_v7  ;;  %v1241_v7 = vpack.c.bf16 %v1234_v1, %v1234_v1 }
 0x11b   : > { %v987_v40 = vadd.f32 %v4727_v48, %v874_v61  ;;  %v4791_v5 = vpop.f32.mrf.mxu1  ;;  %v974_v55 = vpop.f32.mrf.mxu0 }
 0x11d   : > { %v1100_v6 = vadd.f32 %v1072_v54, %v987_v40 }
 0x11e   : > { %3966 = vmatmul.msk.bf16.gmra.mxu0 %vm448_vm0, %v1354_v38 }
 0x11f   : > { %v4795_v29 = vadd.f32 %v1185_v63, %v1100_v6 }
 0x120   : > { %v4797_v17 = vpop.f32.mrf.mxu3 }
 0x121   : > { %v4799_v24 = vpop.f32.mrf.mxu2 }
 0x123   : > { %v1077_v62 = vpop.f32.mrf.mxu1  ;;  %v4806_v47 = vpop.f32.mrf.mxu0 }
 0x125   : > { %3949 = vmatmul.msk.bf16.gmra.mxu3 %vm448_vm0, %v1239_v13 }
 0x128   : > { %v851_v48 = vpop.f32.mrf.mxu3 }
 0x129   : > { %v876_v49 = vadd.f32 %v851_v48, %v4635_v31  ;;  %v1190_v28 = vpop.f32.mrf.mxu2 }
 0x12b   : > { %v989_v9 = vadd.f32 %v964_v15, %v876_v49  ;;  %v4809_v33 = vpop.f32.mrf.mxu1  ;;  %v979_v45 = vpop.f32.mrf.mxu0 }
 0x12d   : > { %v1102_v21 = vadd.f32 %v1077_v62, %v989_v9 }
 0x12f   : > { %v4814_v31 = vadd.f32 %v1190_v28, %v1102_v21 }
 0x130   : > { %v4816_v53 = vpop.f32.mrf.mxu3 }
 0x131   : > { %v4818_v59 = vpop.f32.mrf.mxu2 }
 0x133   : > { %v1082_v22 = vpop.f32.mrf.mxu1  ;;  %v981_v60 = vpop.f32.mrf.mxu0 }
 0x135   : > { %3950 = vmatmul.msk.bf16.gmra.mxu3 %vm448_vm0, %v1240_v44  ;;  %v5738_v44 = vmov 0.0  }
 0x136   : > { %449 = vst.msk [vmem:[#allocation2] sm:$0xff] %vm448_vm0, %v5738_v44 }
 0x137   : > { %450 = vst.msk [vmem:[#allocation2 + $0x8] sm:$0xff] %vm448_vm0, %v5738_v44 }
 0x138   : > { %v856_v15 = vpop.f32.mrf.mxu3  ;;  %451 = vst.msk [vmem:[#allocation2 + $0x78] sm:$0xff] %vm448_vm0, %v5738_v44 }
 0x139   : > { %v878_v54 = vadd.f32 %v856_v15, %v4661_v50  ;;  %v1195_v57 = vpop.f32.mrf.mxu2  ;;  %452 = vst.msk [vmem:[#allocation2 + $0x80] sm:$0xff] %vm448_vm0, %v5738_v44 }
 0x13a   : > { %453 = vst.msk [vmem:[#allocation3] sm:$0xff] %vm448_vm0, %v5738_v44 }
 0x13b   : > { %v991_v4 = vadd.f32 %v969_v27, %v878_v54  ;;  %v4822_v61 = vpop.f32.mrf.mxu1  ;;  %v1401_v62 = vpop.f32.mrf.mxu0  ;;  %454 = vst.msk [vmem:[#allocation3 + $0x8] sm:$0xff] %vm448_vm0, %v5738_v44 }
 0x13c   : > { %455 = vst.msk [vmem:[#allocation3 + $0x78] sm:$0xff] %vm448_vm0, %v5738_v44 }
 0x13d   : > { %v1104_v63 = vadd.f32 %v1082_v22, %v991_v4  ;;  %v4262_v22 = vld [vmem:[%s5731_s6 + $0x28] sm:$0xff]  ;;  %456 = vst.msk [vmem:[#allocation3 + $0x80] sm:$0xff] %vm448_vm0, %v5738_v44 }
 0x13e   : > { %1875 = vmatpush.bf16.msrb.mxu3 %v4262_v22  ;;  %v4901_v22 = vld [vmem:[%s5730_s5] ss:$0 sm:$0xff] }
 0x13f   : > { %v4825_v40 = vadd.f32 %v1195_v57, %v1104_v63  ;;  %v4261_v63 = vld [vmem:[%s5731_s6 + $0x20] sm:$0xff] }
 0x140   : > { %v4827_v6 = vpop.f32.mrf.mxu3 }
 0x141   : > { %v4829_v35 = vpop.f32.mrf.mxu2 }
 0x142   : > { %1876 = vmatpush.bf16.msrb.mxu3 %v4261_v63  ;;  %v4912_v63 = vpop.permute.xlu0 %1523 }
 0x143   : > { %v1087_v13 = vpop.f32.mrf.mxu1  ;;  %v1403_v30 = vpop.f32.mrf.mxu0 }
 0x145   : > { %3951 = vmatmul.msk.bf16.gmra.mxu3 %vm448_vm0, %v1241_v7 }
 0x148   : > { %v861_v48 = vpop.f32.mrf.mxu3 }
 0x149   : > { %v880_v50 = vadd.f32 %v861_v48, %v4690_v8  ;;  %v1200_v49 = vpop.f32.mrf.mxu2 }
 0x14b   : > { %v993_v27 = vadd.f32 %v974_v55, %v880_v50  ;;  %v4833_v28 = vpop.f32.mrf.mxu1  ;;  %v4841_v42 = vpop.f32.mrf.mxu0  ;;  %v4258_v55 = vld [vmem:[%s5731_s6 + $0x8] sm:$0xff] }
 0x14c   : > { %1775 = vmatpush.bf16.msra.mxu2 %v4258_v55 }
 0x14d   : > { %v1106_v58 = vadd.f32 %v1087_v13, %v993_v27  ;;  %v4264_v13 = vld [vmem:[%s5731_s6 + $0x38] sm:$0xff] }
 0x14e   : > { %1988 = vmatpush.bf16.msrb.mxu0 %v4264_v13 }
 0x14f   : > { %v4835_v9 = vadd.f32 %v1200_v49, %v1106_v58  ;;  %v4263_v49 = vld [vmem:[%s5731_s6 + $0x30] sm:$0xff] }
 0x150   : > { %v4837_v38 = vpop.f32.mrf.mxu3 }
 0x151   : > { %v4839_v21 = vpop.f32.mrf.mxu2 }
 0x152   : > { %1989 = vmatpush.bf16.msrb.mxu0 %v4263_v49  ;;  %v1483_v49 = vld [vmem:[%s4896_s24 + $0x18] sm:$0xff] }
 0x153   : > { %v1092_v41 = vpop.f32.mrf.mxu1  ;;  %v4860_v4 = vpop.f32.mrf.mxu0 }
 0x158   : > { %v866_v8 = vpop.f32.mrf.mxu3 }
 0x159   : > { %v882_v15 = vadd.f32 %v866_v8, %v4717_v11  ;;  %v1205_v54 = vpop.f32.mrf.mxu2  ;;  %v4257_v11 = vld [vmem:[%s5731_s6] sm:$0xff]  ;;  %v1097_v8 = vadd.f32 %v4739_v3, %v4753_v26 }
 0x15a   : > { %1776 = vmatpush.bf16.msra.mxu2 %v4257_v11 }
 0x15b   : > { %v995_v57 = vadd.f32 %v979_v45, %v882_v15  ;;  %v1094_v60 = vpop.f32.mrf.mxu1  ;;  %v4879_v50 = vpop.f32.mrf.mxu0  ;;  %v1210_v3 = vadd.f32 %v4746_v25, %v1097_v8 }
 0x15d   : > { %v1108_v1 = vadd.f32 %v1092_v41, %v995_v57  ;;  %v4888_v41 = vld [vmem:[%s5729_s4] ss:$0 sm:$0xff]  ;;  %v4266_v57 = vld [vmem:[%s5731_s6 + $0x48] sm:$0xff] }
 0x15e   : > { %2101 = vmatpush.bf16.msrb.mxu1 %v4266_v57  ;;  %v1636_v57 = vld [vmem:[#allocation2 + $0x6] sm:$0xff] }
 0x15f   : > { %v4874_v45 = vadd.f32 %v1205_v54, %v1108_v1  ;;  %v1482_v54 = vld [vmem:[%s4896_s24 + $0x10] sm:$0xff] }
 0x160   : > { %v868_v7 = vpop.f32.mrf.mxu3 }
 0x161   : > { %v1207_v48 = vpop.f32.mrf.mxu2 }
 0x168   : > { %v1288_v27 = vpop.f32.mrf.mxu3 }
 0x169   : > { %v1322_v58 = vadd.f32 %v1288_v27, %v4744_v16  ;;  %v4903_v16 = vpop.f32.mrf.mxu0 }
 0x16b   : > { %v1435_v55 = vadd.f32 %v1401_v62, %v1322_v58 }
 0x16d   : > { %v1452_v15 = vmul.f32 %v4888_v41, %v1435_v55 }
 0x16f   : > { %v1469_v26 = vadd.f32 %v4901_v22, %v1452_v15 }
 0x170   : > { %v1290_v62 = vpop.f32.mrf.mxu3 }
 0x171   : > { %v1495_v60 = vadd.f32 %v1482_v54, %v1469_v26  ;;  %v1323_v11 = vadd.f32 %v1290_v62, %v1210_v3  ;;  %v4914_v13 = vpop.f32.mrf.mxu0  ;;  %v636_v3 = vadd.f32 %v4616_v14, %v4622_v18  ;;  %v4930_v26 = vpop.permute.xlu0 %1528  ;;  %v1612_v62 = vld [vmem:[#allocation2 + $0x5] sm:$0xff] }
 0x173   : > { %v1508_v1 = vmax.f32 %v1495_v60, 0.0  ;;  %v1436_v7 = vadd.f32 %v1403_v30, %v1323_v11  ;;  %v1099_v30 = vadd.f32 %v4765_v39, %v4779_v34  ;;  %v1812_v60 = vld [vmem:[#allocation2 + $0x7] sm:$0xff] }
 0x175   : > { %v4917_v48 = vmul.f32 %v4912_v63, %v1508_v1  ;;  %v1453_v25 = vmul.f32 %v4888_v41, %v1436_v7  ;;  %v1484_v7 = vld [vmem:[%s4896_s24 + $0x20] sm:$0xff]  ;;  %v1212_v39 = vadd.f32 %v4772_v12, %v1099_v30  ;;  %v4947_v30 = vpop.permute.xlu1 %1533 }
 0x177   : > { %5761 = vst [vmem:[#allocation4_spill] sm:$0xff] %v4917_v48  ;;  %v1470_v27 = vadd.f32 %v4901_v22, %v1453_v25 }
 0x178   : > { %1599 = vst.msk [vmem:[#allocation2 + $0x10] sm:$0xff] %vm448_vm0, %v4917_v48  ;;  %v1293_v58 = vpop.f32.mrf.mxu3 }
 0x179   : > { %v1496_v8 = vadd.f32 %v1483_v49, %v1470_v27  ;;  %v1324_v55 = vadd.f32 %v1293_v58, %v4769_v43  ;;  %v4932_v11 = vpop.f32.mrf.mxu0  ;;  %v762_v58 = vadd.f32 %v4624_v19, %v636_v3 }
 0x17b   : > { %v1509_v15 = vmax.f32 %v1496_v8, 0.0  ;;  %v1437_v54 = vadd.f32 %v4841_v42, %v1324_v55  ;;  %v875_v12 = vadd.f32 %v4797_v17, %v762_v58 }
 0x17d   : > { %v4935_v1 = vmul.f32 %v4930_v26, %v1509_v15  ;;  %v1454_v43 = vmul.f32 %v4888_v41, %v1437_v54 }
 0x17f   : > { %5762 = vst [vmem:[#allocation5_spill] sm:$0xff] %v4935_v1  ;;  %v1637_v34 = vld [vmem:[#allocation2 + $0xe] sm:$0xff]  ;;  %v1471_v14 = vadd.f32 %v4901_v22, %v1454_v43 }
 0x180   : > { %v1613_v42 = vld [vmem:[#allocation2 + $0xd] sm:$0xff]  ;;  %1600 = vst.msk [vmem:[#allocation2 + $0x18] sm:$0xff] %vm448_vm0, %v4935_v1  ;;  %v1649_v18 = vpack.c.bf16 %v1637_v34, %v1636_v57  ;;  %v1295_v8 = vpop.f32.mrf.mxu3 }
 0x181   : > { %v1813_v25 = vld [vmem:[#allocation2 + $0xf] sm:$0xff]  ;;  %v1625_v49 = vpack.c.bf16 %v1613_v42, %v1612_v62  ;;  %v1497_v55 = vadd.f32 %v1484_v7, %v1471_v14  ;;  %v1325_v15 = vadd.f32 %v1295_v8, %v1212_v39  ;;  %v4955_v3 = vpop.f32.mrf.mxu0 }
 0x182   : > { %v1825_v27 = vpack.c.bf16 %v1813_v25, %v1812_v60  ;;  %3975 = vmatmul.msk.bf16.vlgmr.msra.gmra.mxu1 %vm448_vm0, %v1649_v18  ;;  %v988_v60 = vadd.f32 %v4734_v0, %v875_v12  ;;  %v1485_v43 = vld [vmem:[%s4896_s24 + $0x28] sm:$0xff]  ;;  %v1486_v8 = vld [vmem:[%s4896_s24 + $0x30] sm:$0xff] }
 0x183   : > { %3990 = vmatmul.msk.bf16.vlgmr.msra.gmra.mxu2 %vm448_vm0, %v1625_v49  ;;  %v1510_v54 = vmax.f32 %v1497_v55, 0.0  ;;  %v1438_v57 = vadd.f32 %v4860_v4, %v1325_v15  ;;  %v641_v49 = vadd.f32 %v4637_v32, %v4641_v36 }
 0x184   : > { %4005 = vmatmul.msk.bf16.vlgmr.msrb.gmra.mxu3 %vm448_vm0, %v1825_v27  ;;  %v1101_v14 = vadd.f32 %v4791_v5, %v988_v60  ;;  %v4968_v27 = vpop.permute.xlu1 %1538 }
 0x185   : > { %v4952_v62 = vmul.f32 %v4947_v30, %v1510_v54  ;;  %v1455_v19 = vmul.f32 %v4888_v41, %v1438_v57  ;;  %v764_v60 = vadd.f32 %v4643_v37, %v641_v49 }
 0x186   : > { %v1214_v15 = vadd.f32 %v4799_v24, %v1101_v14 }
 0x187   : > { %5763 = vst [vmem:[#allocation6_spill] sm:$0xff] %v4952_v62  ;;  %v1926_v7 = vld [vmem:[#allocation2 + $0x17] sm:$0xff]  ;;  %v1472_v17 = vadd.f32 %v4901_v22, %v1455_v19  ;;  %v877_v24 = vadd.f32 %v4816_v53, %v764_v60 }
 0x188   : > { %1601 = vst.msk [vmem:[#allocation2 + $0x20] sm:$0xff] %vm448_vm0, %v4952_v62  ;;  %v1938_v39 = vpack.c.bf16 %v1926_v7, %v1813_v25  ;;  %v1298_v34 = vpop.f32.mrf.mxu3  ;;  %v1638_v55 = vld [vmem:[#allocation2 + $0x16] sm:$0xff] }
 0x189   : > { %v1498_v4 = vadd.f32 %v1485_v43, %v1472_v17  ;;  %v1326_v42 = vadd.f32 %v1298_v34, %v4795_v29  ;;  %v1614_v29 = vld [vmem:[#allocation2 + $0x15] sm:$0xff]  ;;  %v4979_v19 = vpop.f32.mrf.mxu0  ;;  %v4985_v34 = vpop.permute.xlu2 %1543  ;;  %v990_v14 = vadd.f32 %v4762_v46, %v877_v24 }
 0x18a   : > { %4020 = vmatmul.msk.bf16.vlgmr.msrb.gmra.mxu0 %vm448_vm0, %v1938_v39 }
 0x18b   : > { %v1511_v18 = vmax.f32 %v1498_v4, 0.0  ;;  %v1439_v0 = vadd.f32 %v4879_v50, %v1326_v42 }
 0x18d   : > { %v4971_v58 = vmul.f32 %v4968_v27, %v1511_v18  ;;  %v1456_v25 = vmul.f32 %v4888_v41, %v1439_v0  ;;  %v1487_v18 = vld [vmem:[%s4896_s24 + $0x38] sm:$0xff] }
 0x18f   : > { %5764 = vst [vmem:[#allocation7_spill] sm:$0xff] %v4971_v58  ;;  %v1639_v12 = vld [vmem:[#allocation2 + $0x1e] sm:$0xff]  ;;  %v1473_v32 = vadd.f32 %v4901_v22, %v1456_v25 }
 0x190   : > { %v1615_v5 = vld [vmem:[#allocation2 + $0x1d] sm:$0xff]  ;;  %1602 = vst.msk [vmem:[#allocation2 + $0x28] sm:$0xff] %vm448_vm0, %v4971_v58  ;;  %v1650_v36 = vpack.c.bf16 %v1639_v12, %v1638_v55  ;;  %v1300_v43 = vpop.f32.mrf.mxu3  ;;  %v646_v12 = vadd.f32 %v4663_v51, %v4667_v52 }
 0x191   : > { %v1815_v54 = vld [vmem:[#allocation2 + $0x1f] sm:$0xff]  ;;  %v1626_v50 = vpack.c.bf16 %v1615_v5, %v1614_v29  ;;  %v1499_v17 = vadd.f32 %v1486_v8, %v1473_v32  ;;  %v1327_v39 = vadd.f32 %v1300_v43, %v1214_v15  ;;  %v5000_v55 = vpop.f32.mrf.mxu0  ;;  %v1103_v29 = vadd.f32 %v4809_v33, %v990_v14  ;;  %v5006_v5 = vpop.permute.xlu2 %1548 }
 0x192   : > { %v1826_v57 = vpack.c.bf16 %v1815_v54, %v1926_v7  ;;  %3976 = vmatmul.msk.bf16.gmra.mxu1 %vm448_vm0, %v1650_v36 }
 0x193   : > { %3991 = vmatmul.msk.bf16.gmra.mxu2 %vm448_vm0, %v1626_v50  ;;  %v1512_v4 = vmax.f32 %v1499_v17, 0.0  ;;  %v1440_v7 = vadd.f32 %v4903_v16, %v1327_v39  ;;  %v766_v39 = vadd.f32 %v4672_v56, %v646_v12 }
 0x194   : > { %4006 = vmatmul.msk.bf16.gmra.mxu3 %vm448_vm0, %v1826_v57  ;;  %v1216_v57 = vadd.f32 %v4818_v59, %v1103_v29 }
 0x195   : > { %v4990_v42 = vmul.f32 %v4985_v34, %v1512_v4  ;;  %v1457_v37 = vmul.f32 %v4888_v41, %v1440_v7  ;;  %v879_v59 = vadd.f32 %v4827_v6, %v766_v39 }
 0x197   : > { %5765 = vst [vmem:[#allocation8_spill] sm:$0xff] %v4990_v42  ;;  %v1928_v0 = vld [vmem:[#allocation2 + $0x27] sm:$0xff]  ;;  %v1474_v53 = vadd.f32 %v4901_v22, %v1457_v37 }
 0x198   : > { %1603 = vst.msk [vmem:[#allocation2 + $0x30] sm:$0xff] %vm448_vm0, %v4990_v42  ;;  %v1939_v49 = vpack.c.bf16 %v1928_v0, %v1815_v54  ;;  %v1303_v25 = vpop.f32.mrf.mxu3  ;;  %v1640_v36 = vld [vmem:[#allocation2 + $0x26] sm:$0xff] }
 0x199   : > { %v1500_v8 = vadd.f32 %v1487_v18, %v1474_v53  ;;  %v1328_v16 = vadd.f32 %v1303_v25, %v4814_v31  ;;  %v1488_v31 = vld [vmem:[%s4896_s24 + $0x40] sm:$0xff]  ;;  %v5023_v18 = vpop.f32.mrf.mxu0  ;;  %v1489_v25 = vld [vmem:[%s4896_s24 + $0x48] sm:$0xff] }
 0x19a   : > { %4021 = vmatmul.msk.bf16.gmra.mxu0 %vm448_vm0, %v1939_v49  ;;  %v1616_v50 = vld [vmem:[#allocation2 + $0x25] sm:$0xff]  ;;  %v992_v49 = vadd.f32 %v4788_v2, %v879_v59 }
 0x19b   : > { %v1513_v46 = vmax.f32 %v1500_v8, 0.0  ;;  %v1441_v15 = vadd.f32 %v4914_v13, %v1328_v16  ;;  %v4265_v16 = vld [vmem:[%s5731_s6 + $0x40] sm:$0xff] }
 0x19c   : > { %2102 = vmatpush.bf16.msrb.mxu1 %v4265_v16  ;;  %v1105_v2 = vadd.f32 %v4822_v61, %v992_v49 }
 0x19d   : > { %v5009_v54 = vmul.f32 %v5006_v5, %v1513_v46  ;;  %v1458_v32 = vmul.f32 %v4888_v41, %v1441_v15 }
 0x19e   : > { %v1218_v61 = vadd.f32 %v4829_v35, %v1105_v2 }
 0x19f   : > { %5766 = vst [vmem:[#allocation9_spill] sm:$0xff] %v5009_v54  ;;  %v1641_v60 = vld [vmem:[#allocation2 + $0x2e] sm:$0xff]  ;;  %v1475_v51 = vadd.f32 %v4901_v22, %v1458_v32 }
 0x1a0   : > { %v1617_v33 = vld [vmem:[#allocation2 + $0x2d] sm:$0xff]  ;;  %1604 = vst.msk [vmem:[#allocation2 + $0x38] sm:$0xff] %vm448_vm0, %v5009_v54  ;;  %v1651_v52 = vpack.c.bf16 %v1641_v60, %v1640_v36  ;;  %v1305_v24 = vpop.f32.mrf.mxu3  ;;  %v651_v36 = vadd.f32 %v4692_v10, %v4696_v20 }
 0x1a1   : > { %v1817_v43 = vld [vmem:[#allocation2 + $0x2f] sm:$0xff]  ;;  %v1627_v13 = vpack.c.bf16 %v1617_v33, %v1616_v50  ;;  %v1501_v4 = vadd.f32 %v1488_v31, %v1475_v51  ;;  %v1329_v7 = vadd.f32 %v1305_v24, %v1216_v57  ;;  %v5043_v31 = vpop.f32.mrf.mxu0  ;;  %v5047_v50 = vpop.permute.xlu1 %1558 }
 0x1a2   : > { %v1827_v17 = vpack.c.bf16 %v1817_v43, %v1928_v0  ;;  %3977 = vmatmul.msk.bf16.gmra.mxu1 %vm448_vm0, %v1651_v52  ;;  %v5025_v0 = vpop.permute.xlu0 %1553  ;;  %v1490_v60 = vld [vmem:[%s4896_s24 + $0x50] sm:$0xff]  ;;  %v768_v39 = vadd.f32 %v4698_v23, %v651_v36  ;;  %v1492_v36 = vld [vmem:[%s4896_s24 + $0x60] sm:$0xff] }
 0x1a3   : > { %3992 = vmatmul.msk.bf16.gmra.mxu2 %vm448_vm0, %v1627_v13  ;;  %v1514_v37 = vmax.f32 %v1501_v4, 0.0  ;;  %v1442_v14 = vadd.f32 %v4932_v11, %v1329_v7 }
 0x1a4   : > { %4007 = vmatmul.msk.bf16.gmra.mxu3 %vm448_vm0, %v1827_v17  ;;  %v881_v35 = vadd.f32 %v4837_v38, %v768_v39 }
 0x1a5   : > { %v5028_v56 = vmul.f32 %v5025_v0, %v1514_v37  ;;  %v1459_v53 = vmul.f32 %v4888_v41, %v1442_v14 }
 0x1a7   : > { %5767 = vst [vmem:[#allocation10_spill] sm:$0xff] %v5028_v56  ;;  %v1930_v8 = vld [vmem:[#allocation2 + $0x37] sm:$0xff]  ;;  %v1476_v6 = vadd.f32 %v4901_v22, %v1459_v53  ;;  %v5064_v53 = vpop.permute.xlu2 %1563 }
 0x1a8   : > { %1605 = vst.msk [vmem:[#allocation2 + $0x40] sm:$0xff] %vm448_vm0, %v5028_v56  ;;  %v1940_v11 = vpack.c.bf16 %v1930_v8, %v1817_v43  ;;  %v1308_v29 = vpop.f32.mrf.mxu3  ;;  %v1642_v33 = vld [vmem:[#allocation2 + $0x36] sm:$0xff] }
 0x1a9   : > { %v1502_v46 = vadd.f32 %v1489_v25, %v1476_v6  ;;  %v1330_v15 = vadd.f32 %v1308_v29, %v4825_v40  ;;  %v1618_v43 = vld [vmem:[#allocation2 + $0x35] sm:$0xff]  ;;  %v1433_v14 = vpop.f32.mrf.mxu0  ;;  %v994_v25 = vadd.f32 %v4806_v47, %v881_v35  ;;  %v1493_v35 = vld [vmem:[%s4896_s24 + $0x68] sm:$0xff] }
 0x1aa   : > { %4022 = vmatmul.msk.bf16.gmra.mxu0 %vm448_vm0, %v1940_v11  ;;  %v5079_v2 = vpop.permute.xlu0 %1568  ;;  %v2493_v44 = vld [vmem:[#allocation2 + $0x33] sm:$0xff] }
 0x1ab   : > { %v1515_v12 = vmax.f32 %v1502_v46, 0.0  ;;  %v1443_v32 = vadd.f32 %v4955_v3, %v1330_v15  ;;  %v1107_v46 = vadd.f32 %v4833_v28, %v994_v25  ;;  %5770 = vst [vmem:[#allocation13_spill] sm:$0xff] %v5079_v2 }
 0x1ad   : > { %v5050_v57 = vmul.f32 %v5047_v50, %v1515_v12  ;;  %v1460_v40 = vmul.f32 %v4888_v41, %v1443_v32 }
 0x1af   : > { %5768 = vst [vmem:[#allocation11_spill] sm:$0xff] %v5050_v57  ;;  %v1643_v51 = vld [vmem:[#allocation2 + $0x3e] sm:$0xff]  ;;  %v1477_v10 = vadd.f32 %v4901_v22, %v1460_v40 }
 0x1b0   : > { %v1619_v52 = vld [vmem:[#allocation2 + $0x3d] sm:$0xff]  ;;  %1606 = vst.msk [vmem:[#allocation2 + $0x48] sm:$0xff] %vm448_vm0, %v5050_v57  ;;  %v1652_v20 = vpack.c.bf16 %v1643_v51, %v1642_v33  ;;  %v1310_v24 = vpop.f32.mrf.mxu3  ;;  %v1220_v33 = vadd.f32 %v4839_v21, %v1107_v46  ;;  %v1494_v46 = vld [vmem:[%s4896_s24 + $0x70] sm:$0xff] }
 0x1b1   : > { %v1819_v3 = vld [vmem:[#allocation2 + $0x3f] sm:$0xff]  ;;  %v1628_v13 = vpack.c.bf16 %v1619_v52, %v1618_v43  ;;  %v1503_v4 = vadd.f32 %v1490_v60, %v1477_v10  ;;  %v1331_v7 = vadd.f32 %v1310_v24, %v1218_v61  ;;  %v5100_v24 = vpop.permute.xlu1 %1573 }
 0x1b2   : > { %v1828_v17 = vpack.c.bf16 %v1819_v3, %v1930_v8  ;;  %3978 = vmatmul.msk.bf16.gmra.mxu1 %vm448_vm0, %v1652_v20  ;;  %v1491_v8 = vld [vmem:[%s4896_s24 + $0x58] sm:$0xff]  ;;  %5772 = vst [vmem:[#allocation15_spill] sm:$0xff] %v5100_v24  ;;  %s5557_s24 = scalar_lea.vmem %s5737_s12, %s4423_s19 }
 0x1b3   : > { %3993 = vmatmul.msk.bf16.gmra.mxu2 %vm448_vm0, %v1628_v13  ;;  %v1516_v59 = vmax.f32 %v1503_v4, 0.0  ;;  %v1444_v37 = vadd.f32 %v4979_v19, %v1331_v7  ;;  %v4268_v21 = vld [vmem:[%s5731_s6 + $0x58] sm:$0xff]  ;;  %v4270_v13 = vld [vmem:[%s5731_s6 + $0x68] sm:$0xff] }
 0x1b4   : > { %4008 = vmatmul.msk.bf16.gmra.mxu3 %vm448_vm0, %v1828_v17  ;;  %2214 = vmatpush.bf16.msrb.mxu2 %v4268_v21 }
 0x1b5   : > { %v5067_v49 = vmul.f32 %v5064_v53, %v1516_v59  ;;  %v1461_v23 = vmul.f32 %v4888_v41, %v1444_v37  ;;  %2327 = vmatpush.bf16.msra.mxu3 %v4270_v13 }
 0x1b7   : > { %5769 = vst [vmem:[#allocation12_spill] sm:$0xff] %v5067_v49  ;;  %v1932_v6 = vld [vmem:[#allocation2 + $0x47] sm:$0xff]  ;;  %v1478_v38 = vadd.f32 %v4901_v22, %v1461_v23 }
 0x1b8   : > { %1607 = vst.msk [vmem:[#allocation2 + $0x50] sm:$0xff] %vm448_vm0, %v5067_v49  ;;  %v1941_v11 = vpack.c.bf16 %v1932_v6, %v1819_v3  ;;  %v1313_v19 = vpop.f32.mrf.mxu3  ;;  %v1644_v40 = vld [vmem:[#allocation2 + $0x46] sm:$0xff] }
 0x1b9   : > { %v1504_v16 = vadd.f32 %v1491_v8, %v1478_v38  ;;  %v1332_v29 = vadd.f32 %v1313_v19, %v4835_v9  ;;  %v1620_v60 = vld [vmem:[#allocation2 + $0x45] sm:$0xff]  ;;  %v4267_v8 = vld [vmem:[%s5731_s6 + $0x50] sm:$0xff]  ;;  %v4272_v38 = vld [vmem:[%s5731_s6 + $0x78] sm:$0xff] }
 0x1ba   : > { %4023 = vmatmul.msk.bf16.gmra.mxu0 %vm448_vm0, %v1941_v11  ;;  %2215 = vmatpush.bf16.msrb.mxu2 %v4267_v8 }
 0x1bb   : > { %v1517_v15 = vmax.f32 %v1504_v16, 0.0  ;;  %v1445_v47 = vadd.f32 %v5000_v55, %v1332_v29  ;;  %2440 = vmatpush.bf16.msra.mxu0 %v4272_v38  ;;  %v2377_v38 = vld [vmem:[#allocation2 + $0x1a] sm:$0xff] }
 0x1bd   : > { %v5082_v12 = vmul.f32 %v5079_v2, %v1517_v15  ;;  %v1462_v32 = vmul.f32 %v4888_v41, %v1445_v47 }
 0x1bf   : > { %5771 = vst [vmem:[#allocation14_spill] sm:$0xff] %v5082_v12  ;;  %v1645_v9 = vld [vmem:[#allocation2 + $0x4e] sm:$0xff]  ;;  %v1479_v28 = vadd.f32 %v4901_v22, %v1462_v32 }
 0x1c0   : > { %v1621_v43 = vld [vmem:[#allocation2 + $0x4d] sm:$0xff]  ;;  %1608 = vst.msk [vmem:[#allocation2 + $0x58] sm:$0xff] %vm448_vm0, %v5082_v12  ;;  %v1653_v55 = vpack.c.bf16 %v1645_v9, %v1644_v40  ;;  %v1315_v3 = vpop.f32.mrf.mxu3 }
 0x1c1   : > { %v1821_v61 = vld [vmem:[#allocation2 + $0x4f] sm:$0xff]  ;;  %v1629_v51 = vpack.c.bf16 %v1621_v43, %v1620_v60  ;;  %v1505_v10 = vadd.f32 %v1492_v36, %v1479_v28  ;;  %v1333_v20 = vadd.f32 %v1315_v3, %v1220_v33 }
 0x1c2   : > { %v1829_v52 = vpack.c.bf16 %v1821_v61, %v1932_v6  ;;  %3979 = vmatmul.msk.bf16.gmra.mxu1 %vm448_vm0, %v1653_v55  ;;  %v4269_v6 = vld [vmem:[%s5731_s6 + $0x60] sm:$0xff]  ;;  %v4271_v28 = vld [vmem:[%s5731_s6 + $0x70] sm:$0xff]  ;;  %v5141_v55 = vpop.permute.xlu0 %1583 }
 0x1c3   : > { %3994 = vmatmul.msk.bf16.gmra.mxu2 %vm448_vm0, %v1629_v51  ;;  %v1518_v17 = vmax.f32 %v1505_v10, 0.0  ;;  %v1446_v39 = vadd.f32 %v5023_v18, %v1333_v20  ;;  %2328 = vmatpush.bf16.msra.mxu3 %v4269_v6  ;;  %5776 = vst [vmem:[#allocation19_spill] sm:$0xff] %v5141_v55  ;;  %v2378_v6 = vld [vmem:[#allocation2 + $0x22] sm:$0xff] }
 0x1c4   : > { %4009 = vmatmul.msk.bf16.gmra.mxu3 %vm448_vm0, %v1829_v52  ;;  %2441 = vmatpush.bf16.msra.mxu0 %v4271_v28 }
 0x1c5   : > { %v5103_v4 = vmul.f32 %v5100_v24, %v1518_v17  ;;  %v1463_v7 = vmul.f32 %v4888_v41, %v1446_v39 }
 0x1c7   : > { %5773 = vst [vmem:[#allocation16_spill] sm:$0xff] %v5103_v4  ;;  %v1934_v59 = vld [vmem:[#allocation2 + $0x57] sm:$0xff]  ;;  %v1480_v37 = vadd.f32 %v4901_v22, %v1463_v7 }
 0x1c8   : > { %1609 = vst.msk [vmem:[#allocation2 + $0x60] sm:$0xff] %vm448_vm0, %v5103_v4  ;;  %v1942_v14 = vpack.c.bf16 %v1934_v59, %v1821_v61  ;;  %v1318_v23 = vpop.f32.mrf.mxu3  ;;  %v1646_v15 = vld [vmem:[#allocation2 + $0x56] sm:$0xff] }
 0x1c9   : > { %v1506_v18 = vadd.f32 %v1493_v35, %v1480_v37  ;;  %v1334_v25 = vadd.f32 %v1318_v23, %v4874_v45  ;;  %v5122_v45 = vpop.permute.xlu2 %1578  ;;  %v1622_v47 = vld [vmem:[#allocation2 + $0x55] sm:$0xff]  ;;  %v2265_v37 = vld [vmem:[#allocation2 + $0x21] sm:$0xff] }
 0x1ca   : > { %4024 = vmatmul.msk.bf16.gmra.mxu0 %vm448_vm0, %v1942_v14  ;;  %5774 = vst [vmem:[#allocation17_spill] sm:$0xff] %v5122_v45  ;;  %v2039_v35 = vld [vmem:[#allocation2 + $0x18] sm:$0xff]  ;;  %v2038_v14 = vld [vmem:[#allocation2 + $0x10] sm:$0xff] }
 0x1cb   : > { %v1519_v11 = vmax.f32 %v1506_v18, 0.0  ;;  %v1447_v19 = vadd.f32 %v5043_v31, %v1334_v25  ;;  %v2151_v23 = vld [vmem:[#allocation2 + $0x11] sm:$0xff]  ;;  %v2051_v18 = vpack.c.bf16 %v2039_v35, %v2038_v14 }
 0x1cd   : > { %v5125_v16 = vmul.f32 %v5122_v45, %v1519_v11  ;;  %v1464_v29 = vmul.f32 %v4888_v41, %v1447_v19  ;;  %v4274_v41 = vld [vmem:[%s5731_s6 + $0x88] sm:$0xff]  ;;  %v2390_v11 = vpack.c.bf16 %v2378_v6, %v2377_v38 }
 0x1ce   : > { %2553 = vmatpush.bf16.msra.mxu1 %v4274_v41  ;;  %v2041_v19 = vld [vmem:[#allocation2 + $0x28] sm:$0xff] }
 0x1cf   : > { %5775 = vst [vmem:[#allocation18_spill] sm:$0xff] %v5125_v16  ;;  %v1647_v32 = vld [vmem:[#allocation2 + $0x5e] sm:$0xff]  ;;  %v1481_v31 = vadd.f32 %v4901_v22, %v1464_v29  ;;  %v2154_v29 = vld [vmem:[#allocation2 + $0x29] sm:$0xff] }
 0x1d0   : > { %v1623_v36 = vld [vmem:[#allocation2 + $0x5d] sm:$0xff]  ;;  %1610 = vst.msk [vmem:[#allocation2 + $0x68] sm:$0xff] %vm448_vm0, %v5125_v16  ;;  %v1654_v60 = vpack.c.bf16 %v1647_v32, %v1646_v15  ;;  %v1320_v43 = vpop.f32.mrf.mxu3  ;;  %v2379_v41 = vld [vmem:[#allocation2 + $0x2a] sm:$0xff] }
 0x1d1   : > { %v1823_v40 = vld [vmem:[#allocation2 + $0x5f] sm:$0xff]  ;;  %v1630_v33 = vpack.c.bf16 %v1623_v36, %v1622_v47  ;;  %v1507_v61 = vadd.f32 %v1494_v46, %v1481_v31  ;;  %v2267_v46 = vld [vmem:[#allocation2 + $0x31] sm:$0xff]  ;;  %v2165_v36 = vpack.c.bf16 %v2154_v29, %v2265_v37 }
 0x1d2   : > { %v1830_v9 = vpack.c.bf16 %v1823_v40, %v1934_v59  ;;  %3980 = vmatmul.msk.bf16.gmra.mxu1 %vm448_vm0, %v1654_v60  ;;  %v2152_v59 = vld [vmem:[#allocation2 + $0x19] sm:$0xff]  ;;  %v2382_v6 = vld [vmem:[#allocation2 + $0x42] sm:$0xff] }
 0x1d3   : > { %3995 = vmatmul.msk.bf16.gmra.mxu2 %vm448_vm0, %v1630_v33  ;;  %v1520_v22 = vmax.f32 %v1507_v61, 0.0  ;;  %v2164_v25 = vpack.c.bf16 %v2152_v59, %v2151_v23  ;;  %v2277_v8 = vpack.c.bf16 %v2265_v37, %v2152_v59  ;;  %v2040_v47 = vld [vmem:[#allocation2 + $0x20] sm:$0xff]  ;;  %v2380_v60 = vld [vmem:[#allocation2 + $0x32] sm:$0xff] }
 0x1d4   : > { %4010 = vmatmul.msk.bf16.gmra.mxu3 %vm448_vm0, %v1830_v9  ;;  %v2052_v32 = vpack.c.bf16 %v2041_v19, %v2040_v47  ;;  %v2042_v59 = vld [vmem:[#allocation2 + $0x30] sm:$0xff] }
 0x1d5   : > { %v5144_v51 = vmul.f32 %v5141_v55, %v1520_v22  ;;  %v2391_v22 = vpack.c.bf16 %v2380_v60, %v2379_v41  ;;  %v2044_v41 = vld [vmem:[#allocation2 + $0x40] sm:$0xff] }
 0x1d7   : > { %5777 = vst [vmem:[#allocation20_spill] sm:$0xff] %v5144_v51  ;;  %v1936_v52 = vld [vmem:[#allocation2 + $0x67] sm:$0xff] }
 0x1d8   : > { %1611 = vst.msk [vmem:[#allocation2 + $0x70] sm:$0xff] %vm448_vm0, %v5144_v51  ;;  %v1943_v3 = vpack.c.bf16 %v1936_v52, %v1823_v40  ;;  %v1648_v10 = vld [vmem:[#allocation2 + $0x66] sm:$0xff]  ;;  %v1831_v17 = vpack.c.bf16 %v1936_v52, %v1936_v52  ;;  %v2278_v40 = vpack.c.bf16 %v2267_v46, %v2154_v29 }
 0x1d9   : > { %v1624_v20 = vld [vmem:[#allocation2 + $0x65] sm:$0xff]  ;;  %v1655_v21 = vpack.c.bf16 %v1648_v10, %v1648_v10 }
 0x1da   : > { %4025 = vmatmul.msk.bf16.gmra.mxu0 %vm448_vm0, %v1943_v3  ;;  %v1631_v13 = vpack.c.bf16 %v1624_v20, %v1624_v20  ;;  %v4273_v3 = vld [vmem:[%s5731_s6 + $0x80] sm:$0xff]  ;;  %v2043_v20 = vld [vmem:[#allocation2 + $0x38] sm:$0xff] }
 0x1db   : > { %2554 = vmatpush.bf16.msra.mxu1 %v4273_v3  ;;  %v2053_v14 = vpack.c.bf16 %v2043_v20, %v2042_v59 }
 0x1df   : > { %v1937_v39 = vld [vmem:[#allocation2 + $0x6f] sm:$0xff] }
 0x1e0   : > { %v1944_v7 = vpack.c.bf16 %v1937_v39, %v1937_v39  ;;  %v2269_v39 = vld [vmem:[#allocation2 + $0x41] sm:$0xff]  ;;  %v2500_v62 = vld [vmem:[#allocation2 + $0x6b] sm:$0xff]  ;;  %v2501_v1 = vld [vmem:[#allocation2 + $0x73] sm:$0xff] }
 0x1e2   : > { %3981 = vmatmul.msk.bf16.gmra.mxu1 %vm448_vm0, %v1655_v21  ;;  %v2156_v21 = vld [vmem:[#allocation2 + $0x39] sm:$0xff] }
 0x1e3   : > { %3996 = vmatmul.msk.bf16.gmra.mxu2 %vm448_vm0, %v1631_v13  ;;  %v2166_v23 = vpack.c.bf16 %v2156_v21, %v2267_v46 }
 0x1e4   : > { %4011 = vmatmul.msk.bf16.gmra.mxu3 %vm448_vm0, %v1831_v17 }
 0x1ea   : > { %4026 = vmatmul.msk.bf16.gmra.mxu0 %vm448_vm0, %v1944_v7 }
 0x1f2   : > { %4035 = vmatmul.msk.bf16.vlgmr.msrb.gmra.mxu1 %vm448_vm0, %v2051_v18  ;;  %v2279_v18 = vpack.c.bf16 %v2269_v39, %v2156_v21 }
 0x1f3   : > { %4050 = vmatmul.msk.bf16.vlgmr.msrb.gmra.mxu2 %vm448_vm0, %v2164_v25 }
 0x1f4   : > { %4065 = vmatmul.msk.bf16.vlgmr.msra.gmra.mxu3 %vm448_vm0, %v2277_v8 }
 0x1fa   : > { %4080 = vmatmul.msk.bf16.vlgmr.msra.gmra.mxu0 %vm448_vm0, %v2390_v11 }
 0x1ff   : > { %v1702_v15 = vpop.f32.mrf.mxu1 }
 0x202   : > { %4036 = vmatmul.msk.bf16.gmra.mxu1 %vm448_vm0, %v2052_v32 }
 0x203   : > { %4051 = vmatmul.msk.bf16.gmra.mxu2 %vm448_vm0, %v2165_v36 }
 0x204   : > { %4066 = vmatmul.msk.bf16.gmra.mxu3 %vm448_vm0, %v2278_v40  ;;  %v2045_v40 = vld [vmem:[#allocation2 + $0x48] sm:$0xff] }
 0x206   : > { %v1778_v31 = vpop.f32.mrf.mxu2 }
 0x207   : > { %v1779_v33 = vadd.f32 %v1778_v31, %v1702_v15  ;;  %v1878_v9 = vpop.f32.mrf.mxu3  ;;  %v1704_v43 = vpop.f32.mrf.mxu1  ;;  %v2381_v15 = vld [vmem:[#allocation2 + $0x3a] sm:$0xff]  ;;  %v2158_v31 = vld [vmem:[#allocation2 + $0x49] sm:$0xff] }
 0x208   : > { %v1991_v61 = vpop.f32.mrf.mxu0  ;;  %v2392_v32 = vpack.c.bf16 %v2382_v6, %v2381_v15  ;;  %v2167_v3 = vpack.c.bf16 %v2158_v31, %v2269_v39  ;;  %v2160_v6 = vld [vmem:[#allocation2 + $0x59] sm:$0xff]  ;;  %v2046_v15 = vld [vmem:[#allocation2 + $0x50] sm:$0xff] }
 0x209   : > { %v1912_v28 = vadd.f32 %v1878_v9, %v1779_v33  ;;  %v2271_v9 = vld [vmem:[#allocation2 + $0x51] sm:$0xff] }
 0x20a   : > { %4081 = vmatmul.msk.bf16.gmra.mxu0 %vm448_vm0, %v2391_v22  ;;  %v2054_v22 = vpack.c.bf16 %v2045_v40, %v2044_v41  ;;  %v2385_v41 = vld [vmem:[#allocation2 + $0x5a] sm:$0xff] }
 0x20b   : > { %v5160_v52 = vadd.f32 %v1991_v61, %v1912_v28 }
 0x20e   : > { %v1780_v10 = vpop.f32.mrf.mxu2 }
 0x20f   : > { %v1781_v13 = vadd.f32 %v1780_v10, %v1704_v43  ;;  %v1880_v17 = vpop.f32.mrf.mxu3  ;;  %v1707_v7 = vpop.f32.mrf.mxu1  ;;  %v2280_v10 = vpack.c.bf16 %v2271_v9, %v2158_v31  ;;  %v2386_v31 = vld [vmem:[#allocation2 + $0x62] sm:$0xff] }
 0x210   : > { %v1993_v35 = vpop.f32.mrf.mxu0 }
 0x211   : > { %v1913_v37 = vadd.f32 %v1880_v17, %v1781_v13  ;;  %v2384_v13 = vld [vmem:[#allocation2 + $0x52] sm:$0xff] }
 0x212   : > { %4037 = vmatmul.msk.bf16.gmra.mxu1 %vm448_vm0, %v2053_v14 }
 0x213   : > { %v5166_v25 = vadd.f32 %v1993_v35, %v1913_v37  ;;  %4052 = vmatmul.msk.bf16.gmra.mxu2 %vm448_vm0, %v2166_v23  ;;  %v2383_v37 = vld [vmem:[#allocation2 + $0x4a] sm:$0xff] }
 0x214   : > { %4067 = vmatmul.msk.bf16.gmra.mxu3 %vm448_vm0, %v2279_v18  ;;  %v2393_v23 = vpack.c.bf16 %v2384_v13, %v2383_v37  ;;  %v2048_v37 = vld [vmem:[#allocation2 + $0x60] sm:$0xff] }
 0x216   : > { %v1783_v8 = vpop.f32.mrf.mxu2 }
 0x217   : > { %v1784_v38 = vadd.f32 %v1783_v8, %v1707_v7  ;;  %v1883_v11 = vpop.f32.mrf.mxu3  ;;  %v1709_v19 = vpop.f32.mrf.mxu1  ;;  %v2047_v8 = vld [vmem:[#allocation2 + $0x58] sm:$0xff] }
 0x218   : > { %v1996_v29 = vpop.f32.mrf.mxu0 }
 0x219   : > { %v1914_v47 = vadd.f32 %v1883_v11, %v1784_v38  ;;  %v2273_v11 = vld [vmem:[#allocation2 + $0x61] sm:$0xff] }
 0x21a   : > { %4082 = vmatmul.msk.bf16.gmra.mxu0 %vm448_vm0, %v2392_v32  ;;  %v2168_v32 = vpack.c.bf16 %v2160_v6, %v2271_v9 }
 0x21b   : > { %v5171_v36 = vadd.f32 %v1996_v29, %v1914_v47  ;;  %v2055_v47 = vpack.c.bf16 %v2047_v8, %v2046_v15  ;;  %v2388_v15 = vld [vmem:[#allocation2 + $0x72] sm:$0xff] }
 0x21e   : > { %v1785_v46 = vpop.f32.mrf.mxu2 }
 0x21f   : > { %v1786_v60 = vadd.f32 %v1785_v46, %v1709_v19  ;;  %v1885_v33 = vpop.f32.mrf.mxu3  ;;  %v1712_v43 = vpop.f32.mrf.mxu1  ;;  %v2281_v46 = vpack.c.bf16 %v2273_v11, %v2160_v6 }
 0x220   : > { %v1998_v61 = vpop.f32.mrf.mxu0 }
 0x221   : > { %v1915_v28 = vadd.f32 %v1885_v33, %v1786_v60 }
 0x222   : > { %4038 = vmatmul.msk.bf16.gmra.mxu1 %vm448_vm0, %v2054_v22  ;;  %v2394_v22 = vpack.c.bf16 %v2386_v31, %v2385_v41  ;;  %v2050_v41 = vld [vmem:[#allocation2 + $0x70] sm:$0xff] }
 0x223   : > { %v5174_v20 = vadd.f32 %v1998_v61, %v1915_v28  ;;  %4053 = vmatmul.msk.bf16.gmra.mxu2 %vm448_vm0, %v2167_v3 }
 0x224   : > { %4068 = vmatmul.msk.bf16.gmra.mxu3 %vm448_vm0, %v2280_v10  ;;  %v2049_v10 = vld [vmem:[#allocation2 + $0x68] sm:$0xff] }
 0x226   : > { %v1788_v21 = vpop.f32.mrf.mxu2 }
 0x227   : > { %v1789_v17 = vadd.f32 %v1788_v21, %v1712_v43  ;;  %v1888_v7 = vpop.f32.mrf.mxu3  ;;  %v5179_v35 = vpop.f32.mrf.mxu1  ;;  %v2162_v21 = vld [vmem:[#allocation2 + $0x69] sm:$0xff] }
 0x228   : > { %v2001_v59 = vpop.f32.mrf.mxu0 }
 0x229   : > { %v1916_v14 = vadd.f32 %v1888_v7, %v1789_v17  ;;  %v2275_v17 = vld [vmem:[#allocation2 + $0x71] sm:$0xff] }
 0x22a   : > { %4083 = vmatmul.msk.bf16.gmra.mxu0 %vm448_vm0, %v2393_v23  ;;  %v2169_v23 = vpack.c.bf16 %v2162_v21, %v2273_v11  ;;  %v2282_v8 = vpack.c.bf16 %v2275_v17, %v2162_v21  ;;  %v2276_v11 = vld [vmem:[#allocation2 + $0x79] sm:$0xff] }
 0x22b   : > { %v5181_v39 = vadd.f32 %v2001_v59, %v1916_v14  ;;  %v2056_v14 = vpack.c.bf16 %v2049_v10, %v2048_v37  ;;  %v2283_v21 = vpack.c.bf16 %v2276_v11, %v2276_v11  ;;  %v2170_v37 = vpack.c.bf16 %v2275_v17, %v2275_v17 }
 0x22e   : > { %v5184_v18 = vpop.f32.mrf.mxu2 }
 0x22f   : > { %v5186_v38 = vpop.f32.mrf.mxu3  ;;  %v1717_v19 = vpop.f32.mrf.mxu1 }
 0x230   : > { %v5188_v29 = vpop.f32.mrf.mxu0 }
 0x232   : > { %4039 = vmatmul.msk.bf16.gmra.mxu1 %vm448_vm0, %v2055_v47 }
 0x233   : > { %4054 = vmatmul.msk.bf16.gmra.mxu2 %vm448_vm0, %v2168_v32 }
 0x234   : > { %4069 = vmatmul.msk.bf16.gmra.mxu3 %vm448_vm0, %v2281_v46 }
 0x236   : > { %v1793_v40 = vpop.f32.mrf.mxu2 }
 0x237   : > { %v1794_v60 = vadd.f32 %v1793_v40, %v1717_v19  ;;  %v1893_v33 = vpop.f32.mrf.mxu3  ;;  %v5193_v43 = vpop.f32.mrf.mxu1  ;;  %v2387_v19 = vld [vmem:[#allocation2 + $0x6a] sm:$0xff] }
 0x238   : > { %v2006_v61 = vpop.f32.mrf.mxu0 }
 0x239   : > { %v1918_v28 = vadd.f32 %v1893_v33, %v1794_v60  ;;  %v2395_v60 = vpack.c.bf16 %v2388_v15, %v2387_v19 }
 0x23a   : > { %4084 = vmatmul.msk.bf16.gmra.mxu0 %vm448_vm0, %v2394_v22 }
 0x23b   : > { %v5195_v3 = vadd.f32 %v2006_v61, %v1918_v28 }
 0x23e   : > { %v5198_v9 = vpop.f32.mrf.mxu2 }
 0x23f   : > { %v5200_v13 = vpop.f32.mrf.mxu3  ;;  %v1722_v7 = vpop.f32.mrf.mxu1 }
 0x240   : > { %v5202_v59 = vpop.f32.mrf.mxu0 }
 0x242   : > { %4040 = vmatmul.msk.bf16.gmra.mxu1 %vm448_vm0, %v2056_v14  ;;  %v2389_v14 = vld [vmem:[#allocation2 + $0x7a] sm:$0xff] }
 0x243   : > { %4055 = vmatmul.msk.bf16.gmra.mxu2 %vm448_vm0, %v2169_v23  ;;  %v2396_v19 = vpack.c.bf16 %v2389_v14, %v2389_v14 }
 0x244   : > { %4070 = vmatmul.msk.bf16.gmra.mxu3 %vm448_vm0, %v2282_v8 }
 0x246   : > { %v1798_v6 = vpop.f32.mrf.mxu2 }
 0x247   : > { %v1799_v47 = vadd.f32 %v1798_v6, %v1722_v7  ;;  %v1898_v32 = vpop.f32.mrf.mxu3  ;;  %v5207_v46 = vpop.f32.mrf.mxu1  ;;  %v2057_v7 = vpack.c.bf16 %v2050_v41, %v2050_v41 }
 0x248   : > { %v2011_v40 = vpop.f32.mrf.mxu0 }
 0x249   : > { %v1920_v31 = vadd.f32 %v1898_v32, %v1799_v47 }
 0x24a   : > { %4085 = vmatmul.msk.bf16.gmra.mxu0 %vm448_vm0, %v2395_v60 }
 0x24b   : > { %v5209_v33 = vadd.f32 %v2011_v40, %v1920_v31  ;;  %v2491_v31 = vld [vmem:[#allocation2 + $0x23] sm:$0xff] }
 0x24e   : > { %v5212_v61 = vpop.f32.mrf.mxu2 }
 0x24f   : > { %v5214_v28 = vpop.f32.mrf.mxu3  ;;  %v1727_v22 = vpop.f32.mrf.mxu1 }
 0x250   : > { %v5216_v10 = vpop.f32.mrf.mxu0 }
 0x252   : > { %4041 = vmatmul.msk.bf16.gmra.mxu1 %vm448_vm0, %v2057_v7  ;;  %v4278_v7 = vld [vmem:[%s5734_s9 + $0x18] sm:$0xff] }
 0x253   : > { %4056 = vmatmul.msk.bf16.gmra.mxu2 %vm448_vm0, %v2170_v37 }
 0x254   : > { %4071 = vmatmul.msk.bf16.gmra.mxu3 %vm448_vm0, %v2283_v21  ;;  %v2490_v21 = vld [vmem:[#allocation2 + $0x1b] sm:$0xff]  ;;  %2763 = vmatpush.bf16.msra.mxu2 %v4278_v7 }
 0x256   : > { %v1803_v23 = vpop.f32.mrf.mxu2 }
 0x257   : > { %v1804_v8 = vadd.f32 %v1803_v23, %v1727_v22  ;;  %v1903_v6 = vpop.f32.mrf.mxu3  ;;  %v5221_v15 = vpop.f32.mrf.mxu1  ;;  %v2503_v22 = vpack.c.bf16 %v2491_v31, %v2490_v21  ;;  %v2492_v21 = vld [vmem:[#allocation2 + $0x2b] sm:$0xff] }
 0x258   : > { %v2016_v47 = vpop.f32.mrf.mxu0  ;;  %v2504_v4 = vpack.c.bf16 %v2493_v44, %v2492_v21 }
 0x259   : > { %v1922_v32 = vadd.f32 %v1903_v6, %v1804_v8 }
 0x25a   : > { %4086 = vmatmul.msk.bf16.gmra.mxu0 %vm448_vm0, %v2396_v19 }
 0x25b   : > { %v5223_v40 = vadd.f32 %v2016_v47, %v1922_v32 }
 0x25e   : > { %v5226_v17 = vpop.f32.mrf.mxu2 }
 0x25f   : > { %v5228_v60 = vpop.f32.mrf.mxu3  ;;  %v1732_v11 = vpop.f32.mrf.mxu1 }
 0x260   : > { %v5230_v41 = vpop.f32.mrf.mxu0 }
 0x261   : > { %5778 = vst [vmem:[#allocation21_spill] sm:$0xff] %v5230_v41 }
 0x262   : > { %4095 = vmatmul.msk.bf16.vlgmr.msra.gmra.mxu1 %vm448_vm0, %v2503_v22 }
 0x266   : > { %v1808_v37 = vpop.f32.mrf.mxu2 }
 0x267   : > { %v1809_v14 = vadd.f32 %v1808_v37, %v1732_v11  ;;  %v1908_v23 = vpop.f32.mrf.mxu3  ;;  %v1734_v8 = vpop.f32.mrf.mxu1 }
 0x268   : > { %v2021_v6 = vpop.f32.mrf.mxu0 }
 0x269   : > { %v1924_v19 = vadd.f32 %v1908_v23, %v1809_v14 }
 0x26b   : > { %v5236_v47 = vadd.f32 %v2021_v6, %v1924_v19 }
 0x26e   : > { %v1810_v32 = vpop.f32.mrf.mxu2 }
 0x26f   : > { %v1910_v51 = vpop.f32.mrf.mxu3  ;;  %v2104_v31 = vpop.f32.mrf.mxu1 }
 0x270   : > { %v2023_v16 = vpop.f32.mrf.mxu0  ;;  %v2138_v22 = vadd.f32 %v2104_v31, %v5160_v52 }
 0x271   : > { %v2495_v16 = vld [vmem:[#allocation2 + $0x43] sm:$0xff] }
 0x272   : > { %4096 = vmatmul.msk.bf16.gmra.mxu1 %vm448_vm0, %v2504_v4  ;;  %v2494_v4 = vld [vmem:[#allocation2 + $0x3b] sm:$0xff] }
 0x273   : > { %v2505_v32 = vpack.c.bf16 %v2495_v16, %v2494_v4 }
 0x276   : > { %v2217_v7 = vpop.f32.mrf.mxu2 }
 0x277   : > { %v2251_v12 = vadd.f32 %v2217_v7, %v2138_v22  ;;  %v2330_v11 = vpop.f32.mrf.mxu3  ;;  %v2106_v37 = vpop.f32.mrf.mxu1 }
 0x278   : > { %v2443_v8 = vpop.f32.mrf.mxu0  ;;  %v5241_v14 = vadd.f32 %v2106_v37, %v5166_v25 }
 0x279   : > { %v2364_v49 = vadd.f32 %v2330_v11, %v2251_v12 }
 0x27b   : > { %v5243_v23 = vadd.f32 %v2443_v8, %v2364_v49  ;;  %v2497_v8 = vld [vmem:[#allocation2 + $0x53] sm:$0xff] }
 0x27e   : > { %v5245_v51 = vpop.f32.mrf.mxu2 }
 0x27f   : > { %v5247_v6 = vpop.f32.mrf.mxu3  ;;  %v2109_v52 = vpop.f32.mrf.mxu1 }
 0x280   : > { %v5249_v44 = vpop.f32.mrf.mxu0  ;;  %v2140_v19 = vadd.f32 %v2109_v52, %v5171_v36  ;;  %v2496_v52 = vld [vmem:[#allocation2 + $0x4b] sm:$0xff] }
 0x282   : > { %4097 = vmatmul.msk.bf16.gmra.mxu1 %vm448_vm0, %v2505_v32 }
 0x286   : > { %v2222_v12 = vpop.f32.mrf.mxu2 }
 0x287   : > { %v2253_v31 = vadd.f32 %v2222_v12, %v2140_v19  ;;  %v2335_v25 = vpop.f32.mrf.mxu3  ;;  %v2111_v21 = vpop.f32.mrf.mxu1  ;;  %v2506_v19 = vpack.c.bf16 %v2497_v8, %v2496_v52 }
 0x288   : > { %v2448_v49 = vpop.f32.mrf.mxu0  ;;  %v5254_v7 = vadd.f32 %v2111_v21, %v5174_v20 }
 0x289   : > { %v2366_v22 = vadd.f32 %v2335_v25, %v2253_v31 }
 0x28b   : > { %v5256_v11 = vadd.f32 %v2448_v49, %v2366_v22  ;;  %v4277_v22 = vld [vmem:[%s5734_s9 + $0x10] sm:$0xff] }
 0x28c   : > { %2764 = vmatpush.bf16.msra.mxu2 %v4277_v22 }
 0x28e   : > { %v5258_v37 = vpop.f32.mrf.mxu2 }
 0x28f   : > { %v5260_v57 = vpop.f32.mrf.mxu3  ;;  %v2114_v36 = vpop.f32.mrf.mxu1 }
 0x290   : > { %v5262_v16 = vpop.f32.mrf.mxu0  ;;  %v2142_v4 = vadd.f32 %v2114_v36, %v5181_v39  ;;  %v2499_v39 = vld [vmem:[#allocation2 + $0x63] sm:$0xff] }
 0x292   : > { %4098 = vmatmul.msk.bf16.gmra.mxu1 %vm448_vm0, %v2506_v19 }
 0x296   : > { %v2227_v32 = vpop.f32.mrf.mxu2 }
 0x297   : > { %v2255_v12 = vadd.f32 %v2227_v32, %v2142_v4  ;;  %v2340_v20 = vpop.f32.mrf.mxu3  ;;  %v5266_v31 = vpop.f32.mrf.mxu1  ;;  %v2498_v4 = vld [vmem:[#allocation2 + $0x5b] sm:$0xff] }
 0x298   : > { %v2453_v25 = vpop.f32.mrf.mxu0  ;;  %v2507_v32 = vpack.c.bf16 %v2499_v39, %v2498_v4 }
 0x299   : > { %v2368_v21 = vadd.f32 %v2340_v20, %v2255_v12 }
 0x29b   : > { %v5268_v49 = vadd.f32 %v2453_v25, %v2368_v21 }
 0x29e   : > { %v5273_v56 = vpop.f32.mrf.mxu2 }
 0x29f   : > { %v5275_v8 = vpop.f32.mrf.mxu3  ;;  %v2119_v36 = vpop.f32.mrf.mxu1 }
 0x2a0   : > { %v5277_v52 = vpop.f32.mrf.mxu0  ;;  %v2144_v19 = vadd.f32 %v2119_v36, %v5195_v3  ;;  %v2508_v36 = vpack.c.bf16 %v2501_v1, %v2500_v62 }
 0x2a2   : > { %4099 = vmatmul.msk.bf16.gmra.mxu1 %vm448_vm0, %v2507_v32 }
 0x2a6   : > { %v2232_v12 = vpop.f32.mrf.mxu2 }
 0x2a7   : > { %v2257_v20 = vadd.f32 %v2232_v12, %v2144_v19  ;;  %v2345_v25 = vpop.f32.mrf.mxu3  ;;  %v5281_v21 = vpop.f32.mrf.mxu1 }
 0x2a8   : > { %v2458_v22 = vpop.f32.mrf.mxu0 }
 0x2a9   : > { %v2370_v54 = vadd.f32 %v2345_v25, %v2257_v20 }
 0x2ab   : > { %v5283_v42 = vadd.f32 %v2458_v22, %v2370_v54  ;;  %v2502_v22 = vld [vmem:[#allocation2 + $0x7b] sm:$0xff] }
 0x2ac   : > { %v2509_v2 = vpack.c.bf16 %v2502_v22, %v2502_v22  ;;  %v4276_v22 = vld [vmem:[%s5734_s9 + $0x8] sm:$0xff] }
 0x2ad   : > { %2839 = vmatpush.bf16.msrb.mxu3 %v4276_v22 }
 0x2ae   : > { %v5285_v58 = vpop.f32.mrf.mxu2 }
 0x2af   : > { %v5287_v48 = vpop.f32.mrf.mxu3  ;;  %v2124_v55 = vpop.f32.mrf.mxu1 }
 0x2b0   : > { %v5289_v3 = vpop.f32.mrf.mxu0  ;;  %v2146_v39 = vadd.f32 %v2124_v55, %v5209_v33 }
 0x2b2   : > { %4100 = vmatmul.msk.bf16.gmra.mxu1 %vm448_vm0, %v2508_v36 }
 0x2b6   : > { %v2237_v4 = vpop.f32.mrf.mxu2 }
 0x2b7   : > { %v2259_v19 = vadd.f32 %v2237_v4, %v2146_v39  ;;  %v2350_v32 = vpop.f32.mrf.mxu3  ;;  %v5293_v12 = vpop.f32.mrf.mxu1 }
 0x2b8   : > { %v2463_v54 = vpop.f32.mrf.mxu0 }
 0x2b9   : > { %v2372_v20 = vadd.f32 %v2350_v32, %v2259_v19 }
 0x2bb   : > { %v5295_v25 = vadd.f32 %v2463_v54, %v2372_v20 }
 0x2be   : > { %v5297_v45 = vpop.f32.mrf.mxu2 }
 0x2bf   : > { %v5299_v24 = vpop.f32.mrf.mxu3  ;;  %v2129_v41 = vpop.f32.mrf.mxu1 }
 0x2c0   : > { %v5301_v55 = vpop.f32.mrf.mxu0  ;;  %v2148_v1 = vadd.f32 %v2129_v41, %v5223_v40 }
 0x2c2   : > { %4101 = vmatmul.msk.bf16.gmra.mxu1 %vm448_vm0, %v2509_v2  ;;  %v4280_v2 = vld [vmem:[%s5734_s9 + $0x28] sm:$0xff] }
 0x2c3   : > { %2939 = vmatpush.bf16.msrb.mxu0 %v4280_v2 }
 0x2c6   : > { %v2242_v62 = vpop.f32.mrf.mxu2 }
 0x2c7   : > { %v2261_v33 = vadd.f32 %v2242_v62, %v2148_v1  ;;  %v2355_v39 = vpop.f32.mrf.mxu3  ;;  %v5305_v36 = vpop.f32.mrf.mxu1  ;;  %v4275_v62 = vld [vmem:[%s5734_s9] sm:$0xff] }
 0x2c8   : > { %v2468_v4 = vpop.f32.mrf.mxu0  ;;  %2840 = vmatpush.bf16.msrb.mxu3 %v4275_v62  ;;  %v4281_v62 = vld [vmem:[%s5734_s9 + $0x30] sm:$0xff] }
 0x2c9   : > { %v2374_v19 = vadd.f32 %v2355_v39, %v2261_v33  ;;  %v4279_v33 = vld [vmem:[%s5734_s9 + $0x20] sm:$0xff] }
 0x2ca   : > { %2940 = vmatpush.bf16.msrb.mxu0 %v4279_v33  ;;  %v2252_v33 = vadd.f32 %v5245_v51, %v5241_v14 }
 0x2cb   : > { %v5307_v32 = vadd.f32 %v2468_v4, %v2374_v19 }
 0x2cd   : > { %5779 = vst [vmem:[#allocation22_spill] sm:$0xff] %v5307_v32  ;;  %v2876_v32 = vld [vmem:[#allocation3 + $0x7] sm:$0xff] }
 0x2ce   : > { %v5309_v54 = vpop.f32.mrf.mxu2 }
 0x2cf   : > { %v5311_v20 = vpop.f32.mrf.mxu3  ;;  %v2134_v40 = vpop.f32.mrf.mxu1 }
 0x2d0   : > { %5780 = vst [vmem:[#allocation23_spill] sm:$0xff] %v5311_v20  ;;  %v5319_v41 = vpop.f32.mrf.mxu0  ;;  %v2150_v1 = vadd.f32 %v2134_v40, %v5236_v47  ;;  %v4284_v20 = vld [vmem:[%s5734_s9 + $0x48] sm:$0xff] }
 0x2d1   : > { %5781 = vst [vmem:[#allocation24_spill] sm:$0xff] %v5319_v41  ;;  %v4282_v41 = vld [vmem:[%s5734_s9 + $0x38] sm:$0xff]  ;;  %3165 = vmatpush.bf16.msrb.mxu2 %v4284_v20  ;;  %v2365_v20 = vadd.f32 %v5247_v6, %v2252_v33  ;;  %v2254_v6 = vadd.f32 %v5258_v37, %v5254_v7 }
 0x2d2   : > { %3052 = vmatpush.bf16.msrb.mxu1 %v4282_v41  ;;  %v5344_v41 = vld [vmem:[%s5732_s7] ss:$0 sm:$0xff] }
 0x2d3   : > { %v2478_v51 = vadd.f32 %v5249_v44, %v2365_v20 }
 0x2d6   : > { %v2247_v39 = vpop.f32.mrf.mxu2  ;;  %3053 = vmatpush.bf16.msrb.mxu1 %v4281_v62 }
 0x2d7   : > { %v2263_v4 = vadd.f32 %v2247_v39, %v2150_v1  ;;  %v2360_v19 = vpop.f32.mrf.mxu3  ;;  %v2136_v47 = vpop.f32.mrf.mxu1 }
 0x2d8   : > { %v2473_v22 = vpop.f32.mrf.mxu0 }
 0x2d9   : > { %v2376_v2 = vadd.f32 %v2360_v19, %v2263_v4 }
 0x2db   : > { %v5331_v40 = vadd.f32 %v2473_v22, %v2376_v2  ;;  %v5350_v22 = vld [vmem:[%s5733_s8] ss:$0 sm:$0xff] }
 0x2dd   : > { %5782 = vst [vmem:[#allocation25_spill] sm:$0xff] %v5331_v40  ;;  %v2700_v40 = vld [vmem:[#allocation3 + $0x6] sm:$0xff] }
 0x2de   : > { %v2249_v1 = vpop.f32.mrf.mxu2 }
 0x2df   : > { %v2362_v39 = vpop.f32.mrf.mxu3  ;;  %v2556_v4 = vpop.f32.mrf.mxu1 }
 0x2e0   : > { %v2475_v19 = vpop.f32.mrf.mxu0  ;;  %v2590_v47 = vadd.f32 %v2556_v4, %v5243_v23 }
 0x2e2   : > { %v2607_v2 = vmul.f32 %v5344_v41, %v2590_v47 }
 0x2e4   : > { %v2624_v14 = vadd.f32 %v5350_v22, %v2607_v2  ;;  %v2676_v2 = vld [vmem:[#allocation3 + $0x5] sm:$0xff] }
 0x2e6   : > { %v2637_v62 = vmax.f32 %v2624_v14, 0.0  ;;  %v1791_v14 = vadd.f32 %v5184_v18, %v5179_v35 }
 0x2e7   : > { %v2558_v1 = vpop.f32.mrf.mxu1 }
 0x2e8   : > { %v2650_v39 = vmul.f32 %v2637_v62, %v4912_v63  ;;  %v2591_v19 = vadd.f32 %v2558_v1, %v2478_v51  ;;  %v2367_v51 = vadd.f32 %v5260_v57, %v2254_v6  ;;  %v1917_v35 = vadd.f32 %v5186_v38, %v1791_v14 }
 0x2ea   : > { %2663 = vst.msk [vmem:[#allocation3 + $0x10] sm:$0xff] %vm448_vm0, %v2650_v39  ;;  %v2608_v23 = vmul.f32 %v5344_v41, %v2591_v19  ;;  %v2480_v57 = vadd.f32 %v5262_v16, %v2367_v51 }
 0x2ec   : > { %v2625_v4 = vadd.f32 %v5350_v22, %v2608_v23 }
 0x2ee   : > { %v2638_v33 = vmax.f32 %v2625_v4, 0.0 }
 0x2ef   : > { %v2561_v47 = vpop.f32.mrf.mxu1 }
 0x2f0   : > { %v2651_v44 = vmul.f32 %v2638_v33, %v4930_v26  ;;  %v2592_v20 = vadd.f32 %v2561_v47, %v5256_v11 }
 0x2f1   : > { %v2701_v62 = vld [vmem:[#allocation3 + $0xe] sm:$0xff] }
 0x2f2   : > { %v2677_v1 = vld [vmem:[#allocation3 + $0xd] sm:$0xff]  ;;  %2664 = vst.msk [vmem:[#allocation3 + $0x18] sm:$0xff] %vm448_vm0, %v2651_v44  ;;  %v2609_v7 = vmul.f32 %v5344_v41, %v2592_v20  ;;  %v2713_v37 = vpack.c.bf16 %v2701_v62, %v2700_v40  ;;  %v2030_v40 = vadd.f32 %v5188_v29, %v1917_v35 }
 0x2f3   : > { %v2877_v39 = vld [vmem:[#allocation3 + $0xf] sm:$0xff]  ;;  %v2689_v19 = vpack.c.bf16 %v2677_v1, %v2676_v2 }
 0x2f4   : > { %v2889_v23 = vpack.c.bf16 %v2877_v39, %v2876_v32  ;;  %v2626_v4 = vadd.f32 %v5350_v22, %v2609_v7  ;;  %4110 = vmatmul.msk.bf16.vlgmr.msra.gmra.mxu2 %vm448_vm0, %v2713_v37  ;;  %v2143_v44 = vadd.f32 %v5266_v31, %v2030_v40  ;;  %v1796_v7 = vadd.f32 %v5198_v9, %v5193_v43 }
 0x2f5   : > { %4125 = vmatmul.msk.bf16.vlgmr.msrb.gmra.mxu3 %vm448_vm0, %v2689_v19 }
 0x2f6   : > { %4140 = vmatmul.msk.bf16.vlgmr.msrb.gmra.mxu0 %vm448_vm0, %v2889_v23  ;;  %v2639_v18 = vmax.f32 %v2626_v4, 0.0  ;;  %v2256_v16 = vadd.f32 %v5273_v56, %v2143_v44  ;;  %v1919_v43 = vadd.f32 %v5200_v13, %v1796_v7 }
 0x2f7   : > { %v2563_v11 = vpop.f32.mrf.mxu1 }
 0x2f8   : > { %v2652_v6 = vmul.f32 %v2639_v18, %v4947_v30  ;;  %v2593_v33 = vadd.f32 %v2563_v11, %v2480_v57 }
 0x2f9   : > { %v2990_v32 = vld [vmem:[#allocation3 + $0x17] sm:$0xff] }
 0x2fa   : > { %2665 = vst.msk [vmem:[#allocation3 + $0x20] sm:$0xff] %vm448_vm0, %v2652_v6  ;;  %v2610_v47 = vmul.f32 %v5344_v41, %v2593_v33  ;;  %v3002_v2 = vpack.c.bf16 %v2990_v32, %v2877_v39  ;;  %v2702_v62 = vld [vmem:[#allocation3 + $0x16] sm:$0xff]  ;;  %v2369_v39 = vadd.f32 %v5275_v8, %v2256_v16  ;;  %v2032_v6 = vadd.f32 %v5202_v59, %v1919_v43 }
 0x2fb   : > { %v2678_v1 = vld [vmem:[#allocation3 + $0x15] sm:$0xff] }
 0x2fc   : > { %v2627_v38 = vadd.f32 %v5350_v22, %v2610_v47  ;;  %4155 = vmatmul.msk.bf16.vlgmr.msrb.gmra.mxu1 %vm448_vm0, %v3002_v2  ;;  %v2482_v9 = vadd.f32 %v5277_v52, %v2369_v39  ;;  %v2145_v47 = vadd.f32 %v5281_v21, %v2032_v6  ;;  %v1806_v6 = vadd.f32 %v5226_v17, %v5221_v15 }
 0x2fe   : > { %v2640_v20 = vmax.f32 %v2627_v38, 0.0  ;;  %v2258_v52 = vadd.f32 %v5285_v58, %v2145_v47  ;;  %v1923_v15 = vadd.f32 %v5228_v60, %v1806_v6  ;;  %v4286_v6 = vld [vmem:[%s5734_s9 + $0x58] sm:$0xff] }
 0x2ff   : > { %v2566_v14 = vpop.f32.mrf.mxu1  ;;  %3278 = vmatpush.bf16.msra.mxu3 %v4286_v6 }
 0x300   : > { %v2653_v51 = vmul.f32 %v2640_v20, %v4968_v27  ;;  %v2594_v29 = vadd.f32 %v2566_v14, %v5268_v49  ;;  %v1801_v14 = vadd.f32 %v5212_v61, %v5207_v46 }
 0x301   : > { %v2703_v31 = vld [vmem:[#allocation3 + $0x1e] sm:$0xff] }
 0x302   : > { %v2679_v37 = vld [vmem:[#allocation3 + $0x1d] sm:$0xff]  ;;  %2666 = vst.msk [vmem:[#allocation3 + $0x28] sm:$0xff] %vm448_vm0, %v2653_v51  ;;  %v2611_v56 = vmul.f32 %v5344_v41, %v2594_v29  ;;  %v2714_v23 = vpack.c.bf16 %v2703_v31, %v2702_v62  ;;  %v2371_v51 = vadd.f32 %v5287_v48, %v2258_v52  ;;  %v1921_v48 = vadd.f32 %v5214_v28, %v1801_v14 }
 0x303   : > { %v2879_v19 = vld [vmem:[#allocation3 + $0x1f] sm:$0xff]  ;;  %v2690_v4 = vpack.c.bf16 %v2679_v37, %v2678_v1 }
 0x304   : > { %v2890_v35 = vpack.c.bf16 %v2879_v19, %v2990_v32  ;;  %v2628_v57 = vadd.f32 %v5350_v22, %v2611_v56  ;;  %4111 = vmatmul.msk.bf16.gmra.mxu2 %vm448_vm0, %v2714_v23  ;;  %v2484_v46 = vadd.f32 %v5289_v3, %v2371_v51  ;;  %v2034_v23 = vadd.f32 %v5216_v10, %v1921_v48  ;;  %v5786_v48 = vld [vmem:[#allocation23_spill] sm:$0xff] }
 0x305   : > { %4126 = vmatmul.msk.bf16.gmra.mxu3 %vm448_vm0, %v2690_v4 }
 0x306   : > { %4141 = vmatmul.msk.bf16.gmra.mxu0 %vm448_vm0, %v2890_v35  ;;  %v2641_v49 = vmax.f32 %v2628_v57, 0.0  ;;  %v2147_v28 = vadd.f32 %v5293_v12, %v2034_v23 }
 0x307   : > { %v2568_v8 = vpop.f32.mrf.mxu1 }
 0x308   : > { %v2654_v18 = vmul.f32 %v2641_v49, %v4985_v34  ;;  %v2595_v11 = vadd.f32 %v2568_v8, %v2482_v9  ;;  %v2260_v3 = vadd.f32 %v5297_v45, %v2147_v28 }
 0x309   : > { %v2992_v33 = vld [vmem:[#allocation3 + $0x27] sm:$0xff] }
 0x30a   : > { %2667 = vst.msk [vmem:[#allocation3 + $0x30] sm:$0xff] %vm448_vm0, %v2654_v18  ;;  %v2612_v40 = vmul.f32 %v5344_v41, %v2595_v11  ;;  %v3003_v32 = vpack.c.bf16 %v2992_v33, %v2879_v19  ;;  %v2704_v16 = vld [vmem:[#allocation3 + $0x26] sm:$0xff] }
 0x30b   : > { %v2680_v20 = vld [vmem:[#allocation3 + $0x25] sm:$0xff] }
 0x30c   : > { %v2629_v13 = vadd.f32 %v5350_v22, %v2612_v40  ;;  %4156 = vmatmul.msk.bf16.gmra.mxu1 %vm448_vm0, %v3003_v32 }
 0x30e   : > { %v2642_v2 = vmax.f32 %v2629_v13, 0.0 }
 0x30f   : > { %v2571_v44 = vpop.f32.mrf.mxu1 }
 0x310   : > { %v2655_v38 = vmul.f32 %v2642_v2, %v5006_v5  ;;  %v2596_v59 = vadd.f32 %v2571_v44, %v5283_v42  ;;  %v4283_v42 = vld [vmem:[%s5734_s9 + $0x40] sm:$0xff] }
 0x311   : > { %v2705_v21 = vld [vmem:[#allocation3 + $0x2e] sm:$0xff]  ;;  %3166 = vmatpush.bf16.msrb.mxu2 %v4283_v42 }
 0x312   : > { %v2681_v29 = vld [vmem:[#allocation3 + $0x2d] sm:$0xff]  ;;  %2668 = vst.msk [vmem:[#allocation3 + $0x38] sm:$0xff] %vm448_vm0, %v2655_v38  ;;  %v2613_v58 = vmul.f32 %v5344_v41, %v2596_v59  ;;  %v2715_v1 = vpack.c.bf16 %v2705_v21, %v2704_v16 }
 0x313   : > { %v2881_v62 = vld [vmem:[#allocation3 + $0x2f] sm:$0xff]  ;;  %v2691_v7 = vpack.c.bf16 %v2681_v29, %v2680_v20 }
 0x314   : > { %v2891_v39 = vpack.c.bf16 %v2881_v62, %v2992_v33  ;;  %v2630_v31 = vadd.f32 %v5350_v22, %v2613_v58  ;;  %4112 = vmatmul.msk.bf16.gmra.mxu2 %vm448_vm0, %v2715_v1  ;;  %v2373_v33 = vadd.f32 %v5299_v24, %v2260_v3  ;;  %v5783_v59 = vld [vmem:[#allocation21_spill] sm:$0xff]  ;;  %v5788_v3 = vld [vmem:[#allocation15_spill] sm:$0xff] }
 0x315   : > { %4127 = vmatmul.msk.bf16.gmra.mxu3 %vm448_vm0, %v2691_v7  ;;  %v2036_v16 = vadd.f32 %v5783_v59, %v1923_v15  ;;  %v5784_v58 = vld [vmem:[#allocation13_spill] sm:$0xff]  ;;  %v5785_v7 = vld [vmem:[#allocation22_spill] sm:$0xff] }
 0x316   : > { %4142 = vmatmul.msk.bf16.gmra.mxu0 %vm448_vm0, %v2891_v39  ;;  %v2643_v61 = vmax.f32 %v2630_v31, 0.0  ;;  %v2486_v24 = vadd.f32 %v5301_v55, %v2373_v33  ;;  %v4288_v33 = vld [vmem:[%s5734_s9 + $0x68] sm:$0xff] }
 0x317   : > { %v2573_v37 = vpop.f32.mrf.mxu1  ;;  %v2149_v21 = vadd.f32 %v5305_v36, %v2036_v16  ;;  %3391 = vmatpush.bf16.msra.mxu0 %v4288_v33 }
 0x318   : > { %v2656_v19 = vmul.f32 %v2643_v61, %v5025_v0  ;;  %v2597_v56 = vadd.f32 %v2573_v37, %v2484_v46 }
 0x319   : > { %v2994_v4 = vld [vmem:[#allocation3 + $0x37] sm:$0xff]  ;;  %v2262_v55 = vadd.f32 %v5309_v54, %v2149_v21 }
 0x31a   : > { %2669 = vst.msk [vmem:[#allocation3 + $0x40] sm:$0xff] %vm448_vm0, %v2656_v19  ;;  %v2614_v35 = vmul.f32 %v5344_v41, %v2597_v56  ;;  %v3004_v57 = vpack.c.bf16 %v2994_v4, %v2881_v62  ;;  %v2706_v18 = vld [vmem:[#allocation3 + $0x36] sm:$0xff] }
 0x31b   : > { %v2682_v11 = vld [vmem:[#allocation3 + $0x35] sm:$0xff]  ;;  %v2375_v46 = vadd.f32 %v5786_v48, %v2262_v55  ;;  %v5791_v55 = vld [vmem:[#allocation19_spill] sm:$0xff] }
 0x31c   : > { %v2631_v43 = vadd.f32 %v5350_v22, %v2614_v35  ;;  %4157 = vmatmul.msk.bf16.gmra.mxu1 %vm448_vm0, %v3004_v57  ;;  %v5787_v35 = vld [vmem:[#allocation24_spill] sm:$0xff] }
 0x31d   : > { %v2488_v57 = vadd.f32 %v5787_v35, %v2375_v46 }
 0x31e   : > { %v2644_v9 = vmax.f32 %v2631_v43, 0.0 }
 0x31f   : > { %v2576_v49 = vpop.f32.mrf.mxu1 }
 0x320   : > { %v2657_v8 = vmul.f32 %v2644_v9, %v5047_v50  ;;  %v2598_v10 = vadd.f32 %v2576_v49, %v5295_v25 }
 0x321   : > { %v2707_v12 = vld [vmem:[#allocation3 + $0x3e] sm:$0xff] }
 0x322   : > { %v2683_v40 = vld [vmem:[#allocation3 + $0x3d] sm:$0xff]  ;;  %2670 = vst.msk [vmem:[#allocation3 + $0x48] sm:$0xff] %vm448_vm0, %v2657_v8  ;;  %v2615_v45 = vmul.f32 %v5344_v41, %v2598_v10  ;;  %v2716_v47 = vpack.c.bf16 %v2707_v12, %v2706_v18 }
 0x323   : > { %v2883_v32 = vld [vmem:[#allocation3 + $0x3f] sm:$0xff]  ;;  %v2692_v13 = vpack.c.bf16 %v2683_v40, %v2682_v11 }
 0x324   : > { %v2892_v52 = vpack.c.bf16 %v2883_v32, %v2994_v4  ;;  %v2632_v2 = vadd.f32 %v5350_v22, %v2615_v45  ;;  %4113 = vmatmul.msk.bf16.gmra.mxu2 %vm448_vm0, %v2716_v47  ;;  %v4287_v45 = vld [vmem:[%s5734_s9 + $0x60] sm:$0xff]  ;;  %v5789_v47 = vld [vmem:[#allocation17_spill] sm:$0xff] }
 0x325   : > { %4128 = vmatmul.msk.bf16.gmra.mxu3 %vm448_vm0, %v2692_v13  ;;  %3392 = vmatpush.bf16.msra.mxu0 %v4287_v45 }
 0x326   : > { %4143 = vmatmul.msk.bf16.gmra.mxu0 %vm448_vm0, %v2892_v52  ;;  %v2645_v17 = vmax.f32 %v2632_v2, 0.0  ;;  %v5790_v52 = vld [vmem:[#allocation25_spill] sm:$0xff] }
 0x327   : > { %v2578_v25 = vpop.f32.mrf.mxu1 }
 0x328   : > { %v2658_v44 = vmul.f32 %v2645_v17, %v5064_v53  ;;  %v2599_v38 = vadd.f32 %v2578_v25, %v2486_v24 }
 0x329   : > { %v2996_v20 = vld [vmem:[#allocation3 + $0x47] sm:$0xff] }
 0x32a   : > { %2671 = vst.msk [vmem:[#allocation3 + $0x50] sm:$0xff] %vm448_vm0, %v2658_v44  ;;  %v2616_v14 = vmul.f32 %v5344_v41, %v2599_v38  ;;  %v3005_v51 = vpack.c.bf16 %v2996_v20, %v2883_v32  ;;  %v2708_v42 = vld [vmem:[#allocation3 + $0x46] sm:$0xff] }
 0x32b   : > { %v2684_v31 = vld [vmem:[#allocation3 + $0x45] sm:$0xff] }
 0x32c   : > { %v2633_v60 = vadd.f32 %v5350_v22, %v2616_v14  ;;  %4158 = vmatmul.msk.bf16.gmra.mxu1 %vm448_vm0, %v3005_v51  ;;  %v4285_v32 = vld [vmem:[%s5734_s9 + $0x50] sm:$0xff]  ;;  %v4292_v51 = vld [vmem:[%s5734_s9 + $0x88] sm:$0xff] }
 0x32d   : > { %3279 = vmatpush.bf16.msra.mxu3 %v4285_v32  ;;  %3617 = vmatpush.bf16.msra.mxu2 %v4292_v51  ;;  %v3444_v32 = vld [vmem:[#allocation3 + $0x32] sm:$0xff] }
 0x32e   : > { %v2646_v29 = vmax.f32 %v2633_v60, 0.0 }
 0x32f   : > { %v2581_v62 = vpop.f32.mrf.mxu1 }
 0x330   : > { %v2659_v1 = vmul.f32 %v2646_v29, %v5784_v58  ;;  %v2600_v39 = vadd.f32 %v2581_v62, %v5785_v7 }
 0x331   : > { %v2709_v61 = vld [vmem:[#allocation3 + $0x4e] sm:$0xff] }
 0x332   : > { %v2685_v37 = vld [vmem:[#allocation3 + $0x4d] sm:$0xff]  ;;  %2672 = vst.msk [vmem:[#allocation3 + $0x58] sm:$0xff] %vm448_vm0, %v2659_v1  ;;  %v2617_v36 = vmul.f32 %v5344_v41, %v2600_v39  ;;  %v2717_v56 = vpack.c.bf16 %v2709_v61, %v2708_v42 }
 0x333   : > { %v2885_v19 = vld [vmem:[#allocation3 + $0x4f] sm:$0xff]  ;;  %v2693_v23 = vpack.c.bf16 %v2685_v37, %v2684_v31  ;;  %v3103_v37 = vld [vmem:[#allocation3 + $0x18] sm:$0xff] }
 0x334   : > { %v2893_v54 = vpack.c.bf16 %v2885_v19, %v2996_v20  ;;  %v2634_v4 = vadd.f32 %v5350_v22, %v2617_v36  ;;  %4114 = vmatmul.msk.bf16.gmra.mxu2 %vm448_vm0, %v2717_v56  ;;  %v3329_v36 = vld [vmem:[#allocation3 + $0x21] sm:$0xff]  ;;  %v3102_v56 = vld [vmem:[#allocation3 + $0x10] sm:$0xff] }
 0x335   : > { %4129 = vmatmul.msk.bf16.gmra.mxu3 %vm448_vm0, %v2693_v23  ;;  %v3215_v23 = vld [vmem:[#allocation3 + $0x11] sm:$0xff] }
 0x336   : > { %4144 = vmatmul.msk.bf16.gmra.mxu0 %vm448_vm0, %v2893_v54  ;;  %v2647_v28 = vmax.f32 %v2634_v4, 0.0  ;;  %v3115_v54 = vpack.c.bf16 %v3103_v37, %v3102_v56 }
 0x337   : > { %v2583_v43 = vpop.f32.mrf.mxu1 }
 0x338   : > { %v2660_v9 = vmul.f32 %v2647_v28, %v5788_v3  ;;  %v2601_v49 = vadd.f32 %v2583_v43, %v2488_v57  ;;  %v3442_v57 = vld [vmem:[#allocation3 + $0x22] sm:$0xff]  ;;  %v3441_v28 = vld [vmem:[#allocation3 + $0x1a] sm:$0xff] }
 0x339   : > { %v2998_v8 = vld [vmem:[#allocation3 + $0x57] sm:$0xff]  ;;  %v3454_v43 = vpack.c.bf16 %v3442_v57, %v3441_v28 }
 0x33a   : > { %2673 = vst.msk [vmem:[#allocation3 + $0x60] sm:$0xff] %vm448_vm0, %v2660_v9  ;;  %v2618_v10 = vmul.f32 %v5344_v41, %v2601_v49  ;;  %v3006_v18 = vpack.c.bf16 %v2998_v8, %v2885_v19  ;;  %v2710_v15 = vld [vmem:[#allocation3 + $0x56] sm:$0xff]  ;;  %v3105_v9 = vld [vmem:[#allocation3 + $0x28] sm:$0xff] }
 0x33b   : > { %v2686_v24 = vld [vmem:[#allocation3 + $0x55] sm:$0xff]  ;;  %v3218_v49 = vld [vmem:[#allocation3 + $0x29] sm:$0xff] }
 0x33c   : > { %v2635_v11 = vadd.f32 %v5350_v22, %v2618_v10  ;;  %4159 = vmatmul.msk.bf16.gmra.mxu1 %vm448_vm0, %v3006_v18  ;;  %v3216_v19 = vld [vmem:[#allocation3 + $0x19] sm:$0xff]  ;;  %v3229_v6 = vpack.c.bf16 %v3218_v49, %v3329_v36  ;;  %v3335_v57 = vld [vmem:[#allocation3 + $0x51] sm:$0xff] }
 0x33d   : > { %v3228_v4 = vpack.c.bf16 %v3216_v19, %v3215_v23  ;;  %v3341_v35 = vpack.c.bf16 %v3329_v36, %v3216_v19  ;;  %v3104_v10 = vld [vmem:[#allocation3 + $0x20] sm:$0xff] }
 0x33e   : > { %v2648_v12 = vmax.f32 %v2635_v11, 0.0  ;;  %v3116_v11 = vpack.c.bf16 %v3105_v9, %v3104_v10 }
 0x33f   : > { %v2586_v40 = vpop.f32.mrf.mxu1 }
 0x340   : > { %v2661_v13 = vmul.f32 %v2648_v12, %v5789_v47  ;;  %v2602_v2 = vadd.f32 %v2586_v40, %v5790_v52  ;;  %v3443_v52 = vld [vmem:[#allocation3 + $0x2a] sm:$0xff] }
 0x341   : > { %v2711_v17 = vld [vmem:[#allocation3 + $0x5e] sm:$0xff] }
 0x342   : > { %v2687_v25 = vld [vmem:[#allocation3 + $0x5d] sm:$0xff]  ;;  %2674 = vst.msk [vmem:[#allocation3 + $0x68] sm:$0xff] %vm448_vm0, %v2661_v13  ;;  %v2619_v38 = vmul.f32 %v5344_v41, %v2602_v2  ;;  %v2718_v59 = vpack.c.bf16 %v2711_v17, %v2710_v15  ;;  %v4290_v41 = vld [vmem:[%s5734_s9 + $0x78] sm:$0xff] }
 0x343   : > { %v2887_v44 = vld [vmem:[#allocation3 + $0x5f] sm:$0xff]  ;;  %v2694_v16 = vpack.c.bf16 %v2687_v25, %v2686_v24  ;;  %3504 = vmatpush.bf16.msra.mxu1 %v4290_v41  ;;  %v3455_v24 = vpack.c.bf16 %v3444_v32, %v3443_v52  ;;  %v3106_v41 = vld [vmem:[#allocation3 + $0x30] sm:$0xff] }
 0x344   : > { %v2894_v20 = vpack.c.bf16 %v2887_v44, %v2998_v8  ;;  %v2636_v14 = vadd.f32 %v5350_v22, %v2619_v38  ;;  %4115 = vmatmul.msk.bf16.gmra.mxu2 %vm448_vm0, %v2718_v59  ;;  %v4289_v22 = vld [vmem:[%s5734_s9 + $0x70] sm:$0xff]  ;;  %v3331_v8 = vld [vmem:[#allocation3 + $0x31] sm:$0xff] }
 0x345   : > { %4130 = vmatmul.msk.bf16.gmra.mxu3 %vm448_vm0, %v2694_v16  ;;  %v3342_v33 = vpack.c.bf16 %v3331_v8, %v3218_v49  ;;  %v4291_v25 = vld [vmem:[%s5734_s9 + $0x80] sm:$0xff] }
 0x346   : > { %4145 = vmatmul.msk.bf16.gmra.mxu0 %vm448_vm0, %v2894_v20  ;;  %v2649_v21 = vmax.f32 %v2636_v14, 0.0  ;;  %3618 = vmatpush.bf16.msra.mxu2 %v4291_v25  ;;  %v3107_v59 = vld [vmem:[#allocation3 + $0x38] sm:$0xff]  ;;  %v3333_v14 = vld [vmem:[#allocation3 + $0x41] sm:$0xff] }
 0x347   : > { %v2588_v60 = vpop.f32.mrf.mxu1  ;;  %3505 = vmatpush.bf16.msra.mxu1 %v4289_v22  ;;  %v3220_v16 = vld [vmem:[#allocation3 + $0x39] sm:$0xff] }
 0x348   : > { %v2662_v29 = vmul.f32 %v2649_v21, %v5791_v55  ;;  %v3117_v60 = vpack.c.bf16 %v3107_v59, %v3106_v41 }
 0x349   : > { %v3000_v62 = vld [vmem:[#allocation3 + $0x67] sm:$0xff] }
 0x34a   : > { %2675 = vst.msk [vmem:[#allocation3 + $0x70] sm:$0xff] %vm448_vm0, %v2662_v29  ;;  %v3007_v1 = vpack.c.bf16 %v3000_v62, %v2887_v44  ;;  %v2712_v7 = vld [vmem:[#allocation3 + $0x66] sm:$0xff]  ;;  %v2895_v48 = vpack.c.bf16 %v3000_v62, %v3000_v62  ;;  %v3230_v29 = vpack.c.bf16 %v3220_v16, %v3331_v8  ;;  %v3343_v62 = vpack.c.bf16 %v3333_v14, %v3220_v16 }
 0x34b   : > { %v2688_v39 = vld [vmem:[#allocation3 + $0x65] sm:$0xff]  ;;  %v2719_v42 = vpack.c.bf16 %v2712_v7, %v2712_v7 }
 0x34c   : > { %4160 = vmatmul.msk.bf16.gmra.mxu1 %vm448_vm0, %v3007_v1  ;;  %v2695_v31 = vpack.c.bf16 %v2688_v39, %v2688_v39  ;;  %v3337_v16 = vld [vmem:[#allocation3 + $0x61] sm:$0xff] }
 0x351   : > { %v3001_v46 = vld [vmem:[#allocation3 + $0x6f] sm:$0xff] }
 0x352   : > { %v3008_v61 = vpack.c.bf16 %v3001_v46, %v3001_v46  ;;  %v3445_v46 = vld [vmem:[#allocation3 + $0x3a] sm:$0xff] }
 0x354   : > { %4116 = vmatmul.msk.bf16.gmra.mxu2 %vm448_vm0, %v2719_v42  ;;  %v3446_v42 = vld [vmem:[#allocation3 + $0x42] sm:$0xff] }
 0x355   : > { %4131 = vmatmul.msk.bf16.gmra.mxu3 %vm448_vm0, %v2695_v31  ;;  %v3456_v19 = vpack.c.bf16 %v3446_v42, %v3445_v46 }
 0x356   : > { %4146 = vmatmul.msk.bf16.gmra.mxu0 %vm448_vm0, %v2895_v48 }
 0x35c   : > { %4161 = vmatmul.msk.bf16.gmra.mxu1 %vm448_vm0, %v3008_v61 }
 0x364   : > { %4170 = vmatmul.msk.bf16.vlgmr.msrb.gmra.mxu2 %vm448_vm0, %v3115_v54  ;;  %v3109_v54 = vld [vmem:[#allocation3 + $0x48] sm:$0xff] }
 0x365   : > { %4185 = vmatmul.msk.bf16.vlgmr.msra.gmra.mxu3 %vm448_vm0, %v3228_v4  ;;  %v3222_v4 = vld [vmem:[#allocation3 + $0x49] sm:$0xff] }
 0x366   : > { %4200 = vmatmul.msk.bf16.vlgmr.msra.gmra.mxu0 %vm448_vm0, %v3341_v35  ;;  %v3231_v10 = vpack.c.bf16 %v3222_v4, %v3333_v14  ;;  %v3110_v14 = vld [vmem:[#allocation3 + $0x50] sm:$0xff] }
 0x36c   : > { %4215 = vmatmul.msk.bf16.vlgmr.msra.gmra.mxu1 %vm448_vm0, %v3454_v43  ;;  %v3108_v43 = vld [vmem:[#allocation3 + $0x40] sm:$0xff] }
 0x36d   : > { %v3118_v8 = vpack.c.bf16 %v3109_v54, %v3108_v43  ;;  %v3113_v54 = vld [vmem:[#allocation3 + $0x68] sm:$0xff]  ;;  %v3112_v43 = vld [vmem:[#allocation3 + $0x60] sm:$0xff] }
 0x373   : > { %v2942_v18 = vpop.f32.mrf.mxu0 }
 0x374   : > { %4171 = vmatmul.msk.bf16.gmra.mxu2 %vm448_vm0, %v3116_v11 }
 0x375   : > { %4186 = vmatmul.msk.bf16.gmra.mxu3 %vm448_vm0, %v3229_v6 }
 0x376   : > { %4201 = vmatmul.msk.bf16.gmra.mxu0 %vm448_vm0, %v3342_v33 }
 0x377   : > { %v2766_v12 = vpop.f32.mrf.mxu2 }
 0x378   : > { %v2842_v40 = vpop.f32.mrf.mxu3 }
 0x379   : > { %v2843_v45 = vadd.f32 %v2842_v40, %v2766_v12  ;;  %v3055_v13 = vpop.f32.mrf.mxu1  ;;  %v3448_v12 = vld [vmem:[#allocation3 + $0x52] sm:$0xff] }
 0x37b   : > { %v2944_v2 = vpop.f32.mrf.mxu0  ;;  %v2976_v15 = vadd.f32 %v2942_v18, %v2843_v45  ;;  %v3344_v18 = vpack.c.bf16 %v3335_v57, %v3222_v4  ;;  %v3447_v45 = vld [vmem:[#allocation3 + $0x4a] sm:$0xff] }
 0x37c   : > { %4216 = vmatmul.msk.bf16.gmra.mxu1 %vm448_vm0, %v3455_v24  ;;  %v3226_v4 = vld [vmem:[#allocation3 + $0x69] sm:$0xff] }
 0x37d   : > { %v5507_v17 = vadd.f32 %v3055_v13, %v2976_v15 }
 0x37f   : > { %v2768_v44 = vpop.f32.mrf.mxu2 }
 0x380   : > { %v2844_v38 = vpop.f32.mrf.mxu3 }
 0x381   : > { %v2845_v20 = vadd.f32 %v2844_v38, %v2768_v44  ;;  %v3057_v51 = vpop.f32.mrf.mxu1  ;;  %v3111_v44 = vld [vmem:[#allocation3 + $0x58] sm:$0xff] }
 0x382   : > { %v3224_v38 = vld [vmem:[#allocation3 + $0x59] sm:$0xff] }
 0x383   : > { %v2947_v21 = vpop.f32.mrf.mxu0  ;;  %v2977_v22 = vadd.f32 %v2944_v2, %v2845_v20  ;;  %v3457_v2 = vpack.c.bf16 %v3448_v12, %v3447_v45 }
 0x384   : > { %4172 = vmatmul.msk.bf16.gmra.mxu2 %vm448_vm0, %v3117_v60  ;;  %v3345_v60 = vpack.c.bf16 %v3337_v16, %v3224_v38 }
 0x385   : > { %v5513_v1 = vadd.f32 %v3057_v51, %v2977_v22  ;;  %4187 = vmatmul.msk.bf16.gmra.mxu3 %vm448_vm0, %v3230_v29  ;;  %v3232_v22 = vpack.c.bf16 %v3224_v38, %v3335_v57  ;;  %v3339_v57 = vld [vmem:[#allocation3 + $0x71] sm:$0xff] }
 0x386   : > { %4202 = vmatmul.msk.bf16.gmra.mxu0 %vm448_vm0, %v3343_v62 }
 0x387   : > { %v2771_v7 = vpop.f32.mrf.mxu2 }
 0x388   : > { %v2847_v39 = vpop.f32.mrf.mxu3 }
 0x389   : > { %v2848_v31 = vadd.f32 %v2847_v39, %v2771_v7  ;;  %v3060_v48 = vpop.f32.mrf.mxu1  ;;  %v3450_v39 = vld [vmem:[#allocation3 + $0x62] sm:$0xff] }
 0x38b   : > { %v2949_v61 = vpop.f32.mrf.mxu0  ;;  %v2978_v37 = vadd.f32 %v2947_v21, %v2848_v31  ;;  %v3119_v21 = vpack.c.bf16 %v3111_v44, %v3110_v14  ;;  %v3340_v44 = vld [vmem:[#allocation3 + $0x79] sm:$0xff] }
 0x38c   : > { %4217 = vmatmul.msk.bf16.gmra.mxu1 %vm448_vm0, %v3456_v19 }
 0x38d   : > { %v5518_v36 = vadd.f32 %v3060_v48, %v2978_v37  ;;  %v3449_v48 = vld [vmem:[#allocation3 + $0x5a] sm:$0xff] }
 0x38e   : > { %v3458_v37 = vpack.c.bf16 %v3450_v39, %v3449_v48 }
 0x38f   : > { %v2773_v56 = vpop.f32.mrf.mxu2 }
 0x390   : > { %v2849_v23 = vpop.f32.mrf.mxu3 }
 0x391   : > { %v2850_v35 = vadd.f32 %v2849_v23, %v2773_v56  ;;  %v3062_v28 = vpop.f32.mrf.mxu1 }
 0x393   : > { %v2952_v9 = vpop.f32.mrf.mxu0  ;;  %v2979_v49 = vadd.f32 %v2949_v61, %v2850_v35 }
 0x394   : > { %4173 = vmatmul.msk.bf16.gmra.mxu2 %vm448_vm0, %v3118_v8  ;;  %v3120_v8 = vpack.c.bf16 %v3113_v54, %v3112_v43  ;;  %v3554_v43 = vld [vmem:[#allocation3 + $0x1b] sm:$0xff] }
 0x395   : > { %v5521_v11 = vadd.f32 %v3062_v28, %v2979_v49  ;;  %4188 = vmatmul.msk.bf16.gmra.mxu3 %vm448_vm0, %v3231_v10  ;;  %v3233_v10 = vpack.c.bf16 %v3226_v4, %v3337_v16  ;;  %v3114_v16 = vld [vmem:[#allocation3 + $0x70] sm:$0xff] }
 0x396   : > { %4203 = vmatmul.msk.bf16.gmra.mxu0 %vm448_vm0, %v3344_v18  ;;  %v3346_v18 = vpack.c.bf16 %v3339_v57, %v3226_v4  ;;  %v3555_v4 = vld [vmem:[#allocation3 + $0x23] sm:$0xff] }
 0x397   : > { %v2776_v6 = vpop.f32.mrf.mxu2 }
 0x398   : > { %v2852_v33 = vpop.f32.mrf.mxu3 }
 0x399   : > { %v2853_v40 = vadd.f32 %v2852_v33, %v2776_v6  ;;  %v3065_v32 = vpop.f32.mrf.mxu1 }
 0x39b   : > { %v2954_v13 = vpop.f32.mrf.mxu0  ;;  %v2980_v52 = vadd.f32 %v2952_v9, %v2853_v40  ;;  %v3451_v40 = vld [vmem:[#allocation3 + $0x6a] sm:$0xff] }
 0x39c   : > { %4218 = vmatmul.msk.bf16.gmra.mxu1 %vm448_vm0, %v3457_v2 }
 0x39d   : > { %v5526_v15 = vadd.f32 %v3065_v32, %v2980_v52  ;;  %v3452_v32 = vld [vmem:[#allocation3 + $0x72] sm:$0xff] }
 0x39f   : > { %v2778_v24 = vpop.f32.mrf.mxu2 }
 0x3a0   : > { %v2854_v25 = vpop.f32.mrf.mxu3 }
 0x3a1   : > { %v2855_v59 = vadd.f32 %v2854_v25, %v2778_v24  ;;  %v3067_v20 = vpop.f32.mrf.mxu1  ;;  %v3459_v24 = vpack.c.bf16 %v3452_v32, %v3451_v40 }
 0x3a3   : > { %v2957_v51 = vpop.f32.mrf.mxu0  ;;  %v2981_v41 = vadd.f32 %v2954_v13, %v2855_v59 }
 0x3a4   : > { %4174 = vmatmul.msk.bf16.gmra.mxu2 %vm448_vm0, %v3119_v21 }
 0x3a5   : > { %v5529_v29 = vadd.f32 %v3067_v20, %v2981_v41  ;;  %4189 = vmatmul.msk.bf16.gmra.mxu3 %vm448_vm0, %v3232_v22  ;;  %v3121_v22 = vpack.c.bf16 %v3114_v16, %v3114_v16 }
 0x3a6   : > { %4204 = vmatmul.msk.bf16.gmra.mxu0 %vm448_vm0, %v3345_v60  ;;  %v3234_v60 = vpack.c.bf16 %v3339_v57, %v3339_v57  ;;  %v5792_v57 = vmov 0.0  }
 0x3a7   : > { %v2781_v62 = vpop.f32.mrf.mxu2  ;;  %3740 = vst.msk [vmem:[%s5557_s24] sm:$0xff] %vm448_vm0, %v5792_v57 }
 0x3a8   : > { %v2857_v7 = vpop.f32.mrf.mxu3  ;;  %3741 = vst.msk [vmem:[%s5557_s24 + $0x8] sm:$0xff] %vm448_vm0, %v5792_v57 }
 0x3a9   : > { %v2858_v42 = vadd.f32 %v2857_v7, %v2781_v62  ;;  %v3070_v31 = vpop.f32.mrf.mxu1  ;;  %v3453_v7 = vld [vmem:[#allocation3 + $0x7a] sm:$0xff]  ;;  %3755 = vst.msk [vmem:[%s5557_s24 + $0x78] sm:$0xff] %vm448_vm0, %v5792_v57 }
 0x3aa   : > { %v3460_v48 = vpack.c.bf16 %v3453_v7, %v3453_v7  ;;  %3756 = vst.msk [vmem:[%s5557_s24 + $0x80] sm:$0xff] %vm448_vm0, %v5792_v57 }
 0x3ab   : > { %v2959_v46 = vpop.f32.mrf.mxu0  ;;  %v2982_v61 = vadd.f32 %v2957_v51, %v2858_v42  ;;  %v3347_v51 = vpack.c.bf16 %v3340_v44, %v3340_v44 }
 0x3ac   : > { %4219 = vmatmul.msk.bf16.gmra.mxu1 %vm448_vm0, %v3458_v37 }
 0x3ad   : > { %v5534_v19 = vadd.f32 %v3070_v31, %v2982_v61 }
 0x3af   : > { %v2783_v56 = vpop.f32.mrf.mxu2 }
 0x3b0   : > { %v2859_v23 = vpop.f32.mrf.mxu3 }
 0x3b1   : > { %v2860_v35 = vadd.f32 %v2859_v23, %v2783_v56  ;;  %v3072_v28 = vpop.f32.mrf.mxu1 }
 0x3b3   : > { %v2962_v9 = vpop.f32.mrf.mxu0  ;;  %v2983_v49 = vadd.f32 %v2959_v46, %v2860_v35 }
 0x3b4   : > { %4175 = vmatmul.msk.bf16.gmra.mxu2 %vm448_vm0, %v3120_v8  ;;  %v3567_v8 = vpack.c.bf16 %v3555_v4, %v3554_v43 }
 0x3b5   : > { %v5537_v6 = vadd.f32 %v3072_v28, %v2983_v49  ;;  %4190 = vmatmul.msk.bf16.gmra.mxu3 %vm448_vm0, %v3233_v10 }
 0x3b6   : > { %4205 = vmatmul.msk.bf16.gmra.mxu0 %vm448_vm0, %v3346_v18 }
 0x3b7   : > { %v2786_v33 = vpop.f32.mrf.mxu2 }
 0x3b8   : > { %v2862_v12 = vpop.f32.mrf.mxu3 }
 0x3b9   : > { %v2863_v45 = vadd.f32 %v2862_v12, %v2786_v33  ;;  %v3075_v13 = vpop.f32.mrf.mxu1 }
 0x3bb   : > { %v2964_v52 = vpop.f32.mrf.mxu0  ;;  %v2984_v2 = vadd.f32 %v2962_v9, %v2863_v45 }
 0x3bc   : > { %4220 = vmatmul.msk.bf16.gmra.mxu1 %vm448_vm0, %v3459_v24  ;;  %v3557_v24 = vld [vmem:[#allocation3 + $0x33] sm:$0xff] }
 0x3bd   : > { %v5542_v25 = vadd.f32 %v3075_v13, %v2984_v2 }
 0x3bf   : > { %v2788_v38 = vpop.f32.mrf.mxu2 }
 0x3c0   : > { %v2864_v59 = vpop.f32.mrf.mxu3 }
 0x3c1   : > { %v2865_v20 = vadd.f32 %v2864_v59, %v2788_v38  ;;  %v3077_v14 = vpop.f32.mrf.mxu1  ;;  %v3556_v38 = vld [vmem:[#allocation3 + $0x2b] sm:$0xff] }
 0x3c2   : > { %v3568_v16 = vpack.c.bf16 %v3557_v24, %v3556_v38 }
 0x3c3   : > { %v2967_v41 = vpop.f32.mrf.mxu0  ;;  %v2985_v21 = vadd.f32 %v2964_v52, %v2865_v20 }
 0x3c4   : > { %4176 = vmatmul.msk.bf16.gmra.mxu2 %vm448_vm0, %v3121_v22 }
 0x3c5   : > { %v5545_v62 = vadd.f32 %v3077_v14, %v2985_v21  ;;  %4191 = vmatmul.msk.bf16.gmra.mxu3 %vm448_vm0, %v3234_v60 }
 0x3c6   : > { %4206 = vmatmul.msk.bf16.gmra.mxu0 %vm448_vm0, %v3347_v51 }
 0x3c7   : > { %v2791_v39 = vpop.f32.mrf.mxu2 }
 0x3c8   : > { %v2867_v42 = vpop.f32.mrf.mxu3 }
 0x3c9   : > { %v2868_v31 = vadd.f32 %v2867_v42, %v2791_v39  ;;  %v3080_v46 = vpop.f32.mrf.mxu1 }
 0x3cb   : > { %v2969_v61 = vpop.f32.mrf.mxu0  ;;  %v2986_v37 = vadd.f32 %v2967_v41, %v2868_v31  ;;  %v3559_v31 = vld [vmem:[#allocation3 + $0x43] sm:$0xff] }
 0x3cc   : > { %4221 = vmatmul.msk.bf16.gmra.mxu1 %vm448_vm0, %v3460_v48 }
 0x3cd   : > { %v5550_v56 = vadd.f32 %v3080_v46, %v2986_v37 }
 0x3cf   : > { %v2793_v23 = vpop.f32.mrf.mxu2 }
 0x3d0   : > { %v2869_v54 = vpop.f32.mrf.mxu3 }
 0x3d1   : > { %v2870_v35 = vadd.f32 %v2869_v54, %v2793_v23  ;;  %v3082_v28 = vpop.f32.mrf.mxu1 }
 0x3d3   : > { %v2972_v9 = vpop.f32.mrf.mxu0  ;;  %v2987_v49 = vadd.f32 %v2969_v61, %v2870_v35  ;;  %v3558_v61 = vld [vmem:[#allocation3 + $0x3b] sm:$0xff] }
 0x3d4   : > { %4230 = vmatmul.msk.bf16.vlgmr.msra.gmra.mxu2 %vm448_vm0, %v3567_v8  ;;  %v3569_v54 = vpack.c.bf16 %v3559_v31, %v3558_v61  ;;  %v3562_v31 = vld [vmem:[#allocation3 + $0x5b] sm:$0xff] }
 0x3d5   : > { %v5571_v10 = vadd.f32 %v3082_v28, %v2987_v49 }
 0x3d7   : > { %v2796_v18 = vpop.f32.mrf.mxu2 }
 0x3d8   : > { %v2872_v33 = vpop.f32.mrf.mxu3 }
 0x3d9   : > { %v2873_v12 = vadd.f32 %v2872_v33, %v2796_v18  ;;  %v3085_v40 = vpop.f32.mrf.mxu1 }
 0x3db   : > { %v2974_v32 = vpop.f32.mrf.mxu0  ;;  %v2988_v45 = vadd.f32 %v2972_v9, %v2873_v12  ;;  %v3561_v12 = vld [vmem:[#allocation3 + $0x53] sm:$0xff] }
 0x3dd   : > { %v5574_v13 = vadd.f32 %v3085_v40, %v2988_v45  ;;  %v3560_v45 = vld [vmem:[#allocation3 + $0x4b] sm:$0xff] }
 0x3de   : > { %v3570_v24 = vpack.c.bf16 %v3561_v12, %v3560_v45 }
 0x3df   : > { %v2798_v52 = vpop.f32.mrf.mxu2 }
 0x3e0   : > { %v2874_v2 = vpop.f32.mrf.mxu3 }
 0x3e1   : > { %v3087_v44 = vpop.f32.mrf.mxu1 }
 0x3e3   : > { %v3394_v59 = vpop.f32.mrf.mxu0 }
 0x3e4   : > { %4231 = vmatmul.msk.bf16.gmra.mxu2 %vm448_vm0, %v3568_v16 }
 0x3e7   : > { %v3168_v20 = vpop.f32.mrf.mxu2 }
 0x3e8   : > { %v3281_v14 = vpop.f32.mrf.mxu3  ;;  %v3202_v51 = vadd.f32 %v3168_v20, %v5507_v17 }
 0x3e9   : > { %v3507_v41 = vpop.f32.mrf.mxu1 }
 0x3ea   : > { %v3315_v21 = vadd.f32 %v3281_v14, %v3202_v51 }
 0x3eb   : > { %v3396_v22 = vpop.f32.mrf.mxu0 }
 0x3ec   : > { %v3428_v60 = vadd.f32 %v3394_v59, %v3315_v21 }
 0x3ee   : > { %v5578_v7 = vadd.f32 %v3507_v41, %v3428_v60  ;;  %v3563_v60 = vld [vmem:[#allocation3 + $0x63] sm:$0xff] }
 0x3ef   : > { %v3170_v39 = vpop.f32.mrf.mxu2  ;;  %v3571_v61 = vpack.c.bf16 %v3563_v60, %v3562_v31 }
 0x3f0   : > { %v3283_v42 = vpop.f32.mrf.mxu3  ;;  %v3203_v48 = vadd.f32 %v3170_v39, %v5513_v1 }
 0x3f1   : > { %v3509_v46 = vpop.f32.mrf.mxu1 }
 0x3f2   : > { %v3316_v37 = vadd.f32 %v3283_v42, %v3203_v48 }
 0x3f3   : > { %v3399_v23 = vpop.f32.mrf.mxu0 }
 0x3f4   : > { %v3429_v4 = vadd.f32 %v3396_v22, %v3316_v37  ;;  %4232 = vmatmul.msk.bf16.gmra.mxu2 %vm448_vm0, %v3569_v54 }
 0x3f6   : > { %v5582_v17 = vadd.f32 %v3509_v46, %v3429_v4 }
 0x3f7   : > { %v3173_v35 = vpop.f32.mrf.mxu2 }
 0x3f8   : > { %v3286_v57 = vpop.f32.mrf.mxu3  ;;  %v3204_v28 = vadd.f32 %v3173_v35, %v5518_v36 }
 0x3f9   : > { %v3512_v43 = vpop.f32.mrf.mxu1 }
 0x3fa   : > { %v3317_v9 = vadd.f32 %v3286_v57, %v3204_v28 }
 0x3fb   : > { %v3401_v49 = vpop.f32.mrf.mxu0 }
 0x3fc   : > { %v3430_v8 = vadd.f32 %v3399_v23, %v3317_v9 }
 0x3fe   : > { %v5585_v18 = vadd.f32 %v3512_v43, %v3430_v8  ;;  %v3564_v8 = vld [vmem:[#allocation3 + $0x6b] sm:$0xff] }
 0x3ff   : > { %v3175_v1 = vpop.f32.mrf.mxu2 }
 0x400   : > { %v3288_v33 = vpop.f32.mrf.mxu3  ;;  %v3205_v40 = vadd.f32 %v3175_v1, %v5521_v11  ;;  %v3565_v1 = vld [vmem:[#allocation3 + $0x73] sm:$0xff] }
 0x401   : > { %v3514_v32 = vpop.f32.mrf.mxu1  ;;  %v3572_v45 = vpack.c.bf16 %v3565_v1, %v3564_v8 }
 0x402   : > { %v3318_v52 = vadd.f32 %v3288_v33, %v3205_v40 }
 0x403   : > { %v3404_v2 = vpop.f32.mrf.mxu0 }
 0x404   : > { %v3431_v44 = vadd.f32 %v3401_v49, %v3318_v52  ;;  %4233 = vmatmul.msk.bf16.gmra.mxu2 %vm448_vm0, %v3570_v24 }
 0x406   : > { %v5589_v36 = vadd.f32 %v3514_v32, %v3431_v44 }
 0x407   : > { %v3178_v38 = vpop.f32.mrf.mxu2 }
 0x408   : > { %v3291_v59 = vpop.f32.mrf.mxu3  ;;  %v3206_v16 = vadd.f32 %v3178_v38, %v5526_v15 }
 0x409   : > { %v3517_v20 = vpop.f32.mrf.mxu1 }
 0x40a   : > { %v3319_v14 = vadd.f32 %v3291_v59, %v3206_v16 }
 0x40b   : > { %v3406_v51 = vpop.f32.mrf.mxu0 }
 0x40c   : > { %v3432_v41 = vadd.f32 %v3404_v2, %v3319_v14  ;;  %v3566_v14 = vld [vmem:[#allocation3 + $0x7b] sm:$0xff] }
 0x40e   : > { %v5592_v21 = vadd.f32 %v3517_v20, %v3432_v41 }
 0x40f   : > { %v3180_v11 = vpop.f32.mrf.mxu2 }
 0x410   : > { %v3293_v22 = vpop.f32.mrf.mxu3  ;;  %v3207_v39 = vadd.f32 %v3180_v11, %v5529_v29 }
 0x411   : > { %v3519_v42 = vpop.f32.mrf.mxu1 }
 0x412   : > { %v3320_v48 = vadd.f32 %v3293_v22, %v3207_v39  ;;  %v3573_v22 = vpack.c.bf16 %v3566_v14, %v3566_v14 }
 0x413   : > { %v3409_v46 = vpop.f32.mrf.mxu0 }
 0x414   : > { %v3433_v37 = vadd.f32 %v3406_v51, %v3320_v48  ;;  %4234 = vmatmul.msk.bf16.gmra.mxu2 %vm448_vm0, %v3571_v61 }
 0x416   : > { %v5596_v15 = vadd.f32 %v3519_v42, %v3433_v37 }
 0x417   : > { %v3183_v23 = vpop.f32.mrf.mxu2 }
 0x418   : > { %v3296_v54 = vpop.f32.mrf.mxu3  ;;  %v3208_v4 = vadd.f32 %v3183_v23, %v5534_v19 }
 0x419   : > { %v3522_v35 = vpop.f32.mrf.mxu1 }
 0x41a   : > { %v3321_v57 = vadd.f32 %v3296_v54, %v3208_v4 }
 0x41b   : > { %v3411_v28 = vpop.f32.mrf.mxu0 }
 0x41c   : > { %v3434_v43 = vadd.f32 %v3409_v46, %v3321_v57 }
 0x41e   : > { %v5599_v9 = vadd.f32 %v3522_v35, %v3434_v43 }
 0x41f   : > { %v3185_v29 = vpop.f32.mrf.mxu2 }
 0x420   : > { %v3298_v49 = vpop.f32.mrf.mxu3  ;;  %v3209_v33 = vadd.f32 %v3185_v29, %v5537_v6 }
 0x421   : > { %v3524_v12 = vpop.f32.mrf.mxu1 }
 0x422   : > { %v3322_v40 = vadd.f32 %v3298_v49, %v3209_v33 }
 0x423   : > { %v3414_v32 = vpop.f32.mrf.mxu0 }
 0x424   : > { %v3435_v52 = vadd.f32 %v3411_v28, %v3322_v40  ;;  %4235 = vmatmul.msk.bf16.gmra.mxu2 %vm448_vm0, %v3572_v45 }
 0x426   : > { %v5603_v19 = vadd.f32 %v3524_v12, %v3435_v52 }
 0x427   : > { %v3188_v2 = vpop.f32.mrf.mxu2 }
 0x428   : > { %v3301_v24 = vpop.f32.mrf.mxu3  ;;  %v3210_v44 = vadd.f32 %v3188_v2, %v5542_v25 }
 0x429   : > { %v3527_v38 = vpop.f32.mrf.mxu1 }
 0x42a   : > { %v3323_v59 = vadd.f32 %v3301_v24, %v3210_v44 }
 0x42b   : > { %v3416_v16 = vpop.f32.mrf.mxu0 }
 0x42c   : > { %v3436_v20 = vadd.f32 %v3414_v32, %v3323_v59 }
 0x42e   : > { %v5606_v51 = vadd.f32 %v3527_v38, %v3436_v20  ;;  %v5624_v38 = vld [vmem:[%s5735_s10] ss:$0 sm:$0xff] }
 0x42f   : > { %v3190_v6 = vpop.f32.mrf.mxu2 }
 0x430   : > { %v3303_v41 = vpop.f32.mrf.mxu3  ;;  %v3211_v11 = vadd.f32 %v3190_v6, %v5545_v62  ;;  %v5793_v6 = vld [vmem:[#allocation4_spill] sm:$0xff] }
 0x431   : > { %v3529_v60 = vpop.f32.mrf.mxu1 }
 0x432   : > { %v3324_v39 = vadd.f32 %v3303_v41, %v3211_v11 }
 0x433   : > { %v3419_v42 = vpop.f32.mrf.mxu0 }
 0x434   : > { %v3437_v31 = vadd.f32 %v3416_v16, %v3324_v39  ;;  %4236 = vmatmul.msk.bf16.gmra.mxu2 %vm448_vm0, %v3573_v22 }
 0x436   : > { %v5610_v48 = vadd.f32 %v3529_v60, %v3437_v31  ;;  %v5794_v31 = vld [vmem:[#allocation5_spill] sm:$0xff] }
 0x437   : > { %v3193_v25 = vpop.f32.mrf.mxu2 }
 0x438   : > { %v3306_v46 = vpop.f32.mrf.mxu3  ;;  %v3212_v61 = vadd.f32 %v3193_v25, %v5550_v56 }
 0x439   : > { %v3532_v37 = vpop.f32.mrf.mxu1 }
 0x43a   : > { %v3325_v23 = vadd.f32 %v3306_v46, %v3212_v61 }
 0x43b   : > { %v3421_v54 = vpop.f32.mrf.mxu0 }
 0x43c   : > { %v3438_v4 = vadd.f32 %v3419_v42, %v3325_v23 }
 0x43e   : > { %v5613_v35 = vadd.f32 %v3532_v37, %v3438_v4 }
 0x43f   : > { %v3195_v62 = vpop.f32.mrf.mxu2 }
 0x440   : > { %v3308_v57 = vpop.f32.mrf.mxu3  ;;  %v3213_v28 = vadd.f32 %v3195_v62, %v5571_v10 }
 0x441   : > { %v3534_v43 = vpop.f32.mrf.mxu1 }
 0x442   : > { %v3326_v29 = vadd.f32 %v3308_v57, %v3213_v28 }
 0x443   : > { %v3424_v49 = vpop.f32.mrf.mxu0 }
 0x444   : > { %v3439_v8 = vadd.f32 %v3421_v54, %v3326_v29 }
 0x446   : > { %v5616_v1 = vadd.f32 %v3534_v43, %v3439_v8 }
 0x447   : > { %v3198_v33 = vpop.f32.mrf.mxu2 }
 0x448   : > { %v3311_v12 = vpop.f32.mrf.mxu3  ;;  %v3214_v56 = vadd.f32 %v3198_v33, %v5574_v13  ;;  %v5630_v13 = vld [vmem:[%s5736_s11] ss:$0 sm:$0xff] }
 0x449   : > { %v3537_v40 = vpop.f32.mrf.mxu1 }
 0x44a   : > { %v3327_v32 = vadd.f32 %v3311_v12, %v3214_v56 }
 0x44b   : > { %v3426_v45 = vpop.f32.mrf.mxu0 }
 0x44c   : > { %v3440_v52 = vadd.f32 %v3424_v49, %v3327_v32 }
 0x44e   : > { %v5619_v2 = vadd.f32 %v3537_v40, %v3440_v52 }
 0x44f   : > { %v3200_v24 = vpop.f32.mrf.mxu2 }
 0x450   : > { %v3313_v44 = vpop.f32.mrf.mxu3 }
 0x451   : > { %v3539_v10 = vpop.f32.mrf.mxu1 }
 0x457   : > { %v3620_v59 = vpop.f32.mrf.mxu2 }
 0x458   : > { %v3654_v16 = vadd.f32 %v3620_v59, %v5578_v7 }
 0x45a   : > { %v3671_v20 = vmul.f32 %v5624_v38, %v3654_v16 }
 0x45c   : > { %v3688_v14 = vadd.f32 %v5630_v13, %v3671_v20 }
 0x45e   : > { %v3701_v41 = vadd.f32 %v3688_v14, %v5793_v6 }
 0x45f   : > { %v3622_v11 = vpop.f32.mrf.mxu2 }
 0x460   : > { %v3714_v22 = vmax.f32 %v3701_v41, 0.0  ;;  %v3655_v60 = vadd.f32 %v3622_v11, %v5582_v17  ;;  %v5795_v17 = vld [vmem:[#allocation6_spill] sm:$0xff] }
 0x462   : > { %v3727_v39 = vmul.f32 %v3714_v22, %v4912_v63  ;;  %v3672_v7 = vmul.f32 %v5624_v38, %v3655_v60 }
 0x464   : > { %3742 = vst.msk [vmem:[%s5557_s24 + $0x10] sm:$0xff] %vm448_vm0, %v3727_v39  ;;  %v3689_v42 = vadd.f32 %v5630_v13, %v3672_v7 }
 0x466   : > { %v3702_v25 = vadd.f32 %v3689_v42, %v5794_v31 }
 0x467   : > { %v3625_v46 = vpop.f32.mrf.mxu2 }
 0x468   : > { %v3715_v61 = vmax.f32 %v3702_v25, 0.0  ;;  %v3656_v37 = vadd.f32 %v3625_v46, %v5585_v18  ;;  %v5796_v18 = vld [vmem:[#allocation7_spill] sm:$0xff] }
 0x46a   : > { %v3728_v23 = vmul.f32 %v3715_v61, %v4930_v26  ;;  %v3673_v54 = vmul.f32 %v5624_v38, %v3656_v37 }
 0x46c   : > { %3743 = vst.msk [vmem:[%s5557_s24 + $0x18] sm:$0xff] %vm448_vm0, %v3728_v23  ;;  %v3690_v63 = vadd.f32 %v5630_v13, %v3673_v54 }
 0x46e   : > { %v3703_v4 = vadd.f32 %v3690_v63, %v5795_v17 }
 0x46f   : > { %v3627_v62 = vpop.f32.mrf.mxu2 }
 0x470   : > { %v3716_v57 = vmax.f32 %v3703_v4, 0.0  ;;  %v3657_v28 = vadd.f32 %v3627_v62, %v5589_v36  ;;  %v5797_v36 = vld [vmem:[#allocation8_spill] sm:$0xff] }
 0x472   : > { %v3729_v43 = vmul.f32 %v3716_v57, %v4947_v30  ;;  %v3674_v29 = vmul.f32 %v5624_v38, %v3657_v28 }
 0x474   : > { %3744 = vst.msk [vmem:[%s5557_s24 + $0x20] sm:$0xff] %vm448_vm0, %v3729_v43  ;;  %v3691_v26 = vadd.f32 %v5630_v13, %v3674_v29 }
 0x476   : > { %v3704_v49 = vadd.f32 %v3691_v26, %v5796_v18 }
 0x477   : > { %v3630_v8 = vpop.f32.mrf.mxu2 }
 0x478   : > { %v3717_v33 = vmax.f32 %v3704_v49, 0.0  ;;  %v3658_v12 = vadd.f32 %v3630_v8, %v5592_v21  ;;  %v5798_v21 = vld [vmem:[#allocation9_spill] sm:$0xff] }
 0x47a   : > { %v3730_v56 = vmul.f32 %v3717_v33, %v4968_v27  ;;  %v3675_v40 = vmul.f32 %v5624_v38, %v3658_v12 }
 0x47c   : > { %3745 = vst.msk [vmem:[%s5557_s24 + $0x28] sm:$0xff] %vm448_vm0, %v3730_v56  ;;  %v3692_v30 = vadd.f32 %v5630_v13, %v3675_v40 }
 0x47e   : > { %v3705_v32 = vadd.f32 %v3692_v30, %v5797_v36  ;;  %v5804_v30 = vld [vmem:[#allocation18_spill] sm:$0xff] }
 0x47f   : > { %v3632_v45 = vpop.f32.mrf.mxu2 }
 0x480   : > { %v3718_v52 = vmax.f32 %v3705_v32, 0.0  ;;  %v3659_v24 = vadd.f32 %v3632_v45, %v5596_v15  ;;  %v5799_v15 = vld [vmem:[#allocation10_spill] sm:$0xff] }
 0x482   : > { %v3731_v44 = vmul.f32 %v3718_v52, %v4985_v34  ;;  %v3676_v10 = vmul.f32 %v5624_v38, %v3659_v24 }
 0x484   : > { %3746 = vst.msk [vmem:[%s5557_s24 + $0x30] sm:$0xff] %vm448_vm0, %v3731_v44  ;;  %v3693_v27 = vadd.f32 %v5630_v13, %v3676_v10 }
 0x486   : > { %v3706_v59 = vadd.f32 %v3693_v27, %v5798_v21 }
 0x487   : > { %v3635_v16 = vpop.f32.mrf.mxu2 }
 0x488   : > { %v3719_v20 = vmax.f32 %v3706_v59, 0.0  ;;  %v3660_v14 = vadd.f32 %v3635_v16, %v5599_v9  ;;  %v5800_v9 = vld [vmem:[#allocation11_spill] sm:$0xff] }
 0x48a   : > { %v3732_v6 = vmul.f32 %v3719_v20, %v5006_v5  ;;  %v3677_v41 = vmul.f32 %v5624_v38, %v3660_v14 }
 0x48c   : > { %3747 = vst.msk [vmem:[%s5557_s24 + $0x38] sm:$0xff] %vm448_vm0, %v3732_v6  ;;  %v3694_v34 = vadd.f32 %v5630_v13, %v3677_v41 }
 0x48e   : > { %v3707_v11 = vadd.f32 %v3694_v34, %v5799_v15 }
 0x48f   : > { %v3637_v22 = vpop.f32.mrf.mxu2 }
 0x490   : > { %v3720_v60 = vmax.f32 %v3707_v11, 0.0  ;;  %v3661_v39 = vadd.f32 %v3637_v22, %v5603_v19  ;;  %v5801_v19 = vld [vmem:[#allocation12_spill] sm:$0xff] }
 0x492   : > { %v3733_v7 = vmul.f32 %v3720_v60, %v5025_v0  ;;  %v3678_v42 = vmul.f32 %v5624_v38, %v3661_v39 }
 0x494   : > { %3748 = vst.msk [vmem:[%s5557_s24 + $0x40] sm:$0xff] %vm448_vm0, %v3733_v7  ;;  %v3695_v5 = vadd.f32 %v5630_v13, %v3678_v42 }
 0x496   : > { %v3708_v31 = vadd.f32 %v3695_v5, %v5800_v9 }
 0x497   : > { %v3640_v25 = vpop.f32.mrf.mxu2 }
 0x498   : > { %v3721_v46 = vmax.f32 %v3708_v31, 0.0  ;;  %v3662_v61 = vadd.f32 %v3640_v25, %v5606_v51  ;;  %v5802_v51 = vld [vmem:[#allocation14_spill] sm:$0xff] }
 0x49a   : > { %v3734_v37 = vmul.f32 %v3721_v46, %v5047_v50  ;;  %v3679_v23 = vmul.f32 %v5624_v38, %v3662_v61 }
 0x49c   : > { %3749 = vst.msk [vmem:[%s5557_s24 + $0x48] sm:$0xff] %vm448_vm0, %v3734_v37  ;;  %v3696_v0 = vadd.f32 %v5630_v13, %v3679_v23 }
 0x49e   : > { %v3709_v54 = vadd.f32 %v3696_v0, %v5801_v19 }
 0x49f   : > { %v3642_v63 = vpop.f32.mrf.mxu2 }
 0x4a0   : > { %v3722_v17 = vmax.f32 %v3709_v54, 0.0  ;;  %v3663_v4 = vadd.f32 %v3642_v63, %v5610_v48  ;;  %v5803_v48 = vld [vmem:[#allocation16_spill] sm:$0xff] }
 0x4a2   : > { %v3735_v62 = vmul.f32 %v3722_v17, %v5064_v53  ;;  %v3680_v57 = vmul.f32 %v5624_v38, %v3663_v4 }
 0x4a4   : > { %3750 = vst.msk [vmem:[%s5557_s24 + $0x50] sm:$0xff] %vm448_vm0, %v3735_v62  ;;  %v3697_v50 = vadd.f32 %v5630_v13, %v3680_v57 }
 0x4a6   : > { %v3710_v28 = vadd.f32 %v3697_v50, %v5802_v51 }
 0x4a7   : > { %v3645_v43 = vpop.f32.mrf.mxu2 }
 0x4a8   : > { %v3723_v29 = vmax.f32 %v3710_v28, 0.0  ;;  %v3664_v26 = vadd.f32 %v3645_v43, %v5613_v35 }
 0x4aa   : > { %v3736_v18 = vmul.f32 %v3723_v29, %v5784_v58  ;;  %v3681_v49 = vmul.f32 %v5624_v38, %v3664_v26 }
 0x4ac   : > { %3751 = vst.msk [vmem:[%s5557_s24 + $0x58] sm:$0xff] %vm448_vm0, %v3736_v18  ;;  %v3698_v53 = vadd.f32 %v5630_v13, %v3681_v49 }
 0x4ae   : > { %v3711_v8 = vadd.f32 %v3698_v53, %v5803_v48 }
 0x4af   : > { %v3647_v33 = vpop.f32.mrf.mxu2 }
 0x4b0   : > { %v3724_v12 = vmax.f32 %v3711_v8, 0.0  ;;  %v3665_v56 = vadd.f32 %v3647_v33, %v5616_v1  ;;  %v5805_v1 = vld [vmem:[#allocation20_spill] sm:$0xff] }
 0x4b2   : > { %v3737_v40 = vmul.f32 %v3724_v12, %v5788_v3  ;;  %v3682_v35 = vmul.f32 %v5624_v38, %v3665_v56 }
 0x4b4   : > { %3752 = vst.msk [vmem:[%s5557_s24 + $0x60] sm:$0xff] %vm448_vm0, %v3737_v40  ;;  %v3699_v58 = vadd.f32 %v5630_v13, %v3682_v35 }
 0x4b6   : > { %v3712_v36 = vadd.f32 %v3699_v58, %v5804_v30 }
 0x4b7   : > { %v3650_v32 = vpop.f32.mrf.mxu2 }
 0x4b8   : > { %v3725_v45 = vmax.f32 %v3712_v36, 0.0  ;;  %v3666_v52 = vadd.f32 %v3650_v32, %v5619_v2 }
 0x4ba   : > { %v3738_v24 = vmul.f32 %v3725_v45, %v5789_v47  ;;  %v3683_v44 = vmul.f32 %v5624_v38, %v3666_v52 }
 0x4bc   : > { %3753 = vst.msk [vmem:[%s5557_s24 + $0x68] sm:$0xff] %vm448_vm0, %v3738_v24  ;;  %v3700_v3 = vadd.f32 %v5630_v13, %v3683_v44 }
 0x4be   : > { %v3713_v10 = vadd.f32 %v3700_v3, %v5805_v1 }
 0x4bf   : > { %v3652_v27 = vpop.f32.mrf.mxu2 }
 0x4c0   : > { %v3726_v21 = vmax.f32 %v3713_v10, 0.0 }
 0x4c2   : > { %v3739_v59 = vmul.f32 %v3726_v21, %v5791_v55 }
 0x4c4   : > { %3754 = vst.msk [vmem:[%s5557_s24 + $0x70] sm:$0xff] %vm448_vm0, %v3739_v59 }
 0x4c5 PF: > { %s22_s21 = sadd.s32 1, %s4325_s21  }
 0x4c6   : > { %p19_p4 = scmp.ge.s32.totalorder %s22_s21, 4  }
 0x4c8   :  { %21 = sbr.rel (!%p19_p4) target bundleno = 1 (0x1), region = 101 }

// kernel: resnet_forward.11
= control target key start
LH: loop header
LB: loop body
LE: loop exit
PB: predicated region body
PF: predicated region fallthrough
CT: control target
= control target key end

     0   :  { %vm473_vm0 = vcmask 523264   ;;  %s1512_s1 = inlined_call_operand.vmem [shape: bf16[576,256], index: 1, kind: input, shape index: {}]   ;;  %s1513_s0 = inlined_call_operand.vmem [shape: bf16[8,576], index: 0, kind: input, shape index: {}]   ;;  %s1514_s4 = inlined_call_operand.vmem [shape: f32[1,256], index: 4, kind: input, shape index: {}]   ;;  %s1515_s2 = inlined_call_operand.vmem [shape: f32[1,256], index: 2, kind: input, shape index: {}]   ;;  %s1516_s3 = inlined_call_operand.vmem [shape: f32[1,256], index: 3, kind: input, shape index: {}]   ;;  %s1517_s5 = inlined_call_operand.vmem [shape: f32[8,256], index: 5, kind: output, shape index: {}]  }
   0x1   :  { %v698_v0 = vld [vmem:[%s1512_s1 + $0x70] sm:$0xf]  ;;  %v945_v1 = vld [vmem:[%s1512_s1 + $0x74] sm:$0xf0]  ;;  %v690_v11 = vld [vmem:[%s1512_s1 + $0x60] sm:$0xf] }
   0x2   :  { %v762_v2 = vld [vmem:[%s1512_s1 + $0xf0] sm:$0xf]  ;;  %v699_v3 = vor.u32 %v945_v1, %v698_v0  ;;  %v961_v4 = vld [vmem:[%s1512_s1 + $0xf4] sm:$0xf0]  ;;  %v943_v13 = vld [vmem:[%s1512_s1 + $0x64] sm:$0xf0] }
   0x3   :  { %v826_v5 = vld [vmem:[%s1512_s1 + $0x170] sm:$0xf]  ;;  %v977_v6 = vld [vmem:[%s1512_s1 + $0x174] sm:$0xf0]  ;;  %v763_v7 = vor.u32 %v961_v4, %v762_v2  ;;  %v754_v14 = vld [vmem:[%s1512_s1 + $0xe0] sm:$0xf]  ;;  %v691_v16 = vor.u32 %v943_v13, %v690_v11 }
   0x4   :  { %v827_v8 = vor.u32 %v977_v6, %v826_v5  ;;  %v890_v9 = vld [vmem:[%s1512_s1 + $0x1f0] sm:$0xf]  ;;  %v993_v10 = vld [vmem:[%s1512_s1 + $0x1f4] sm:$0xf0]  ;;  %477 = vmatpush.bf16.msra.mxu0 %v699_v3  ;;  %v959_v15 = vld [vmem:[%s1512_s1 + $0xe4] sm:$0xf0] }
   0x5   :  { %v891_v12 = vor.u32 %v993_v10, %v890_v9  ;;  %490 = vmatpush.bf16.msra.mxu1 %v763_v7  ;;  %v755_v17 = vor.u32 %v959_v15, %v754_v14  ;;  %v818_v18 = vld [vmem:[%s1512_s1 + $0x160] sm:$0xf]  ;;  %v975_v19 = vld [vmem:[%s1512_s1 + $0x164] sm:$0xf0]  ;;  %v682_v23 = vld [vmem:[%s1512_s1 + $0x50] sm:$0xf] }
   0x6   :  { %503 = vmatpush.bf16.msra.mxu2 %v827_v8  ;;  %v882_v20 = vld [vmem:[%s1512_s1 + $0x1e0] sm:$0xf]  ;;  %v819_v21 = vor.u32 %v975_v19, %v818_v18  ;;  %v991_v22 = vld [vmem:[%s1512_s1 + $0x1e4] sm:$0xf0]  ;;  %v941_v24 = vld [vmem:[%s1512_s1 + $0x54] sm:$0xf0] }
   0x7   :  { %516 = vmatpush.bf16.msra.mxu3 %v891_v12  ;;  %v883_v25 = vor.u32 %v991_v22, %v882_v20  ;;  %v746_v26 = vld [vmem:[%s1512_s1 + $0xd0] sm:$0xf]  ;;  %v957_v27 = vld [vmem:[%s1512_s1 + $0xd4] sm:$0xf0]  ;;  %v683_v29 = vor.u32 %v941_v24, %v682_v23  ;;  %v674_v35 = vld [vmem:[%s1512_s1 + $0x40] sm:$0xf] }
   0x8   :  { %v810_v28 = vld [vmem:[%s1512_s1 + $0x150] sm:$0xf]  ;;  %478 = vmatpush.bf16.msra.mxu0 %v691_v16  ;;  %v973_v30 = vld [vmem:[%s1512_s1 + $0x154] sm:$0xf0]  ;;  %v747_v33 = vor.u32 %v957_v27, %v746_v26  ;;  %v939_v36 = vld [vmem:[%s1512_s1 + $0x44] sm:$0xf0] }
   0x9   :  { %v874_v31 = vld [vmem:[%s1512_s1 + $0x1d0] sm:$0xf]  ;;  %v989_v32 = vld [vmem:[%s1512_s1 + $0x1d4] sm:$0xf0]  ;;  %491 = vmatpush.bf16.msra.mxu1 %v755_v17  ;;  %v811_v34 = vor.u32 %v973_v30, %v810_v28  ;;  %v738_v37 = vld [vmem:[%s1512_s1 + $0xc0] sm:$0xf]  ;;  %v675_v44 = vor.u32 %v939_v36, %v674_v35 }
   0xa   :  { %504 = vmatpush.bf16.msra.mxu2 %v819_v21  ;;  %v875_v38 = vor.u32 %v989_v32, %v874_v31  ;;  %v955_v39 = vld [vmem:[%s1512_s1 + $0xc4] sm:$0xf0]  ;;  %v802_v40 = vld [vmem:[%s1512_s1 + $0x140] sm:$0xf]  ;;  %v666_v47 = vld [vmem:[%s1512_s1 + $0x30] sm:$0xf] }
   0xb   :  { %517 = vmatpush.bf16.msra.mxu3 %v883_v25  ;;  %v971_v41 = vld [vmem:[%s1512_s1 + $0x144] sm:$0xf0]  ;;  %v866_v42 = vld [vmem:[%s1512_s1 + $0x1c0] sm:$0xf]  ;;  %v739_v45 = vor.u32 %v955_v39, %v738_v37  ;;  %v937_v48 = vld [vmem:[%s1512_s1 + $0x34] sm:$0xf0] }
   0xc   :  { %v987_v43 = vld [vmem:[%s1512_s1 + $0x1c4] sm:$0xf0]  ;;  %479 = vmatpush.bf16.msra.mxu0 %v683_v29  ;;  %v803_v46 = vor.u32 %v971_v41, %v802_v40  ;;  %v730_v49 = vld [vmem:[%s1512_s1 + $0xb0] sm:$0xf]  ;;  %v953_v51 = vld [vmem:[%s1512_s1 + $0xb4] sm:$0xf0]  ;;  %v667_v56 = vor.u32 %v937_v48, %v666_v47 }
   0xd   :  { %492 = vmatpush.bf16.msra.mxu1 %v747_v33  ;;  %v867_v50 = vor.u32 %v987_v43, %v866_v42  ;;  %v794_v52 = vld [vmem:[%s1512_s1 + $0x130] sm:$0xf]  ;;  %v969_v53 = vld [vmem:[%s1512_s1 + $0x134] sm:$0xf0]  ;;  %v731_v57 = vor.u32 %v953_v51, %v730_v49  ;;  %v658_v59 = vld [vmem:[%s1512_s1 + $0x20] sm:$0xf] }
   0xe   :  { %505 = vmatpush.bf16.msra.mxu2 %v811_v34  ;;  %v858_v54 = vld [vmem:[%s1512_s1 + $0x1b0] sm:$0xf]  ;;  %v985_v55 = vld [vmem:[%s1512_s1 + $0x1b4] sm:$0xf0]  ;;  %v795_v58 = vor.u32 %v969_v53, %v794_v52  ;;  %v935_v60 = vld [vmem:[%s1512_s1 + $0x24] sm:$0xf0] }
   0xf   :  { %518 = vmatpush.bf16.msra.mxu3 %v875_v38  ;;  %v722_v61 = vld [vmem:[%s1512_s1 + $0xa0] sm:$0xf]  ;;  %v859_v62 = vor.u32 %v985_v55, %v858_v54  ;;  %v951_v63 = vld [vmem:[%s1512_s1 + $0xa4] sm:$0xf0]  ;;  %v659_v4 = vor.u32 %v935_v60, %v658_v59  ;;  %v650_v7 = vld [vmem:[%s1512_s1 + $0x10] sm:$0xf] }
  0x10   :  { %480 = vmatpush.bf16.msra.mxu0 %v675_v44  ;;  %v786_v0 = vld [vmem:[%s1512_s1 + $0x120] sm:$0xf]  ;;  %v967_v1 = vld [vmem:[%s1512_s1 + $0x124] sm:$0xf0]  ;;  %v723_v5 = vor.u32 %v951_v63, %v722_v61  ;;  %v933_v8 = vld [vmem:[%s1512_s1 + $0x14] sm:$0xf0] }
  0x11   :  { %493 = vmatpush.bf16.msra.mxu1 %v739_v45  ;;  %v850_v2 = vld [vmem:[%s1512_s1 + $0x1a0] sm:$0xf]  ;;  %v983_v3 = vld [vmem:[%s1512_s1 + $0x1a4] sm:$0xf0]  ;;  %v787_v6 = vor.u32 %v967_v1, %v786_v0  ;;  %v714_v9 = vld [vmem:[%s1512_s1 + $0x90] sm:$0xf]  ;;  %v651_v17 = vor.u32 %v933_v8, %v650_v7 }
  0x12   :  { %506 = vmatpush.bf16.msra.mxu2 %v803_v46  ;;  %v851_v10 = vor.u32 %v983_v3, %v850_v2  ;;  %v949_v11 = vld [vmem:[%s1512_s1 + $0x94] sm:$0xf0]  ;;  %v778_v12 = vld [vmem:[%s1512_s1 + $0x110] sm:$0xf]  ;;  %v642_v16 = vld [vmem:[%s1512_s1] sm:$0xf] }
  0x13   :  { %519 = vmatpush.bf16.msra.mxu3 %v867_v50  ;;  %v965_v13 = vld [vmem:[%s1512_s1 + $0x114] sm:$0xf0]  ;;  %v842_v14 = vld [vmem:[%s1512_s1 + $0x190] sm:$0xf]  ;;  %v931_v18 = vld [vmem:[%s1512_s1 + $0x4] sm:$0xf0]  ;;  %v715_v21 = vor.u32 %v949_v11, %v714_v9 }
  0x14   :  { %481 = vmatpush.bf16.msra.mxu0 %v667_v56  ;;  %v981_v15 = vld [vmem:[%s1512_s1 + $0x194] sm:$0xf0]  ;;  %v706_v19 = vld [vmem:[%s1512_s1 + $0x80] sm:$0xf]  ;;  %v947_v20 = vld [vmem:[%s1512_s1 + $0x84] sm:$0xf0]  ;;  %v779_v22 = vor.u32 %v965_v13, %v778_v12  ;;  %v643_v33 = vor.u32 %v931_v18, %v642_v16 }
  0x15   :  { %494 = vmatpush.bf16.msra.mxu1 %v731_v57  ;;  %v770_v23 = vld [vmem:[%s1512_s1 + $0x100] sm:$0xf]  ;;  %v963_v24 = vld [vmem:[%s1512_s1 + $0x104] sm:$0xf0]  ;;  %v843_v26 = vor.u32 %v981_v15, %v842_v14  ;;  %v922_v29 = vld [vmem:[%s1512_s1 + $0x230] sm:$0xf]  ;;  %v707_v38 = vor.u32 %v947_v20, %v706_v19 }
  0x16   :  { %507 = vmatpush.bf16.msra.mxu2 %v795_v58  ;;  %v21_v25 = vld [vmem:[%s1513_s0] sm:$0xff]  ;;  %v979_v28 = vld [vmem:[%s1512_s1 + $0x184] sm:$0xf0]  ;;  %v1001_v30 = vld [vmem:[%s1512_s1 + $0x234] sm:$0xf0]  ;;  %v771_v39 = vor.u32 %v963_v24, %v770_v23 }
  0x17   :  { %520 = vmatpush.bf16.msra.mxu3 %v859_v62  ;;  %v834_v27 = vld [vmem:[%s1512_s1 + $0x180] sm:$0xf]  ;;  %v944_v31 = vld [vmem:[%s1512_s1 + $0x74] sm:$0xf]  ;;  %v700_v32 = vld [vmem:[%s1512_s1 + $0x78] sm:$0xf0]  ;;  %v99_v36 = vunpack.c.l.b16 %v21_v25  ;;  %v100_v42 = vunpack.c.h.b16 %v21_v25  ;;  %v923_v45 = vor.u32 %v1001_v30, %v922_v29 }
  0x18   :  { %482 = vmatpush.bf16.msra.mxu0 %v659_v4  ;;  %v960_v34 = vld [vmem:[%s1512_s1 + $0xf4] sm:$0xf]  ;;  %v764_v35 = vld [vmem:[%s1512_s1 + $0xf8] sm:$0xf0]  ;;  %v22_v37 = vld [vmem:[%s1513_s0 + $0x8] sm:$0xff]  ;;  %v835_v44 = vor.u32 %v979_v28, %v834_v27  ;;  %v703_v47 = vor.u32 %v944_v31, %v700_v32 }
  0x19   :  { %495 = vmatpush.bf16.msra.mxu1 %v723_v5  ;;  %v976_v40 = vld [vmem:[%s1512_s1 + $0x174] sm:$0xf]  ;;  %v828_v41 = vld [vmem:[%s1512_s1 + $0x178] sm:$0xf0]  ;;  %v101_v43 = vunpack.c.l.b16 %v22_v37  ;;  %v102_v46 = vunpack.c.h.b16 %v22_v37  ;;  %v767_v48 = vor.u32 %v960_v34, %v764_v35  ;;  %v914_v49 = vld [vmem:[%s1512_s1 + $0x220] sm:$0xf]  ;;  %v1265_v53 = vpack.c.b16 %v99_v36, %v99_v36 }
  0x1a   :  { %508 = vmatpush.bf16.msra.mxu2 %v787_v6  ;;  %v999_v50 = vld [vmem:[%s1512_s1 + $0x224] sm:$0xf0]  ;;  %v942_v51 = vld [vmem:[%s1512_s1 + $0x64] sm:$0xf]  ;;  %v831_v52 = vor.u32 %v976_v40, %v828_v41  ;;  %v692_v54 = vld [vmem:[%s1512_s1 + $0x68] sm:$0xf0]  ;;  %v1282_v59 = vpack.c.b16 %v100_v42, %v100_v42 }
  0x1b   :  { %521 = vmatpush.bf16.msra.mxu3 %v851_v10  ;;  %v958_v55 = vld [vmem:[%s1512_s1 + $0xe4] sm:$0xf]  ;;  %v756_v56 = vld [vmem:[%s1512_s1 + $0xe8] sm:$0xf0]  ;;  %v1284_v60 = vpack.c.b16 %v101_v43, %v101_v43  ;;  %v915_v61 = vor.u32 %v999_v50, %v914_v49  ;;  %v1286_v62 = vpack.c.b16 %v102_v46, %v102_v46  ;;  %v695_v63 = vor.u32 %v942_v51, %v692_v54  ;;  %v906_v1 = vld [vmem:[%s1512_s1 + $0x210] sm:$0xf] }
  0x1c   :  { %483 = vmatpush.bf16.msra.mxu0 %v651_v17  ;;  %v974_v57 = vld [vmem:[%s1512_s1 + $0x164] sm:$0xf]  ;;  %v820_v58 = vld [vmem:[%s1512_s1 + $0x168] sm:$0xf0]  ;;  %v759_v0 = vor.u32 %v958_v55, %v756_v56  ;;  %v997_v2 = vld [vmem:[%s1512_s1 + $0x214] sm:$0xf0] }
  0x1d   :  { %496 = vmatpush.bf16.msra.mxu1 %v715_v21  ;;  %v940_v3 = vld [vmem:[%s1512_s1 + $0x54] sm:$0xf]  ;;  %v823_v4 = vor.u32 %v974_v57, %v820_v58  ;;  %v684_v5 = vld [vmem:[%s1512_s1 + $0x58] sm:$0xf0]  ;;  %v907_v10 = vor.u32 %v997_v2, %v906_v1  ;;  %v898_v11 = vld [vmem:[%s1512_s1 + $0x200] sm:$0xf] }
  0x1e   :  { %509 = vmatpush.bf16.msra.mxu2 %v779_v22  ;;  %v956_v6 = vld [vmem:[%s1512_s1 + $0xd4] sm:$0xf]  ;;  %v748_v7 = vld [vmem:[%s1512_s1 + $0xd8] sm:$0xf0]  ;;  %v687_v12 = vor.u32 %v940_v3, %v684_v5  ;;  %v995_v14 = vld [vmem:[%s1512_s1 + $0x204] sm:$0xf0] }
  0x1f   :  { %522 = vmatpush.bf16.msra.mxu3 %v843_v26  ;;  %v972_v8 = vld [vmem:[%s1512_s1 + $0x154] sm:$0xf]  ;;  %v812_v9 = vld [vmem:[%s1512_s1 + $0x158] sm:$0xf0]  ;;  %v751_v13 = vor.u32 %v956_v6, %v748_v7  ;;  %v938_v15 = vld [vmem:[%s1512_s1 + $0x44] sm:$0xf]  ;;  %v899_v25 = vor.u32 %v995_v14, %v898_v11 }
  0x20   :  { %484 = vmatpush.bf16.msra.mxu0 %v643_v33  ;;  %v676_v16 = vld [vmem:[%s1512_s1 + $0x48] sm:$0xf0]  ;;  %v815_v17 = vor.u32 %v972_v8, %v812_v9  ;;  %v954_v18 = vld [vmem:[%s1512_s1 + $0xc4] sm:$0xf]  ;;  %v992_v22 = vld [vmem:[%s1512_s1 + $0x1f4] sm:$0xf] }
  0x21   :  { %497 = vmatpush.bf16.msra.mxu1 %v707_v38  ;;  %v740_v19 = vld [vmem:[%s1512_s1 + $0xc8] sm:$0xf0]  ;;  %v970_v20 = vld [vmem:[%s1512_s1 + $0x144] sm:$0xf]  ;;  %v892_v23 = vld [vmem:[%s1512_s1 + $0x1f8] sm:$0xf0]  ;;  %v679_v26 = vor.u32 %v938_v15, %v676_v16 }
  0x22   :  { %510 = vmatpush.bf16.msra.mxu2 %v771_v39  ;;  %v804_v21 = vld [vmem:[%s1512_s1 + $0x148] sm:$0xf0]  ;;  %v23_v24 = vld [vmem:[%s1513_s0 + $0x10] sm:$0xf]  ;;  %v743_v27 = vor.u32 %v954_v18, %v740_v19  ;;  %v936_v28 = vld [vmem:[%s1512_s1 + $0x34] sm:$0xf]  ;;  %v895_v31 = vor.u32 %v992_v22, %v892_v23 }
  0x23   :  { %523 = vmatpush.bf16.msra.mxu3 %v835_v44  ;;  %485 = vmatmul.bf16.vlgmr.msra.gmra.mxu0 %v1265_v53  ;;  %v668_v29 = vld [vmem:[%s1512_s1 + $0x38] sm:$0xf0]  ;;  %v807_v30 = vor.u32 %v970_v20, %v804_v21  ;;  %v952_v32 = vld [vmem:[%s1512_s1 + $0xb4] sm:$0xf]  ;;  %v103_v35 = vunpack.c.l.b16 %v23_v24  ;;  %v990_v37 = vld [vmem:[%s1512_s1 + $0x1e4] sm:$0xf] }
  0x24   :  { %533 = vmatpush.bf16.msrb.mxu0 %v923_v45  ;;  %498 = vmatmul.bf16.vlgmr.msra.gmra.mxu1 %v1282_v59  ;;  %v732_v33 = vld [vmem:[%s1512_s1 + $0xb8] sm:$0xf0]  ;;  %v968_v34 = vld [vmem:[%s1512_s1 + $0x134] sm:$0xf]  ;;  %v884_v38 = vld [vmem:[%s1512_s1 + $0x1e8] sm:$0xf0]  ;;  %v671_v39 = vor.u32 %v936_v28, %v668_v29 }
  0x25   :  { %542 = vmatpush.bf16.msrb.mxu1 %v703_v47  ;;  %511 = vmatmul.bf16.vlgmr.msra.gmra.mxu2 %v1284_v60  ;;  %v796_v36 = vld [vmem:[%s1512_s1 + $0x138] sm:$0xf0]  ;;  %v735_v40 = vor.u32 %v952_v32, %v732_v33  ;;  %v934_v41 = vld [vmem:[%s1512_s1 + $0x24] sm:$0xf]  ;;  %v660_v42 = vld [vmem:[%s1512_s1 + $0x28] sm:$0xf0]  ;;  %v887_v44 = vor.u32 %v990_v37, %v884_v38 }
  0x26   :  { %555 = vmatpush.bf16.msrb.mxu2 %v767_v48  ;;  %524 = vmatmul.bf16.vlgmr.msra.gmra.mxu3 %v1286_v62  ;;  %v799_v43 = vor.u32 %v968_v34, %v796_v36  ;;  %v950_v45 = vld [vmem:[%s1512_s1 + $0xa4] sm:$0xf]  ;;  %v724_v46 = vld [vmem:[%s1512_s1 + $0xa8] sm:$0xf0]  ;;  %v1388_v48 = vpack.c.b16 %v103_v35, %v103_v35  ;;  %v988_v50 = vld [vmem:[%s1512_s1 + $0x1d4] sm:$0xf] }
  0x27   :  { %568 = vmatpush.bf16.msrb.mxu3 %v831_v52  ;;  %v966_v47 = vld [vmem:[%s1512_s1 + $0x124] sm:$0xf]  ;;  %v788_v49 = vld [vmem:[%s1512_s1 + $0x128] sm:$0xf0]  ;;  %v876_v51 = vld [vmem:[%s1512_s1 + $0x1d8] sm:$0xf0]  ;;  %v663_v52 = vor.u32 %v934_v41, %v660_v42  ;;  %v727_v54 = vor.u32 %v950_v45, %v724_v46 }
  0x28   :  { %534 = vmatpush.bf16.msrb.mxu0 %v915_v61  ;;  %v932_v55 = vld [vmem:[%s1512_s1 + $0x14] sm:$0xf]  ;;  %v652_v56 = vld [vmem:[%s1512_s1 + $0x18] sm:$0xf0]  ;;  %v791_v57 = vor.u32 %v966_v47, %v788_v49  ;;  %v879_v58 = vor.u32 %v988_v50, %v876_v51  ;;  %v986_v2 = vld [vmem:[%s1512_s1 + $0x1c4] sm:$0xf] }
  0x29   :  { %543 = vmatpush.bf16.msrb.mxu1 %v695_v63  ;;  %v948_v61 = vld [vmem:[%s1512_s1 + $0x94] sm:$0xf]  ;;  %v716_v63 = vld [vmem:[%s1512_s1 + $0x98] sm:$0xf0]  ;;  %v868_v3 = vld [vmem:[%s1512_s1 + $0x1c8] sm:$0xf0] }
  0x2a   :  { %556 = vmatpush.bf16.msrb.mxu2 %v759_v0  ;;  %v964_v0 = vld [vmem:[%s1512_s1 + $0x114] sm:$0xf]  ;;  %v780_v1 = vld [vmem:[%s1512_s1 + $0x118] sm:$0xf0]  ;;  %v719_v5 = vor.u32 %v948_v61, %v716_v63  ;;  %v930_v6 = vld [vmem:[%s1512_s1 + $0x4] sm:$0xf]  ;;  %v871_v9 = vor.u32 %v986_v2, %v868_v3 }
  0x2b   :  { %569 = vmatpush.bf16.msrb.mxu3 %v823_v4  ;;  %v655_v4 = vor.u32 %v932_v55, %v652_v56  ;;  %v644_v7 = vld [vmem:[%s1512_s1 + $0x8] sm:$0xf0]  ;;  %v783_v8 = vor.u32 %v964_v0, %v780_v1  ;;  %v984_v14 = vld [vmem:[%s1512_s1 + $0x1b4] sm:$0xf]  ;;  %v860_v15 = vld [vmem:[%s1512_s1 + $0x1b8] sm:$0xf0] }
  0x2c   :  { %535 = vmatpush.bf16.msrb.mxu0 %v907_v10  ;;  %v946_v10 = vld [vmem:[%s1512_s1 + $0x84] sm:$0xf]  ;;  %v708_v11 = vld [vmem:[%s1512_s1 + $0x88] sm:$0xf0]  ;;  %v1000_v16 = vld [vmem:[%s1512_s1 + $0x234] sm:$0xf]  ;;  %v647_v18 = vor.u32 %v930_v6, %v644_v7  ;;  %v863_v21 = vor.u32 %v984_v14, %v860_v15 }
  0x2d   :  { %544 = vmatpush.bf16.msrb.mxu1 %v687_v12  ;;  %v962_v12 = vld [vmem:[%s1512_s1 + $0x104] sm:$0xf]  ;;  %v711_v19 = vor.u32 %v946_v10, %v708_v11  ;;  %v852_v24 = vld [vmem:[%s1512_s1 + $0x1a8] sm:$0xf0]  ;;  %v980_v29 = vld [vmem:[%s1512_s1 + $0x194] sm:$0xf] }
  0x2e   :  { %557 = vmatpush.bf16.msrb.mxu2 %v751_v13  ;;  %v772_v13 = vld [vmem:[%s1512_s1 + $0x108] sm:$0xf0]  ;;  %v982_v23 = vld [vmem:[%s1512_s1 + $0x1a4] sm:$0xf]  ;;  %v908_v32 = vld [vmem:[%s1512_s1 + $0x218] sm:$0xf0] }
  0x2f   :  { %570 = vmatpush.bf16.msrb.mxu3 %v815_v17  ;;  %v924_v17 = vld [vmem:[%s1512_s1 + $0x238] sm:$0xf0]  ;;  %v775_v20 = vor.u32 %v962_v12, %v772_v13  ;;  %v994_v35 = vld [vmem:[%s1512_s1 + $0x204] sm:$0xf]  ;;  %v623_v46 = vld [vmem:[%s1514_s4] sm:$0x3] }
  0x30   :  { %536 = vmatpush.bf16.msrb.mxu0 %v899_v25  ;;  %v927_v22 = vor.u32 %v1000_v16, %v924_v17  ;;  %v998_v25 = vld [vmem:[%s1512_s1 + $0x224] sm:$0xf]  ;;  %v607_v47 = vld [vmem:[%s1515_s2] sm:$0x3]  ;;  %vm624_vm1 = vcmp.ne.f32.partialorder %v623_v46, 0.0  ;;  %v1003_v51 = vmov 0  }
  0x31   :  { %545 = vmatpush.bf16.msrb.mxu1 %v679_v26  ;;  %v916_v26 = vld [vmem:[%s1512_s1 + $0x228] sm:$0xf0]  ;;  %v609_v50 = vperm.slane %v607_v47, 0  ;;  %v610_v13 = vperm.slane %v607_v47, 1 }
  0x32   :  { %558 = vmatpush.bf16.msrb.mxu2 %v743_v27  ;;  %v855_v27 = vor.u32 %v982_v23, %v852_v24  ;;  %v919_v28 = vor.u32 %v998_v25, %v916_v26 }
  0x33   :  { %571 = vmatpush.bf16.msrb.mxu3 %v807_v30  ;;  %928 = vmatmul.msk.bf16.vlgmr.msrb.gmra.mxu0 %vm473_vm0, %v1388_v48  ;;  %v844_v30 = vld [vmem:[%s1512_s1 + $0x198] sm:$0xf0] }
  0x34   :  { %581 = vmatpush.bf16.msra.mxu0 %v895_v31  ;;  %v996_v31 = vld [vmem:[%s1512_s1 + $0x214] sm:$0xf]  ;;  %v847_v33 = vor.u32 %v980_v29, %v844_v30 }
  0x35   :  { %546 = vmatpush.bf16.msrb.mxu1 %v671_v39  ;;  %v911_v34 = vor.u32 %v996_v31, %v908_v32 }
  0x36   :  { %559 = vmatpush.bf16.msrb.mxu2 %v735_v40 }
  0x37   :  { %572 = vmatpush.bf16.msrb.mxu3 %v799_v43 }
  0x38   :  { %582 = vmatpush.bf16.msra.mxu0 %v887_v44 }
  0x39   :  { %547 = vmatpush.bf16.msrb.mxu1 %v663_v52  ;;  %v627_v52 = vsel %vm624_vm1, 1, %v1003_v51 }
  0x3a   :  { %560 = vmatpush.bf16.msrb.mxu2 %v727_v54  ;;  %v629_v17 = vperm.slane %v627_v52, 1 }
  0x3b   :  { %573 = vmatpush.bf16.msrb.mxu3 %v791_v57 }
  0x3c   :  { %583 = vmatpush.bf16.msra.mxu0 %v879_v58  ;;  %v628_v58 = vperm.slane %v627_v52, 0  ;;  %vm631_vm3 = vcmp.eq.s32.totalorder %v629_v17, 1 }
  0x3d   :  { %548 = vmatpush.bf16.msrb.mxu1 %v655_v4 }
  0x3e   :  { %561 = vmatpush.bf16.msrb.mxu2 %v719_v5  ;;  %vm630_vm2 = vcmp.eq.s32.totalorder %v628_v58, 1 }
  0x3f   :  { %574 = vmatpush.bf16.msrb.mxu3 %v783_v8 }
  0x40   :  { %584 = vmatpush.bf16.msra.mxu0 %v871_v9 }
  0x41   :  { %549 = vmatpush.bf16.msrb.mxu1 %v647_v18 }
  0x42   :  { %562 = vmatpush.bf16.msrb.mxu2 %v711_v19 }
  0x43   :  { %575 = vmatpush.bf16.msrb.mxu3 %v775_v20 }
  0x44   :  { %585 = vmatpush.bf16.msra.mxu0 %v863_v21  ;;  %550 = vmatmul.bf16.vlgmr.msrb.gmra.mxu1 %v1265_v53  ;;  %v978_v53 = vld [vmem:[%s1512_s1 + $0x184] sm:$0xf] }
  0x45   :  { %598 = vmatpush.bf16.msra.mxu1 %v927_v22  ;;  %563 = vmatmul.bf16.vlgmr.msrb.gmra.mxu2 %v1282_v59  ;;  %v836_v59 = vld [vmem:[%s1512_s1 + $0x188] sm:$0xf0] }
  0x46   :  { %576 = vmatmul.bf16.vlgmr.msrb.gmra.mxu3 %v1284_v60  ;;  %v900_v60 = vld [vmem:[%s1512_s1 + $0x208] sm:$0xf0]  ;;  %v839_v36 = vor.u32 %v978_v53, %v836_v59 }
  0x47   :  { %v903_v37 = vor.u32 %v994_v35, %v900_v60 }
  0x48   :  { %586 = vmatpush.bf16.msra.mxu0 %v855_v27 }
  0x49   :  { %599 = vmatpush.bf16.msra.mxu1 %v919_v28 }
  0x4c   :  { %587 = vmatpush.bf16.msra.mxu0 %v847_v33 }
  0x4d   :  { %600 = vmatpush.bf16.msra.mxu1 %v911_v34 }
  0x50   :  { %588 = vmatpush.bf16.msra.mxu0 %v839_v36 }
  0x51   :  { %601 = vmatpush.bf16.msra.mxu1 %v903_v37 }
  0x53   :  { %589 = vmatmul.bf16.vlgmr.msra.gmra.mxu0 %v1286_v62 }
  0x54   :  { %929 = vmatmul.msk.bf16.vlgmr.msra.gmra.mxu1 %vm473_vm0, %v1388_v48  ;;  %v615_v48 = vld [vmem:[%s1516_s3] sm:$0x3] }
  0x55   :  { %v617_v57 = vperm.slane %v615_v48, 0  ;;  %v618_v16 = vperm.slane %v615_v48, 1 }
  0xa0   :  { %v486_v38 = vpop.f32.mrf.mxu0 }
  0xa1   :  { %v499_v39 = vpop.f32.mrf.mxu1 }
  0xa2   :  { %v500_v40 = vadd.f32 %v499_v39, %v486_v38 }
  0xa8   :  { %v512_v41 = vpop.f32.mrf.mxu2  ;;  %v488_v42 = vpop.f32.mrf.mxu0 }
  0xa9   :  { %v525_v43 = vpop.f32.mrf.mxu3  ;;  %v501_v44 = vpop.f32.mrf.mxu1  ;;  %v513_v45 = vadd.f32 %v512_v41, %v500_v40 }
  0xab   :  { %v526_v62 = vadd.f32 %v525_v43, %v513_v45 }
  0xb0   :  { %v514_v49 = vpop.f32.mrf.mxu2  ;;  %v538_v55 = vpop.f32.mrf.mxu0 }
  0xb1   :  { %v527_v54 = vpop.f32.mrf.mxu3  ;;  %v539_v56 = vadd.f32 %v538_v55, %v526_v62 }
  0xb3   :  { %v613_v61 = vmul.f32 %v609_v50, %v539_v56 }
  0xb5   :  { %v621_v63 = vadd.f32 %v617_v57, %v613_v61 }
  0xb7   :  { %v625_v0 = vmax.f32 %v621_v63, 0.0 }
  0xb8   :  { %v540_v1 = vpop.f32.mrf.mxu0 }
  0xb9   :  { %v632_v2 = vsel %vm630_vm2, %v625_v0, %v621_v63 }
  0xba   :  { %634 = vst [vmem:[%s1517_s5] sm:$0xff] %v632_v2 }
  0xc1   :  { %v551_v3 = vpop.f32.mrf.mxu1 }
  0xc8   :  { %v564_v4 = vpop.f32.mrf.mxu2 }
  0xc9   :  { %v577_v5 = vpop.f32.mrf.mxu3  ;;  %v565_v6 = vadd.f32 %v564_v4, %v551_v3  ;;  %v553_v7 = vpop.f32.mrf.mxu1 }
  0xcb   :  { %v578_v8 = vadd.f32 %v577_v5, %v565_v6 }
  0xd0   :  { %v590_v9 = vpop.f32.mrf.mxu0  ;;  %v566_v11 = vpop.f32.mrf.mxu2 }
  0xd1   :  { %v591_v10 = vadd.f32 %v590_v9, %v578_v8  ;;  %v579_v12 = vpop.f32.mrf.mxu3  ;;  %v603_v14 = vpop.f32.mrf.mxu1 }
  0xd3   :  { %v604_v15 = vadd.f32 %v603_v14, %v591_v10 }
  0xd5   :  { %v614_v18 = vmul.f32 %v610_v13, %v604_v15 }
  0xd7   :  { %v622_v19 = vadd.f32 %v618_v16, %v614_v18 }
  0xd8   :  { %v592_v20 = vpop.f32.mrf.mxu0 }
  0xd9   :  { %v626_v21 = vmax.f32 %v622_v19, 0.0  ;;  %v605_v22 = vpop.f32.mrf.mxu1 }
  0xdb   :  { %v633_v23 = vsel %vm631_vm3, %v626_v21, %v622_v19 }
  0xdc   :  { %635 = vst [vmem:[%s1517_s5 + $0x8] sm:$0xff] %v633_v23 }

// kernel: resnet_forward.10
= control target key start
LH: loop header
LB: loop body
LE: loop exit
PB: predicated region body
PF: predicated region fallthrough
CT: control target
= control target key end

     0   :  { %s3432_s21 = smov 0   ;;  %s4222_s0 = inlined_call_operand.vmem [shape: f32[2,56,64], index: 0, kind: input, shape index: {}]   ;;  %s4223_s1 = inlined_call_operand.vmem [shape: f32[2,56,64], index: 1, kind: input, shape index: {}]   ;;  %s4224_s2 = inlined_call_operand.vmem [shape: f32[40,1], index: 2, kind: input, shape index: {}]   ;;  %s4225_s3 = inlined_call_operand.vmem [shape: bf16[576,64], index: 3, kind: input, shape index: {}]   ;;  %s4226_s4 = inlined_call_operand.vmem [shape: f32[1,64], index: 4, kind: input, shape index: {}]   ;;  %s4227_s5 = inlined_call_operand.vmem [shape: f32[1,64], index: 5, kind: input, shape index: {}]   ;;  %s4228_s6 = inlined_call_operand.vmem [shape: bf16[576,64], index: 6, kind: input, shape index: {}]   ;;  %s4229_s7 = inlined_call_operand.vmem [shape: f32[1,64], index: 7, kind: input, shape index: {}]   ;;  %s4230_s8 = inlined_call_operand.vmem [shape: f32[1,64], index: 8, kind: input, shape index: {}]   ;;  %s4231_s9 = inlined_call_operand.vmem [shape: bf16[576,64], index: 9, kind: input, shape index: {}]   ;;  %s4232_s10 = inlined_call_operand.vmem [shape: f32[1,64], index: 10, kind: input, shape index: {}]   ;;  %s4233_s11 = inlined_call_operand.vmem [shape: f32[1,64], index: 11, kind: input, shape index: {}]   ;;  %s4234_s12 = inlined_call_operand.vmem [shape: f32[2,56,64], index: 12, kind: output, shape index: {}]  }
   0x1 LB: > { %s2702_s22 = sadd.s32 4294967295, %s3363_s21   ;;  %p2706_p0 = scmp.ge.s32.totalorder %s3363_s21, 1  ;;  %s3363_s21 = sphi %s3432_s21, %s22_s21  }
   0x2   : > { %p372_p1 = scmp.lt.s32.totalorder %s3363_s21, 3 }
   0x4   : > { %p373_p2 = pnand %p2706_p0, %p372_p1 }
   0x5   : > { %p419_p3 = scmp.lt.s32.totalorder (!%p373_p2), %s2702_s22, 1 }
   0x6   : > { %376 = sbr.rel (%p373_p2) target bundleno = 794 (0x31a), region = 68 }
   0xb   : > { %v3232_v0 = vld [vmem:[%s4225_s3 + $0x38] sm:$0xff]  ;;  %v3231_v3 = vld [vmem:[%s4225_s3 + $0x30] sm:$0xff]  ;;  %s4236_s22 = smov (!%p419_p3, %s2702_s22), 1  ;;  %v3230_v6 = vld [vmem:[%s4225_s3 + $0x28] sm:$0xff]  ;;  %vm440_vm0 = vcmask 523264  }
   0xc   : > { %v3228_v1 = vld [vmem:[%s4225_s3 + $0x18] sm:$0xff]  ;;  %3333 = vmatpush.bf16.msra.mxu3 %v3232_v0  ;;  %v3227_v4 = vld [vmem:[%s4225_s3 + $0x10] sm:$0xff]  ;;  %514 = vmatpush.bf16.msra.mxu0 %v3232_v0  ;;  %s3458_s17 = smul.u32 56, %s4236_s22  ;;  %v3226_v7 = vld [vmem:[%s4225_s3 + $0x8] sm:$0xff] }
   0xd   : > { %v3236_v2 = vld [vmem:[%s4225_s3 + $0x58] sm:$0xff]  ;;  %570 = vmatpush.bf16.msra.mxu1 %v3228_v1  ;;  %v3235_v5 = vld [vmem:[%s4225_s3 + $0x50] sm:$0xff]  ;;  %v3234_v8 = vld [vmem:[%s4225_s3 + $0x48] sm:$0xff] }
   0xe   : > { %642 = vmatpush.bf16.msra.mxu2 %v3236_v2  ;;  %s3470_s26 = scalar_lea.vmem %s4222_s0, %s3458_s17  ;;  %v3229_v9 = vld [vmem:[%s4225_s3 + $0x20] sm:$0xff]  ;;  %v3240_v15 = vld [vmem:[%s4225_s3 + $0x78] sm:$0xff]  ;;  %v3239_v26 = vld [vmem:[%s4225_s3 + $0x70] sm:$0xff]  ;;  %s3763_s20 = scalar_lea.vmem %s4223_s1, %s3458_s17 }
   0xf   : > { %v3225_v10 = vld [vmem:[%s4225_s3] sm:$0xff]  ;;  %v463_v12 = vld [vmem:[%s3470_s26 + $0x12] sm:$0xff]  ;;  %v3491_v16 = vld [vmem:[%s3470_s26 + $0x9] sm:$0xff]  ;;  %s4179_s30 = scalar_lea.vmem %s4234_s12, %s3458_s17 }
  0x10   : > { %3334 = vmatpush.bf16.msra.mxu3 %v3231_v3  ;;  %515 = vmatpush.bf16.msra.mxu0 %v3231_v3  ;;  %v3233_v11 = vld [vmem:[%s4225_s3 + $0x40] sm:$0xff]  ;;  %v590_v18 = vld [vmem:[%s3470_s26 + $0xb] sm:$0xff]  ;;  %v3252_v19 = vld [vmem:[%s4225_s3 + $0xd8] sm:$0xff] }
  0x11   : > { %571 = vmatpush.bf16.msra.mxu1 %v3227_v4  ;;  %v464_v13 = vld [vmem:[%s3470_s26 + $0x1a] sm:$0xff]  ;;  %v589_v17 = vld [vmem:[%s3470_s26 + $0x3] sm:$0xff]  ;;  %v3243_v29 = vld [vmem:[%s4225_s3 + $0x90] sm:$0xff] }
  0x12   : > { %643 = vmatpush.bf16.msra.mxu2 %v3235_v5  ;;  %v445_v14 = vld [vmem:[%s3470_s26 + $0x1] sm:$0xff]  ;;  %v462_v21 = vld [vmem:[%s3470_s26 + $0xa] sm:$0xff]  ;;  %v467_v22 = vpack.c.bf16 %v464_v13, %v463_v12  ;;  %v594_v24 = vpack.c.bf16 %v590_v18, %v589_v17  ;;  %v3244_v25 = vld [vmem:[%s4225_s3 + $0x98] sm:$0xff] }
  0x13   : > { %v461_v20 = vld [vmem:[%s3470_s26 + $0x2] sm:$0xff]  ;;  %v450_v23 = vpack.c.bf16 %v3491_v16, %v445_v14  ;;  %v3248_v28 = vld [vmem:[%s4225_s3 + $0xb8] sm:$0xff]  ;;  %v3251_v30 = vld [vmem:[%s4225_s3 + $0xd0] sm:$0xff] }
  0x14   : > { %3335 = vmatpush.bf16.msra.mxu3 %v3230_v6  ;;  %516 = vmatpush.bf16.msra.mxu0 %v3230_v6  ;;  %v466_v27 = vpack.c.bf16 %v462_v21, %v461_v20  ;;  %v3238_v31 = vld [vmem:[%s4225_s3 + $0x68] sm:$0xff]  ;;  %v3247_v32 = vld [vmem:[%s4225_s3 + $0xb0] sm:$0xff]  ;;  %v3237_v35 = vld [vmem:[%s4225_s3 + $0x60] sm:$0xff] }
  0x15   : > { %572 = vmatpush.bf16.msra.mxu1 %v3226_v7  ;;  %v3250_v33 = vld [vmem:[%s4225_s3 + $0xc8] sm:$0xff]  ;;  %v3256_v36 = vld [vmem:[%s4225_s3 + $0xf8] sm:$0xff]  ;;  %v3241_v39 = vld [vmem:[%s4225_s3 + $0x80] sm:$0xff] }
  0x16   : > { %644 = vmatpush.bf16.msra.mxu2 %v3234_v8  ;;  %v3242_v34 = vld [vmem:[%s4225_s3 + $0x88] sm:$0xff]  ;;  %v3249_v40 = vld [vmem:[%s4225_s3 + $0xc0] sm:$0xff]  ;;  %v447_v41 = vld [vmem:[%s3470_s26 + $0x11] sm:$0xff] }
  0x17   : > { %v3246_v37 = vld [vmem:[%s4225_s3 + $0xa8] sm:$0xff]  ;;  %v3550_v42 = vld [vmem:[%s3470_s26 + $0x19] sm:$0xff]  ;;  %v744_v47 = vld [vmem:[%s3470_s26 + $0x10] sm:$0xff] }
  0x18   : > { %3336 = vmatpush.bf16.msra.mxu3 %v3229_v9  ;;  %517 = vmatpush.bf16.msra.mxu0 %v3229_v9  ;;  %v465_v38 = vld [vmem:[%s3470_s26 + $0x22] sm:$0xff]  ;;  %v591_v43 = vld [vmem:[%s3470_s26 + $0x13] sm:$0xff]  ;;  %v451_v51 = vpack.c.bf16 %v3550_v42, %v447_v41 }
  0x19   : > { %573 = vmatpush.bf16.msra.mxu1 %v3225_v10  ;;  %v592_v44 = vld [vmem:[%s3470_s26 + $0x1b] sm:$0xff]  ;;  %v743_v45 = vld [vmem:[%s3470_s26 + $0x8] sm:$0xff]  ;;  %v3255_v48 = vld [vmem:[%s4225_s3 + $0xf0] sm:$0xff]  ;;  %v468_v50 = vpack.c.bf16 %v465_v38, %v465_v38 }
  0x1a   : > { %645 = vmatpush.bf16.msra.mxu2 %v3233_v11  ;;  %v3260_v46 = vld [vmem:[%s4225_s3 + $0x118] sm:$0xff]  ;;  %v3245_v49 = vld [vmem:[%s4225_s3 + $0xa0] sm:$0xff]  ;;  %v595_v52 = vpack.c.bf16 %v592_v44, %v591_v43  ;;  %v748_v53 = vpack.c.bf16 %v744_v47, %v743_v45  ;;  %v3259_v54 = vld [vmem:[%s4225_s3 + $0x110] sm:$0xff]  ;;  %v825_v11 = vpack.c.bf16 %v447_v41, %v3491_v16 }
  0x1b   : > { %2727 = vmatmul.msk.bf16.vlgmr.msra.gmra.mxu3 %vm440_vm0, %v467_v22  ;;  %2726 = vmatmul.msk.bf16.vlgmr.msra.gmra.mxu0 %vm440_vm0, %v466_v27  ;;  %v3254_v55 = vld [vmem:[%s4225_s3 + $0xe8] sm:$0xff]  ;;  %v745_v60 = vld [vmem:[%s3470_s26 + $0x18] sm:$0xff]  ;;  %v746_v61 = vld [vmem:[%s3470_s26 + $0x20] sm:$0xff]  ;;  %v3365_v22 = vmov 0  }
  0x1c   : > { %719 = vmatpush.bf16.msrb.mxu3 %v3240_v15  ;;  %2745 = vmatmul.msk.bf16.vlgmr.msra.gmra.mxu1 %vm440_vm0, %v450_v23  ;;  %v449_v56 = vld [vmem:[%s3470_s26 + $0x21] sm:$0xff]  ;;  %v667_v58 = vld [vmem:[%s3470_s26 + $0xf] sm:$0xff]  ;;  %v749_v1 = vpack.c.bf16 %v746_v61, %v745_v60  ;;  %v668_v5 = vld [vmem:[%s3470_s26 + $0x17] sm:$0xff] }
  0x1d   : > { %2764 = vmatmul.msk.bf16.vlgmr.msra.gmra.mxu2 %vm440_vm0, %v594_v24  ;;  %796 = vmatpush.bf16.msrb.mxu0 %v3244_v25  ;;  %v666_v57 = vld [vmem:[%s3470_s26 + $0x7] sm:$0xff]  ;;  %v452_v62 = vpack.c.bf16 %v449_v56, %v449_v56  ;;  %v669_v6 = vld [vmem:[%s3470_s26 + $0x1f] sm:$0xff]  ;;  %v898_v8 = vld [vmem:[%s3470_s26 + $0x15] sm:$0xff]  ;;  %v1056_v20 = vpack.c.bf16 %v668_v5, %v667_v58 }
  0x1e   : > { %950 = vmatpush.bf16.msrb.mxu2 %v3252_v19  ;;  %873 = vmatpush.bf16.msrb.mxu1 %v3248_v28  ;;  %v593_v59 = vld [vmem:[%s3470_s26 + $0x23] sm:$0xff]  ;;  %v671_v63 = vpack.c.bf16 %v667_v58, %v666_v57  ;;  %v897_v7 = vld [vmem:[%s3470_s26 + $0xd] sm:$0xff]  ;;  %v672_v10 = vpack.c.bf16 %v669_v6, %v668_v5  ;;  %v826_v19 = vpack.c.bf16 %v449_v56, %v3550_v42  ;;  %v3268_v5 = vld [vmem:[%s4228_s6 + $0x38] sm:$0xff] }
  0x1f   : > { %v596_v0 = vpack.c.bf16 %v593_v59, %v593_v59  ;;  %v3258_v2 = vld [vmem:[%s4225_s3 + $0x108] sm:$0xff]  ;;  %v3253_v3 = vld [vmem:[%s4225_s3 + $0xe0] sm:$0xff]  ;;  %v902_v12 = vpack.c.bf16 %v898_v8, %v897_v7  ;;  %3348 = vset.pattern.permute.xlu0 %v3365_v22  ;;  %3349 = vset.pattern.permute.xlu1 %v3365_v22 }
  0x20   : > { %720 = vmatpush.bf16.msrb.mxu3 %v3239_v26  ;;  %v3257_v4 = vld [vmem:[%s4225_s3 + $0x100] sm:$0xff]  ;;  %v747_v9 = vld [vmem:[%s3470_s26 + $0x28] sm:$0xff]  ;;  %3350 = vset.pattern.permute.xlu2 %v3365_v22  ;;  %v975_v26 = vld [vmem:[%s3470_s26 + $0x16] sm:$0xff]  ;;  %v3366_v22 = vmov 0.0  }
  0x21   : > { %797 = vmatpush.bf16.msrb.mxu0 %v3243_v29  ;;  %v750_v13 = vpack.c.bf16 %v747_v9, %v747_v9  ;;  %v670_v14 = vld [vmem:[%s3470_s26 + $0x27] sm:$0xff]  ;;  %v899_v15 = vld [vmem:[%s3470_s26 + $0x1d] sm:$0xff]  ;;  %441 = vst.msk [vmem:[#allocation2] sm:$0xff] %vm440_vm0, %v3366_v22 }
  0x22   : > { %951 = vmatpush.bf16.msrb.mxu2 %v3251_v30  ;;  %874 = vmatpush.bf16.msrb.mxu1 %v3247_v32  ;;  %v900_v17 = vld [vmem:[%s3470_s26 + $0x25] sm:$0xff]  ;;  %v673_v18 = vpack.c.bf16 %v670_v14, %v670_v14  ;;  %v974_v25 = vld [vmem:[%s3470_s26 + $0xe] sm:$0xff]  ;;  %442 = vst.msk [vmem:[#allocation2 + $0x30] sm:$0xff] %vm440_vm0, %v3366_v22 }
  0x23   : > { %v903_v16 = vpack.c.bf16 %v900_v17, %v899_v15  ;;  %v435_v21 = vld [vmem:[%s4224_s2] sm:$0xff]  ;;  %v436_v23 = vld [vmem:[%s4224_s2 + $0x8] sm:$0xff]  ;;  %v979_v29 = vpack.c.bf16 %v975_v26, %v974_v25  ;;  %v437_v32 = vld [vmem:[%s4224_s2 + $0x10] sm:$0xff]  ;;  %443 = vst.msk [vmem:[#allocation3] sm:$0xff] %vm440_vm0, %v3366_v22 }
  0x24   : > { %721 = vmatpush.bf16.msrb.mxu3 %v3238_v31  ;;  %1163 = vperm.xlu0 %3348, %v435_v21   ;;  %v824_v24 = vld [vmem:[%s3470_s26 + $0x29] sm:$0xff]  ;;  %v1057_v31 = vpack.c.bf16 %v670_v14, %v669_v6  ;;  %v3272_v25 = vld [vmem:[%s4228_s6 + $0x58] sm:$0xff]  ;;  %444 = vst.msk [vmem:[#allocation3 + $0x30] sm:$0xff] %vm440_vm0, %v3366_v22 }
  0x25   : > { %798 = vmatpush.bf16.msrb.mxu0 %v3242_v34  ;;  %v901_v27 = vld [vmem:[%s3470_s26 + $0x2d] sm:$0xff]  ;;  %v827_v28 = vpack.c.bf16 %v824_v24, %v824_v24  ;;  %1173 = vperm.xlu1 %3349, %v437_v32   ;;  %v976_v34 = vld [vmem:[%s3470_s26 + $0x1e] sm:$0xff]  ;;  %2628 = vst.msk [vmem:[%s4179_s30] sm:$0xff] %vm440_vm0, %v3366_v22 }
  0x26   : > { %952 = vmatpush.bf16.msrb.mxu2 %v3250_v33  ;;  %875 = vmatpush.bf16.msrb.mxu1 %v3246_v37  ;;  %v904_v30 = vpack.c.bf16 %v901_v27, %v901_v27  ;;  %v438_v33 = vld [vmem:[%s4224_s2 + $0x18] sm:$0xff]  ;;  %2634 = vst.msk [vmem:[%s4179_s30 + $0x30] sm:$0xff] %vm440_vm0, %v3366_v22 }
  0x27   : > { %v3264_v24 = vld [vmem:[%s4228_s6 + $0x18] sm:$0xff] }
  0x28   : > { %722 = vmatpush.bf16.msrb.mxu3 %v3237_v35  ;;  %v977_v35 = vld [vmem:[%s3470_s26 + $0x26] sm:$0xff]  ;;  %v3276_v26 = vld [vmem:[%s4228_s6 + $0x78] sm:$0xff] }
  0x29   : > { %799 = vmatpush.bf16.msrb.mxu0 %v3241_v39  ;;  %v980_v37 = vpack.c.bf16 %v977_v35, %v976_v34  ;;  %v978_v39 = vld [vmem:[%s3470_s26 + $0x2e] sm:$0xff] }
  0x2a   : > { %953 = vmatpush.bf16.msrb.mxu2 %v3249_v40  ;;  %876 = vmatpush.bf16.msrb.mxu1 %v3245_v49  ;;  %v981_v40 = vpack.c.bf16 %v978_v39, %v978_v39 }
  0x2b   : > { %2728 = vmatmul.msk.bf16.gmra.mxu3 %vm440_vm0, %v468_v50 }
  0x2c   : > { %1027 = vmatpush.bf16.msra.mxu3 %v3256_v36  ;;  %2746 = vmatmul.msk.bf16.gmra.mxu1 %vm440_vm0, %v451_v51  ;;  %v1055_v36 = vld [vmem:[%s3470_s26 + $0x2f] sm:$0xff] }
  0x2d   : > { %1104 = vmatpush.bf16.msra.mxu0 %v3260_v46  ;;  %2765 = vmatmul.msk.bf16.gmra.mxu2 %vm440_vm0, %v595_v52  ;;  %v1058_v38 = vpack.c.bf16 %v1055_v36, %v1055_v36  ;;  %v3262_v36 = vld [vmem:[%s4228_s6 + $0x8] sm:$0xff] }
  0x2e   : > { %2802 = vmatmul.msk.bf16.vlgmr.msrb.gmra.mxu0 %vm440_vm0, %v748_v53  ;;  %1168 = vperm.xlu0 %3348, %v436_v23  }
  0x2f   : > { %1178 = vperm.xlu1 %3349, %v438_v33   ;;  %1265 = vmatpush.bf16.msra.mxu1 %v3268_v5 }
  0x30   : > { %1028 = vmatpush.bf16.msra.mxu3 %v3255_v48  ;;  %v439_v48 = vld [vmem:[%s4224_s2 + $0x20] sm:$0xff]  ;;  %1321 = vmatpush.bf16.msra.mxu2 %v3264_v24 }
  0x31   : > { %1105 = vmatpush.bf16.msra.mxu0 %v3259_v54  ;;  %1183 = vperm.xlu2 %3350, %v439_v48  }
  0x34   : > { %1029 = vmatpush.bf16.msra.mxu3 %v3254_v55 }
  0x35   : > { %1106 = vmatpush.bf16.msra.mxu0 %v3258_v2 }
  0x38   : > { %1030 = vmatpush.bf16.msra.mxu3 %v3253_v3 }
  0x39   : > { %1107 = vmatpush.bf16.msra.mxu0 %v3257_v4 }
  0x3b   : > { %2783 = vmatmul.msk.bf16.vlgmr.msrb.gmra.mxu3 %vm440_vm0, %v671_v63 }
  0x3c   : > { %2747 = vmatmul.msk.bf16.gmra.mxu1 %vm440_vm0, %v452_v62  ;;  %1393 = vmatpush.bf16.msrb.mxu3 %v3272_v25 }
  0x3d   : > { %2766 = vmatmul.msk.bf16.gmra.mxu2 %vm440_vm0, %v596_v0  ;;  %1470 = vmatpush.bf16.msrb.mxu0 %v3276_v26 }
  0x3e   : > { %2803 = vmatmul.msk.bf16.gmra.mxu0 %vm440_vm0, %v749_v1 }
  0x4b   : > { %2784 = vmatmul.msk.bf16.gmra.mxu3 %vm440_vm0, %v672_v10  ;;  %v3267_v10 = vld [vmem:[%s4228_s6 + $0x30] sm:$0xff] }
  0x4c   : > { %2821 = vmatmul.msk.bf16.vlgmr.msrb.gmra.mxu1 %vm440_vm0, %v825_v11 }
  0x4d   : > { %2840 = vmatmul.msk.bf16.vlgmr.msrb.gmra.mxu2 %vm440_vm0, %v902_v12  ;;  %1266 = vmatpush.bf16.msra.mxu1 %v3267_v10 }
  0x4e   : > { %2804 = vmatmul.msk.bf16.gmra.mxu0 %vm440_vm0, %v750_v13 }
  0x5b   : > { %2785 = vmatmul.msk.bf16.gmra.mxu3 %vm440_vm0, %v673_v18 }
  0x5c   : > { %2822 = vmatmul.msk.bf16.gmra.mxu1 %vm440_vm0, %v826_v19 }
  0x5d   : > { %2841 = vmatmul.msk.bf16.gmra.mxu2 %vm440_vm0, %v903_v16 }
  0x5e   : > { %2878 = vmatmul.msk.bf16.vlgmr.msra.gmra.mxu0 %vm440_vm0, %v1056_v20  ;;  %v3266_v20 = vld [vmem:[%s4228_s6 + $0x28] sm:$0xff] }
  0x5f   : > { %1267 = vmatpush.bf16.msra.mxu1 %v3266_v20 }
  0x6b   : > { %2859 = vmatmul.msk.bf16.vlgmr.msra.gmra.mxu3 %vm440_vm0, %v979_v29  ;;  %v3263_v29 = vld [vmem:[%s4228_s6 + $0x10] sm:$0xff] }
  0x6c   : > { %2823 = vmatmul.msk.bf16.gmra.mxu1 %vm440_vm0, %v827_v28  ;;  %1322 = vmatpush.bf16.msra.mxu2 %v3263_v29 }
  0x6d   : > { %2842 = vmatmul.msk.bf16.gmra.mxu2 %vm440_vm0, %v904_v30  ;;  %v3271_v30 = vld [vmem:[%s4228_s6 + $0x50] sm:$0xff] }
  0x6e   : > { %2879 = vmatmul.msk.bf16.gmra.mxu0 %vm440_vm0, %v1057_v31  ;;  %v3275_v31 = vld [vmem:[%s4228_s6 + $0x70] sm:$0xff]  ;;  %1394 = vmatpush.bf16.msrb.mxu3 %v3271_v30 }
  0x6f   : > { %1471 = vmatpush.bf16.msrb.mxu0 %v3275_v31  ;;  %v1147_v30 = vld [vmem:[%s3763_s20 + $0x10] sm:$0xff] }
  0x70   : > { %1323 = vmatpush.bf16.msra.mxu2 %v3262_v36 }
  0x7b   : > { %2860 = vmatmul.msk.bf16.gmra.mxu3 %vm440_vm0, %v980_v37  ;;  %v3270_v37 = vld [vmem:[%s4228_s6 + $0x48] sm:$0xff] }
  0x7c   : > { %1395 = vmatpush.bf16.msrb.mxu3 %v3270_v37 }
  0x7e   : > { %2880 = vmatmul.msk.bf16.gmra.mxu0 %vm440_vm0, %v1058_v38  ;;  %v3274_v38 = vld [vmem:[%s4228_s6 + $0x68] sm:$0xff] }
  0x7f   : > { %1472 = vmatpush.bf16.msrb.mxu0 %v3274_v38 }
  0x8b   : > { %2861 = vmatmul.msk.bf16.gmra.mxu3 %vm440_vm0, %v981_v40 }
  0x98   : > { %v519_v42 = vpop.f32.mrf.mxu0 }
  0x99   : > { %v575_v41 = vpop.f32.mrf.mxu1 }
  0x9a   : > { %v576_v43 = vadd.f32 %v575_v41, %v519_v42 }
  0x9e   : > { %v524_v44 = vpop.f32.mrf.mxu3 }
  0xa0   : > { %v647_v45 = vpop.f32.mrf.mxu2  ;;  %v521_v49 = vpop.f32.mrf.mxu0 }
  0xa1   : > { %v3640_v46 = vpop.f32.mrf.mxu1  ;;  %v661_v47 = vadd.f32 %v647_v45, %v576_v43  ;;  %v3261_v45 = vld [vmem:[%s4228_s6] sm:$0xff] }
  0xa2   : > { %v578_v34 = vadd.f32 %v3640_v46, %v521_v49  ;;  %v3269_v46 = vld [vmem:[%s4228_s6 + $0x40] sm:$0xff]  ;;  %1324 = vmatpush.bf16.msra.mxu2 %v3261_v45 }
  0xa3   : > { %1396 = vmatpush.bf16.msrb.mxu3 %v3269_v46 }
  0xa6   : > { %v3645_v50 = vpop.f32.mrf.mxu3 }
  0xa8   : > { %v3647_v51 = vpop.f32.mrf.mxu2 }
  0xa9   : > { %v580_v52 = vpop.f32.mrf.mxu1  ;;  %v662_v42 = vadd.f32 %v3647_v51, %v578_v34 }
  0xaa   : > { %v581_v53 = vadd.f32 %v580_v52, %v524_v44  ;;  %v3265_v44 = vld [vmem:[%s4228_s6 + $0x20] sm:$0xff] }
  0xab   : > { %v3649_v54 = vpop.f32.mrf.mxu0  ;;  %1268 = vmatpush.bf16.msra.mxu1 %v3265_v44 }
  0xae   : > { %v529_v55 = vpop.f32.mrf.mxu3 }
  0xb0   : > { %v652_v56 = vpop.f32.mrf.mxu2 }
  0xb1   : > { %v3651_v57 = vadd.f32 %v652_v56, %v581_v53  ;;  %v3653_v58 = vpop.f32.mrf.mxu1 }
  0xb3   : > { %v3655_v59 = vpop.f32.mrf.mxu0 }
  0xb6   : > { %v531_v60 = vpop.f32.mrf.mxu3 }
  0xb8   : > { %v3657_v61 = vpop.f32.mrf.mxu2 }
  0xb9   : > { %v585_v62 = vpop.f32.mrf.mxu1 }
  0xba   : > { %v586_v63 = vadd.f32 %v585_v62, %v529_v55  ;;  %v3757_v62 = vld [vmem:[%s4227_s5] ss:$0 sm:$0xff] }
  0xbb   : > { %v3659_v0 = vpop.f32.mrf.mxu0 }
  0xbe   : > { %v724_v1 = vpop.f32.mrf.mxu3 }
  0xbf   : > { %v738_v32 = vadd.f32 %v724_v1, %v661_v47  ;;  %v3273_v47 = vld [vmem:[%s4228_s6 + $0x60] sm:$0xff] }
  0xc0   : > { %v657_v2 = vpop.f32.mrf.mxu2  ;;  %1473 = vmatpush.bf16.msrb.mxu0 %v3273_v47  ;;  %v3816_v47 = vpop.permute.xlu1 %1173 }
  0xc1   : > { %v3661_v3 = vadd.f32 %v657_v2, %v586_v63  ;;  %v587_v4 = vpop.f32.mrf.mxu1  ;;  %v815_v40 = vadd.f32 %v3649_v54, %v738_v32  ;;  %v3751_v54 = vld [vmem:[%s4226_s4] ss:$0 sm:$0xff] }
  0xc2   : > { %v1146_v4 = vld [vmem:[%s3763_s20 + $0x8] sm:$0xff] }
  0xc3   : > { %v3666_v6 = vpop.f32.mrf.mxu0 }
  0xc6   : > { %v726_v7 = vpop.f32.mrf.mxu3 }
  0xc7   : > { %v739_v48 = vadd.f32 %v726_v7, %v662_v42 }
  0xc8   : > { %v659_v8 = vpop.f32.mrf.mxu2 }
  0xc9   : > { %v878_v9 = vpop.f32.mrf.mxu1  ;;  %v816_v56 = vadd.f32 %v3655_v59, %v739_v48  ;;  %v3280_v8 = vld [vmem:[%s4228_s6 + $0x98] sm:$0xff] }
  0xca   : > { %v892_v43 = vadd.f32 %v878_v9, %v815_v40  ;;  %1547 = vmatpush.bf16.msrb.mxu1 %v3280_v8 }
  0xcb   : > { %v3671_v11 = vpop.f32.mrf.mxu0 }
  0xce   : > { %v3673_v12 = vpop.f32.mrf.mxu3 }
  0xcf   : > { %v740_v59 = vadd.f32 %v3673_v12, %v3651_v57 }
  0xd0   : > { %v955_v13 = vpop.f32.mrf.mxu2 }
  0xd1   : > { %v3675_v14 = vpop.f32.mrf.mxu1  ;;  %v969_v49 = vadd.f32 %v955_v13, %v892_v43  ;;  %v817_v57 = vadd.f32 %v3659_v0, %v740_v59  ;;  %v1148_v43 = vld [vmem:[%s3763_s20 + $0x18] sm:$0xff] }
  0xd2   : > { %v893_v1 = vadd.f32 %v3675_v14, %v816_v56 }
  0xd3   : > { %v813_v15 = vpop.f32.mrf.mxu0 }
  0xd4   : > { %v3775_v15 = vpop.permute.xlu0 %1163 }
  0xd6   : > { %v3677_v17 = vpop.f32.mrf.mxu3 }
  0xd8   : > { %v3679_v18 = vpop.f32.mrf.mxu2 }
  0xd9   : > { %v3681_v19 = vpop.f32.mrf.mxu1  ;;  %v970_v5 = vadd.f32 %v3679_v18, %v893_v1 }
  0xda   : > { %v894_v25 = vadd.f32 %v3681_v19, %v817_v57  ;;  %v3277_v57 = vld [vmem:[%s4228_s6 + $0x80] sm:$0xff] }
  0xdb   : > { %v1109_v16 = vpop.f32.mrf.mxu0 }
  0xdc   : > { %v3801_v34 = vpop.permute.xlu0 %1168 }
  0xde   : > { %v3686_v21 = vpop.f32.mrf.mxu3 }
  0xdf   : > { %v742_v42 = vadd.f32 %v3686_v21, %v3661_v3  ;;  %v1149_v3 = vld [vmem:[%s3763_s20 + $0x20] sm:$0xff] }
  0xe0   : > { %v3690_v23 = vpop.f32.mrf.mxu2 }
  0xe1   : > { %v3703_v27 = vpop.f32.mrf.mxu1  ;;  %v819_v46 = vadd.f32 %v3671_v11, %v742_v42 }
  0xe3   : > { %v1111_v28 = vpop.f32.mrf.mxu0 }
  0xe6   : > { %v736_v33 = vpop.f32.mrf.mxu3 }
  0xe8   : > { %v3719_v35 = vpop.f32.mrf.mxu2 }
  0xe9   : > { %v3730_v39 = vpop.f32.mrf.mxu1 }
  0xeb   : > { %v1114_v41 = vpop.f32.mrf.mxu0 }
  0xee   : > { %v1032_v51 = vpop.f32.mrf.mxu3 }
  0xef   : > { %v1046_v53 = vadd.f32 %v1032_v51, %v969_v49  ;;  %v896_v51 = vadd.f32 %v3730_v39, %v819_v46 }
  0xf0   : > { %v3746_v52 = vpop.f32.mrf.mxu2 }
  0xf1   : > { %v890_v55 = vpop.f32.mrf.mxu1  ;;  %v1123_v60 = vadd.f32 %v1109_v16, %v1046_v53  ;;  %v583_v16 = vadd.f32 %v3653_v58, %v3645_v50  ;;  %v971_v50 = vadd.f32 %v3690_v23, %v894_v25  ;;  %v3287_v25 = vld [vmem:[%s4228_s6 + $0xd0] sm:$0xff] }
  0xf3   : > { %v1116_v63 = vpop.f32.mrf.mxu0  ;;  %v1132_v2 = vmul.f32 %v3751_v54, %v1123_v60  ;;  %v664_v24 = vadd.f32 %v3657_v61, %v583_v16  ;;  %v3279_v61 = vld [vmem:[%s4228_s6 + $0x90] sm:$0xff]  ;;  %v973_v60 = vadd.f32 %v3746_v52, %v896_v51  ;;  %v3292_v16 = vld [vmem:[%s4228_s6 + $0xf8] sm:$0xff] }
  0xf4   : > { %1548 = vmatpush.bf16.msrb.mxu1 %v3279_v61  ;;  %1778 = vmatpush.bf16.msra.mxu0 %v3292_v16 }
  0xf5   : > { %v1141_v7 = vadd.f32 %v3757_v62, %v1132_v2  ;;  %v741_v31 = vadd.f32 %v3677_v17, %v664_v24  ;;  %v3278_v17 = vld [vmem:[%s4228_s6 + $0x88] sm:$0xff]  ;;  %v3283_v24 = vld [vmem:[%s4228_s6 + $0xb0] sm:$0xff] }
  0xf6   : > { %v1034_v9 = vpop.f32.mrf.mxu3 }
  0xf7   : > { %v1151_v10 = vadd.f32 %v1146_v4, %v1141_v7  ;;  %v1047_v13 = vadd.f32 %v1034_v9, %v970_v5  ;;  %v818_v23 = vadd.f32 %v3666_v6, %v741_v31 }
  0xf8   : > { %v967_v14 = vpop.f32.mrf.mxu2  ;;  %1549 = vmatpush.bf16.msrb.mxu1 %v3278_v17 }
  0xf9   : > { %v1156_v12 = vmax.f32 %v1151_v10, 0.0  ;;  %v1124_v18 = vadd.f32 %v1111_v28, %v1047_v13  ;;  %v895_v37 = vadd.f32 %v3703_v27, %v818_v23  ;;  %v3284_v13 = vld [vmem:[%s4228_s6 + $0xb8] sm:$0xff]  ;;  %v3883_v23 = vpop.permute.xlu2 %1183 }
  0xfa   : > { %v3288_v14 = vld [vmem:[%s4228_s6 + $0xd8] sm:$0xff]  ;;  %1624 = vmatpush.bf16.msrb.mxu2 %v3284_v13 }
  0xfb   : > { %v3780_v20 = vpop.f32.mrf.mxu0  ;;  %v3785_v26 = vmul.f32 %v3775_v15, %v1156_v12  ;;  %v1133_v29 = vmul.f32 %v3751_v54, %v1124_v18  ;;  %v972_v6 = vadd.f32 %v3719_v35, %v895_v37  ;;  %1701 = vmatpush.bf16.msra.mxu3 %v3288_v14  ;;  %v3289_v37 = vld [vmem:[%s4228_s6 + $0xe0] sm:$0xff] }
  0xfc   : > { %1550 = vmatpush.bf16.msrb.mxu1 %v3277_v57 }
  0xfd   : > { %1191 = vst.msk [vmem:[#allocation2 + $0x8] sm:$0xff] %vm440_vm0, %v3785_v26  ;;  %v1142_v58 = vadd.f32 %v3757_v62, %v1133_v29  ;;  %v3857_v29 = vpop.permute.xlu1 %1178 }
  0xfe   : > { %v1037_v0 = vpop.f32.mrf.mxu3  ;;  %1625 = vmatpush.bf16.msrb.mxu2 %v3283_v24 }
  0xff   : > { %v1152_v19 = vadd.f32 %v1147_v30, %v1142_v58  ;;  %v1048_v28 = vadd.f32 %v1037_v0, %v971_v50  ;;  %v3291_v30 = vld [vmem:[%s4228_s6 + $0xf0] sm:$0xff]  ;;  %v1150_v50 = vld [vmem:[%s3763_s20 + $0x28] sm:$0xff]  ;;  %1702 = vmatpush.bf16.msra.mxu3 %v3287_v25 }
 0x100   : > { %v3282_v0 = vld [vmem:[%s4228_s6 + $0xa8] sm:$0xff]  ;;  %1779 = vmatpush.bf16.msra.mxu0 %v3291_v30 }
 0x101   : > { %v1157_v32 = vmax.f32 %v1152_v19, 0.0  ;;  %v1125_v33 = vadd.f32 %v1114_v41, %v1048_v28  ;;  %v3286_v19 = vld [vmem:[%s4228_s6 + $0xc8] sm:$0xff] }
 0x102   : > { %1626 = vmatpush.bf16.msrb.mxu2 %v3282_v0 }
 0x103   : > { %v1121_v36 = vpop.f32.mrf.mxu0  ;;  %v3805_v38 = vmul.f32 %v3801_v34, %v1157_v32  ;;  %v1134_v40 = vmul.f32 %v3751_v54, %v1125_v33  ;;  %1703 = vmatpush.bf16.msra.mxu3 %v3286_v19  ;;  %v3281_v33 = vld [vmem:[%s4228_s6 + $0xa0] sm:$0xff] }
 0x104   : > { %v1212_v53 = vld [vmem:[#allocation2 + $0x2] sm:$0xff] }
 0x105   : > { %1192 = vst.msk [vmem:[#allocation2 + $0x10] sm:$0xff] %vm440_vm0, %v3805_v38  ;;  %v1143_v41 = vadd.f32 %v3757_v62, %v1134_v40  ;;  %v1196_v55 = vld [vmem:[#allocation2 + $0x1] sm:$0xff] }
 0x106   : > { %v1039_v44 = vpop.f32.mrf.mxu3  ;;  %v1340_v56 = vld [vmem:[#allocation2 + $0x3] sm:$0xff]  ;;  %1627 = vmatpush.bf16.msrb.mxu2 %v3281_v33 }
 0x107   : > { %v1153_v27 = vadd.f32 %v1148_v43, %v1143_v41  ;;  %v1049_v45 = vadd.f32 %v1039_v44, %v972_v6  ;;  %v1417_v5 = vld [vmem:[#allocation2 + $0x7] sm:$0xff] }
 0x108   : > { %v3285_v36 = vld [vmem:[%s4228_s6 + $0xc0] sm:$0xff] }
 0x109   : > { %v1158_v48 = vmax.f32 %v1153_v27, 0.0  ;;  %v1126_v49 = vadd.f32 %v1116_v63, %v1049_v45  ;;  %1704 = vmatpush.bf16.msra.mxu3 %v3285_v36 }
 0x10b   : > { %v3821_v21 = vmul.f32 %v3816_v47, %v1158_v48  ;;  %v1135_v35 = vmul.f32 %v3751_v54, %v1126_v49 }
 0x10c   : > { %v1213_v1 = vld [vmem:[#allocation2 + $0xa] sm:$0xff] }
 0x10d   : > { %v3825_v2 = vld [vmem:[#allocation2 + $0x9] sm:$0xff]  ;;  %1193 = vst.msk [vmem:[#allocation2 + $0x18] sm:$0xff] %vm440_vm0, %v3821_v21  ;;  %v1144_v39 = vadd.f32 %v3757_v62, %v1135_v35  ;;  %v1217_v63 = vpack.c.bf16 %v1213_v1, %v1212_v53 }
 0x10e   : > { %v1341_v11 = vld [vmem:[#allocation2 + $0xb] sm:$0xff]  ;;  %v1201_v4 = vpack.c.bf16 %v3825_v2, %v1196_v55  ;;  %v1042_v8 = vpop.f32.mrf.mxu3 }
 0x10f   : > { %v1345_v59 = vpack.c.bf16 %v1341_v11, %v1340_v56  ;;  %v3831_v7 = vld [vmem:[#allocation2 + $0xf] sm:$0xff]  ;;  %v1154_v52 = vadd.f32 %v1149_v3, %v1144_v39  ;;  %v1050_v10 = vadd.f32 %v1042_v8, %v973_v60  ;;  %2897 = vmatmul.msk.bf16.vlgmr.msra.gmra.mxu1 %vm440_vm0, %v1217_v63  ;;  %v3296_v3 = vld [vmem:[%s4228_s6 + $0x118] sm:$0xff] }
 0x110   : > { %v1422_v9 = vpack.c.bf16 %v3831_v7, %v1417_v5  ;;  %2916 = vmatmul.msk.bf16.vlgmr.msra.gmra.mxu2 %vm440_vm0, %v1201_v4  ;;  %1855 = vmatpush.bf16.msra.mxu1 %v3296_v3  ;;  %v3295_v35 = vld [vmem:[%s4228_s6 + $0x110] sm:$0xff] }
 0x111   : > { %2935 = vmatmul.msk.bf16.vlgmr.msrb.gmra.mxu3 %vm440_vm0, %v1345_v59  ;;  %v1159_v12 = vmax.f32 %v1154_v52, 0.0  ;;  %v1127_v18 = vadd.f32 %v3780_v20, %v1050_v10  ;;  %v3294_v59 = vld [vmem:[%s4228_s6 + $0x108] sm:$0xff]  ;;  %v1495_v5 = vld [vmem:[#allocation2 + $0x10] sm:$0xff] }
 0x112   : > { %2954 = vmatmul.msk.bf16.vlgmr.msrb.gmra.mxu0 %vm440_vm0, %v1422_v9  ;;  %v1494_v52 = vld [vmem:[#allocation2 + $0x8] sm:$0xff] }
 0x113   : > { %v3863_v20 = vmul.f32 %v3857_v29, %v1159_v12  ;;  %v1136_v31 = vmul.f32 %v3751_v54, %v1127_v18  ;;  %v3290_v54 = vld [vmem:[%s4228_s6 + $0xe8] sm:$0xff]  ;;  %v1499_v10 = vpack.c.bf16 %v1495_v5, %v1494_v52  ;;  %v3293_v18 = vld [vmem:[%s4228_s6 + $0x100] sm:$0xff] }
 0x114   : > { %v3870_v61 = vld [vmem:[#allocation2 + $0x17] sm:$0xff]  ;;  %1780 = vmatpush.bf16.msra.mxu0 %v3290_v54  ;;  %1856 = vmatpush.bf16.msra.mxu1 %v3295_v35  ;;  %v1648_v14 = vld [vmem:[#allocation2 + $0xd] sm:$0xff] }
 0x115   : > { %1194 = vst.msk [vmem:[#allocation2 + $0x20] sm:$0xff] %vm440_vm0, %v3863_v20  ;;  %v1145_v58 = vadd.f32 %v3757_v62, %v1136_v31  ;;  %v1807_v62 = vpack.c.bf16 %v3870_v61, %v3831_v7  ;;  %v1214_v42 = vld [vmem:[#allocation2 + $0x12] sm:$0xff] }
 0x116   : > { %v1044_v28 = vpop.f32.mrf.mxu3  ;;  %v1198_v43 = vld [vmem:[#allocation2 + $0x11] sm:$0xff] }
 0x117   : > { %v1155_v17 = vadd.f32 %v1150_v50, %v1145_v58  ;;  %v1342_v6 = vld [vmem:[#allocation2 + $0x13] sm:$0xff]  ;;  %v1576_v13 = vpack.c.bf16 %v1198_v43, %v3825_v2 }
 0x118   : > { %1781 = vmatpush.bf16.msra.mxu0 %v3289_v37  ;;  %1857 = vmatpush.bf16.msra.mxu1 %v3294_v59  ;;  %v1649_v8 = vld [vmem:[#allocation2 + $0x15] sm:$0xff] }
 0x119   : > { %v1160_v32 = vmax.f32 %v1155_v17, 0.0  ;;  %v1726_v9 = vld [vmem:[#allocation2 + $0x16] sm:$0xff]  ;;  %v1725_v16 = vld [vmem:[#allocation2 + $0xe] sm:$0xff]  ;;  %v1653_v57 = vpack.c.bf16 %v1649_v8, %v1648_v14 }
 0x11a   : > { %v1730_v12 = vpack.c.bf16 %v1726_v9, %v1725_v16  ;;  %v1496_v30 = vld [vmem:[#allocation2 + $0x18] sm:$0xff] }
 0x11b   : > { %v3895_v40 = vmul.f32 %v3883_v23, %v1160_v32 }
 0x11c   : > { %v1215_v41 = vld [vmem:[#allocation2 + $0x1a] sm:$0xff]  ;;  %1858 = vmatpush.bf16.msra.mxu1 %v3293_v18 }
 0x11d   : > { %v1199_v44 = vld [vmem:[#allocation2 + $0x19] sm:$0xff]  ;;  %1195 = vst.msk [vmem:[#allocation2 + $0x28] sm:$0xff] %vm440_vm0, %v3895_v40  ;;  %v1218_v45 = vpack.c.bf16 %v1215_v41, %v1214_v42 }
 0x11e   : > { %v1343_v27 = vld [vmem:[#allocation2 + $0x1b] sm:$0xff]  ;;  %v1202_v46 = vpack.c.bf16 %v1199_v44, %v1198_v43 }
 0x11f   : > { %v1346_v48 = vpack.c.bf16 %v1343_v27, %v1342_v6  ;;  %v3899_v49 = vld [vmem:[#allocation2 + $0x1f] sm:$0xff]  ;;  %2898 = vmatmul.msk.bf16.gmra.mxu1 %vm440_vm0, %v1218_v45 }
 0x120   : > { %v1423_v51 = vpack.c.bf16 %v3899_v49, %v3870_v61  ;;  %2917 = vmatmul.msk.bf16.gmra.mxu2 %vm440_vm0, %v1202_v46  ;;  %v1497_v24 = vld [vmem:[#allocation2 + $0x20] sm:$0xff] }
 0x121   : > { %2936 = vmatmul.msk.bf16.gmra.mxu3 %vm440_vm0, %v1346_v48  ;;  %v1500_v31 = vpack.c.bf16 %v1497_v24, %v1496_v30  ;;  %v1650_v58 = vld [vmem:[#allocation2 + $0x1d] sm:$0xff] }
 0x122   : > { %2955 = vmatmul.msk.bf16.gmra.mxu0 %vm440_vm0, %v1423_v51  ;;  %v1727_v0 = vld [vmem:[#allocation2 + $0x1e] sm:$0xff] }
 0x123   : > { %v3304_v30 = vld [vmem:[%s4231_s9 + $0x38] sm:$0xff] }
 0x124   : > { %v1421_v53 = vld [vmem:[#allocation2 + $0x27] sm:$0xff]  ;;  %v1806_v6 = vld [vmem:[#allocation2 + $0x2f] sm:$0xff]  ;;  %1981 = vmatpush.bf16.msra.mxu2 %v3304_v30 }
 0x125   : > { %v1808_v55 = vpack.c.bf16 %v1421_v53, %v3899_v49  ;;  %v1216_v56 = vld [vmem:[#allocation2 + $0x22] sm:$0xff]  ;;  %v1424_v4 = vpack.c.bf16 %v1421_v53, %v1421_v53  ;;  %v1652_v32 = vld [vmem:[#allocation2 + $0x2d] sm:$0xff]  ;;  %v1809_v27 = vpack.c.bf16 %v1806_v6, %v1806_v6 }
 0x126   : > { %v1200_v60 = vld [vmem:[#allocation2 + $0x21] sm:$0xff]  ;;  %v1219_v11 = vpack.c.bf16 %v1216_v56, %v1216_v56  ;;  %v1575_v17 = vld [vmem:[#allocation2 + $0x29] sm:$0xff]  ;;  %v1655_v42 = vpack.c.bf16 %v1652_v32, %v1652_v32 }
 0x127   : > { %v1344_v1 = vld [vmem:[#allocation2 + $0x23] sm:$0xff]  ;;  %v1203_v39 = vpack.c.bf16 %v1200_v60, %v1200_v60  ;;  %v1577_v50 = vpack.c.bf16 %v1200_v60, %v1199_v44  ;;  %v1729_v33 = vld [vmem:[#allocation2 + $0x2e] sm:$0xff]  ;;  %v1578_v37 = vpack.c.bf16 %v1575_v17, %v1575_v17 }
 0x128   : > { %v1347_v63 = vpack.c.bf16 %v1344_v1, %v1344_v1  ;;  %v1651_v25 = vld [vmem:[#allocation2 + $0x25] sm:$0xff]  ;;  %v1732_v43 = vpack.c.bf16 %v1729_v33, %v1729_v33  ;;  %v3303_v33 = vld [vmem:[%s4231_s9 + $0x30] sm:$0xff] }
 0x129   : > { %v1728_v2 = vld [vmem:[#allocation2 + $0x26] sm:$0xff]  ;;  %v1654_v19 = vpack.c.bf16 %v1651_v25, %v1650_v58  ;;  %1982 = vmatpush.bf16.msra.mxu2 %v3303_v33 }
 0x12a   : > { %v1731_v28 = vpack.c.bf16 %v1728_v2, %v1727_v0  ;;  %v1498_v54 = vld [vmem:[#allocation2 + $0x28] sm:$0xff] }
 0x12b   : > { %v1501_v36 = vpack.c.bf16 %v1498_v54, %v1498_v54 }
 0x12f   : > { %2899 = vmatmul.msk.bf16.gmra.mxu1 %vm440_vm0, %v1219_v11 }
 0x130   : > { %2918 = vmatmul.msk.bf16.gmra.mxu2 %vm440_vm0, %v1203_v39 }
 0x131   : > { %2937 = vmatmul.msk.bf16.gmra.mxu3 %vm440_vm0, %v1347_v63 }
 0x132   : > { %2956 = vmatmul.msk.bf16.gmra.mxu0 %vm440_vm0, %v1424_v4 }
 0x13f   : > { %2973 = vmatmul.msk.bf16.vlgmr.msrb.gmra.mxu1 %vm440_vm0, %v1499_v10 }
 0x140   : > { %2992 = vmatmul.msk.bf16.vlgmr.msrb.gmra.mxu2 %vm440_vm0, %v1576_v13 }
 0x141   : > { %3011 = vmatmul.msk.bf16.vlgmr.msra.gmra.mxu3 %vm440_vm0, %v1653_v57 }
 0x142   : > { %3030 = vmatmul.msk.bf16.vlgmr.msra.gmra.mxu0 %vm440_vm0, %v1730_v12 }
 0x14f   : > { %2974 = vmatmul.msk.bf16.gmra.mxu1 %vm440_vm0, %v1500_v31 }
 0x150   : > { %2993 = vmatmul.msk.bf16.gmra.mxu2 %vm440_vm0, %v1577_v50 }
 0x151   : > { %3012 = vmatmul.msk.bf16.gmra.mxu3 %vm440_vm0, %v1654_v19 }
 0x152   : > { %3031 = vmatmul.msk.bf16.gmra.mxu0 %vm440_vm0, %v1731_v28 }
 0x15f   : > { %2975 = vmatmul.msk.bf16.gmra.mxu1 %vm440_vm0, %v1501_v36 }
 0x160   : > { %2994 = vmatmul.msk.bf16.gmra.mxu2 %vm440_vm0, %v1578_v37 }
 0x161   : > { %3013 = vmatmul.msk.bf16.gmra.mxu3 %vm440_vm0, %v1655_v42 }
 0x162   : > { %3032 = vmatmul.msk.bf16.gmra.mxu0 %vm440_vm0, %v1732_v43 }
 0x16f   : > { %3049 = vmatmul.msk.bf16.vlgmr.msra.gmra.mxu1 %vm440_vm0, %v1807_v62 }
 0x17f   : > { %3050 = vmatmul.msk.bf16.gmra.mxu1 %vm440_vm0, %v1808_v55 }
 0x18c   : > { %v1270_v41 = vpop.f32.mrf.mxu1 }
 0x18f   : > { %v1475_v44 = vpop.f32.mrf.mxu0  ;;  %3051 = vmatmul.msk.bf16.gmra.mxu1 %vm440_vm0, %v1809_v27 }
 0x193   : > { %v1326_v45 = vpop.f32.mrf.mxu2 }
 0x194   : > { %v1327_v46 = vadd.f32 %v1326_v45, %v1270_v41  ;;  %v1398_v48 = vpop.f32.mrf.mxu3  ;;  %v1272_v49 = vpop.f32.mrf.mxu1  ;;  %v3302_v45 = vld [vmem:[%s4231_s9 + $0x28] sm:$0xff] }
 0x195   : > { %1983 = vmatpush.bf16.msra.mxu2 %v3302_v45 }
 0x196   : > { %v1412_v51 = vadd.f32 %v1398_v48, %v1327_v46 }
 0x197   : > { %v1477_v3 = vpop.f32.mrf.mxu0 }
 0x198   : > { %v3943_v35 = vadd.f32 %v1475_v44, %v1412_v51  ;;  %v3308_v51 = vld [vmem:[%s4231_s9 + $0x58] sm:$0xff] }
 0x199   : > { %2109 = vmatpush.bf16.msrb.mxu0 %v3308_v51 }
 0x19b   : > { %v1328_v53 = vpop.f32.mrf.mxu2 }
 0x19c   : > { %v1329_v7 = vadd.f32 %v1328_v53, %v1272_v49  ;;  %v1400_v61 = vpop.f32.mrf.mxu3  ;;  %v1275_v62 = vpop.f32.mrf.mxu1  ;;  %v3300_v49 = vld [vmem:[%s4231_s9 + $0x18] sm:$0xff] }
 0x19d   : > { %2037 = vmatpush.bf16.msrb.mxu3 %v3300_v49 }
 0x19e   : > { %v1413_v56 = vadd.f32 %v1400_v61, %v1329_v7  ;;  %v3299_v61 = vld [vmem:[%s4231_s9 + $0x10] sm:$0xff] }
 0x19f   : > { %v1480_v55 = vpop.f32.mrf.mxu0 }
 0x1a0   : > { %v3945_v60 = vadd.f32 %v1477_v3, %v1413_v56  ;;  %v3312_v3 = vld [vmem:[%s4231_s9 + $0x78] sm:$0xff]  ;;  %v3311_v56 = vld [vmem:[%s4231_s9 + $0x70] sm:$0xff] }
 0x1a1   : > { %2186 = vmatpush.bf16.msrb.mxu1 %v3312_v3  ;;  %2038 = vmatpush.bf16.msrb.mxu3 %v3299_v61 }
 0x1a3   : > { %v1331_v1 = vpop.f32.mrf.mxu2 }
 0x1a4   : > { %v1332_v11 = vadd.f32 %v1331_v1, %v1275_v62  ;;  %v1403_v39 = vpop.f32.mrf.mxu3  ;;  %v1277_v63 = vpop.f32.mrf.mxu1  ;;  %v3307_v62 = vld [vmem:[%s4231_s9 + $0x50] sm:$0xff] }
 0x1a5   : > { %2110 = vmatpush.bf16.msrb.mxu0 %v3307_v62  ;;  %2187 = vmatpush.bf16.msrb.mxu1 %v3311_v56 }
 0x1a6   : > { %v1414_v4 = vadd.f32 %v1403_v39, %v1332_v11 }
 0x1a7   : > { %v1482_v59 = vpop.f32.mrf.mxu0 }
 0x1a8   : > { %v3947_v5 = vadd.f32 %v1480_v55, %v1414_v4  ;;  %v3306_v4 = vld [vmem:[%s4231_s9 + $0x48] sm:$0xff] }
 0x1a9   : > { %2111 = vmatpush.bf16.msrb.mxu0 %v3306_v4 }
 0x1ab   : > { %v1333_v8 = vpop.f32.mrf.mxu2 }
 0x1ac   : > { %v1334_v9 = vadd.f32 %v1333_v8, %v1277_v63  ;;  %v1405_v52 = vpop.f32.mrf.mxu3  ;;  %v1280_v10 = vpop.f32.mrf.mxu1  ;;  %v3298_v63 = vld [vmem:[%s4231_s9 + $0x8] sm:$0xff] }
 0x1ad   : > { %2039 = vmatpush.bf16.msrb.mxu3 %v3298_v63 }
 0x1ae   : > { %v1415_v13 = vadd.f32 %v1405_v52, %v1334_v9  ;;  %v3301_v52 = vld [vmem:[%s4231_s9 + $0x20] sm:$0xff] }
 0x1af   : > { %v1485_v14 = vpop.f32.mrf.mxu0  ;;  %1984 = vmatpush.bf16.msra.mxu2 %v3301_v52 }
 0x1b0   : > { %v3949_v16 = vadd.f32 %v1482_v59, %v1415_v13  ;;  %v3310_v59 = vld [vmem:[%s4231_s9 + $0x68] sm:$0xff]  ;;  %v3305_v13 = vld [vmem:[%s4231_s9 + $0x40] sm:$0xff] }
 0x1b1   : > { %2188 = vmatpush.bf16.msrb.mxu1 %v3310_v59  ;;  %2112 = vmatpush.bf16.msrb.mxu0 %v3305_v13 }
 0x1b3   : > { %v1336_v57 = vpop.f32.mrf.mxu2 }
 0x1b4   : > { %v1337_v12 = vadd.f32 %v1336_v57, %v1280_v10  ;;  %v1408_v18 = vpop.f32.mrf.mxu3  ;;  %v1282_v24 = vpop.f32.mrf.mxu1  ;;  %v3297_v10 = vld [vmem:[%s4231_s9] sm:$0xff] }
 0x1b5   : > { %2040 = vmatpush.bf16.msrb.mxu3 %v3297_v10 }
 0x1b6   : > { %v1416_v25 = vadd.f32 %v1408_v18, %v1337_v12 }
 0x1b7   : > { %v1487_v2 = vpop.f32.mrf.mxu0 }
 0x1b8   : > { %v3954_v31 = vadd.f32 %v1485_v14, %v1416_v25  ;;  %v3309_v14 = vld [vmem:[%s4231_s9 + $0x60] sm:$0xff] }
 0x1b9   : > { %2189 = vmatpush.bf16.msrb.mxu1 %v3309_v14  ;;  %v4026_v2 = vld [vmem:[%s4229_s7] ss:$0 sm:$0xff] }
 0x1bb   : > { %v1338_v50 = vpop.f32.mrf.mxu2 }
 0x1bc   : > { %v1410_v58 = vpop.f32.mrf.mxu3  ;;  %v1552_v0 = vpop.f32.mrf.mxu1 }
 0x1bd   : > { %v1566_v55 = vadd.f32 %v1552_v0, %v3943_v35  ;;  %v4031_v58 = vld [vmem:[%s4230_s8] ss:$0 sm:$0xff] }
 0x1bf   : > { %v1783_v19 = vpop.f32.mrf.mxu0 }
 0x1c3   : > { %v1629_v28 = vpop.f32.mrf.mxu2 }
 0x1c4   : > { %v1706_v54 = vpop.f32.mrf.mxu3  ;;  %v1554_v17 = vpop.f32.mrf.mxu1  ;;  %v1643_v11 = vadd.f32 %v1629_v28, %v1566_v55  ;;  %v3316_v28 = vld [vmem:[%s4231_s9 + $0x98] sm:$0xff] }
 0x1c5   : > { %v1567_v57 = vadd.f32 %v1554_v17, %v3945_v60  ;;  %2263 = vmatpush.bf16.msrb.mxu2 %v3316_v28 }
 0x1c6   : > { %v1720_v9 = vadd.f32 %v1706_v54, %v1643_v11 }
 0x1c7   : > { %v3956_v32 = vpop.f32.mrf.mxu0 }
 0x1c8   : > { %v1797_v25 = vadd.f32 %v1783_v19, %v1720_v9 }
 0x1cb   : > { %v1631_v36 = vpop.f32.mrf.mxu2 }
 0x1cc   : > { %v1708_v37 = vpop.f32.mrf.mxu3  ;;  %v1557_v42 = vpop.f32.mrf.mxu1  ;;  %v1644_v18 = vadd.f32 %v1631_v36, %v1567_v57 }
 0x1cd   : > { %v1568_v19 = vadd.f32 %v1557_v42, %v3947_v5  ;;  %v3315_v5 = vld [vmem:[%s4231_s9 + $0x90] sm:$0xff] }
 0x1ce   : > { %v1721_v60 = vadd.f32 %v1708_v37, %v1644_v18  ;;  %2264 = vmatpush.bf16.msrb.mxu2 %v3315_v5 }
 0x1cf   : > { %v3961_v43 = vpop.f32.mrf.mxu0 }
 0x1d0   : > { %v1798_v36 = vadd.f32 %v3956_v32, %v1721_v60  ;;  %v3314_v32 = vld [vmem:[%s4231_s9 + $0x88] sm:$0xff]  ;;  %v3328_v60 = vld [vmem:[%s4231_s9 + $0xf8] sm:$0xff] }
 0x1d1   : > { %2494 = vmatpush.bf16.msra.mxu1 %v3328_v60 }
 0x1d2   : > { %2265 = vmatpush.bf16.msrb.mxu2 %v3314_v32 }
 0x1d3   : > { %v1634_v6 = vpop.f32.mrf.mxu2 }
 0x1d4   : > { %v3963_v41 = vpop.f32.mrf.mxu3  ;;  %v3965_v44 = vpop.f32.mrf.mxu1  ;;  %v1645_v17 = vadd.f32 %v1634_v6, %v1568_v19  ;;  %v3313_v19 = vld [vmem:[%s4231_s9 + $0x80] sm:$0xff] }
 0x1d5   : > { %v1569_v42 = vadd.f32 %v3965_v44, %v3949_v16 }
 0x1d6   : > { %v1722_v37 = vadd.f32 %v3963_v41, %v1645_v17  ;;  %v3319_v17 = vld [vmem:[%s4231_s9 + $0xb0] sm:$0xff]  ;;  %2266 = vmatpush.bf16.msrb.mxu2 %v3313_v19 }
 0x1d7   : > { %v3967_v27 = vpop.f32.mrf.mxu0 }
 0x1d8   : > { %v1799_v62 = vadd.f32 %v3961_v43, %v1722_v37  ;;  %v3318_v37 = vld [vmem:[%s4231_s9 + $0xa8] sm:$0xff] }
 0x1db   : > { %v3972_v46 = vpop.f32.mrf.mxu2 }
 0x1dc   : > { %v3974_v48 = vpop.f32.mrf.mxu3  ;;  %v3985_v53 = vpop.f32.mrf.mxu1  ;;  %v1646_v41 = vadd.f32 %v3972_v46, %v1569_v42 }
 0x1dd   : > { %v1570_v44 = vadd.f32 %v3985_v53, %v3954_v31 }
 0x1de   : > { %v1723_v63 = vadd.f32 %v3974_v48, %v1646_v41  ;;  %v3317_v41 = vld [vmem:[%s4231_s9 + $0xa0] sm:$0xff] }
 0x1df   : > { %v3987_v7 = vpop.f32.mrf.mxu0 }
 0x1e0   : > { %v1800_v43 = vadd.f32 %v3967_v27, %v1723_v63 }
 0x1e3   : > { %v1639_v1 = vpop.f32.mrf.mxu2 }
 0x1e4   : > { %v3999_v39 = vpop.f32.mrf.mxu3  ;;  %v1564_v35 = vpop.f32.mrf.mxu1  ;;  %v1647_v46 = vadd.f32 %v1639_v1, %v1570_v44 }
 0x1e6   : > { %v1724_v13 = vadd.f32 %v3999_v39, %v1647_v46  ;;  %v3320_v39 = vld [vmem:[%s4231_s9 + $0xb8] sm:$0xff] }
 0x1e7   : > { %v1795_v8 = vpop.f32.mrf.mxu0  ;;  %2340 = vmatpush.bf16.msra.mxu3 %v3320_v39 }
 0x1e8   : > { %v1801_v28 = vadd.f32 %v3987_v7, %v1724_v13  ;;  %v3327_v7 = vld [vmem:[%s4231_s9 + $0xf0] sm:$0xff] }
 0x1e9   : > { %2495 = vmatpush.bf16.msra.mxu1 %v3327_v7 }
 0x1eb   : > { %v1641_v12 = vpop.f32.mrf.mxu2  ;;  %2341 = vmatpush.bf16.msra.mxu3 %v3319_v17  ;;  %v3329_v17 = vld [vmem:[%s4231_s9 + $0x100] sm:$0xff] }
 0x1ec   : > { %v1718_v24 = vpop.f32.mrf.mxu3  ;;  %v1860_v30 = vpop.f32.mrf.mxu1 }
 0x1ed   : > { %v1874_v50 = vadd.f32 %v1860_v30, %v1797_v25 }
 0x1ef   : > { %v1883_v0 = vmul.f32 %v4026_v2, %v1874_v50  ;;  %v3324_v50 = vld [vmem:[%s4231_s9 + $0xd8] sm:$0xff]  ;;  %2342 = vmatpush.bf16.msra.mxu3 %v3318_v37 }
 0x1f0   : > { %2417 = vmatpush.bf16.msra.mxu0 %v3324_v50 }
 0x1f1   : > { %v1892_v54 = vadd.f32 %v4031_v58, %v1883_v0 }
 0x1f3   : > { %v1897_v33 = vmax.f32 %v1892_v54, 0.0  ;;  %2343 = vmatpush.bf16.msra.mxu3 %v3317_v41 }
 0x1f4   : > { %v1862_v45 = vpop.f32.mrf.mxu1 }
 0x1f5   : > { %v1902_v49 = vmul.f32 %v1897_v33, %v3775_v15  ;;  %v1875_v51 = vadd.f32 %v1862_v45, %v1798_v36  ;;  %v3323_v33 = vld [vmem:[%s4231_s9 + $0xd0] sm:$0xff] }
 0x1f6   : > { %2418 = vmatpush.bf16.msra.mxu0 %v3323_v33 }
 0x1f7   : > { %1907 = vst.msk [vmem:[#allocation3 + $0x8] sm:$0xff] %vm440_vm0, %v1902_v49  ;;  %v1884_v3 = vmul.f32 %v4026_v2, %v1875_v51 }
 0x1f9   : > { %v1893_v6 = vadd.f32 %v4031_v58, %v1884_v3  ;;  %v3322_v3 = vld [vmem:[%s4231_s9 + $0xc8] sm:$0xff] }
 0x1fa   : > { %2419 = vmatpush.bf16.msra.mxu0 %v3322_v3 }
 0x1fb   : > { %v1898_v61 = vmax.f32 %v1893_v6, 0.0 }
 0x1fc   : > { %v1865_v56 = vpop.f32.mrf.mxu1 }
 0x1fd   : > { %v1903_v55 = vmul.f32 %v1898_v61, %v3801_v34  ;;  %v1876_v11 = vadd.f32 %v1865_v56, %v1799_v62  ;;  %v3321_v61 = vld [vmem:[%s4231_s9 + $0xc0] sm:$0xff] }
 0x1fe   : > { %v1928_v52 = vld [vmem:[#allocation3 + $0x2] sm:$0xff]  ;;  %2420 = vmatpush.bf16.msra.mxu0 %v3321_v61 }
 0x1ff   : > { %1908 = vst.msk [vmem:[#allocation3 + $0x10] sm:$0xff] %vm440_vm0, %v1903_v55  ;;  %v1885_v16 = vmul.f32 %v4026_v2, %v1876_v11  ;;  %v1912_v10 = vld [vmem:[#allocation3 + $0x1] sm:$0xff] }
 0x200   : > { %v2056_v48 = vld [vmem:[#allocation3 + $0x3] sm:$0xff] }
 0x201   : > { %v1894_v4 = vadd.f32 %v4031_v58, %v1885_v16  ;;  %v2133_v18 = vld [vmem:[#allocation3 + $0x7] sm:$0xff] }
 0x202   : > { %v2210_v39 = vld [vmem:[#allocation3 + $0x8] sm:$0xff] }
 0x203   : > { %v1899_v59 = vmax.f32 %v1894_v4, 0.0 }
 0x204   : > { %v1867_v35 = vpop.f32.mrf.mxu1 }
 0x205   : > { %v1904_v8 = vmul.f32 %v1899_v59, %v3816_v47  ;;  %v1877_v9 = vadd.f32 %v1867_v35, %v1800_v43  ;;  %v3325_v43 = vld [vmem:[%s4231_s9 + $0xe0] sm:$0xff] }
 0x206   : > { %v1929_v14 = vld [vmem:[#allocation3 + $0xa] sm:$0xff] }
 0x207   : > { %v4065_v57 = vld [vmem:[#allocation3 + $0x9] sm:$0xff]  ;;  %1909 = vst.msk [vmem:[#allocation3 + $0x18] sm:$0xff] %vm440_vm0, %v1904_v8  ;;  %v1886_v31 = vmul.f32 %v4026_v2, %v1877_v9  ;;  %v1933_v53 = vpack.c.bf16 %v1929_v14, %v1928_v52  ;;  %v3332_v8 = vld [vmem:[%s4231_s9 + $0x118] sm:$0xff]  ;;  %v3331_v9 = vld [vmem:[%s4231_s9 + $0x110] sm:$0xff] }
 0x208   : > { %v2057_v12 = vld [vmem:[#allocation3 + $0xb] sm:$0xff]  ;;  %v1917_v27 = vpack.c.bf16 %v4065_v57, %v1912_v10 }
 0x209   : > { %v2061_v1 = vpack.c.bf16 %v2057_v12, %v2056_v48  ;;  %v4070_v24 = vld [vmem:[#allocation3 + $0xf] sm:$0xff]  ;;  %v1895_v30 = vadd.f32 %v4031_v58, %v1886_v31  ;;  %3068 = vmatmul.msk.bf16.vlgmr.msra.gmra.mxu2 %vm440_vm0, %v1933_v53 }
 0x20a   : > { %v2138_v25 = vpack.c.bf16 %v4070_v24, %v2133_v18  ;;  %3087 = vmatmul.msk.bf16.vlgmr.msrb.gmra.mxu3 %vm440_vm0, %v1917_v27  ;;  %2571 = vmatpush.bf16.msra.mxu2 %v3332_v8  ;;  %v2211_v18 = vld [vmem:[#allocation3 + $0x10] sm:$0xff] }
 0x20b   : > { %3106 = vmatmul.msk.bf16.vlgmr.msrb.gmra.mxu0 %vm440_vm0, %v2061_v1  ;;  %v1900_v0 = vmax.f32 %v1895_v30, 0.0  ;;  %v3330_v1 = vld [vmem:[%s4231_s9 + $0x108] sm:$0xff]  ;;  %v2215_v50 = vpack.c.bf16 %v2211_v18, %v2210_v39 }
 0x20c   : > { %3125 = vmatmul.msk.bf16.vlgmr.msrb.gmra.mxu1 %vm440_vm0, %v2138_v25  ;;  %v1870_v54 = vpop.f32.mrf.mxu1 }
 0x20d   : > { %v1905_v36 = vmul.f32 %v1900_v0, %v3857_v29  ;;  %v1878_v45 = vadd.f32 %v1870_v54, %v1801_v28  ;;  %v2364_v0 = vld [vmem:[#allocation3 + $0xd] sm:$0xff] }
 0x20e   : > { %v4103_v51 = vld [vmem:[#allocation3 + $0x17] sm:$0xff]  ;;  %2572 = vmatpush.bf16.msra.mxu2 %v3331_v9  ;;  %v2441_v28 = vld [vmem:[#allocation3 + $0xe] sm:$0xff] }
 0x20f   : > { %1910 = vst.msk [vmem:[#allocation3 + $0x20] sm:$0xff] %vm440_vm0, %v1905_v36  ;;  %v1887_v49 = vmul.f32 %v4026_v2, %v1878_v45  ;;  %v2523_v5 = vpack.c.bf16 %v4103_v51, %v4070_v24  ;;  %v3326_v2 = vld [vmem:[%s4231_s9 + $0xe8] sm:$0xff]  ;;  %v2212_v45 = vld [vmem:[#allocation3 + $0x18] sm:$0xff] }
 0x210   : > { %v1914_v56 = vld [vmem:[#allocation3 + $0x11] sm:$0xff]  ;;  %2496 = vmatpush.bf16.msra.mxu1 %v3326_v2 }
 0x211   : > { %v1896_v42 = vadd.f32 %v4031_v58, %v1887_v49  ;;  %v1930_v58 = vld [vmem:[#allocation3 + $0x12] sm:$0xff]  ;;  %v2292_v60 = vpack.c.bf16 %v1914_v56, %v4065_v57 }
 0x212   : > { %v2058_v55 = vld [vmem:[#allocation3 + $0x13] sm:$0xff]  ;;  %2573 = vmatpush.bf16.msra.mxu2 %v3330_v1 }
 0x213   : > { %v1901_v6 = vmax.f32 %v1896_v42, 0.0  ;;  %v2365_v25 = vld [vmem:[#allocation3 + $0x15] sm:$0xff] }
 0x214   : > { %v1872_v32 = vpop.f32.mrf.mxu1  ;;  %2497 = vmatpush.bf16.msra.mxu1 %v3325_v43  ;;  %v2442_v30 = vld [vmem:[#allocation3 + $0x16] sm:$0xff]  ;;  %v2369_v19 = vpack.c.bf16 %v2365_v25, %v2364_v0 }
 0x215   : > { %v1906_v62 = vmul.f32 %v1901_v6, %v3883_v23  ;;  %v2446_v54 = vpack.c.bf16 %v2442_v30, %v2441_v28 }
 0x216   : > { %v1931_v11 = vld [vmem:[#allocation3 + $0x1a] sm:$0xff]  ;;  %2574 = vmatpush.bf16.msra.mxu2 %v3329_v17 }
 0x217   : > { %v4124_v63 = vld [vmem:[#allocation3 + $0x19] sm:$0xff]  ;;  %1911 = vst.msk [vmem:[#allocation3 + $0x28] sm:$0xff] %vm440_vm0, %v1906_v62  ;;  %v1934_v44 = vpack.c.bf16 %v1931_v11, %v1930_v58 }
 0x218   : > { %v2059_v16 = vld [vmem:[#allocation3 + $0x1b] sm:$0xff]  ;;  %v1918_v4 = vpack.c.bf16 %v4124_v63, %v1914_v56 }
 0x219   : > { %v2062_v46 = vpack.c.bf16 %v2059_v16, %v2058_v55  ;;  %v4128_v59 = vld [vmem:[#allocation3 + $0x1f] sm:$0xff]  ;;  %3069 = vmatmul.msk.bf16.gmra.mxu2 %vm440_vm0, %v1934_v44 }
 0x21a   : > { %v2139_v35 = vpack.c.bf16 %v4128_v59, %v4103_v51  ;;  %3088 = vmatmul.msk.bf16.gmra.mxu3 %vm440_vm0, %v1918_v4  ;;  %v2213_v33 = vld [vmem:[#allocation3 + $0x20] sm:$0xff] }
 0x21b   : > { %3107 = vmatmul.msk.bf16.gmra.mxu0 %vm440_vm0, %v2062_v46  ;;  %v2216_v7 = vpack.c.bf16 %v2213_v33, %v2212_v45  ;;  %v2366_v37 = vld [vmem:[#allocation3 + $0x1d] sm:$0xff] }
 0x21c   : > { %3126 = vmatmul.msk.bf16.gmra.mxu1 %vm440_vm0, %v2139_v35  ;;  %v2443_v3 = vld [vmem:[#allocation3 + $0x1e] sm:$0xff] }
 0x21e   : > { %v4145_v52 = vld [vmem:[#allocation3 + $0x27] sm:$0xff]  ;;  %v2522_v11 = vld [vmem:[#allocation3 + $0x2f] sm:$0xff] }
 0x21f   : > { %v2524_v10 = vpack.c.bf16 %v4145_v52, %v4128_v59  ;;  %v1932_v48 = vld [vmem:[#allocation3 + $0x22] sm:$0xff]  ;;  %v2140_v27 = vpack.c.bf16 %v4145_v52, %v4145_v52  ;;  %v2368_v41 = vld [vmem:[#allocation3 + $0x2d] sm:$0xff]  ;;  %v2525_v44 = vpack.c.bf16 %v2522_v11, %v2522_v11 }
 0x220   : > { %v1916_v13 = vld [vmem:[#allocation3 + $0x21] sm:$0xff]  ;;  %v1935_v12 = vpack.c.bf16 %v1932_v48, %v1932_v48  ;;  %v2291_v32 = vld [vmem:[#allocation3 + $0x29] sm:$0xff]  ;;  %v2371_v56 = vpack.c.bf16 %v2368_v41, %v2368_v41 }
 0x221   : > { %v2060_v14 = vld [vmem:[#allocation3 + $0x23] sm:$0xff]  ;;  %v1919_v31 = vpack.c.bf16 %v1916_v13, %v1916_v13  ;;  %v2293_v49 = vpack.c.bf16 %v1916_v13, %v4124_v63  ;;  %v2445_v61 = vld [vmem:[#allocation3 + $0x2e] sm:$0xff]  ;;  %v2294_v58 = vpack.c.bf16 %v2291_v32, %v2291_v32 }
 0x222   : > { %v2063_v53 = vpack.c.bf16 %v2060_v14, %v2060_v14  ;;  %v2367_v36 = vld [vmem:[#allocation3 + $0x25] sm:$0xff]  ;;  %v2448_v55 = vpack.c.bf16 %v2445_v61, %v2445_v61 }
 0x223   : > { %v2444_v57 = vld [vmem:[#allocation3 + $0x26] sm:$0xff]  ;;  %v2370_v42 = vpack.c.bf16 %v2367_v36, %v2366_v37 }
 0x224   : > { %v2447_v2 = vpack.c.bf16 %v2444_v57, %v2443_v3  ;;  %v2214_v6 = vld [vmem:[#allocation3 + $0x28] sm:$0xff] }
 0x225   : > { %v2217_v62 = vpack.c.bf16 %v2214_v6, %v2214_v6 }
 0x229   : > { %3070 = vmatmul.msk.bf16.gmra.mxu2 %vm440_vm0, %v1935_v12 }
 0x22a   : > { %3089 = vmatmul.msk.bf16.gmra.mxu3 %vm440_vm0, %v1919_v31 }
 0x22b   : > { %3108 = vmatmul.msk.bf16.gmra.mxu0 %vm440_vm0, %v2063_v53 }
 0x22c   : > { %3127 = vmatmul.msk.bf16.gmra.mxu1 %vm440_vm0, %v2140_v27 }
 0x239   : > { %3144 = vmatmul.msk.bf16.vlgmr.msrb.gmra.mxu2 %vm440_vm0, %v2215_v50 }
 0x23a   : > { %3163 = vmatmul.msk.bf16.vlgmr.msra.gmra.mxu3 %vm440_vm0, %v2292_v60 }
 0x23b   : > { %3182 = vmatmul.msk.bf16.vlgmr.msra.gmra.mxu0 %vm440_vm0, %v2369_v19 }
 0x23c   : > { %3201 = vmatmul.msk.bf16.vlgmr.msra.gmra.mxu1 %vm440_vm0, %v2446_v54 }
 0x249   : > { %3145 = vmatmul.msk.bf16.gmra.mxu2 %vm440_vm0, %v2216_v7 }
 0x24a   : > { %3164 = vmatmul.msk.bf16.gmra.mxu3 %vm440_vm0, %v2293_v49 }
 0x24b   : > { %3183 = vmatmul.msk.bf16.gmra.mxu0 %vm440_vm0, %v2370_v42 }
 0x24c   : > { %3202 = vmatmul.msk.bf16.gmra.mxu1 %vm440_vm0, %v2447_v2 }
 0x259   : > { %3146 = vmatmul.msk.bf16.gmra.mxu2 %vm440_vm0, %v2217_v62 }
 0x25a   : > { %3165 = vmatmul.msk.bf16.gmra.mxu3 %vm440_vm0, %v2294_v58 }
 0x25b   : > { %3184 = vmatmul.msk.bf16.gmra.mxu0 %vm440_vm0, %v2371_v56 }
 0x25c   : > { %3203 = vmatmul.msk.bf16.gmra.mxu1 %vm440_vm0, %v2448_v55 }
 0x269   : > { %3220 = vmatmul.msk.bf16.vlgmr.msra.gmra.mxu2 %vm440_vm0, %v2523_v5 }
 0x279   : > { %3221 = vmatmul.msk.bf16.gmra.mxu2 %vm440_vm0, %v2524_v10 }
 0x288   : > { %v2114_v63 = vpop.f32.mrf.mxu0 }
 0x289   : > { %v2191_v16 = vpop.f32.mrf.mxu1  ;;  %3222 = vmatmul.msk.bf16.gmra.mxu2 %vm440_vm0, %v2525_v44 }
 0x28c   : > { %v1986_v4 = vpop.f32.mrf.mxu2 }
 0x28d   : > { %v2042_v46 = vpop.f32.mrf.mxu3 }
 0x28e   : > { %v2043_v59 = vadd.f32 %v2042_v46, %v1986_v4 }
 0x290   : > { %v2128_v43 = vadd.f32 %v2114_v63, %v2043_v59  ;;  %v2116_v35 = vpop.f32.mrf.mxu0 }
 0x291   : > { %v2193_v8 = vpop.f32.mrf.mxu1 }
 0x292   : > { %v2205_v22 = vadd.f32 %v2191_v16, %v2128_v43 }
 0x294   : > { %v1988_v9 = vpop.f32.mrf.mxu2 }
 0x295   : > { %v2044_v52 = vpop.f32.mrf.mxu3 }
 0x296   : > { %v2045_v24 = vadd.f32 %v2044_v52, %v1988_v9 }
 0x298   : > { %v2129_v51 = vadd.f32 %v2116_v35, %v2045_v24  ;;  %v2119_v5 = vpop.f32.mrf.mxu0 }
 0x299   : > { %v2196_v48 = vpop.f32.mrf.mxu1 }
 0x29a   : > { %v2206_v10 = vadd.f32 %v2193_v8, %v2129_v51 }
 0x29c   : > { %v1991_v13 = vpop.f32.mrf.mxu2 }
 0x29d   : > { %v2047_v14 = vpop.f32.mrf.mxu3 }
 0x29e   : > { %v2048_v12 = vadd.f32 %v2047_v14, %v1991_v13  ;;  %v3355_v14 = vld [vmem:[%s4232_s10] ss:$0 sm:$0xff] }
 0x2a0   : > { %v2130_v31 = vadd.f32 %v2119_v5, %v2048_v12  ;;  %v2121_v53 = vpop.f32.mrf.mxu0 }
 0x2a1   : > { %v2198_v27 = vpop.f32.mrf.mxu1 }
 0x2a2   : > { %v2207_v1 = vadd.f32 %v2196_v48, %v2130_v31 }
 0x2a4   : > { %v1993_v18 = vpop.f32.mrf.mxu2 }
 0x2a5   : > { %v2049_v25 = vpop.f32.mrf.mxu3 }
 0x2a6   : > { %v2050_v30 = vadd.f32 %v2049_v25, %v1993_v18 }
 0x2a8   : > { %v2131_v39 = vadd.f32 %v2121_v53, %v2050_v30  ;;  %v2124_v50 = vpop.f32.mrf.mxu0 }
 0x2a9   : > { %v2201_v60 = vpop.f32.mrf.mxu1 }
 0x2aa   : > { %v2208_v0 = vadd.f32 %v2198_v27, %v2131_v39 }
 0x2ac   : > { %v1996_v28 = vpop.f32.mrf.mxu2 }
 0x2ad   : > { %v2052_v19 = vpop.f32.mrf.mxu3 }
 0x2ae   : > { %v2053_v54 = vadd.f32 %v2052_v19, %v1996_v28 }
 0x2b0   : > { %v2132_v17 = vadd.f32 %v2124_v50, %v2053_v54  ;;  %v2126_v33 = vpop.f32.mrf.mxu0 }
 0x2b1   : > { %v2203_v36 = vpop.f32.mrf.mxu1 }
 0x2b2   : > { %v2209_v57 = vadd.f32 %v2201_v60, %v2132_v17 }
 0x2b4   : > { %v1998_v45 = vpop.f32.mrf.mxu2 }
 0x2b5   : > { %v2054_v7 = vpop.f32.mrf.mxu3 }
 0x2b8   : > { %v2422_v49 = vpop.f32.mrf.mxu0 }
 0x2b9   : > { %v2499_v37 = vpop.f32.mrf.mxu1 }
 0x2bc   : > { %v2268_v3 = vpop.f32.mrf.mxu2 }
 0x2bd   : > { %v2345_v42 = vpop.f32.mrf.mxu3  ;;  %v2282_v43 = vadd.f32 %v2268_v3, %v2205_v22  ;;  %v3356_v22 = vld [vmem:[%s4233_s11] ss:$0 sm:$0xff] }
 0x2bf   : > { %v2359_v9 = vadd.f32 %v2345_v42, %v2282_v43 }
 0x2c0   : > { %v2424_v2 = vpop.f32.mrf.mxu0 }
 0x2c1   : > { %v2501_v6 = vpop.f32.mrf.mxu1  ;;  %v2436_v51 = vadd.f32 %v2422_v49, %v2359_v9 }
 0x2c3   : > { %v2513_v13 = vadd.f32 %v2499_v37, %v2436_v51 }
 0x2c4   : > { %v2270_v32 = vpop.f32.mrf.mxu2 }
 0x2c5   : > { %v2347_v41 = vpop.f32.mrf.mxu3  ;;  %v2283_v5 = vadd.f32 %v2270_v32, %v2206_v10 }
 0x2c7   : > { %v2360_v48 = vadd.f32 %v2347_v41, %v2283_v5 }
 0x2c8   : > { %v2427_v61 = vpop.f32.mrf.mxu0 }
 0x2c9   : > { %v2504_v62 = vpop.f32.mrf.mxu1  ;;  %v2437_v53 = vadd.f32 %v2424_v2, %v2360_v48 }
 0x2cb   : > { %v2514_v39 = vadd.f32 %v2501_v6, %v2437_v53 }
 0x2cc   : > { %v2273_v58 = vpop.f32.mrf.mxu2 }
 0x2cd   : > { %v2350_v56 = vpop.f32.mrf.mxu3  ;;  %v2284_v27 = vadd.f32 %v2273_v58, %v2207_v1 }
 0x2cf   : > { %v2361_v30 = vadd.f32 %v2350_v56, %v2284_v27 }
 0x2d0   : > { %v2429_v55 = vpop.f32.mrf.mxu0 }
 0x2d1   : > { %v2506_v11 = vpop.f32.mrf.mxu1  ;;  %v2438_v19 = vadd.f32 %v2427_v61, %v2361_v30 }
 0x2d3   : > { %v2515_v7 = vadd.f32 %v2504_v62, %v2438_v19 }
 0x2d4   : > { %v2275_v63 = vpop.f32.mrf.mxu2 }
 0x2d5   : > { %v2352_v16 = vpop.f32.mrf.mxu3  ;;  %v2285_v54 = vadd.f32 %v2275_v63, %v2208_v0 }
 0x2d7   : > { %v2362_v45 = vadd.f32 %v2352_v16, %v2285_v54 }
 0x2d8   : > { %v2432_v44 = vpop.f32.mrf.mxu0 }
 0x2d9   : > { %v2509_v4 = vpop.f32.mrf.mxu1  ;;  %v2439_v3 = vadd.f32 %v2429_v55, %v2362_v45 }
 0x2db   : > { %v2516_v41 = vadd.f32 %v2506_v11, %v2439_v3 }
 0x2dc   : > { %v2278_v46 = vpop.f32.mrf.mxu2 }
 0x2dd   : > { %v2355_v59 = vpop.f32.mrf.mxu3  ;;  %v2286_v42 = vadd.f32 %v2278_v46, %v2209_v57 }
 0x2df   : > { %v2363_v0 = vadd.f32 %v2355_v59, %v2286_v42 }
 0x2e0   : > { %v2434_v35 = vpop.f32.mrf.mxu0 }
 0x2e1   : > { %v2511_v8 = vpop.f32.mrf.mxu1  ;;  %v2440_v58 = vadd.f32 %v2432_v44, %v2363_v0 }
 0x2e3   : > { %v2517_v55 = vadd.f32 %v2509_v4, %v2440_v58 }
 0x2e4   : > { %v2280_v52 = vpop.f32.mrf.mxu2 }
 0x2e5   : > { %v2357_v24 = vpop.f32.mrf.mxu3 }
 0x2ec   : > { %v2576_v12 = vpop.f32.mrf.mxu2 }
 0x2ed   : > { %v2590_v31 = vadd.f32 %v2576_v12, %v2513_v13 }
 0x2ef   : > { %v2599_v18 = vmul.f32 %v3355_v14, %v2590_v31 }
 0x2f1   : > { %v2608_v25 = vadd.f32 %v3356_v22, %v2599_v18 }
 0x2f3   : > { %v2613_v10 = vadd.f32 %v2608_v25, %v3785_v26 }
 0x2f4   : > { %v2578_v50 = vpop.f32.mrf.mxu2 }
 0x2f5   : > { %v2618_v60 = vmax.f32 %v2613_v10, 0.0  ;;  %v2591_v28 = vadd.f32 %v2578_v50, %v2514_v39 }
 0x2f7   : > { %v2623_v17 = vmul.f32 %v2618_v60, %v3775_v15  ;;  %v2600_v33 = vmul.f32 %v3355_v14, %v2591_v28 }
 0x2f9   : > { %2629 = vst.msk [vmem:[%s4179_s30 + $0x8] sm:$0xff] %vm440_vm0, %v2623_v17  ;;  %v2609_v36 = vadd.f32 %v3356_v22, %v2600_v33 }
 0x2fb   : > { %v2614_v1 = vadd.f32 %v2609_v36, %v3805_v38 }
 0x2fc   : > { %v2581_v49 = vpop.f32.mrf.mxu2 }
 0x2fd   : > { %v2619_v37 = vmax.f32 %v2614_v1, 0.0  ;;  %v2592_v26 = vadd.f32 %v2581_v49, %v2515_v7 }
 0x2ff   : > { %v2624_v2 = vmul.f32 %v2619_v37, %v3801_v34  ;;  %v2601_v6 = vmul.f32 %v3355_v14, %v2592_v26 }
 0x301   : > { %2630 = vst.msk [vmem:[%s4179_s30 + $0x10] sm:$0xff] %vm440_vm0, %v2624_v2  ;;  %v2610_v15 = vadd.f32 %v3356_v22, %v2601_v6 }
 0x303   : > { %v2615_v32 = vadd.f32 %v2610_v15, %v3821_v21 }
 0x304   : > { %v2583_v61 = vpop.f32.mrf.mxu2 }
 0x305   : > { %v2620_v38 = vmax.f32 %v2615_v32, 0.0  ;;  %v2593_v62 = vadd.f32 %v2583_v61, %v2516_v41 }
 0x307   : > { %v2625_v56 = vmul.f32 %v2620_v38, %v3816_v47  ;;  %v2602_v63 = vmul.f32 %v3355_v14, %v2593_v62 }
 0x309   : > { %2631 = vst.msk [vmem:[%s4179_s30 + $0x18] sm:$0xff] %vm440_vm0, %v2625_v56  ;;  %v2611_v34 = vadd.f32 %v3356_v22, %v2602_v63 }
 0x30b   : > { %v2616_v57 = vadd.f32 %v2611_v34, %v3863_v20 }
 0x30c   : > { %v2586_v16 = vpop.f32.mrf.mxu2 }
 0x30d   : > { %v2621_v46 = vmax.f32 %v2616_v57, 0.0  ;;  %v2594_v59 = vadd.f32 %v2586_v16, %v2517_v55 }
 0x30f   : > { %v2626_v21 = vmul.f32 %v2621_v46, %v3857_v29  ;;  %v2603_v11 = vmul.f32 %v3355_v14, %v2594_v59 }
 0x311   : > { %2632 = vst.msk [vmem:[%s4179_s30 + $0x20] sm:$0xff] %vm440_vm0, %v2626_v21  ;;  %v2612_v43 = vadd.f32 %v3356_v22, %v2603_v11 }
 0x313   : > { %v2617_v44 = vadd.f32 %v2612_v43, %v3895_v40 }
 0x314   : > { %v2588_v47 = vpop.f32.mrf.mxu2 }
 0x315   : > { %v2622_v35 = vmax.f32 %v2617_v44, 0.0 }
 0x317   : > { %v2627_v8 = vmul.f32 %v2622_v35, %v3883_v23 }
 0x319   : > { %2633 = vst.msk [vmem:[%s4179_s30 + $0x28] sm:$0xff] %vm440_vm0, %v2627_v8 }
 0x31a PF: > { %s22_s21 = sadd.s32 1, %s3363_s21  }
 0x31b   : > { %p19_p4 = scmp.ge.s32.totalorder %s22_s21, 4  }
 0x31d   :  { %21 = sbr.rel (!%p19_p4) target bundleno = 1 (0x1), region = 101 }

// kernel: resnet_forward.13
= control target key start
LH: loop header
LB: loop body
LE: loop exit
PB: predicated region body
PF: predicated region fallthrough
CT: control target
= control target key end

     0   :  { %s304_s0 = inlined_call_operand.vmem [shape: f32[2,16,128], index: 0, kind: input, shape index: {}]   ;;  %s305_s1 = inlined_call_operand.vmem [shape: f32[1,128], index: 1, kind: input, shape index: {}]   ;;  %s306_s2 = inlined_call_operand.vmem [shape: f32[1,128], index: 2, kind: input, shape index: {}]   ;;  %s307_s3 = inlined_call_operand.vmem [shape: f32[128,10], index: 3, kind: input, shape index: {}]   ;;  %s308_s4 = inlined_call_operand.vmem [shape: f32[1,10], index: 4, kind: input, shape index: {}]   ;;  %s309_s5 = inlined_call_operand.vmem [shape: f32[1,10], index: 5, kind: input, shape index: {}]   ;;  %s310_s6 = inlined_call_operand.vmem [shape: f32[1,10], index: 6, kind: input, shape index: {}]   ;;  %s311_s7 = inlined_call_operand.hbm [shape: f32[2,10], index: 7, kind: output, shape index: {}]  }
   0x1   :  { %v74_v0 = vld [vmem:[%s307_s3 + $0x78] sm:$0xff]  ;;  %v73_v1 = vld [vmem:[%s307_s3 + $0x70] sm:$0xff]  ;;  %v72_v2 = vld [vmem:[%s307_s3 + $0x68] sm:$0xff] }
   0x2   :  { %85 = vmatpush.msra.mxu0 %v74_v0  ;;  %v71_v3 = vld [vmem:[%s307_s3 + $0x60] sm:$0xff]  ;;  %v70_v4 = vld [vmem:[%s307_s3 + $0x58] sm:$0xff]  ;;  %v28_v6 = vld [vmem:[%s304_s0 + $0x8] sm:$0xff] }
   0x3   :  { %v27_v5 = vld [vmem:[%s304_s0] sm:$0xff]  ;;  %v29_v7 = vld [vmem:[%s304_s0 + $0x10] sm:$0xff]  ;;  %v30_v8 = vld [vmem:[%s304_s0 + $0x18] sm:$0xff] }
   0x4   :  { %86 = vmatpush.msra.mxu0 %v73_v1  ;;  %v31_v9 = vadd.f32 %v28_v6, %v27_v5  ;;  %v38_v10 = vadd.f32 %v30_v8, %v29_v7  ;;  %v69_v11 = vld [vmem:[%s307_s3 + $0x50] sm:$0xff]  ;;  %v68_v14 = vld [vmem:[%s307_s3 + $0x48] sm:$0xff] }
   0x6   :  { %87 = vmatpush.msra.mxu0 %v72_v2  ;;  %v32_v12 = vrot.slane %v31_v9, 4  ;;  %v39_v13 = vrot.slane %v38_v10, 4 }
   0x8   :  { %88 = vmatpush.msra.mxu0 %v71_v3  ;;  %v33_v15 = vadd.f32 %v32_v12, %v31_v9 }
   0xa   :  { %89 = vmatpush.msra.mxu0 %v70_v4 }
   0xb   :  { %12 = vsyncpa [#allocation3], 0  ;;  %v40_v16 = vadd.f32 %v39_v13, %v38_v10  ;;  %v67_v17 = vld [vmem:[%s307_s3 + $0x40] sm:$0xff]  ;;  %v34_v18 = vrot.slane %v33_v15, 2  ;;  %v66_v20 = vld [vmem:[%s307_s3 + $0x38] sm:$0xff]  ;;  %vm82_vm0 = vcmask 1041409  }
   0xc   :  { %90 = vmatpush.msra.mxu0 %v69_v11  ;;  %v65_v23 = vld [vmem:[%s307_s3 + $0x30] sm:$0xff]  ;;  %v64_v26 = vld [vmem:[%s307_s3 + $0x28] sm:$0xff]  ;;  %v147_v29 = vld [vmem:[%s305_s1] ss:$0 sm:$0xff]  ;;  %vm115_vm1 = vcmask 74752   ;;  %s137_s24 = sshll.u32 %s311_s7, 4  ;;  %s138_s24 = int_to_ptr.hbm [resolvable:$true] %s137_s24 }
   0xd   :  { %v41_v19 = vrot.slane %v40_v16, 2  ;;  %v35_v21 = vadd.f32 %v34_v18, %v33_v15  ;;  %v63_v30 = vld [vmem:[%s307_s3 + $0x20] sm:$0xff]  ;;  %v62_v34 = vld [vmem:[%s307_s3 + $0x18] sm:$0xff]  ;;  %v61_v37 = vld [vmem:[%s307_s3 + $0x10] sm:$0xff] }
   0xe   :  { %91 = vmatpush.msra.mxu0 %v68_v14  ;;  %v148_v33 = vld [vmem:[%s306_s2] ss:$0 sm:$0xff]  ;;  %v60_v40 = vld [vmem:[%s307_s3 + $0x8] sm:$0xff] }
   0xf   :  { %v42_v22 = vadd.f32 %v41_v19, %v40_v16  ;;  %v36_v24 = vrot.slane %v35_v21, 1  ;;  %v59_v42 = vld [vmem:[%s307_s3] sm:$0xff]  ;;  %s182_s3 = smov [#allocation2]  }
  0x10   :  { %92 = vmatpush.msra.mxu0 %v67_v17  ;;  %v149_v44 = vld [vmem:[%s308_s4] ss:$0 sm:$0xff]  ;;  %s135_s4 = sshll.u32 %s182_s3, 4  ;;  %s136_s4 = int_to_ptr.vmem [resolvable:$true] %s135_s4 }
  0x11   :  { %v43_v25 = vrot.slane %v42_v22, 1  ;;  %v37_v27 = vadd.f32 %v36_v24, %v35_v21  ;;  %v150_v45 = vld [vmem:[%s309_s5] ss:$0 sm:$0xff] }
  0x12   :  { %93 = vmatpush.msra.mxu0 %v66_v20  ;;  %v151_v48 = vld [vmem:[%s310_s6] ss:$0 sm:$0xff] }
  0x13   :  { %v44_v28 = vadd.f32 %v43_v25, %v42_v22  ;;  %v45_v31 = vmul.f32 0.25, %v37_v27 }
  0x14   :  { %94 = vmatpush.msra.mxu0 %v65_v23 }
  0x15   :  { %v46_v32 = vmul.f32 0.25, %v44_v28  ;;  %v51_v35 = vmul.f32 %v147_v29, %v45_v31 }
  0x16   :  { %95 = vmatpush.msra.mxu0 %v64_v26 }
  0x17   :  { %v52_v36 = vmul.f32 %v147_v29, %v46_v32  ;;  %v57_v38 = vadd.f32 %v148_v33, %v51_v35 }
  0x18   :  { %96 = vmatpush.msra.mxu0 %v63_v30 }
  0x19   :  { %v58_v39 = vadd.f32 %v148_v33, %v52_v36 }
  0x1a   :  { %97 = vmatpush.msra.mxu0 %v62_v34 }
  0x1b   :  { %v81_v41 = vrot.slane %v58_v39, 7 }
  0x1c   :  { %98 = vmatpush.msra.mxu0 %v61_v37 }
  0x1d   :  { %v83_v43 = vsel %vm82_vm0, %v81_v41, %v57_v38 }
  0x1e   :  { %99 = vmatpush.msra.mxu0 %v60_v40 }
  0x20   :  { %100 = vmatpush.msra.mxu0 %v59_v42 }
  0x21   :  { %101 = vmatmul.f32.vlgmr.msra.gmra.mxu0 %v83_v43 }
  0x9e   :  { %v102_v46 = vpop.f32.mrf.mxu0 }
  0x9f   :  { %v103_v47 = vadd.f32 %v149_v44, %v102_v46 }
  0xa1   :  { %v109_v49 = vmul.f32 %v150_v45, %v103_v47 }
  0xa3   :  { %v114_v50 = vadd.f32 %v151_v48, %v109_v49 }
  0xa5   :  { %v116_v51 = vsel %vm115_vm1, %v114_v50, -inf }
  0xa6   :  { %117 = vmax.xlane.f32.xlu0 %v116_v51 }
 0x119   :  { %v118_v52 = vpop.xlane.xlu0 %117 }
 0x11a   :  { %v119_v53 = vsub.f32 %v114_v50, %v118_v52 }
 0x11c   :  { %v120_v54 = vmul.f32 1.442695, %v119_v53 }
 0x11e   :  { %152 = vpow2.f32 %v120_v54 }
 0x124   :  { %v153_v55 = vpop.eup %152 }
 0x125   :  { %v122_v56 = vsel %vm115_vm1, %v153_v55, 0.0 }
 0x126   :  { %123 = vadd.xlane.f32.xlu0 %v122_v56 }
 0x199   :  { %v124_v57 = vpop.xlane.xlu0 %123 }
 0x19a   :  { %154 = vlog2.f32 %v124_v57 }
 0x1a0   :  { %v155_v58 = vpop.eup %154 }
 0x1a1   :  { %v126_v59 = vmul.f32 0.6931472, %v155_v58 }
 0x1a3   :  { %v127_v60 = vadd.f32 %v126_v59, %v118_v52 }
 0x1a5   :  { %v128_v61 = vsub.f32 %v114_v50, %v127_v60 }
 0x1a7   :  { %129 = vst.msk [vmem:[#allocation2] sm:$0x3] %vm115_vm1, %v128_v61 }
 0x1a8   :  { %140 = dma.vmem_to_hbm [thread:$0]  %s136_s4, 32, %s138_s24, [#allocation3]  }
 0x1a9   :  { %180 = dma.done.wait [#allocation3], 32  }
 0x1aa   :  { %181 = vsyncadd [#allocation3], 4294967264 }
 0x1ab   :  { %145 = vsyncpa [#allocation3], 1 }

// kernel: resnet_forward.12
= control target key start
LH: loop header
LB: loop body
LE: loop exit
PB: predicated region body
PF: predicated region fallthrough
CT: control target
= control target key end

     0   :  { %s3996_s21 = smov 0   ;;  %s4762_s0 = inlined_call_operand.vmem [shape: f32[2,32,128], index: 0, kind: input, shape index: {}]   ;;  %s4763_s1 = inlined_call_operand.vmem [shape: f32[2,32,128], index: 1, kind: input, shape index: {}]   ;;  %s4764_s2 = inlined_call_operand.vmem [shape: f32[16,1], index: 2, kind: input, shape index: {}]   ;;  %s4765_s3 = inlined_call_operand.vmem [shape: bf16[1152,128], index: 3, kind: input, shape index: {}]   ;;  %s4766_s4 = inlined_call_operand.vmem [shape: f32[1,128], index: 4, kind: input, shape index: {}]   ;;  %s4767_s5 = inlined_call_operand.vmem [shape: f32[1,128], index: 5, kind: input, shape index: {}]   ;;  %s4768_s6 = inlined_call_operand.vmem [shape: bf16[1152,128], index: 6, kind: input, shape index: {}]   ;;  %s4769_s7 = inlined_call_operand.vmem [shape: f32[1,128], index: 7, kind: input, shape index: {}]   ;;  %s4770_s8 = inlined_call_operand.vmem [shape: f32[1,128], index: 8, kind: input, shape index: {}]   ;;  %s4771_s9 = inlined_call_operand.vmem [shape: bf16[1152,128], index: 9, kind: input, shape index: {}]   ;;  %s4772_s10 = inlined_call_operand.vmem [shape: f32[1,128], index: 10, kind: input, shape index: {}]   ;;  %s4773_s11 = inlined_call_operand.vmem [shape: f32[1,128], index: 11, kind: input, shape index: {}]   ;;  %s4774_s12 = inlined_call_operand.vmem [shape: f32[2,32,128], index: 12, kind: output, shape index: {}]  }
   0x1 LB: > { %s2808_s22 = sadd.s32 4294967295, %s3927_s21   ;;  %p2812_p0 = scmp.ge.s32.totalorder %s3927_s21, 1  ;;  %s3927_s21 = sphi %s3996_s21, %s22_s21  }
   0x2   : > { %p372_p1 = scmp.lt.s32.totalorder %s3927_s21, 3 }
   0x4   : > { %p373_p2 = pnand %p2812_p0, %p372_p1 }
   0x5   : > { %p419_p3 = scmp.lt.s32.totalorder (!%p373_p2), %s2808_s22, 1 }
   0x6   : > { %376 = sbr.rel (%p373_p2) target bundleno = 634 (0x27a), region = 68 }
   0xb   : > { %v3703_v0 = vld [vmem:[%s4765_s3 + $0x78] sm:$0xff]  ;;  %v3702_v4 = vld [vmem:[%s4765_s3 + $0x70] sm:$0xff]  ;;  %v3701_v8 = vld [vmem:[%s4765_s3 + $0x68] sm:$0xff]  ;;  %s4776_s22 = smov (!%p419_p3, %s2808_s22), 1 }
   0xc   : > { %v3711_v1 = vld [vmem:[%s4765_s3 + $0xb8] sm:$0xff]  ;;  %526 = vmatpush.bf16.msra.mxu0 %v3703_v0  ;;  %v3710_v5 = vld [vmem:[%s4765_s3 + $0xb0] sm:$0xff]  ;;  %v3709_v9 = vld [vmem:[%s4765_s3 + $0xa8] sm:$0xff]  ;;  %s4080_s23 = sshll.u32 %s4776_s22, 5 }
   0xd   : > { %v3695_v2 = vld [vmem:[%s4765_s3 + $0x38] sm:$0xff]  ;;  %669 = vmatpush.bf16.msra.mxu2 %v3711_v1  ;;  %v3694_v6 = vld [vmem:[%s4765_s3 + $0x30] sm:$0xff]  ;;  %v3693_v10 = vld [vmem:[%s4765_s3 + $0x28] sm:$0xff]  ;;  %s4098_s15 = scalar_lea.vmem %s4762_s0, %s4080_s23  ;;  %s4444_s25 = scalar_lea.vmem %s4763_s1, %s4080_s23 }
   0xe   : > { %v3719_v3 = vld [vmem:[%s4765_s3 + $0xf8] sm:$0xff]  ;;  %588 = vmatpush.bf16.msra.mxu1 %v3695_v2  ;;  %v3718_v7 = vld [vmem:[%s4765_s3 + $0xf0] sm:$0xff]  ;;  %v3717_v11 = vld [vmem:[%s4765_s3 + $0xe8] sm:$0xff]  ;;  %s4741_s14 = scalar_lea.vmem %s4774_s12, %s4080_s23 }
   0xf   : > { %752 = vmatpush.bf16.msra.mxu3 %v3719_v3  ;;  %v3700_v12 = vld [vmem:[%s4765_s3 + $0x60] sm:$0xff]  ;;  %v3699_v16 = vld [vmem:[%s4765_s3 + $0x58] sm:$0xff]  ;;  %v3698_v20 = vld [vmem:[%s4765_s3 + $0x50] sm:$0xff] }
  0x10   : > { %527 = vmatpush.bf16.msra.mxu0 %v3702_v4  ;;  %v3708_v13 = vld [vmem:[%s4765_s3 + $0xa0] sm:$0xff]  ;;  %v3707_v17 = vld [vmem:[%s4765_s3 + $0x98] sm:$0xff]  ;;  %v3706_v21 = vld [vmem:[%s4765_s3 + $0x90] sm:$0xff] }
  0x11   : > { %670 = vmatpush.bf16.msra.mxu2 %v3710_v5  ;;  %v3692_v14 = vld [vmem:[%s4765_s3 + $0x20] sm:$0xff]  ;;  %v3691_v18 = vld [vmem:[%s4765_s3 + $0x18] sm:$0xff]  ;;  %v3690_v22 = vld [vmem:[%s4765_s3 + $0x10] sm:$0xff] }
  0x12   : > { %589 = vmatpush.bf16.msra.mxu1 %v3694_v6  ;;  %v3716_v15 = vld [vmem:[%s4765_s3 + $0xe0] sm:$0xff]  ;;  %v3715_v19 = vld [vmem:[%s4765_s3 + $0xd8] sm:$0xff]  ;;  %v3714_v23 = vld [vmem:[%s4765_s3 + $0xd0] sm:$0xff] }
  0x13   : > { %753 = vmatpush.bf16.msra.mxu3 %v3718_v7  ;;  %v3697_v24 = vld [vmem:[%s4765_s3 + $0x48] sm:$0xff]  ;;  %v3696_v28 = vld [vmem:[%s4765_s3 + $0x40] sm:$0xff]  ;;  %v3727_v30 = vld [vmem:[%s4765_s3 + $0x138] sm:$0xff] }
  0x14   : > { %528 = vmatpush.bf16.msra.mxu0 %v3701_v8  ;;  %v3705_v25 = vld [vmem:[%s4765_s3 + $0x88] sm:$0xff]  ;;  %v3704_v29 = vld [vmem:[%s4765_s3 + $0x80] sm:$0xff]  ;;  %v3743_v31 = vld [vmem:[%s4765_s3 + $0x1b8] sm:$0xff] }
  0x15   : > { %671 = vmatpush.bf16.msra.mxu2 %v3709_v9  ;;  %v3689_v26 = vld [vmem:[%s4765_s3 + $0x8] sm:$0xff]  ;;  %v3688_v32 = vld [vmem:[%s4765_s3] sm:$0xff]  ;;  %v3735_v38 = vld [vmem:[%s4765_s3 + $0x178] sm:$0xff] }
  0x16   : > { %590 = vmatpush.bf16.msra.mxu1 %v3693_v10  ;;  %v3713_v27 = vld [vmem:[%s4765_s3 + $0xc8] sm:$0xff]  ;;  %v3712_v33 = vld [vmem:[%s4765_s3 + $0xc0] sm:$0xff]  ;;  %v3751_v39 = vld [vmem:[%s4765_s3 + $0x1f8] sm:$0xff] }
  0x17   : > { %754 = vmatpush.bf16.msra.mxu3 %v3717_v11  ;;  %v459_v34 = vld [vmem:[%s4098_s15 + $0x4] sm:$0xff]  ;;  %v4120_v35 = vld [vmem:[%s4098_s15 + $0xc] sm:$0xff]  ;;  %v3723_v60 = vld [vmem:[%s4765_s3 + $0x118] sm:$0xff] }
  0x18   : > { %529 = vmatpush.bf16.msra.mxu0 %v3700_v12  ;;  %v602_v36 = vld [vmem:[%s4098_s15 + $0x5] sm:$0xff]  ;;  %v4124_v37 = vld [vmem:[%s4098_s15 + $0xd] sm:$0xff]  ;;  %v461_v44 = vpack.c.bf16 %v4120_v35, %v459_v34  ;;  %v3739_v61 = vld [vmem:[%s4765_s3 + $0x198] sm:$0xff] }
  0x19   : > { %672 = vmatpush.bf16.msra.mxu2 %v3708_v13  ;;  %v440_v40 = vld [vmem:[%s4098_s15 + $0x3] sm:$0xff]  ;;  %v4134_v41 = vld [vmem:[%s4098_s15 + $0xb] sm:$0xff]  ;;  %v604_v45 = vpack.c.bf16 %v4124_v37, %v602_v36  ;;  %v3731_v62 = vld [vmem:[%s4765_s3 + $0x158] sm:$0xff] }
  0x1a   : > { %591 = vmatpush.bf16.msra.mxu1 %v3692_v14  ;;  %v685_v42 = vld [vmem:[%s4098_s15 + $0x7] sm:$0xff]  ;;  %v686_v43 = vld [vmem:[%s4098_s15 + $0xf] sm:$0xff]  ;;  %v442_v48 = vpack.c.bf16 %v4134_v41, %v440_v40  ;;  %v3747_v63 = vld [vmem:[%s4765_s3 + $0x1d8] sm:$0xff] }
  0x1b   : > { %755 = vmatpush.bf16.msra.mxu3 %v3716_v15  ;;  %v3726_v46 = vld [vmem:[%s4765_s3 + $0x130] sm:$0xff]  ;;  %v687_v49 = vpack.c.bf16 %v686_v43, %v685_v42  ;;  %v3725_v52 = vld [vmem:[%s4765_s3 + $0x128] sm:$0xff]  ;;  %v3724_v56 = vld [vmem:[%s4765_s3 + $0x120] sm:$0xff] }
  0x1c   : > { %530 = vmatpush.bf16.msra.mxu0 %v3699_v16  ;;  %v3742_v47 = vld [vmem:[%s4765_s3 + $0x1b0] sm:$0xff]  ;;  %v3741_v53 = vld [vmem:[%s4765_s3 + $0x1a8] sm:$0xff]  ;;  %v3740_v57 = vld [vmem:[%s4765_s3 + $0x1a0] sm:$0xff] }
  0x1d   : > { %673 = vmatpush.bf16.msra.mxu2 %v3707_v17  ;;  %v3734_v50 = vld [vmem:[%s4765_s3 + $0x170] sm:$0xff]  ;;  %v3733_v54 = vld [vmem:[%s4765_s3 + $0x168] sm:$0xff]  ;;  %v3732_v58 = vld [vmem:[%s4765_s3 + $0x160] sm:$0xff] }
  0x1e   : > { %592 = vmatpush.bf16.msra.mxu1 %v3691_v18  ;;  %v3750_v51 = vld [vmem:[%s4765_s3 + $0x1f0] sm:$0xff]  ;;  %v3749_v55 = vld [vmem:[%s4765_s3 + $0x1e8] sm:$0xff]  ;;  %v3748_v59 = vld [vmem:[%s4765_s3 + $0x1e0] sm:$0xff] }
  0x1f   : > { %756 = vmatpush.bf16.msra.mxu3 %v3715_v19  ;;  %v3722_v0 = vld [vmem:[%s4765_s3 + $0x110] sm:$0xff]  ;;  %v3721_v4 = vld [vmem:[%s4765_s3 + $0x108] sm:$0xff]  ;;  %v3720_v8 = vld [vmem:[%s4765_s3 + $0x100] sm:$0xff] }
  0x20   : > { %531 = vmatpush.bf16.msra.mxu0 %v3698_v20  ;;  %v3738_v1 = vld [vmem:[%s4765_s3 + $0x190] sm:$0xff]  ;;  %v3737_v5 = vld [vmem:[%s4765_s3 + $0x188] sm:$0xff]  ;;  %v3736_v9 = vld [vmem:[%s4765_s3 + $0x180] sm:$0xff] }
  0x21   : > { %674 = vmatpush.bf16.msra.mxu2 %v3706_v21  ;;  %v3730_v2 = vld [vmem:[%s4765_s3 + $0x150] sm:$0xff]  ;;  %v3729_v6 = vld [vmem:[%s4765_s3 + $0x148] sm:$0xff]  ;;  %v3759_v13 = vld [vmem:[%s4765_s3 + $0x238] sm:$0xff] }
  0x22   : > { %593 = vmatpush.bf16.msra.mxu1 %v3690_v22  ;;  %v3746_v3 = vld [vmem:[%s4765_s3 + $0x1d0] sm:$0xff]  ;;  %v3745_v7 = vld [vmem:[%s4765_s3 + $0x1c8] sm:$0xff]  ;;  %v3728_v14 = vld [vmem:[%s4765_s3 + $0x140] sm:$0xff] }
  0x23   : > { %757 = vmatpush.bf16.msra.mxu3 %v3714_v23  ;;  %v768_v10 = vld [vmem:[%s4098_s15 + $0x8] sm:$0xff]  ;;  %v769_v11 = vld [vmem:[%s4098_s15 + $0x10] sm:$0xff]  ;;  %v3744_v15 = vld [vmem:[%s4765_s3 + $0x1c0] sm:$0xff] }
  0x24   : > { %532 = vmatpush.bf16.msra.mxu0 %v3697_v24  ;;  %v935_v12 = vld [vmem:[%s4098_s15 + $0x13] sm:$0xff]  ;;  %v851_v16 = vld [vmem:[%s4098_s15 + $0x9] sm:$0xff]  ;;  %v770_v19 = vpack.c.bf16 %v769_v11, %v768_v10  ;;  %v434_v24 = vld [vmem:[%s4764_s2] sm:$0xff] }
  0x25   : > { %675 = vmatpush.bf16.msra.mxu2 %v3705_v25  ;;  %v852_v17 = vld [vmem:[%s4098_s15 + $0x11] sm:$0xff]  ;;  %v936_v20 = vpack.c.bf16 %v935_v12, %v4134_v41  ;;  %v3929_v25 = vmov 0   ;;  %v3760_v12 = vld [vmem:[%s4768_s6] sm:$0xff] }
  0x26   : > { %594 = vmatpush.bf16.msra.mxu1 %v3689_v26  ;;  %v1018_v18 = vld [vmem:[%s4098_s15 + $0x14] sm:$0xff]  ;;  %v853_v21 = vpack.c.bf16 %v852_v17, %v851_v16  ;;  %3914 = vset.pattern.permute.xlu0 %v3929_v25  ;;  %v3757_v26 = vld [vmem:[%s4765_s3 + $0x228] sm:$0xff]  ;;  %v3784_v16 = vld [vmem:[%s4768_s6 + $0xc0] sm:$0xff] }
  0x27   : > { %758 = vmatpush.bf16.msra.mxu3 %v3713_v27  ;;  %v1019_v22 = vpack.c.bf16 %v1018_v18, %v4120_v35  ;;  %v3758_v23 = vld [vmem:[%s4765_s3 + $0x230] sm:$0xff]  ;;  %1203 = vperm.xlu0 %3914, %v434_v24   ;;  %v3756_v27 = vld [vmem:[%s4765_s3 + $0x220] sm:$0xff]  ;;  %v3775_v35 = vld [vmem:[%s4768_s6 + $0x78] sm:$0xff] }
  0x28   : > { %533 = vmatpush.bf16.msra.mxu0 %v3696_v28  ;;  %v435_v28 = vld [vmem:[%s4764_s2 + $0x8] sm:$0xff]  ;;  %v3774_v36 = vld [vmem:[%s4768_s6 + $0x70] sm:$0xff]  ;;  %v3783_v40 = vld [vmem:[%s4768_s6 + $0xb8] sm:$0xff] }
  0x29   : > { %676 = vmatpush.bf16.msra.mxu2 %v3704_v29  ;;  %v3755_v29 = vld [vmem:[%s4765_s3 + $0x218] sm:$0xff]  ;;  %v3766_v43 = vld [vmem:[%s4768_s6 + $0x30] sm:$0xff]  ;;  %v3796_v17 = vld [vmem:[%s4768_s6 + $0x120] sm:$0xff] }
  0x2a   : > { %595 = vmatpush.bf16.msra.mxu1 %v3688_v32  ;;  %v3752_v32 = vld [vmem:[%s4765_s3 + $0x200] sm:$0xff]  ;;  %v3791_v41 = vld [vmem:[%s4768_s6 + $0xf8] sm:$0xff]  ;;  %v3806_v24 = vld [vmem:[%s4768_s6 + $0x170] sm:$0xff] }
  0x2b   : > { %759 = vmatpush.bf16.msra.mxu3 %v3712_v33  ;;  %534 = vmatmul.bf16.vlgmr.msra.gmra.mxu0 %v461_v44  ;;  %v1101_v33 = vld [vmem:[%s4098_s15 + $0x15] sm:$0xff] }
  0x2c   : > { %835 = vmatpush.bf16.msrb.mxu0 %v3727_v30  ;;  %677 = vmatmul.bf16.vlgmr.msra.gmra.mxu2 %v604_v45  ;;  %v3754_v30 = vld [vmem:[%s4765_s3 + $0x210] sm:$0xff]  ;;  %v1102_v34 = vpack.c.bf16 %v1101_v33, %v4124_v37  ;;  %v3772_v37 = vld [vmem:[%s4768_s6 + $0x60] sm:$0xff]  ;;  %v3771_v42 = vld [vmem:[%s4768_s6 + $0x58] sm:$0xff] }
  0x2d   : > { %1001 = vmatpush.bf16.msrb.mxu2 %v3743_v31  ;;  %596 = vmatmul.bf16.vlgmr.msra.gmra.mxu1 %v442_v48  ;;  %v3753_v31 = vld [vmem:[%s4765_s3 + $0x208] sm:$0xff]  ;;  %v3782_v44 = vld [vmem:[%s4768_s6 + $0xb0] sm:$0xff]  ;;  %v3807_v18 = vld [vmem:[%s4768_s6 + $0x178] sm:$0xff] }
  0x2e   : > { %918 = vmatpush.bf16.msrb.mxu1 %v3735_v38  ;;  %760 = vmatmul.bf16.vlgmr.msra.gmra.mxu3 %v687_v49  ;;  %v3773_v38 = vld [vmem:[%s4768_s6 + $0x68] sm:$0xff]  ;;  %v3790_v45 = vld [vmem:[%s4768_s6 + $0xf0] sm:$0xff] }
  0x2f   : > { %1084 = vmatpush.bf16.msrb.mxu3 %v3751_v39  ;;  %1208 = vperm.xlu0 %3914, %v435_v28   ;;  %v3767_v39 = vld [vmem:[%s4768_s6 + $0x38] sm:$0xff]  ;;  %v3781_v48 = vld [vmem:[%s4768_s6 + $0xa8] sm:$0xff]  ;;  %v3814_v25 = vld [vmem:[%s4768_s6 + $0x1b0] sm:$0xff] }
  0x30   : > { %836 = vmatpush.bf16.msrb.mxu0 %v3726_v46  ;;  %v3770_v46 = vld [vmem:[%s4768_s6 + $0x50] sm:$0xff]  ;;  %v3789_v49 = vld [vmem:[%s4768_s6 + $0xe8] sm:$0xff] }
  0x31   : > { %1002 = vmatpush.bf16.msrb.mxu2 %v3742_v47  ;;  %v3765_v47 = vld [vmem:[%s4768_s6 + $0x28] sm:$0xff] }
  0x32   : > { %919 = vmatpush.bf16.msrb.mxu1 %v3734_v50 }
  0x33   : > { %1085 = vmatpush.bf16.msrb.mxu3 %v3750_v51  ;;  %v3769_v51 = vld [vmem:[%s4768_s6 + $0x48] sm:$0xff] }
  0x34   : > { %837 = vmatpush.bf16.msrb.mxu0 %v3725_v52  ;;  %v3764_v52 = vld [vmem:[%s4768_s6 + $0x20] sm:$0xff] }
  0x35   : > { %1003 = vmatpush.bf16.msrb.mxu2 %v3741_v53  ;;  %v3780_v53 = vld [vmem:[%s4768_s6 + $0xa0] sm:$0xff] }
  0x36   : > { %920 = vmatpush.bf16.msrb.mxu1 %v3733_v54  ;;  %v3788_v54 = vld [vmem:[%s4768_s6 + $0xe0] sm:$0xff] }
  0x37   : > { %1086 = vmatpush.bf16.msrb.mxu3 %v3749_v55 }
  0x38   : > { %838 = vmatpush.bf16.msrb.mxu0 %v3724_v56  ;;  %v3768_v56 = vld [vmem:[%s4768_s6 + $0x40] sm:$0xff] }
  0x39   : > { %1004 = vmatpush.bf16.msrb.mxu2 %v3740_v57  ;;  %v3763_v57 = vld [vmem:[%s4768_s6 + $0x18] sm:$0xff] }
  0x3a   : > { %921 = vmatpush.bf16.msrb.mxu1 %v3732_v58  ;;  %v3779_v58 = vld [vmem:[%s4768_s6 + $0x98] sm:$0xff] }
  0x3b   : > { %1087 = vmatpush.bf16.msrb.mxu3 %v3748_v59 }
  0x3c   : > { %839 = vmatpush.bf16.msrb.mxu0 %v3723_v60  ;;  %v3787_v60 = vld [vmem:[%s4768_s6 + $0xd8] sm:$0xff] }
  0x3d   : > { %1005 = vmatpush.bf16.msrb.mxu2 %v3739_v61  ;;  %v3799_v61 = vld [vmem:[%s4768_s6 + $0x138] sm:$0xff] }
  0x3e   : > { %922 = vmatpush.bf16.msrb.mxu1 %v3731_v62 }
  0x3f   : > { %1088 = vmatpush.bf16.msrb.mxu3 %v3747_v63  ;;  %v3762_v63 = vld [vmem:[%s4768_s6 + $0x10] sm:$0xff] }
  0x40   : > { %840 = vmatpush.bf16.msrb.mxu0 %v3722_v0  ;;  %v3778_v0 = vld [vmem:[%s4768_s6 + $0x90] sm:$0xff] }
  0x41   : > { %1006 = vmatpush.bf16.msrb.mxu2 %v3738_v1 }
  0x42   : > { %923 = vmatpush.bf16.msrb.mxu1 %v3730_v2  ;;  %v3786_v2 = vld [vmem:[%s4768_s6 + $0xd0] sm:$0xff] }
  0x43   : > { %1089 = vmatpush.bf16.msrb.mxu3 %v3746_v3  ;;  %v3798_v3 = vld [vmem:[%s4768_s6 + $0x130] sm:$0xff] }
  0x44   : > { %841 = vmatpush.bf16.msrb.mxu0 %v3721_v4 }
  0x45   : > { %1007 = vmatpush.bf16.msrb.mxu2 %v3737_v5  ;;  %v3761_v5 = vld [vmem:[%s4768_s6 + $0x8] sm:$0xff] }
  0x46   : > { %924 = vmatpush.bf16.msrb.mxu1 %v3729_v6  ;;  %v3777_v6 = vld [vmem:[%s4768_s6 + $0x88] sm:$0xff] }
  0x47   : > { %1090 = vmatpush.bf16.msrb.mxu3 %v3745_v7  ;;  %v3785_v7 = vld [vmem:[%s4768_s6 + $0xc8] sm:$0xff] }
  0x48   : > { %842 = vmatpush.bf16.msrb.mxu0 %v3720_v8 }
  0x49   : > { %1008 = vmatpush.bf16.msrb.mxu2 %v3736_v9  ;;  %v3797_v9 = vld [vmem:[%s4768_s6 + $0x128] sm:$0xff] }
  0x4a   : > { %925 = vmatpush.bf16.msrb.mxu1 %v3728_v14  ;;  %v3930_v14 = vmov 0.0  }
  0x4b   : > { %1091 = vmatpush.bf16.msrb.mxu3 %v3744_v15  ;;  %843 = vmatmul.bf16.vlgmr.msrb.gmra.mxu0 %v770_v19  ;;  %436 = vst [vmem:[#allocation2] sm:$0xff] %v3930_v14 }
  0x4c   : > { %1167 = vmatpush.bf16.msra.mxu0 %v3759_v13  ;;  %1009 = vmatmul.bf16.vlgmr.msrb.gmra.mxu2 %v936_v20  ;;  %v3776_v13 = vld [vmem:[%s4768_s6 + $0x80] sm:$0xff]  ;;  %437 = vst [vmem:[#allocation2 + $0x18] sm:$0xff] %v3930_v14  ;;  %v3815_v20 = vld [vmem:[%s4768_s6 + $0x1b8] sm:$0xff] }
  0x4d   : > { %926 = vmatmul.bf16.vlgmr.msrb.gmra.mxu1 %v853_v21  ;;  %1363 = vmatpush.bf16.msra.mxu2 %v3767_v39  ;;  %v3823_v21 = vld [vmem:[%s4768_s6 + $0x1f8] sm:$0xff]  ;;  %438 = vst [vmem:[#allocation3] sm:$0xff] %v3930_v14  ;;  %v3804_v39 = vld [vmem:[%s4768_s6 + $0x160] sm:$0xff] }
  0x4e   : > { %1092 = vmatmul.bf16.vlgmr.msrb.gmra.mxu3 %v1019_v22  ;;  %1301 = vmatpush.bf16.msra.mxu1 %v3775_v35  ;;  %439 = vst [vmem:[#allocation3 + $0x18] sm:$0xff] %v3930_v14 }
  0x4f   : > { %1444 = vmatpush.bf16.msra.mxu3 %v3783_v40  ;;  %v3812_v40 = vld [vmem:[%s4768_s6 + $0x1a0] sm:$0xff]  ;;  %2737 = vst [vmem:[%s4741_s14] sm:$0xff] %v3930_v14 }
  0x50   : > { %1168 = vmatpush.bf16.msra.mxu0 %v3758_v23  ;;  %v3795_v23 = vld [vmem:[%s4768_s6 + $0x118] sm:$0xff]  ;;  %2740 = vst [vmem:[%s4741_s14 + $0x18] sm:$0xff] %v3930_v14 }
  0x51   : > { %1364 = vmatpush.bf16.msra.mxu2 %v3766_v43 }
  0x52   : > { %1302 = vmatpush.bf16.msra.mxu1 %v3774_v36 }
  0x53   : > { %1445 = vmatpush.bf16.msra.mxu3 %v3782_v44 }
  0x54   : > { %1169 = vmatpush.bf16.msra.mxu0 %v3757_v26  ;;  %v3822_v26 = vld [vmem:[%s4768_s6 + $0x1f0] sm:$0xff] }
  0x55   : > { %1365 = vmatpush.bf16.msra.mxu2 %v3765_v47  ;;  %v3915_v47 = vld [vmem:[%s4766_s4] ss:$0 sm:$0xff] }
  0x56   : > { %1303 = vmatpush.bf16.msra.mxu1 %v3773_v38 }
  0x57   : > { %1446 = vmatpush.bf16.msra.mxu3 %v3781_v48  ;;  %v3792_v48 = vld [vmem:[%s4768_s6 + $0x100] sm:$0xff] }
  0x58   : > { %1170 = vmatpush.bf16.msra.mxu0 %v3756_v27 }
  0x59   : > { %1366 = vmatpush.bf16.msra.mxu2 %v3764_v52  ;;  %v3819_v52 = vld [vmem:[%s4768_s6 + $0x1d8] sm:$0xff] }
  0x5a   : > { %1304 = vmatpush.bf16.msra.mxu1 %v3772_v37  ;;  %v3793_v37 = vld [vmem:[%s4768_s6 + $0x108] sm:$0xff] }
  0x5b   : > { %1447 = vmatpush.bf16.msra.mxu3 %v3780_v53 }
  0x5c   : > { %1171 = vmatpush.bf16.msra.mxu0 %v3755_v29 }
  0x5d   : > { %1367 = vmatpush.bf16.msra.mxu2 %v3763_v57  ;;  %v3916_v57 = vld [vmem:[%s4767_s5] ss:$0 sm:$0xff] }
  0x5e   : > { %1305 = vmatpush.bf16.msra.mxu1 %v3771_v42  ;;  %v3820_v42 = vld [vmem:[%s4768_s6 + $0x1e0] sm:$0xff] }
  0x5f   : > { %1448 = vmatpush.bf16.msra.mxu3 %v3779_v58  ;;  %v3802_v58 = vld [vmem:[%s4768_s6 + $0x150] sm:$0xff] }
  0x60   : > { %1172 = vmatpush.bf16.msra.mxu0 %v3754_v30  ;;  %v3794_v30 = vld [vmem:[%s4768_s6 + $0x110] sm:$0xff] }
  0x61   : > { %1368 = vmatpush.bf16.msra.mxu2 %v3762_v63 }
  0x62   : > { %1306 = vmatpush.bf16.msra.mxu1 %v3770_v46 }
  0x63   : > { %1449 = vmatpush.bf16.msra.mxu3 %v3778_v0  ;;  %v1195_v0 = vld [vmem:[%s4444_s25 + $0x8] sm:$0xff] }
  0x64   : > { %1173 = vmatpush.bf16.msra.mxu0 %v3753_v31  ;;  %v3805_v31 = vld [vmem:[%s4768_s6 + $0x168] sm:$0xff] }
  0x65   : > { %1369 = vmatpush.bf16.msra.mxu2 %v3761_v5 }
  0x66   : > { %1307 = vmatpush.bf16.msra.mxu1 %v3769_v51  ;;  %v3811_v51 = vld [vmem:[%s4768_s6 + $0x198] sm:$0xff] }
  0x67   : > { %1450 = vmatpush.bf16.msra.mxu3 %v3777_v6 }
  0x68   : > { %1174 = vmatpush.bf16.msra.mxu0 %v3752_v32  ;;  %v3813_v32 = vld [vmem:[%s4768_s6 + $0x1a8] sm:$0xff] }
  0x69   : > { %1370 = vmatpush.bf16.msra.mxu2 %v3760_v12  ;;  %v3808_v12 = vld [vmem:[%s4768_s6 + $0x180] sm:$0xff] }
  0x6a   : > { %1308 = vmatpush.bf16.msra.mxu1 %v3768_v56 }
  0x6b   : > { %1175 = vmatmul.bf16.vlgmr.msra.gmra.mxu0 %v1102_v34  ;;  %1451 = vmatpush.bf16.msra.mxu3 %v3776_v13  ;;  %v3821_v34 = vld [vmem:[%s4768_s6 + $0x1e8] sm:$0xff]  ;;  %v3816_v13 = vld [vmem:[%s4768_s6 + $0x1c0] sm:$0xff] }
  0x6c   : > { %1527 = vmatpush.bf16.msrb.mxu0 %v3791_v41 }
  0x6d   : > { %1693 = vmatpush.bf16.msrb.mxu2 %v3807_v18 }
  0x6e   : > { %1610 = vmatpush.bf16.msrb.mxu1 %v3799_v61 }
  0x6f   : > { %1776 = vmatpush.bf16.msrb.mxu3 %v3815_v20 }
  0x70   : > { %1528 = vmatpush.bf16.msrb.mxu0 %v3790_v45 }
  0x71   : > { %1694 = vmatpush.bf16.msrb.mxu2 %v3806_v24 }
  0x72   : > { %1611 = vmatpush.bf16.msrb.mxu1 %v3798_v3  ;;  %v3809_v3 = vld [vmem:[%s4768_s6 + $0x188] sm:$0xff] }
  0x73   : > { %1777 = vmatpush.bf16.msrb.mxu3 %v3814_v25 }
  0x74   : > { %1529 = vmatpush.bf16.msrb.mxu0 %v3789_v49 }
  0x75   : > { %1695 = vmatpush.bf16.msrb.mxu2 %v3805_v31 }
  0x76   : > { %1612 = vmatpush.bf16.msrb.mxu1 %v3797_v9 }
  0x77   : > { %1778 = vmatpush.bf16.msrb.mxu3 %v3813_v32 }
  0x78   : > { %1530 = vmatpush.bf16.msrb.mxu0 %v3788_v54 }
  0x79   : > { %1696 = vmatpush.bf16.msrb.mxu2 %v3804_v39 }
  0x7a   : > { %1613 = vmatpush.bf16.msrb.mxu1 %v3796_v17  ;;  %v1196_v17 = vld [vmem:[%s4444_s25 + $0x10] sm:$0xff] }
  0x7b   : > { %1779 = vmatpush.bf16.msrb.mxu3 %v3812_v40 }
  0x7c   : > { %1531 = vmatpush.bf16.msrb.mxu0 %v3787_v60  ;;  %v3818_v60 = vld [vmem:[%s4768_s6 + $0x1d0] sm:$0xff] }
  0x7e   : > { %1614 = vmatpush.bf16.msrb.mxu1 %v3795_v23 }
  0x7f   : > { %1780 = vmatpush.bf16.msrb.mxu3 %v3811_v51 }
  0x80   : > { %1532 = vmatpush.bf16.msrb.mxu0 %v3786_v2  ;;  %v3801_v2 = vld [vmem:[%s4768_s6 + $0x148] sm:$0xff] }
  0x82   : > { %1615 = vmatpush.bf16.msrb.mxu1 %v3794_v30 }
  0x84   : > { %1533 = vmatpush.bf16.msrb.mxu0 %v3785_v7 }
  0x86   : > { %1616 = vmatpush.bf16.msrb.mxu1 %v3793_v37  ;;  %v3828_v37 = vld [vmem:[%s4768_s6 + $0x220] sm:$0xff] }
  0x88   : > { %1534 = vmatpush.bf16.msrb.mxu0 %v3784_v16 }
  0x8a   : > { %1617 = vmatpush.bf16.msrb.mxu1 %v3792_v48  ;;  %v3826_v48 = vld [vmem:[%s4768_s6 + $0x210] sm:$0xff] }
  0x8c   : > { %1859 = vmatpush.bf16.msra.mxu0 %v3823_v21 }
  0x90   : > { %1860 = vmatpush.bf16.msra.mxu0 %v3822_v26 }
  0x94   : > { %1861 = vmatpush.bf16.msra.mxu0 %v3821_v34  ;;  %v3831_v34 = vld [vmem:[%s4768_s6 + $0x238] sm:$0xff] }
  0x98   : > { %1862 = vmatpush.bf16.msra.mxu0 %v3820_v42 }
  0x99   : > { %v4465_v7 = vpop.permute.xlu0 %1203 }
  0x9c   : > { %1863 = vmatpush.bf16.msra.mxu0 %v3819_v52 }
  0xa0   : > { %1864 = vmatpush.bf16.msra.mxu0 %v3818_v60  ;;  %v3843_v60 = vld [vmem:[%s4771_s9 + $0x58] sm:$0xff] }
  0xa1   : > { %v4481_v21 = vpop.permute.xlu0 %1208 }
  0xa8   : > { %v535_v50 = vpop.f32.mrf.mxu0 }
  0xaa   : > { %v597_v55 = vpop.f32.mrf.mxu1 }
  0xab   : > { %v598_v4 = vadd.f32 %v597_v55, %v535_v50  ;;  %v3803_v50 = vld [vmem:[%s4768_s6 + $0x158] sm:$0xff] }
  0xac   : > { %1697 = vmatpush.bf16.msrb.mxu2 %v3803_v50  ;;  %v3824_v50 = vld [vmem:[%s4768_s6 + $0x200] sm:$0xff] }
  0xaf   : > { %v678_v59 = vpop.f32.mrf.mxu2 }
  0xb0   : > { %v537_v62 = vpop.f32.mrf.mxu0  ;;  %v683_v10 = vadd.f32 %v678_v59, %v598_v4  ;;  %v3810_v59 = vld [vmem:[%s4768_s6 + $0x190] sm:$0xff]  ;;  %1698 = vmatpush.bf16.msrb.mxu2 %v3802_v58  ;;  %v3817_v4 = vld [vmem:[%s4768_s6 + $0x1c8] sm:$0xff]  ;;  %v3855_v58 = vld [vmem:[%s4771_s9 + $0xb8] sm:$0xff] }
  0xb1   : > { %v761_v1 = vpop.f32.mrf.mxu3  ;;  %1781 = vmatpush.bf16.msrb.mxu3 %v3810_v59  ;;  %1865 = vmatpush.bf16.msra.mxu0 %v3817_v4  ;;  %v3863_v59 = vld [vmem:[%s4771_s9 + $0xf8] sm:$0xff]  ;;  %v3841_v4 = vld [vmem:[%s4771_s9 + $0x48] sm:$0xff] }
  0xb2   : > { %v599_v8 = vpop.f32.mrf.mxu1  ;;  %v766_v19 = vadd.f32 %v761_v1, %v683_v10 }
  0xb3   : > { %v600_v27 = vadd.f32 %v599_v8, %v537_v62 }
  0xb4   : > { %1699 = vmatpush.bf16.msrb.mxu2 %v3801_v2  ;;  %v3853_v2 = vld [vmem:[%s4771_s9 + $0xa8] sm:$0xff] }
  0xb5   : > { %1782 = vmatpush.bf16.msrb.mxu3 %v3809_v3  ;;  %1866 = vmatpush.bf16.msra.mxu0 %v3816_v13  ;;  %v3861_v3 = vld [vmem:[%s4771_s9 + $0xe8] sm:$0xff]  ;;  %v3859_v13 = vld [vmem:[%s4771_s9 + $0xd8] sm:$0xff] }
  0xb7   : > { %v680_v11 = vpop.f32.mrf.mxu2 }
  0xb8   : > { %v684_v35 = vadd.f32 %v680_v11, %v600_v27  ;;  %v3800_v11 = vld [vmem:[%s4768_s6 + $0x140] sm:$0xff] }
  0xb9   : > { %v763_v22 = vpop.f32.mrf.mxu3  ;;  %1700 = vmatpush.bf16.msrb.mxu2 %v3800_v11  ;;  %1783 = vmatpush.bf16.msrb.mxu3 %v3808_v12  ;;  %v3835_v11 = vld [vmem:[%s4771_s9 + $0x18] sm:$0xff] }
  0xba   : > { %v767_v43 = vadd.f32 %v763_v22, %v684_v35  ;;  %v3851_v12 = vld [vmem:[%s4771_s9 + $0x98] sm:$0xff] }
  0xc8   : > { %v844_v15 = vpop.f32.mrf.mxu0 }
  0xc9   : > { %v849_v28 = vadd.f32 %v844_v15, %v766_v19 }
  0xca   : > { %v927_v29 = vpop.f32.mrf.mxu1 }
  0xcb   : > { %v932_v36 = vadd.f32 %v927_v29, %v849_v28 }
  0xcf   : > { %v1010_v33 = vpop.f32.mrf.mxu2 }
  0xd0   : > { %v846_v38 = vpop.f32.mrf.mxu0  ;;  %v1015_v44 = vadd.f32 %v1010_v33, %v932_v36  ;;  %v3830_v36 = vld [vmem:[%s4768_s6 + $0x230] sm:$0xff] }
  0xd1   : > { %v1093_v41 = vpop.f32.mrf.mxu3  ;;  %v850_v45 = vadd.f32 %v846_v38, %v767_v43  ;;  %v3829_v38 = vld [vmem:[%s4768_s6 + $0x228] sm:$0xff] }
  0xd2   : > { %v929_v46 = vpop.f32.mrf.mxu1  ;;  %v1098_v49 = vadd.f32 %v1093_v41, %v1015_v44 }
  0xd3   : > { %v933_v55 = vadd.f32 %v929_v46, %v850_v45  ;;  %v3827_v45 = vld [vmem:[%s4768_s6 + $0x218] sm:$0xff] }
  0xd7   : > { %v1012_v53 = vpop.f32.mrf.mxu2 }
  0xd8   : > { %v1016_v61 = vadd.f32 %v1012_v53, %v933_v55  ;;  %v3847_v53 = vld [vmem:[%s4771_s9 + $0x78] sm:$0xff]  ;;  %v3845_v55 = vld [vmem:[%s4771_s9 + $0x68] sm:$0xff] }
  0xd9   : > { %v1095_v63 = vpop.f32.mrf.mxu3 }
  0xda   : > { %v1099_v5 = vadd.f32 %v1095_v63, %v1016_v61  ;;  %v3838_v61 = vld [vmem:[%s4771_s9 + $0x30] sm:$0xff] }
  0xdb   : > { %v3862_v63 = vld [vmem:[%s4771_s9 + $0xf0] sm:$0xff] }
  0xe8   : > { %v1176_v54 = vpop.f32.mrf.mxu0 }
  0xe9   : > { %v1181_v56 = vadd.f32 %v1176_v54, %v1098_v49  ;;  %v3825_v49 = vld [vmem:[%s4768_s6 + $0x208] sm:$0xff]  ;;  %v3846_v54 = vld [vmem:[%s4771_s9 + $0x70] sm:$0xff] }
  0xeb   : > { %v1187_v62 = vmul.f32 %v3915_v47, %v1181_v56  ;;  %v3844_v56 = vld [vmem:[%s4771_s9 + $0x60] sm:$0xff] }
  0xed   : > { %v1193_v1 = vadd.f32 %v3916_v57, %v1187_v62  ;;  %v3854_v62 = vld [vmem:[%s4771_s9 + $0xb0] sm:$0xff] }
  0xef   : > { %v1197_v6 = vadd.f32 %v1195_v0, %v1193_v1  ;;  %v3842_v0 = vld [vmem:[%s4771_s9 + $0x50] sm:$0xff]  ;;  %v3837_v1 = vld [vmem:[%s4771_s9 + $0x28] sm:$0xff] }
  0xf0   : > { %v1178_v8 = vpop.f32.mrf.mxu0 }
  0xf1   : > { %v1199_v9 = vmax.f32 %v1197_v6, 0.0  ;;  %v1182_v10 = vadd.f32 %v1178_v8, %v1099_v5  ;;  %v3836_v5 = vld [vmem:[%s4771_s9 + $0x20] sm:$0xff] }
  0xf2   : > { %v3852_v6 = vld [vmem:[%s4771_s9 + $0xa0] sm:$0xff] }
  0xf3   : > { %v4477_v15 = vmul.f32 %v4465_v7, %v1199_v9  ;;  %v1188_v16 = vmul.f32 %v3915_v47, %v1182_v10  ;;  %v3860_v8 = vld [vmem:[%s4771_s9 + $0xe0] sm:$0xff] }
  0xf4   : > { %v3840_v10 = vld [vmem:[%s4771_s9 + $0x40] sm:$0xff] }
  0xf5   : > { %1213 = vst [vmem:[#allocation2 + $0x8] sm:$0xff] %v4477_v15  ;;  %v1194_v18 = vadd.f32 %v3916_v57, %v1188_v16  ;;  %v3839_v57 = vld [vmem:[%s4771_s9 + $0x38] sm:$0xff] }
  0xf6   : > { %v3871_v16 = vld [vmem:[%s4771_s9 + $0x138] sm:$0xff] }
  0xf7   : > { %v1198_v19 = vadd.f32 %v1196_v17, %v1194_v18  ;;  %v3834_v17 = vld [vmem:[%s4771_s9 + $0x10] sm:$0xff] }
  0xf8   : > { %v3850_v18 = vld [vmem:[%s4771_s9 + $0x90] sm:$0xff] }
  0xf9   : > { %v1200_v20 = vmax.f32 %v1198_v19, 0.0  ;;  %v3858_v19 = vld [vmem:[%s4771_s9 + $0xd0] sm:$0xff] }
  0xfb   : > { %v4484_v22 = vmul.f32 %v4481_v21, %v1200_v20 }
  0xfc   : > { %v1234_v23 = vld [vmem:[#allocation2 + $0x4] sm:$0xff] }
  0xfd   : > { %1214 = vst [vmem:[#allocation2 + $0x10] sm:$0xff] %v4484_v22  ;;  %v1215_v24 = vld [vmem:[#allocation2 + $0x3] sm:$0xff]  ;;  %v1545_v43 = vpack.c.bf16 %v4484_v22, %v4477_v15 }
  0xfe   : > { %v1377_v25 = vld [vmem:[#allocation2 + $0x5] sm:$0xff] }
  0xff   : > { %v1460_v32 = vld [vmem:[#allocation2 + $0x7] sm:$0xff] }
 0x104   : > { %v1235_v26 = vld [vmem:[#allocation2 + $0xc] sm:$0xff]  ;;  %v1793_v42 = vld [vmem:[#allocation2 + $0x14] sm:$0xff] }
 0x105   : > { %v1216_v27 = vld [vmem:[#allocation2 + $0xb] sm:$0xff]  ;;  %v1236_v29 = vpack.c.bf16 %v1235_v26, %v1234_v23  ;;  %v1710_v41 = vld [vmem:[#allocation2 + $0x13] sm:$0xff]  ;;  %v1794_v47 = vpack.c.bf16 %v1793_v42, %v1235_v26 }
 0x106   : > { %v1378_v28 = vld [vmem:[#allocation2 + $0xd] sm:$0xff]  ;;  %v1217_v30 = vpack.c.bf16 %v1216_v27, %v1215_v24  ;;  %v1711_v46 = vpack.c.bf16 %v1710_v41, %v1216_v27  ;;  %v1876_v51 = vld [vmem:[#allocation2 + $0x15] sm:$0xff] }
 0x107   : > { %v1379_v31 = vpack.c.bf16 %v1378_v28, %v1377_v25  ;;  %v1461_v33 = vld [vmem:[#allocation2 + $0xf] sm:$0xff]  ;;  %1309 = vmatmul.bf16.vlgmr.msra.gmra.mxu1 %v1236_v29  ;;  %v1877_v52 = vpack.c.bf16 %v1876_v51, %v1378_v28 }
 0x108   : > { %v1462_v35 = vpack.c.bf16 %v1461_v33, %v1460_v32  ;;  %1371 = vmatmul.bf16.vlgmr.msra.gmra.mxu2 %v1217_v30  ;;  %1942 = vmatpush.bf16.msra.mxu1 %v3831_v34  ;;  %v1626_v39 = vld [vmem:[#allocation2 + $0x9] sm:$0xff]  ;;  %v1627_v40 = vld [vmem:[#allocation2 + $0x11] sm:$0xff]  ;;  %v3832_v32 = vld [vmem:[%s4771_s9] sm:$0xff] }
 0x109   : > { %1452 = vmatmul.bf16.vlgmr.msra.gmra.mxu3 %v1379_v31  ;;  %v1628_v44 = vpack.c.bf16 %v1627_v40, %v1626_v39  ;;  %2062 = vmatpush.bf16.msra.mxu2 %v3847_v53  ;;  %v3870_v23 = vld [vmem:[%s4771_s9 + $0x130] sm:$0xff]  ;;  %v3833_v27 = vld [vmem:[%s4771_s9 + $0x8] sm:$0xff]  ;;  %v3848_v33 = vld [vmem:[%s4771_s9 + $0x80] sm:$0xff] }
 0x10a   : > { %1535 = vmatmul.bf16.vlgmr.msrb.gmra.mxu0 %v1462_v35  ;;  %2124 = vmatpush.bf16.msra.mxu3 %v3839_v57  ;;  %v3849_v28 = vld [vmem:[%s4771_s9 + $0x88] sm:$0xff]  ;;  %v3856_v34 = vld [vmem:[%s4771_s9 + $0xc0] sm:$0xff]  ;;  %v3895_v40 = vld [vmem:[%s4771_s9 + $0x1f8] sm:$0xff] }
 0x10b   : > { %2205 = vmatpush.bf16.msrb.mxu0 %v3855_v58  ;;  %v3857_v29 = vld [vmem:[%s4771_s9 + $0xc8] sm:$0xff] }
 0x10c   : > { %1943 = vmatpush.bf16.msra.mxu1 %v3830_v36  ;;  %v3869_v30 = vld [vmem:[%s4771_s9 + $0x128] sm:$0xff]  ;;  %v3868_v36 = vld [vmem:[%s4771_s9 + $0x120] sm:$0xff] }
 0x10d   : > { %2063 = vmatpush.bf16.msra.mxu2 %v3846_v54  ;;  %v3877_v51 = vld [vmem:[%s4771_s9 + $0x168] sm:$0xff] }
 0x10e   : > { %2125 = vmatpush.bf16.msra.mxu3 %v3838_v61  ;;  %v3876_v61 = vld [vmem:[%s4771_s9 + $0x160] sm:$0xff] }
 0x10f   : > { %2206 = vmatpush.bf16.msrb.mxu0 %v3854_v62  ;;  %v3884_v62 = vld [vmem:[%s4771_s9 + $0x1a0] sm:$0xff] }
 0x110   : > { %1944 = vmatpush.bf16.msra.mxu1 %v3829_v38  ;;  %v3879_v38 = vld [vmem:[%s4771_s9 + $0x178] sm:$0xff] }
 0x111   : > { %2064 = vmatpush.bf16.msra.mxu2 %v3845_v55  ;;  %v3893_v55 = vld [vmem:[%s4771_s9 + $0x1e8] sm:$0xff] }
 0x112   : > { %2126 = vmatpush.bf16.msra.mxu3 %v3837_v1 }
 0x113   : > { %2207 = vmatpush.bf16.msrb.mxu0 %v3853_v2 }
 0x114   : > { %1945 = vmatpush.bf16.msra.mxu1 %v3828_v37  ;;  %v3887_v37 = vld [vmem:[%s4771_s9 + $0x1b8] sm:$0xff] }
 0x115   : > { %2065 = vmatpush.bf16.msra.mxu2 %v3844_v56 }
 0x116   : > { %2127 = vmatpush.bf16.msra.mxu3 %v3836_v5 }
 0x117   : > { %1618 = vmatmul.bf16.vlgmr.msrb.gmra.mxu1 %v1545_v43  ;;  %2208 = vmatpush.bf16.msrb.mxu0 %v3852_v6  ;;  %v3867_v43 = vld [vmem:[%s4771_s9 + $0x118] sm:$0xff] }
 0x118   : > { %1701 = vmatmul.bf16.vlgmr.msrb.gmra.mxu2 %v1628_v44  ;;  %1946 = vmatpush.bf16.msra.mxu1 %v3827_v45  ;;  %v3878_v44 = vld [vmem:[%s4771_s9 + $0x170] sm:$0xff]  ;;  %v3875_v6 = vld [vmem:[%s4771_s9 + $0x158] sm:$0xff] }
 0x119   : > { %1784 = vmatmul.bf16.vlgmr.msrb.gmra.mxu3 %v1711_v46  ;;  %2066 = vmatpush.bf16.msra.mxu2 %v3843_v60  ;;  %v3886_v45 = vld [vmem:[%s4771_s9 + $0x1b0] sm:$0xff] }
 0x11a   : > { %1867 = vmatmul.bf16.vlgmr.msra.gmra.mxu0 %v1794_v47  ;;  %2128 = vmatpush.bf16.msra.mxu3 %v3835_v11  ;;  %v3894_v46 = vld [vmem:[%s4771_s9 + $0x1f0] sm:$0xff] }
 0x11b   : > { %2209 = vmatpush.bf16.msrb.mxu0 %v3851_v12  ;;  %v3917_v12 = vld [vmem:[%s4769_s7] ss:$0 sm:$0xff] }
 0x11c   : > { %1947 = vmatpush.bf16.msra.mxu1 %v3826_v48 }
 0x11d   : > { %2067 = vmatpush.bf16.msra.mxu2 %v3842_v0 }
 0x11e   : > { %2129 = vmatpush.bf16.msra.mxu3 %v3834_v17  ;;  %v3882_v17 = vld [vmem:[%s4771_s9 + $0x190] sm:$0xff] }
 0x11f   : > { %2210 = vmatpush.bf16.msrb.mxu0 %v3850_v18 }
 0x120   : > { %1948 = vmatpush.bf16.msra.mxu1 %v3825_v49 }
 0x121   : > { %2068 = vmatpush.bf16.msra.mxu2 %v3841_v4 }
 0x122   : > { %2130 = vmatpush.bf16.msra.mxu3 %v3833_v27  ;;  %v3881_v27 = vld [vmem:[%s4771_s9 + $0x188] sm:$0xff] }
 0x123   : > { %2211 = vmatpush.bf16.msrb.mxu0 %v3849_v28 }
 0x124   : > { %1949 = vmatpush.bf16.msra.mxu1 %v3824_v50  ;;  %v3866_v50 = vld [vmem:[%s4771_s9 + $0x110] sm:$0xff] }
 0x125   : > { %2069 = vmatpush.bf16.msra.mxu2 %v3840_v10 }
 0x126   : > { %2131 = vmatpush.bf16.msra.mxu3 %v3832_v32 }
 0x127   : > { %1950 = vmatmul.bf16.vlgmr.msra.gmra.mxu1 %v1877_v52  ;;  %2212 = vmatpush.bf16.msrb.mxu0 %v3848_v33  ;;  %v3885_v52 = vld [vmem:[%s4771_s9 + $0x1a8] sm:$0xff] }
 0x128   : > { %2288 = vmatpush.bf16.msrb.mxu1 %v3863_v59  ;;  %v3865_v59 = vld [vmem:[%s4771_s9 + $0x108] sm:$0xff] }
 0x129   : > { %2371 = vmatpush.bf16.msrb.mxu2 %v3871_v16  ;;  %v3874_v16 = vld [vmem:[%s4771_s9 + $0x150] sm:$0xff] }
 0x12a   : > { %2454 = vmatpush.bf16.msrb.mxu3 %v3879_v38 }
 0x12b   : > { %2537 = vmatpush.bf16.msra.mxu0 %v3887_v37  ;;  %v3888_v37 = vld [vmem:[%s4771_s9 + $0x1c0] sm:$0xff] }
 0x12c   : > { %2289 = vmatpush.bf16.msrb.mxu1 %v3862_v63  ;;  %v3892_v63 = vld [vmem:[%s4771_s9 + $0x1e0] sm:$0xff] }
 0x12d   : > { %2372 = vmatpush.bf16.msrb.mxu2 %v3870_v23 }
 0x12e   : > { %2455 = vmatpush.bf16.msrb.mxu3 %v3878_v44 }
 0x12f   : > { %2538 = vmatpush.bf16.msra.mxu0 %v3886_v45 }
 0x130   : > { %2290 = vmatpush.bf16.msrb.mxu1 %v3861_v3  ;;  %v3864_v3 = vld [vmem:[%s4771_s9 + $0x100] sm:$0xff] }
 0x131   : > { %2373 = vmatpush.bf16.msrb.mxu2 %v3869_v30 }
 0x132   : > { %2456 = vmatpush.bf16.msrb.mxu3 %v3877_v51 }
 0x133   : > { %2539 = vmatpush.bf16.msra.mxu0 %v3885_v52 }
 0x134   : > { %2291 = vmatpush.bf16.msrb.mxu1 %v3860_v8  ;;  %v3883_v8 = vld [vmem:[%s4771_s9 + $0x198] sm:$0xff] }
 0x135   : > { %2374 = vmatpush.bf16.msrb.mxu2 %v3868_v36 }
 0x136   : > { %2457 = vmatpush.bf16.msrb.mxu3 %v3876_v61 }
 0x137   : > { %2540 = vmatpush.bf16.msra.mxu0 %v3884_v62 }
 0x138   : > { %2292 = vmatpush.bf16.msrb.mxu1 %v3859_v13 }
 0x139   : > { %2375 = vmatpush.bf16.msrb.mxu2 %v3867_v43 }
 0x13a   : > { %2458 = vmatpush.bf16.msrb.mxu3 %v3875_v6  ;;  %v3896_v6 = vld [vmem:[%s4771_s9 + $0x200] sm:$0xff] }
 0x13b   : > { %2541 = vmatpush.bf16.msra.mxu0 %v3883_v8 }
 0x13c   : > { %2293 = vmatpush.bf16.msrb.mxu1 %v3858_v19  ;;  %v3918_v19 = vld [vmem:[%s4770_s8] ss:$0 sm:$0xff] }
 0x13d   : > { %2376 = vmatpush.bf16.msrb.mxu2 %v3866_v50 }
 0x13e   : > { %2459 = vmatpush.bf16.msrb.mxu3 %v3874_v16 }
 0x13f   : > { %2542 = vmatpush.bf16.msra.mxu0 %v3882_v17 }
 0x140   : > { %2294 = vmatpush.bf16.msrb.mxu1 %v3857_v29  ;;  %v3889_v29 = vld [vmem:[%s4771_s9 + $0x1c8] sm:$0xff] }
 0x141   : > { %2377 = vmatpush.bf16.msrb.mxu2 %v3865_v59 }
 0x143   : > { %2543 = vmatpush.bf16.msra.mxu0 %v3881_v27 }
 0x144   : > { %2295 = vmatpush.bf16.msrb.mxu1 %v3856_v34  ;;  %v3872_v34 = vld [vmem:[%s4771_s9 + $0x140] sm:$0xff] }
 0x145   : > { %2378 = vmatpush.bf16.msrb.mxu2 %v3864_v3 }
 0x148   : > { %2620 = vmatpush.bf16.msra.mxu1 %v3895_v40 }
 0x14c   : > { %2621 = vmatpush.bf16.msra.mxu1 %v3894_v46 }
 0x150   : > { %2622 = vmatpush.bf16.msra.mxu1 %v3893_v55 }
 0x154   : > { %2623 = vmatpush.bf16.msra.mxu1 %v3892_v63 }
 0x184   : > { %v1310_v9 = vpop.f32.mrf.mxu1 }
 0x187   : > { %v1536_v26 = vpop.f32.mrf.mxu0 }
 0x18b   : > { %v1372_v20 = vpop.f32.mrf.mxu2 }
 0x18c   : > { %v1453_v24 = vpop.f32.mrf.mxu3  ;;  %v1312_v25 = vpop.f32.mrf.mxu1  ;;  %v1373_v31 = vadd.f32 %v1372_v20, %v1310_v9  ;;  %v3891_v9 = vld [vmem:[%s4771_s9 + $0x1d8] sm:$0xff]  ;;  %v3890_v20 = vld [vmem:[%s4771_s9 + $0x1d0] sm:$0xff] }
 0x18d   : > { %2624 = vmatpush.bf16.msra.mxu1 %v3891_v9 }
 0x18e   : > { %v1458_v41 = vadd.f32 %v1453_v24, %v1373_v31 }
 0x18f   : > { %v1538_v47 = vpop.f32.mrf.mxu0 }
 0x190   : > { %v1541_v49 = vadd.f32 %v1536_v26, %v1458_v41  ;;  %v3873_v26 = vld [vmem:[%s4771_s9 + $0x148] sm:$0xff] }
 0x191   : > { %2625 = vmatpush.bf16.msra.mxu1 %v3890_v20  ;;  %2460 = vmatpush.bf16.msrb.mxu3 %v3873_v26 }
 0x193   : > { %v1374_v35 = vpop.f32.mrf.mxu2 }
 0x194   : > { %v1455_v39 = vpop.f32.mrf.mxu3  ;;  %v1619_v42 = vpop.f32.mrf.mxu1  ;;  %v1375_v48 = vadd.f32 %v1374_v35, %v1312_v25  ;;  %v3880_v35 = vld [vmem:[%s4771_s9 + $0x180] sm:$0xff] }
 0x195   : > { %v1624_v53 = vadd.f32 %v1619_v42, %v1541_v49  ;;  %2626 = vmatpush.bf16.msra.mxu1 %v3889_v29  ;;  %2461 = vmatpush.bf16.msrb.mxu3 %v3872_v34 }
 0x196   : > { %v1459_v56 = vadd.f32 %v1455_v39, %v1375_v48  ;;  %2544 = vmatpush.bf16.msra.mxu0 %v3880_v35 }
 0x197   : > { %v1868_v2 = vpop.f32.mrf.mxu0 }
 0x198   : > { %v1542_v1 = vadd.f32 %v1538_v47, %v1459_v56  ;;  %v3902_v56 = vld [vmem:[%s4771_s9 + $0x230] sm:$0xff] }
 0x199   : > { %2627 = vmatpush.bf16.msra.mxu1 %v3888_v37 }
 0x19b   : > { %v1702_v54 = vpop.f32.mrf.mxu2 }
 0x19c   : > { %v1707_v57 = vadd.f32 %v1702_v54, %v1624_v53  ;;  %v1621_v58 = vpop.f32.mrf.mxu1  ;;  %v1785_v60 = vpop.f32.mrf.mxu3  ;;  %v3903_v54 = vld [vmem:[%s4771_s9 + $0x238] sm:$0xff] }
 0x19d   : > { %v1625_v4 = vadd.f32 %v1621_v58, %v1542_v1  ;;  %v3900_v58 = vld [vmem:[%s4771_s9 + $0x220] sm:$0xff]  ;;  %v3899_v1 = vld [vmem:[%s4771_s9 + $0x218] sm:$0xff] }
 0x19e   : > { %v1790_v0 = vadd.f32 %v1785_v60, %v1707_v57  ;;  %v3901_v57 = vld [vmem:[%s4771_s9 + $0x228] sm:$0xff] }
 0x19f   : > { %v1870_v30 = vpop.f32.mrf.mxu0 }
 0x1a0   : > { %v1873_v11 = vadd.f32 %v1868_v2, %v1790_v0 }
 0x1a3   : > { %v1704_v5 = vpop.f32.mrf.mxu2 }
 0x1a4   : > { %v1708_v10 = vadd.f32 %v1704_v5, %v1625_v4  ;;  %v1951_v13 = vpop.f32.mrf.mxu1  ;;  %v1787_v23 = vpop.f32.mrf.mxu3  ;;  %v3898_v4 = vld [vmem:[%s4771_s9 + $0x210] sm:$0xff]  ;;  %v3897_v5 = vld [vmem:[%s4771_s9 + $0x208] sm:$0xff] }
 0x1a5   : > { %v1956_v18 = vadd.f32 %v1951_v13, %v1873_v11 }
 0x1a6   : > { %v1791_v24 = vadd.f32 %v1787_v23, %v1708_v10 }
 0x1a7   : > { %v1962_v25 = vmul.f32 %v3917_v12, %v1956_v18 }
 0x1a8   : > { %v1874_v32 = vadd.f32 %v1870_v30, %v1791_v24 }
 0x1a9   : > { %v1968_v28 = vadd.f32 %v3918_v19, %v1962_v25 }
 0x1ab   : > { %v1970_v31 = vmax.f32 %v1968_v28, 0.0 }
 0x1ac   : > { %v1953_v33 = vpop.f32.mrf.mxu1 }
 0x1ad   : > { %v1972_v36 = vmul.f32 %v1970_v31, %v4465_v7  ;;  %v1957_v38 = vadd.f32 %v1953_v33, %v1874_v32 }
 0x1af   : > { %1974 = vst [vmem:[#allocation3 + $0x8] sm:$0xff] %v1972_v36  ;;  %v1963_v39 = vmul.f32 %v3917_v12, %v1957_v38 }
 0x1b1   : > { %v1969_v40 = vadd.f32 %v3918_v19, %v1963_v39  ;;  %v3919_v39 = vld [vmem:[%s4772_s10] ss:$0 sm:$0xff] }
 0x1b3   : > { %v1971_v41 = vmax.f32 %v1969_v40, 0.0 }
 0x1b5   : > { %v1973_v42 = vmul.f32 %v1971_v41, %v4481_v21 }
 0x1b6   : > { %v1995_v43 = vld [vmem:[#allocation3 + $0x4] sm:$0xff] }
 0x1b7   : > { %1975 = vst [vmem:[#allocation3 + $0x10] sm:$0xff] %v1973_v42  ;;  %v1976_v44 = vld [vmem:[#allocation3 + $0x3] sm:$0xff]  ;;  %v2306_v63 = vpack.c.bf16 %v1973_v42, %v1972_v36  ;;  %v3920_v42 = vld [vmem:[%s4773_s11] ss:$0 sm:$0xff] }
 0x1b8   : > { %v2138_v45 = vld [vmem:[#allocation3 + $0x5] sm:$0xff] }
 0x1b9   : > { %v2221_v52 = vld [vmem:[#allocation3 + $0x7] sm:$0xff] }
 0x1be   : > { %v1996_v46 = vld [vmem:[#allocation3 + $0xc] sm:$0xff]  ;;  %v2554_v62 = vld [vmem:[#allocation3 + $0x14] sm:$0xff] }
 0x1bf   : > { %v1977_v47 = vld [vmem:[#allocation3 + $0xb] sm:$0xff]  ;;  %v1997_v49 = vpack.c.bf16 %v1996_v46, %v1995_v43  ;;  %v2471_v61 = vld [vmem:[#allocation3 + $0x13] sm:$0xff]  ;;  %v2555_v3 = vpack.c.bf16 %v2554_v62, %v1996_v46 }
 0x1c0   : > { %v2139_v48 = vld [vmem:[#allocation3 + $0xd] sm:$0xff]  ;;  %v1978_v50 = vpack.c.bf16 %v1977_v47, %v1976_v44  ;;  %v2472_v2 = vpack.c.bf16 %v2471_v61, %v1977_v47  ;;  %v2637_v8 = vld [vmem:[#allocation3 + $0x15] sm:$0xff] }
 0x1c1   : > { %v2140_v51 = vpack.c.bf16 %v2139_v48, %v2138_v45  ;;  %v2222_v53 = vld [vmem:[#allocation3 + $0xf] sm:$0xff]  ;;  %2070 = vmatmul.bf16.vlgmr.msra.gmra.mxu2 %v1997_v49  ;;  %v2638_v9 = vpack.c.bf16 %v2637_v8, %v2139_v48 }
 0x1c2   : > { %v2223_v55 = vpack.c.bf16 %v2222_v53, %v2221_v52  ;;  %2132 = vmatmul.bf16.vlgmr.msra.gmra.mxu3 %v1978_v50  ;;  %2703 = vmatpush.bf16.msra.mxu2 %v3903_v54  ;;  %v2387_v59 = vld [vmem:[#allocation3 + $0x9] sm:$0xff]  ;;  %v2388_v60 = vld [vmem:[#allocation3 + $0x11] sm:$0xff] }
 0x1c3   : > { %2213 = vmatmul.bf16.vlgmr.msrb.gmra.mxu0 %v2140_v51  ;;  %v2389_v0 = vpack.c.bf16 %v2388_v60, %v2387_v59 }
 0x1c4   : > { %2296 = vmatmul.bf16.vlgmr.msrb.gmra.mxu1 %v2223_v55 }
 0x1c6   : > { %2704 = vmatpush.bf16.msra.mxu2 %v3902_v56 }
 0x1ca   : > { %2705 = vmatpush.bf16.msra.mxu2 %v3901_v57 }
 0x1ce   : > { %2706 = vmatpush.bf16.msra.mxu2 %v3900_v58 }
 0x1d1   : > { %2379 = vmatmul.bf16.vlgmr.msrb.gmra.mxu2 %v2306_v63 }
 0x1d2   : > { %2462 = vmatmul.bf16.vlgmr.msrb.gmra.mxu3 %v2389_v0  ;;  %2707 = vmatpush.bf16.msra.mxu2 %v3899_v1 }
 0x1d3   : > { %2545 = vmatmul.bf16.vlgmr.msra.gmra.mxu0 %v2472_v2 }
 0x1d4   : > { %2628 = vmatmul.bf16.vlgmr.msra.gmra.mxu1 %v2555_v3 }
 0x1d6   : > { %2708 = vmatpush.bf16.msra.mxu2 %v3898_v4 }
 0x1da   : > { %2709 = vmatpush.bf16.msra.mxu2 %v3897_v5 }
 0x1de   : > { %2710 = vmatpush.bf16.msra.mxu2 %v3896_v6 }
 0x1e1   : > { %2711 = vmatmul.bf16.vlgmr.msra.gmra.mxu2 %v2638_v9 }
 0x240   : > { %v2214_v12 = vpop.f32.mrf.mxu0 }
 0x241   : > { %v2297_v16 = vpop.f32.mrf.mxu1 }
 0x244   : > { %v2071_v10 = vpop.f32.mrf.mxu2 }
 0x245   : > { %v2133_v11 = vpop.f32.mrf.mxu3 }
 0x246   : > { %v2134_v17 = vadd.f32 %v2133_v11, %v2071_v10 }
 0x248   : > { %v2219_v19 = vadd.f32 %v2214_v12, %v2134_v17  ;;  %v2216_v20 = vpop.f32.mrf.mxu0 }
 0x249   : > { %v2299_v26 = vpop.f32.mrf.mxu1 }
 0x24a   : > { %v2302_v25 = vadd.f32 %v2297_v16, %v2219_v19 }
 0x24c   : > { %v2073_v13 = vpop.f32.mrf.mxu2 }
 0x24d   : > { %v2135_v18 = vpop.f32.mrf.mxu3 }
 0x24e   : > { %v2136_v24 = vadd.f32 %v2135_v18, %v2073_v13 }
 0x250   : > { %v2220_v29 = vadd.f32 %v2216_v20, %v2136_v24  ;;  %v2546_v32 = vpop.f32.mrf.mxu0 }
 0x251   : > { %v2629_v35 = vpop.f32.mrf.mxu1 }
 0x252   : > { %v2303_v14 = vadd.f32 %v2299_v26, %v2220_v29 }
 0x254   : > { %v2380_v23 = vpop.f32.mrf.mxu2 }
 0x255   : > { %v2385_v27 = vadd.f32 %v2380_v23, %v2302_v25  ;;  %v2463_v28 = vpop.f32.mrf.mxu3 }
 0x257   : > { %v2468_v30 = vadd.f32 %v2463_v28, %v2385_v27 }
 0x258   : > { %v2548_v43 = vpop.f32.mrf.mxu0 }
 0x259   : > { %v2551_v33 = vadd.f32 %v2546_v32, %v2468_v30  ;;  %v2631_v47 = vpop.f32.mrf.mxu1 }
 0x25b   : > { %v2634_v37 = vadd.f32 %v2629_v35, %v2551_v33 }
 0x25c   : > { %v2382_v31 = vpop.f32.mrf.mxu2 }
 0x25d   : > { %v2386_v34 = vadd.f32 %v2382_v31, %v2303_v14  ;;  %v2465_v36 = vpop.f32.mrf.mxu3 }
 0x25f   : > { %v2469_v38 = vadd.f32 %v2465_v36, %v2386_v34 }
 0x261   : > { %v2552_v44 = vadd.f32 %v2548_v43, %v2469_v38 }
 0x263   : > { %v2635_v49 = vadd.f32 %v2631_v47, %v2552_v44 }
 0x264   : > { %v2712_v40 = vpop.f32.mrf.mxu2 }
 0x265   : > { %v2717_v41 = vadd.f32 %v2712_v40, %v2634_v37 }
 0x267   : > { %v2723_v45 = vmul.f32 %v3919_v39, %v2717_v41 }
 0x269   : > { %v2729_v46 = vadd.f32 %v3920_v42, %v2723_v45 }
 0x26b   : > { %v2731_v48 = vadd.f32 %v2729_v46, %v4477_v15 }
 0x26c   : > { %v2714_v50 = vpop.f32.mrf.mxu2 }
 0x26d   : > { %v2733_v51 = vmax.f32 %v2731_v48, 0.0  ;;  %v2718_v52 = vadd.f32 %v2714_v50, %v2635_v49 }
 0x26f   : > { %v2735_v53 = vmul.f32 %v2733_v51, %v4465_v7  ;;  %v2724_v54 = vmul.f32 %v3919_v39, %v2718_v52 }
 0x271   : > { %2738 = vst [vmem:[%s4741_s14 + $0x8] sm:$0xff] %v2735_v53  ;;  %v2730_v55 = vadd.f32 %v3920_v42, %v2724_v54 }
 0x273   : > { %v2732_v56 = vadd.f32 %v2730_v55, %v4484_v22 }
 0x275   : > { %v2734_v57 = vmax.f32 %v2732_v56, 0.0 }
 0x277   : > { %v2736_v58 = vmul.f32 %v2734_v57, %v4481_v21 }
 0x279   : > { %2739 = vst [vmem:[%s4741_s14 + $0x10] sm:$0xff] %v2736_v58 }
 0x27a PF: > { %s22_s21 = sadd.s32 1, %s3927_s21  }
 0x27b   : > { %p19_p4 = scmp.ge.s32.totalorder %s22_s21, 4  }
 0x27d   :  { %21 = sbr.rel (!%p19_p4) target bundleno = 1 (0x1), region = 101 }

</bundles_post_ra>
